<compile_context>
chip_gen: v7x
topology: tpu7x:2x2x1
jax: 0.10.0
libtpu: 0.0.40
codegen_flags: <defaults>
</compile_context>

<pallas_src>
import functools

import jax
import jax.numpy as jnp
from jax import lax
from jax.experimental import pallas as pl
from jax.experimental.pallas import tpu as pltpu

LN_EPS = 1e-5


def _pick_vmem_limit():
    """Scoped-VMEM budget: ~3/4 of physical VMEM (96 MiB on 128 MiB parts,
    48 MiB on v7x's 64 MiB per-core VMEM), conservative fallback otherwise."""
    try:
        cap = getattr(pltpu.get_tpu_info(), "vmem_capacity_bytes", None)
        if cap:
            return (int(cap) * 3) // 4
    except Exception:
        pass
    return 48 * 1024 * 1024


def _layernorm_f32(x, gamma, beta):
    x = x.astype(jnp.float32)
    mu = jnp.mean(x, axis=-1, keepdims=True)
    var = jnp.mean((x - mu) ** 2, axis=-1, keepdims=True)
    return (x - mu) * lax.rsqrt(var + LN_EPS) * gamma.astype(jnp.float32) \
        + beta.astype(jnp.float32)


# ---------------------------------------------------------------------------
# Kernel 1: LN1 + fused Q/K/V projection (single (TN,C) x (C,3C) GEMM).
# Outputs q/k/v as lane-dense (B, N, C) slabs (head h lives in columns
# [h*hd, (h+1)*hd), exactly matching the PyTorch reshape semantics).
# ---------------------------------------------------------------------------
def _ln_qkv_kernel(x_ref, g1_ref, b1_ref, wqkv_ref, q_ref, k_ref, v_ref):
    C = x_ref.shape[-1]
    h = _layernorm_f32(x_ref[0], g1_ref[0], b1_ref[0]).astype(wqkv_ref.dtype)
    qkv = jnp.dot(h, wqkv_ref[...], preferred_element_type=jnp.float32)  # (TN, 3C)
    # Slices land on C-aligned (>=128-lane) boundaries -> cheap, lane-dense stores.
    q_ref[0] = qkv[:, :C].astype(q_ref.dtype)
    k_ref[0] = qkv[:, C:2 * C].astype(k_ref.dtype)
    v_ref[0] = qkv[:, 2 * C:].astype(v_ref.dtype)


# ---------------------------------------------------------------------------
# Kernel 2: flash attention (online softmax over KV tiles), all heads per
# grid step.  Softmax scale is pre-folded into the Q weights, so no per-step
# rescale of the (TQ, TK) score matrix.
# ---------------------------------------------------------------------------
def _flash_attn_kernel(q_ref, k_ref, v_ref, o_ref, m_s, l_s, acc_s, *,
                       num_heads, head_dim, prob_dtype, approx_recip):
    ki = pl.program_id(2)
    H, hd = num_heads, head_dim

    @pl.when(ki == 0)
    def _():
        m_s[...] = jnp.full_like(m_s, -jnp.inf)
        l_s[...] = jnp.zeros_like(l_s)
        acc_s[...] = jnp.zeros_like(acc_s)

    q = q_ref[0]                               # (TQ, C), scale already folded in
    k = k_ref[0]                               # (TK, C)
    v = v_ref[0]                               # (TK, C)

    for h in range(H):                         # static unroll over heads
        q_h = q[:, h * hd:(h + 1) * hd]
        k_h = k[:, h * hd:(h + 1) * hd]
        v_h = v[:, h * hd:(h + 1) * hd]
        # contract over hd without an explicit transpose of k
        s = lax.dot_general(q_h, k_h, (((1,), (1,)), ((), ())),
                            preferred_element_type=jnp.float32)       # (TQ, TK)
        m_prev = m_s[h]                                                # (TQ, 1)
        m_new = jnp.maximum(m_prev, jnp.max(s, axis=-1, keepdims=True))
        alpha = jnp.exp(m_prev - m_new)
        # bf16 probabilities on bf16 runs (bf16 EUP on v6e/v7x); f32 stats kept.
        p = jnp.exp((s - m_new).astype(prob_dtype))
        l_s[h] = alpha * l_s[h] + jnp.sum(p.astype(jnp.float32), axis=-1,
                                          keepdims=True)
        acc_s[h] = alpha * acc_s[h] + jnp.dot(p.astype(v_h.dtype), v_h,
                                              preferred_element_type=jnp.float32)
        m_s[h] = m_new

    @pl.when(ki == pl.num_programs(2) - 1)
    def _():
        inv_l = pl.reciprocal(l_s[...], approx=approx_recip)   # (H, TQ, 1)
        out = acc_s[...] * inv_l                               # (H, TQ, hd)
        # Reassemble heads along lanes once per q-tile -> lane-dense (TQ, C) store.
        o_ref[0] = jnp.concatenate([out[h] for h in range(H)],
                                   axis=-1).astype(o_ref.dtype)


# ---------------------------------------------------------------------------
# Kernel 3: attention output projection (single (C,C) GEMM) + residual + LN2
# + MLP.  The MLP hidden dim is either fully resident (block_h == Hm) or
# streamed over grid axis 2 with only (C, TH)/(TH, C) weight tiles resident.
# ---------------------------------------------------------------------------
def _proj_mlp_kernel(x_ref, attn_ref, wp_ref, bp_ref, g2_ref, b2_ref,
                     wfc1_ref, bfc1_ref, wfc2_ref, bfc2_ref,
                     o_ref, x1_acc, h2_s):
    hi = pl.program_id(2)

    @pl.when(hi == 0)
    def _():
        proj = jnp.dot(attn_ref[0], wp_ref[...],
                       preferred_element_type=jnp.float32)            # (TN, C)
        x1 = x_ref[0].astype(jnp.float32) + proj + bp_ref[0].astype(jnp.float32)
        x1_acc[...] = x1
        h2_s[...] = _layernorm_f32(x1, g2_ref[0], b2_ref[0]).astype(h2_s.dtype)

    # one hidden tile of the MLP: relu(h2 @ W1_tile + b1_tile) @ W2_tile
    m = jnp.dot(h2_s[...], wfc1_ref[...], preferred_element_type=jnp.float32)
    m = jnp.maximum(m + bfc1_ref[0].astype(jnp.float32), 0.0)
    x1_acc[...] += jnp.dot(m.astype(wfc2_ref.dtype), wfc2_ref[...],
                           preferred_element_type=jnp.float32)

    @pl.when(hi == pl.num_programs(2) - 1)
    def _():
        o_ref[0] = (x1_acc[...] + bfc2_ref[0].astype(jnp.float32)).astype(o_ref.dtype)


# ---------------------------------------------------------------------------
# Wrapper
# ---------------------------------------------------------------------------
def transformer_layer(x, params, num_heads, *,
                      block_q=512, block_kv=512, block_n=512, block_h=None):
    B, N, C = x.shape
    H = num_heads
    assert C % H == 0, "num_heads must divide dim_self"
    hd = C // H
    Hm = params["w_fc1"].shape[1]

    dt = x.dtype                       # compute/storage dtype (f32 or bf16)
    isz = jnp.dtype(dt).itemsize
    f32 = jnp.float32
    vmem_limit = _pick_vmem_limit()

    block_q = min(block_q, N)
    block_kv = min(block_kv, N)
    block_n = min(block_n, N)
    if block_h is None:
        # Keep W1/W2 fully resident (constant index maps -> single HBM read)
        # when their double-buffered footprint fits the budget; else stream.
        resident_bytes = 2 * (2 * C * Hm * isz)
        if resident_bytes <= vmem_limit // 3:
            block_h = Hm
        else:
            block_h = 512
            while block_h > 128 and Hm % block_h:
                block_h //= 2
            if Hm % block_h:
                block_h = Hm
    block_h = min(block_h, Hm)

    assert N % block_q == 0 and N % block_kv == 0 and N % block_n == 0
    assert Hm % block_h == 0
    assert block_q % 8 == 0 and block_kv % 8 == 0 and block_n % 8 == 0
    assert block_h % 128 == 0 or block_h == Hm

    scale = float(hd) ** (-0.5)

    # Host-side weight prep (one-time): fuse Q/K/V into a single (C, 3C)
    # weight and fold the softmax scale into the Q columns.
    wq = params["wq"].astype(jnp.float32) * scale
    wkv = params["wkv"].astype(jnp.float32)          # columns: [keys | values]
    wqkv = jnp.concatenate([wq, wkv], axis=1).astype(dt)      # (C, 3C)
    wp = params["wp"].astype(dt)
    g1, b1 = params["g1"].astype(dt), params["b1"].astype(dt)
    g2, b2 = params["g2"].astype(dt), params["b2"].astype(dt)
    bp = params["bp"].astype(dt)
    w_fc1, b_fc1 = params["w_fc1"].astype(dt), params["b_fc1"].astype(dt)
    w_fc2, b_fc2 = params["w_fc2"].astype(dt), params["b_fc2"].astype(dt)

    # ------------------- call 1: LN1 + fused QKV ----------------------------
    ce_qkv = pl.CostEstimate(
        flops=int(6 * B * N * C * C),
        transcendentals=int(B * N),
        bytes_accessed=int((4 * B * N * C + 3 * C * C) * isz))
    q, k, v = pl.pallas_call(
        _ln_qkv_kernel,
        out_shape=[jax.ShapeDtypeStruct((B, N, C), dt)] * 3,
        grid_spec=pltpu.PrefetchScalarGridSpec(
            num_scalar_prefetch=0,
            grid=(B, N // block_n),
            in_specs=[
                pl.BlockSpec((1, block_n, C), lambda b, n: (b, n, 0)),
                pl.BlockSpec((1, C), lambda b, n: (0, 0)),
                pl.BlockSpec((1, C), lambda b, n: (0, 0)),
                # Constant index map: the fused weight is DMA'd once and reused
                # every grid step.  (For very large C, pipeline_mode with a
                # single buffer would halve its VMEM footprint.)
                pl.BlockSpec((C, 3 * C), lambda b, n: (0, 0)),
            ],
            out_specs=[pl.BlockSpec((1, block_n, C), lambda b, n: (b, n, 0))] * 3,
        ),
        compiler_params=pltpu.CompilerParams(
            dimension_semantics=("parallel", "parallel"),
            vmem_limit_bytes=vmem_limit),
        cost_estimate=ce_qkv,
    )(x, g1, b1, wqkv)

    # ------------------- call 2: flash attention ----------------------------
    prob_dtype = jnp.bfloat16 if dt == jnp.bfloat16 else jnp.float32
    ce_attn = pl.CostEstimate(
        flops=int(4 * B * N * N * C),
        transcendentals=int(B * H * N * N),
        bytes_accessed=int((B * N * C * (N // block_kv)
                            + 2 * B * N * C * (N // block_q)
                            + B * N * C) * isz))
    attn = pl.pallas_call(
        functools.partial(_flash_attn_kernel, num_heads=H, head_dim=hd,
                          prob_dtype=prob_dtype,
                          approx_recip=(dt == jnp.bfloat16)),
        out_shape=jax.ShapeDtypeStruct((B, N, C), dt),
        grid_spec=pltpu.PrefetchScalarGridSpec(
            num_scalar_prefetch=0,
            grid=(B, N // block_q, N // block_kv),
            in_specs=[
                pl.BlockSpec((1, block_q, C), lambda b, qi, ki: (b, qi, 0)),
                pl.BlockSpec((1, block_kv, C), lambda b, qi, ki: (b, ki, 0)),
                pl.BlockSpec((1, block_kv, C), lambda b, qi, ki: (b, ki, 0)),
            ],
            out_specs=pl.BlockSpec((1, block_q, C), lambda b, qi, ki: (b, qi, 0)),
            scratch_shapes=[
                pltpu.VMEM((H, block_q, 1), f32),     # running max per head
                pltpu.VMEM((H, block_q, 1), f32),     # running denom per head
                pltpu.VMEM((H, block_q, hd), f32),    # running numerator per head
            ]),
        compiler_params=pltpu.CompilerParams(
            dimension_semantics=("parallel", "parallel", "arbitrary"),
            vmem_limit_bytes=vmem_limit),
        cost_estimate=ce_attn,
    )(q, k, v)

    # ------------------- call 3: proj + residual + LN2 + MLP ----------------
    ce_mlp = pl.CostEstimate(
        flops=int(2 * B * N * C * C + 4 * B * N * C * Hm),
        transcendentals=int(B * N),
        bytes_accessed=int((3 * B * N * C + C * C + 2 * C * Hm) * isz))
    out = pl.pallas_call(
        _proj_mlp_kernel,
        out_shape=jax.ShapeDtypeStruct((B, N, C), x.dtype),
        grid_spec=pltpu.PrefetchScalarGridSpec(
            num_scalar_prefetch=0,
            grid=(B, N // block_n, Hm // block_h),
            in_specs=[
                pl.BlockSpec((1, block_n, C), lambda b, n, h: (b, n, 0)),   # x
                pl.BlockSpec((1, block_n, C), lambda b, n, h: (b, n, 0)),   # attn
                pl.BlockSpec((C, C), lambda b, n, h: (0, 0)),               # wp
                pl.BlockSpec((1, C), lambda b, n, h: (0, 0)),               # bp
                pl.BlockSpec((1, C), lambda b, n, h: (0, 0)),               # g2
                pl.BlockSpec((1, C), lambda b, n, h: (0, 0)),               # b2
                pl.BlockSpec((C, block_h), lambda b, n, h: (0, h)),         # w_fc1 tile
                pl.BlockSpec((1, block_h), lambda b, n, h: (0, h)),         # b_fc1 tile
                pl.BlockSpec((block_h, C), lambda b, n, h: (h, 0)),         # w_fc2 tile
                pl.BlockSpec((1, C), lambda b, n, h: (0, 0)),               # b_fc2
            ],
            out_specs=pl.BlockSpec((1, block_n, C), lambda b, n, h: (b, n, 0)),
            scratch_shapes=[
                pltpu.VMEM((block_n, C), f32),   # x1 + MLP accumulator
                pltpu.VMEM((block_n, C), dt),    # LN2(x1), reused across h tiles
            ]),
        compiler_params=pltpu.CompilerParams(
            dimension_semantics=("parallel", "parallel", "arbitrary"),
            vmem_limit_bytes=vmem_limit),
        cost_estimate=ce_mlp,
    )(x, attn, wp, bp, g2, b2, w_fc1, b_fc1, w_fc2, b_fc2)

    # TODO(synk): dropout is identity (p=0.0 in module defaults); the attention
    # map is not returned (forward() only uses the attended output); the
    # optional cross-attention (y) / mask path is not implemented here.
    return out


# ---------------------------------------------------------------------------
# Pure-JAX reference (mirrors the PyTorch forward) for correctness checking.
# ---------------------------------------------------------------------------
def reference_forward(x, p, num_heads):
    B, N, C = x.shape
    hd = C // num_heads
    scale = hd ** (-0.5)

    def ln(v, g, b):
        mu = jnp.mean(v, axis=-1, keepdims=True)
        var = jnp.mean((v - mu) ** 2, axis=-1, keepdims=True)
        return (v - mu) / jnp.sqrt(var + LN_EPS) * g + b

    h = ln(x, p["g1"][0], p["b1"][0])
    q = (h @ p["wq"]).reshape(B, N, num_heads, hd)
    kv = (h @ p["wkv"]).reshape(B, N, 2, num_heads, hd)
    k, v = kv[:, :, 0], kv[:, :, 1]
    att = jnp.einsum("bnhd,bmhd->bnmh", q, k) * scale
    att = jax.nn.softmax(att, axis=2)
    out = jnp.einsum("bnmh,bmhd->bnhd", att, v).reshape(B, N, C)
    out = out @ p["wp"] + p["bp"][0]
    x1 = x + out
    h2 = ln(x1, p["g2"][0], p["b2"][0])
    m = jnp.maximum(h2 @ p["w_fc1"] + p["b_fc1"][0], 0.0)
    m = m @ p["w_fc2"] + p["b_fc2"][0]
    return x1 + m


def make_params(key, dim_self, mlp_ratio=4.0):
    C = dim_self
    Hm = int(C * mlp_ratio)
    ks = jax.random.split(key, 8)
    s = 0.02
    return {
        "g1": jnp.ones((1, C), jnp.float32),
        "b1": jnp.zeros((1, C), jnp.float32),
        "g2": jnp.ones((1, C), jnp.float32),
        "b2": jnp.zeros((1, C), jnp.float32),
        # attention (to_queries / to_keys_values have bias=False; project has bias)
        "wq": jax.random.normal(ks[0], (C, C), jnp.float32) * s,
        "wkv": jax.random.normal(ks[1], (C, 2 * C), jnp.float32) * s,
        "wp": jax.random.normal(ks[2], (C, C), jnp.float32) * s,
        "bp": jax.random.normal(ks[3], (1, C), jnp.float32) * s,
        # MLP
        "w_fc1": jax.random.normal(ks[4], (C, Hm), jnp.float32) * s,
        "b_fc1": jax.random.normal(ks[5], (1, Hm), jnp.float32) * s,
        "w_fc2": jax.random.normal(ks[6], (Hm, C), jnp.float32) * s,
        "b_fc2": jax.random.normal(ks[7], (1, C), jnp.float32) * s,
    }


if __name__ == "__main__":
    # Small but tile-aligned shapes so every grid/accumulation path is exercised.
    B, N, C = 2, 256, 128
    num_heads = 4          # head_dim = 32, mlp hidden = 512

    key = jax.random.PRNGKey(0)
    kx, kp = jax.random.split(key)
    x = jax.random.normal(kx, (B, N, C), jnp.float32)
    params = make_params(kp, C)
    ref = reference_forward(x, params, num_heads)

    # f32 path with small explicit blocks: exercises multi-tile attention
    # (2x2 q/kv tiles), multi n-tiles, and the streamed-MLP accumulation path.
    fwd_f32 = jax.jit(functools.partial(
        transformer_layer, num_heads=num_heads,
        block_q=128, block_kv=128, block_n=128, block_h=256))
    out = jax.block_until_ready(fwd_f32(x, params))
    assert out.shape == (B, N, C)
    assert jnp.allclose(out, ref, atol=2e-3, rtol=2e-3), "f32 mismatch vs reference"

    # bf16 path with auto block sizes (large lane-dense tiles, resident MLP
    # weights, bf16 softmax probabilities): loose check.
    fwd_auto = jax.jit(functools.partial(transformer_layer, num_heads=num_heads))
    xb = x.astype(jnp.bfloat16)
    pb = jax.tree_util.tree_map(lambda a: a.astype(jnp.bfloat16), params)
    outb = jax.block_until_ready(fwd_auto(xb, pb))
    err = float(jnp.max(jnp.abs(outb.astype(jnp.float32) - ref)))
    assert err < 0.25, f"bf16 mismatch vs reference (max abs err {err})"

    print("KERNEL_OK")
</pallas_src>

<mosaic_0001>
module attributes {stable_mosaic.version = 11 : i64} {
  func.func @_flash_attn_kernel(%arg0: i32, %arg1: i32, %arg2: i32, %arg3: memref<1x128x128xf32, #tpu.memory_space<vmem>>, %arg4: memref<1x128x128xf32, #tpu.memory_space<vmem>>, %arg5: memref<1x128x128xf32, #tpu.memory_space<vmem>>, %arg6: memref<1x128x128xf32, #tpu.memory_space<vmem>>, %arg7: memref<4x128x1xf32, #tpu.memory_space<vmem>>, %arg8: memref<4x128x1xf32, #tpu.memory_space<vmem>>, %arg9: memref<4x128x32xf32, #tpu.memory_space<vmem>>) attributes {dimension_semantics = [#tpu.dimension_semantics<parallel>, #tpu.dimension_semantics<parallel>, #tpu.dimension_semantics<arbitrary>], iteration_bounds = array<i64: 2, 2, 2>, scalar_prefetch = 0 : i64, scratch_operands = 3 : i64, tpu.core_type = #tpu.core_type<tc>, window_params = [{transform_indices = @transform_0, window_bounds = array<i64: 1, 128, 128>}, {transform_indices = @transform_1, window_bounds = array<i64: 1, 128, 128>}, {transform_indices = @transform_2, window_bounds = array<i64: 1, 128, 128>}, {transform_indices = @transform_3, window_bounds = array<i64: 1, 128, 128>}]} {
    %c0_i32 = arith.constant 0 : i32
    %0 = arith.cmpi eq, %arg2, %c0_i32 : i32
    %1 = arith.extui %0 : i1 to i32
    %c0_i32_0 = arith.constant 0 : i32
    %2 = arith.cmpi ne, %1, %c0_i32_0 : i32
    scf.if %2 {
      %cst_94 = arith.constant 0xFF800000 : f32
      %152 = vector.broadcast %cst_94 : f32 to vector<4x128x1xf32>
      %c0_95 = arith.constant 0 : index
      %c0_96 = arith.constant 0 : index
      %c0_97 = arith.constant 0 : index
      %153 = vector.load %arg7[%c0_95, %c0_96, %c0_97] : memref<4x128x1xf32, #tpu.memory_space<vmem>>, vector<4x128x1xf32>
      tpu.vector_store %arg7[%c0_95, %c0_96, %c0_97], %152 {strides = array<i32>} : memref<4x128x1xf32, #tpu.memory_space<vmem>>, vector<4x128x1xf32>,
      %cst_98 = arith.constant 0.000000e+00 : f32
      %154 = vector.broadcast %cst_98 : f32 to vector<4x128x1xf32>
      %c0_99 = arith.constant 0 : index
      %c0_100 = arith.constant 0 : index
      %c0_101 = arith.constant 0 : index
      %155 = vector.load %arg8[%c0_99, %c0_100, %c0_101] : memref<4x128x1xf32, #tpu.memory_space<vmem>>, vector<4x128x1xf32>
      tpu.vector_store %arg8[%c0_99, %c0_100, %c0_101], %154 {strides = array<i32>} : memref<4x128x1xf32, #tpu.memory_space<vmem>>, vector<4x128x1xf32>,
      %cst_102 = arith.constant 0.000000e+00 : f32
      %156 = vector.broadcast %cst_102 : f32 to vector<4x128x32xf32>
      %c0_103 = arith.constant 0 : index
      %c0_104 = arith.constant 0 : index
      %c0_105 = arith.constant 0 : index
      %157 = vector.load %arg9[%c0_103, %c0_104, %c0_105] : memref<4x128x32xf32, #tpu.memory_space<vmem>>, vector<4x128x32xf32>
      tpu.vector_store %arg9[%c0_103, %c0_104, %c0_105], %156 {strides = array<i32>} : memref<4x128x32xf32, #tpu.memory_space<vmem>>, vector<4x128x32xf32>,
    } else {
    }
    %c0 = arith.constant 0 : index
    %c0_1 = arith.constant 0 : index
    %c0_2 = arith.constant 0 : index
    %3 = vector.load %arg3[%c0, %c0_1, %c0_2] : memref<1x128x128xf32, #tpu.memory_space<vmem>>, vector<1x128x128xf32>
    %4 = vector.shape_cast %3 : vector<1x128x128xf32> to vector<128x128xf32>
    %c0_3 = arith.constant 0 : index
    %c0_4 = arith.constant 0 : index
    %c0_5 = arith.constant 0 : index
    %5 = vector.load %arg4[%c0_3, %c0_4, %c0_5] : memref<1x128x128xf32, #tpu.memory_space<vmem>>, vector<1x128x128xf32>
    %6 = vector.shape_cast %5 : vector<1x128x128xf32> to vector<128x128xf32>
    %c0_6 = arith.constant 0 : index
    %c0_7 = arith.constant 0 : index
    %c0_8 = arith.constant 0 : index
    %7 = vector.load %arg5[%c0_6, %c0_7, %c0_8] : memref<1x128x128xf32, #tpu.memory_space<vmem>>, vector<1x128x128xf32>
    %8 = vector.shape_cast %7 : vector<1x128x128xf32> to vector<128x128xf32>
    %9 = vector.extract_strided_slice %4 {offsets = [0, 0], sizes = [128, 32], strides = [1, 1]} : vector<128x128xf32> to vector<128x32xf32>
    %10 = vector.extract_strided_slice %6 {offsets = [0, 0], sizes = [128, 32], strides = [1, 1]} : vector<128x128xf32> to vector<128x32xf32>
    %11 = vector.extract_strided_slice %8 {offsets = [0, 0], sizes = [128, 32], strides = [1, 1]} : vector<128x128xf32> to vector<128x32xf32>
    %cst = arith.constant dense<0.000000e+00> : vector<128x128xf32>
    %12 = tpu.matmul %9, %10, %cst {dimension_numbers = #tpu.dot_dimension_numbers<[1], [1], [0], [0], [0, 0, 1, 0], [], []>} : vector<128x32xf32>, vector<128x32xf32>, vector<128x128xf32> -> vector<128x128xf32>
    %c0_9 = arith.constant 0 : index
    %c0_10 = arith.constant 0 : index
    %c0_11 = arith.constant 0 : index
    %13 = vector.load %arg7[%c0_9, %c0_10, %c0_11] : memref<4x128x1xf32, #tpu.memory_space<vmem>>, vector<1x128x1xf32>
    %14 = vector.shape_cast %13 : vector<1x128x1xf32> to vector<128x1xf32>
    %cst_12 = arith.constant dense<0xFF800000> : vector<128xf32>
    %15 = vector.multi_reduction <maximumf>, %12, %cst_12 [1] : vector<128x128xf32> to vector<128xf32>
    %16 = vector.shape_cast %15 : vector<128xf32> to vector<128x1xf32>
    %17 = arith.maximumf %14, %16 : vector<128x1xf32>
    %18 = arith.subf %14, %17 : vector<128x1xf32>
    %19 = math.exp %18 : vector<128x1xf32>
    %20 = vector.broadcast %17 : vector<128x1xf32> to vector<128x128xf32>
    %21 = arith.subf %12, %20 : vector<128x128xf32>
    %22 = math.exp %21 : vector<128x128xf32>
    %c0_13 = arith.constant 0 : index
    %c0_14 = arith.constant 0 : index
    %c0_15 = arith.constant 0 : index
    %23 = vector.load %arg8[%c0_13, %c0_14, %c0_15] : memref<4x128x1xf32, #tpu.memory_space<vmem>>, vector<1x128x1xf32>
    %24 = vector.shape_cast %23 : vector<1x128x1xf32> to vector<128x1xf32>
    %25 = arith.mulf %19, %24 : vector<128x1xf32>
    %cst_16 = arith.constant dense<0.000000e+00> : vector<128xf32>
    %26 = vector.multi_reduction <add>, %22, %cst_16 [1] : vector<128x128xf32> to vector<128xf32>
    %27 = vector.shape_cast %26 : vector<128xf32> to vector<128x1xf32>
    %28 = arith.addf %25, %27 : vector<128x1xf32>
    %c0_17 = arith.constant 0 : index
    %c0_18 = arith.constant 0 : index
    %c0_19 = arith.constant 0 : index
    %29 = vector.load %arg8[%c0_17, %c0_18, %c0_19] : memref<4x128x1xf32, #tpu.memory_space<vmem>>, vector<1x128x1xf32>
    %30 = vector.shape_cast %29 : vector<1x128x1xf32> to vector<128x1xf32>
    %31 = vector.shape_cast %28 : vector<128x1xf32> to vector<1x128x1xf32>
    tpu.vector_store %arg8[%c0_17, %c0_18, %c0_19], %31 {strides = array<i32>} : memref<4x128x1xf32, #tpu.memory_space<vmem>>, vector<1x128x1xf32>,
    %c0_20 = arith.constant 0 : index
    %c0_21 = arith.constant 0 : index
    %c0_22 = arith.constant 0 : index
    %32 = vector.load %arg9[%c0_20, %c0_21, %c0_22] : memref<4x128x32xf32, #tpu.memory_space<vmem>>, vector<1x128x32xf32>
    %33 = vector.shape_cast %32 : vector<1x128x32xf32> to vector<128x32xf32>
    %34 = vector.broadcast %19 : vector<128x1xf32> to vector<128x32xf32>
    %35 = arith.mulf %34, %33 : vector<128x32xf32>
    %cst_23 = arith.constant dense<0.000000e+00> : vector<128x32xf32>
    %36 = tpu.matmul %22, %11, %cst_23 {dimension_numbers = #tpu.dot_dimension_numbers<[1], [0], [0], [1], [0, 0, 1, 1], [], []>} : vector<128x128xf32>, vector<128x32xf32>, vector<128x32xf32> -> vector<128x32xf32>
    %37 = arith.addf %35, %36 : vector<128x32xf32>
    %c0_24 = arith.constant 0 : index
    %c0_25 = arith.constant 0 : index
    %c0_26 = arith.constant 0 : index
    %38 = vector.load %arg9[%c0_24, %c0_25, %c0_26] : memref<4x128x32xf32, #tpu.memory_space<vmem>>, vector<1x128x32xf32>
    %39 = vector.shape_cast %38 : vector<1x128x32xf32> to vector<128x32xf32>
    %40 = vector.shape_cast %37 : vector<128x32xf32> to vector<1x128x32xf32>
    tpu.vector_store %arg9[%c0_24, %c0_25, %c0_26], %40 {strides = array<i32>} : memref<4x128x32xf32, #tpu.memory_space<vmem>>, vector<1x128x32xf32>,
    %c0_27 = arith.constant 0 : index
    %c0_28 = arith.constant 0 : index
    %c0_29 = arith.constant 0 : index
    %41 = vector.load %arg7[%c0_27, %c0_28, %c0_29] : memref<4x128x1xf32, #tpu.memory_space<vmem>>, vector<1x128x1xf32>
    %42 = vector.shape_cast %41 : vector<1x128x1xf32> to vector<128x1xf32>
    %43 = vector.shape_cast %17 : vector<128x1xf32> to vector<1x128x1xf32>
    tpu.vector_store %arg7[%c0_27, %c0_28, %c0_29], %43 {strides = array<i32>} : memref<4x128x1xf32, #tpu.memory_space<vmem>>, vector<1x128x1xf32>,
    %44 = vector.extract_strided_slice %4 {offsets = [0, 32], sizes = [128, 32], strides = [1, 1]} : vector<128x128xf32> to vector<128x32xf32>
    %45 = vector.extract_strided_slice %6 {offsets = [0, 32], sizes = [128, 32], strides = [1, 1]} : vector<128x128xf32> to vector<128x32xf32>
    %46 = vector.extract_strided_slice %8 {offsets = [0, 32], sizes = [128, 32], strides = [1, 1]} : vector<128x128xf32> to vector<128x32xf32>
    %cst_30 = arith.constant dense<0.000000e+00> : vector<128x128xf32>
    %47 = tpu.matmul %44, %45, %cst_30 {dimension_numbers = #tpu.dot_dimension_numbers<[1], [1], [0], [0], [0, 0, 1, 0], [], []>} : vector<128x32xf32>, vector<128x32xf32>, vector<128x128xf32> -> vector<128x128xf32>
    %c1 = arith.constant 1 : index
    %c0_31 = arith.constant 0 : index
    %c0_32 = arith.constant 0 : index
    %48 = vector.load %arg7[%c1, %c0_31, %c0_32] : memref<4x128x1xf32, #tpu.memory_space<vmem>>, vector<1x128x1xf32>
    %49 = vector.shape_cast %48 : vector<1x128x1xf32> to vector<128x1xf32>
    %cst_33 = arith.constant dense<0xFF800000> : vector<128xf32>
    %50 = vector.multi_reduction <maximumf>, %47, %cst_33 [1] : vector<128x128xf32> to vector<128xf32>
    %51 = vector.shape_cast %50 : vector<128xf32> to vector<128x1xf32>
    %52 = arith.maximumf %49, %51 : vector<128x1xf32>
    %53 = arith.subf %49, %52 : vector<128x1xf32>
    %54 = math.exp %53 : vector<128x1xf32>
    %55 = vector.broadcast %52 : vector<128x1xf32> to vector<128x128xf32>
    %56 = arith.subf %47, %55 : vector<128x128xf32>
    %57 = math.exp %56 : vector<128x128xf32>
    %c1_34 = arith.constant 1 : index
    %c0_35 = arith.constant 0 : index
    %c0_36 = arith.constant 0 : index
    %58 = vector.load %arg8[%c1_34, %c0_35, %c0_36] : memref<4x128x1xf32, #tpu.memory_space<vmem>>, vector<1x128x1xf32>
    %59 = vector.shape_cast %58 : vector<1x128x1xf32> to vector<128x1xf32>
    %60 = arith.mulf %54, %59 : vector<128x1xf32>
    %cst_37 = arith.constant dense<0.000000e+00> : vector<128xf32>
    %61 = vector.multi_reduction <add>, %57, %cst_37 [1] : vector<128x128xf32> to vector<128xf32>
    %62 = vector.shape_cast %61 : vector<128xf32> to vector<128x1xf32>
    %63 = arith.addf %60, %62 : vector<128x1xf32>
    %c1_38 = arith.constant 1 : index
    %c0_39 = arith.constant 0 : index
    %c0_40 = arith.constant 0 : index
    %64 = vector.load %arg8[%c1_38, %c0_39, %c0_40] : memref<4x128x1xf32, #tpu.memory_space<vmem>>, vector<1x128x1xf32>
    %65 = vector.shape_cast %64 : vector<1x128x1xf32> to vector<128x1xf32>
    %66 = vector.shape_cast %63 : vector<128x1xf32> to vector<1x128x1xf32>
    tpu.vector_store %arg8[%c1_38, %c0_39, %c0_40], %66 {strides = array<i32>} : memref<4x128x1xf32, #tpu.memory_space<vmem>>, vector<1x128x1xf32>,
    %c1_41 = arith.constant 1 : index
    %c0_42 = arith.constant 0 : index
    %c0_43 = arith.constant 0 : index
    %67 = vector.load %arg9[%c1_41, %c0_42, %c0_43] : memref<4x128x32xf32, #tpu.memory_space<vmem>>, vector<1x128x32xf32>
    %68 = vector.shape_cast %67 : vector<1x128x32xf32> to vector<128x32xf32>
    %69 = vector.broadcast %54 : vector<128x1xf32> to vector<128x32xf32>
    %70 = arith.mulf %69, %68 : vector<128x32xf32>
    %cst_44 = arith.constant dense<0.000000e+00> : vector<128x32xf32>
    %71 = tpu.matmul %57, %46, %cst_44 {dimension_numbers = #tpu.dot_dimension_numbers<[1], [0], [0], [1], [0, 0, 1, 1], [], []>} : vector<128x128xf32>, vector<128x32xf32>, vector<128x32xf32> -> vector<128x32xf32>
    %72 = arith.addf %70, %71 : vector<128x32xf32>
    %c1_45 = arith.constant 1 : index
    %c0_46 = arith.constant 0 : index
    %c0_47 = arith.constant 0 : index
    %73 = vector.load %arg9[%c1_45, %c0_46, %c0_47] : memref<4x128x32xf32, #tpu.memory_space<vmem>>, vector<1x128x32xf32>
    %74 = vector.shape_cast %73 : vector<1x128x32xf32> to vector<128x32xf32>
    %75 = vector.shape_cast %72 : vector<128x32xf32> to vector<1x128x32xf32>
    tpu.vector_store %arg9[%c1_45, %c0_46, %c0_47], %75 {strides = array<i32>} : memref<4x128x32xf32, #tpu.memory_space<vmem>>, vector<1x128x32xf32>,
    %c1_48 = arith.constant 1 : index
    %c0_49 = arith.constant 0 : index
    %c0_50 = arith.constant 0 : index
    %76 = vector.load %arg7[%c1_48, %c0_49, %c0_50] : memref<4x128x1xf32, #tpu.memory_space<vmem>>, vector<1x128x1xf32>
    %77 = vector.shape_cast %76 : vector<1x128x1xf32> to vector<128x1xf32>
    %78 = vector.shape_cast %52 : vector<128x1xf32> to vector<1x128x1xf32>
    tpu.vector_store %arg7[%c1_48, %c0_49, %c0_50], %78 {strides = array<i32>} : memref<4x128x1xf32, #tpu.memory_space<vmem>>, vector<1x128x1xf32>,
    %79 = vector.extract_strided_slice %4 {offsets = [0, 64], sizes = [128, 32], strides = [1, 1]} : vector<128x128xf32> to vector<128x32xf32>
    %80 = vector.extract_strided_slice %6 {offsets = [0, 64], sizes = [128, 32], strides = [1, 1]} : vector<128x128xf32> to vector<128x32xf32>
    %81 = vector.extract_strided_slice %8 {offsets = [0, 64], sizes = [128, 32], strides = [1, 1]} : vector<128x128xf32> to vector<128x32xf32>
    %cst_51 = arith.constant dense<0.000000e+00> : vector<128x128xf32>
    %82 = tpu.matmul %79, %80, %cst_51 {dimension_numbers = #tpu.dot_dimension_numbers<[1], [1], [0], [0], [0, 0, 1, 0], [], []>} : vector<128x32xf32>, vector<128x32xf32>, vector<128x128xf32> -> vector<128x128xf32>
    %c2 = arith.constant 2 : index
    %c0_52 = arith.constant 0 : index
    %c0_53 = arith.constant 0 : index
    %83 = vector.load %arg7[%c2, %c0_52, %c0_53] : memref<4x128x1xf32, #tpu.memory_space<vmem>>, vector<1x128x1xf32>
    %84 = vector.shape_cast %83 : vector<1x128x1xf32> to vector<128x1xf32>
    %cst_54 = arith.constant dense<0xFF800000> : vector<128xf32>
    %85 = vector.multi_reduction <maximumf>, %82, %cst_54 [1] : vector<128x128xf32> to vector<128xf32>
    %86 = vector.shape_cast %85 : vector<128xf32> to vector<128x1xf32>
    %87 = arith.maximumf %84, %86 : vector<128x1xf32>
    %88 = arith.subf %84, %87 : vector<128x1xf32>
    %89 = math.exp %88 : vector<128x1xf32>
    %90 = vector.broadcast %87 : vector<128x1xf32> to vector<128x128xf32>
    %91 = arith.subf %82, %90 : vector<128x128xf32>
    %92 = math.exp %91 : vector<128x128xf32>
    %c2_55 = arith.constant 2 : index
    %c0_56 = arith.constant 0 : index
    %c0_57 = arith.constant 0 : index
    %93 = vector.load %arg8[%c2_55, %c0_56, %c0_57] : memref<4x128x1xf32, #tpu.memory_space<vmem>>, vector<1x128x1xf32>
    %94 = vector.shape_cast %93 : vector<1x128x1xf32> to vector<128x1xf32>
    %95 = arith.mulf %89, %94 : vector<128x1xf32>
    %cst_58 = arith.constant dense<0.000000e+00> : vector<128xf32>
    %96 = vector.multi_reduction <add>, %92, %cst_58 [1] : vector<128x128xf32> to vector<128xf32>
    %97 = vector.shape_cast %96 : vector<128xf32> to vector<128x1xf32>
    %98 = arith.addf %95, %97 : vector<128x1xf32>
    %c2_59 = arith.constant 2 : index
    %c0_60 = arith.constant 0 : index
    %c0_61 = arith.constant 0 : index
    %99 = vector.load %arg8[%c2_59, %c0_60, %c0_61] : memref<4x128x1xf32, #tpu.memory_space<vmem>>, vector<1x128x1xf32>
    %100 = vector.shape_cast %99 : vector<1x128x1xf32> to vector<128x1xf32>
    %101 = vector.shape_cast %98 : vector<128x1xf32> to vector<1x128x1xf32>
    tpu.vector_store %arg8[%c2_59, %c0_60, %c0_61], %101 {strides = array<i32>} : memref<4x128x1xf32, #tpu.memory_space<vmem>>, vector<1x128x1xf32>,
    %c2_62 = arith.constant 2 : index
    %c0_63 = arith.constant 0 : index
    %c0_64 = arith.constant 0 : index
    %102 = vector.load %arg9[%c2_62, %c0_63, %c0_64] : memref<4x128x32xf32, #tpu.memory_space<vmem>>, vector<1x128x32xf32>
    %103 = vector.shape_cast %102 : vector<1x128x32xf32> to vector<128x32xf32>
    %104 = vector.broadcast %89 : vector<128x1xf32> to vector<128x32xf32>
    %105 = arith.mulf %104, %103 : vector<128x32xf32>
    %cst_65 = arith.constant dense<0.000000e+00> : vector<128x32xf32>
    %106 = tpu.matmul %92, %81, %cst_65 {dimension_numbers = #tpu.dot_dimension_numbers<[1], [0], [0], [1], [0, 0, 1, 1], [], []>} : vector<128x128xf32>, vector<128x32xf32>, vector<128x32xf32> -> vector<128x32xf32>
    %107 = arith.addf %105, %106 : vector<128x32xf32>
    %c2_66 = arith.constant 2 : index
    %c0_67 = arith.constant 0 : index
    %c0_68 = arith.constant 0 : index
    %108 = vector.load %arg9[%c2_66, %c0_67, %c0_68] : memref<4x128x32xf32, #tpu.memory_space<vmem>>, vector<1x128x32xf32>
    %109 = vector.shape_cast %108 : vector<1x128x32xf32> to vector<128x32xf32>
    %110 = vector.shape_cast %107 : vector<128x32xf32> to vector<1x128x32xf32>
    tpu.vector_store %arg9[%c2_66, %c0_67, %c0_68], %110 {strides = array<i32>} : memref<4x128x32xf32, #tpu.memory_space<vmem>>, vector<1x128x32xf32>,
    %c2_69 = arith.constant 2 : index
    %c0_70 = arith.constant 0 : index
    %c0_71 = arith.constant 0 : index
    %111 = vector.load %arg7[%c2_69, %c0_70, %c0_71] : memref<4x128x1xf32, #tpu.memory_space<vmem>>, vector<1x128x1xf32>
    %112 = vector.shape_cast %111 : vector<1x128x1xf32> to vector<128x1xf32>
    %113 = vector.shape_cast %87 : vector<128x1xf32> to vector<1x128x1xf32>
    tpu.vector_store %arg7[%c2_69, %c0_70, %c0_71], %113 {strides = array<i32>} : memref<4x128x1xf32, #tpu.memory_space<vmem>>, vector<1x128x1xf32>,
    %114 = vector.extract_strided_slice %4 {offsets = [0, 96], sizes = [128, 32], strides = [1, 1]} : vector<128x128xf32> to vector<128x32xf32>
    %115 = vector.extract_strided_slice %6 {offsets = [0, 96], sizes = [128, 32], strides = [1, 1]} : vector<128x128xf32> to vector<128x32xf32>
    %116 = vector.extract_strided_slice %8 {offsets = [0, 96], sizes = [128, 32], strides = [1, 1]} : vector<128x128xf32> to vector<128x32xf32>
    %cst_72 = arith.constant dense<0.000000e+00> : vector<128x128xf32>
    %117 = tpu.matmul %114, %115, %cst_72 {dimension_numbers = #tpu.dot_dimension_numbers<[1], [1], [0], [0], [0, 0, 1, 0], [], []>} : vector<128x32xf32>, vector<128x32xf32>, vector<128x128xf32> -> vector<128x128xf32>
    %c3 = arith.constant 3 : index
    %c0_73 = arith.constant 0 : index
    %c0_74 = arith.constant 0 : index
    %118 = vector.load %arg7[%c3, %c0_73, %c0_74] : memref<4x128x1xf32, #tpu.memory_space<vmem>>, vector<1x128x1xf32>
    %119 = vector.shape_cast %118 : vector<1x128x1xf32> to vector<128x1xf32>
    %cst_75 = arith.constant dense<0xFF800000> : vector<128xf32>
    %120 = vector.multi_reduction <maximumf>, %117, %cst_75 [1] : vector<128x128xf32> to vector<128xf32>
    %121 = vector.shape_cast %120 : vector<128xf32> to vector<128x1xf32>
    %122 = arith.maximumf %119, %121 : vector<128x1xf32>
    %123 = arith.subf %119, %122 : vector<128x1xf32>
    %124 = math.exp %123 : vector<128x1xf32>
    %125 = vector.broadcast %122 : vector<128x1xf32> to vector<128x128xf32>
    %126 = arith.subf %117, %125 : vector<128x128xf32>
    %127 = math.exp %126 : vector<128x128xf32>
    %c3_76 = arith.constant 3 : index
    %c0_77 = arith.constant 0 : index
    %c0_78 = arith.constant 0 : index
    %128 = vector.load %arg8[%c3_76, %c0_77, %c0_78] : memref<4x128x1xf32, #tpu.memory_space<vmem>>, vector<1x128x1xf32>
    %129 = vector.shape_cast %128 : vector<1x128x1xf32> to vector<128x1xf32>
    %130 = arith.mulf %124, %129 : vector<128x1xf32>
    %cst_79 = arith.constant dense<0.000000e+00> : vector<128xf32>
    %131 = vector.multi_reduction <add>, %127, %cst_79 [1] : vector<128x128xf32> to vector<128xf32>
    %132 = vector.shape_cast %131 : vector<128xf32> to vector<128x1xf32>
    %133 = arith.addf %130, %132 : vector<128x1xf32>
    %c3_80 = arith.constant 3 : index
    %c0_81 = arith.constant 0 : index
    %c0_82 = arith.constant 0 : index
    %134 = vector.load %arg8[%c3_80, %c0_81, %c0_82] : memref<4x128x1xf32, #tpu.memory_space<vmem>>, vector<1x128x1xf32>
    %135 = vector.shape_cast %134 : vector<1x128x1xf32> to vector<128x1xf32>
    %136 = vector.shape_cast %133 : vector<128x1xf32> to vector<1x128x1xf32>
    tpu.vector_store %arg8[%c3_80, %c0_81, %c0_82], %136 {strides = array<i32>} : memref<4x128x1xf32, #tpu.memory_space<vmem>>, vector<1x128x1xf32>,
    %c3_83 = arith.constant 3 : index
    %c0_84 = arith.constant 0 : index
    %c0_85 = arith.constant 0 : index
    %137 = vector.load %arg9[%c3_83, %c0_84, %c0_85] : memref<4x128x32xf32, #tpu.memory_space<vmem>>, vector<1x128x32xf32>
    %138 = vector.shape_cast %137 : vector<1x128x32xf32> to vector<128x32xf32>
    %139 = vector.broadcast %124 : vector<128x1xf32> to vector<128x32xf32>
    %140 = arith.mulf %139, %138 : vector<128x32xf32>
    %cst_86 = arith.constant dense<0.000000e+00> : vector<128x32xf32>
    %141 = tpu.matmul %127, %116, %cst_86 {dimension_numbers = #tpu.dot_dimension_numbers<[1], [0], [0], [1], [0, 0, 1, 1], [], []>} : vector<128x128xf32>, vector<128x32xf32>, vector<128x32xf32> -> vector<128x32xf32>
    %142 = arith.addf %140, %141 : vector<128x32xf32>
    %c3_87 = arith.constant 3 : index
    %c0_88 = arith.constant 0 : index
    %c0_89 = arith.constant 0 : index
    %143 = vector.load %arg9[%c3_87, %c0_88, %c0_89] : memref<4x128x32xf32, #tpu.memory_space<vmem>>, vector<1x128x32xf32>
    %144 = vector.shape_cast %143 : vector<1x128x32xf32> to vector<128x32xf32>
    %145 = vector.shape_cast %142 : vector<128x32xf32> to vector<1x128x32xf32>
    tpu.vector_store %arg9[%c3_87, %c0_88, %c0_89], %145 {strides = array<i32>} : memref<4x128x32xf32, #tpu.memory_space<vmem>>, vector<1x128x32xf32>,
    %c3_90 = arith.constant 3 : index
    %c0_91 = arith.constant 0 : index
    %c0_92 = arith.constant 0 : index
    %146 = vector.load %arg7[%c3_90, %c0_91, %c0_92] : memref<4x128x1xf32, #tpu.memory_space<vmem>>, vector<1x128x1xf32>
    %147 = vector.shape_cast %146 : vector<1x128x1xf32> to vector<128x1xf32>
    %148 = vector.shape_cast %122 : vector<128x1xf32> to vector<1x128x1xf32>
    tpu.vector_store %arg7[%c3_90, %c0_91, %c0_92], %148 {strides = array<i32>} : memref<4x128x1xf32, #tpu.memory_space<vmem>>, vector<1x128x1xf32>,
    %c1_i32 = arith.constant 1 : i32
    %149 = arith.cmpi eq, %arg2, %c1_i32 : i32
    %150 = arith.extui %149 : i1 to i32
    %c0_i32_93 = arith.constant 0 : i32
    %151 = arith.cmpi ne, %150, %c0_i32_93 : i32
    scf.if %151 {
      %c0_94 = arith.constant 0 : index
      %c0_95 = arith.constant 0 : index
      %c0_96 = arith.constant 0 : index
      %152 = vector.load %arg8[%c0_94, %c0_95, %c0_96] : memref<4x128x1xf32, #tpu.memory_space<vmem>>, vector<4x128x1xf32>
      %153 = tpu.reciprocal %152 : vector<4x128x1xf32> -> vector<4x128x1xf32>
      %c0_97 = arith.constant 0 : index
      %c0_98 = arith.constant 0 : index
      %c0_99 = arith.constant 0 : index
      %154 = vector.load %arg9[%c0_97, %c0_98, %c0_99] : memref<4x128x32xf32, #tpu.memory_space<vmem>>, vector<4x128x32xf32>
      %155 = vector.broadcast %153 : vector<4x128x1xf32> to vector<4x128x32xf32>
      %156 = arith.mulf %154, %155 : vector<4x128x32xf32>
      %157 = vector.extract_strided_slice %156 {offsets = [0, 0, 0], sizes = [1, 128, 32], strides = [1, 1, 1]} : vector<4x128x32xf32> to vector<1x128x32xf32>
      %158 = vector.shape_cast %157 : vector<1x128x32xf32> to vector<128x32xf32>
      %159 = vector.extract_strided_slice %156 {offsets = [1, 0, 0], sizes = [1, 128, 32], strides = [1, 1, 1]} : vector<4x128x32xf32> to vector<1x128x32xf32>
      %160 = vector.shape_cast %159 : vector<1x128x32xf32> to vector<128x32xf32>
      %161 = vector.extract_strided_slice %156 {offsets = [2, 0, 0], sizes = [1, 128, 32], strides = [1, 1, 1]} : vector<4x128x32xf32> to vector<1x128x32xf32>
      %162 = vector.shape_cast %161 : vector<1x128x32xf32> to vector<128x32xf32>
      %163 = vector.extract_strided_slice %156 {offsets = [3, 0, 0], sizes = [1, 128, 32], strides = [1, 1, 1]} : vector<4x128x32xf32> to vector<1x128x32xf32>
      %164 = vector.shape_cast %163 : vector<1x128x32xf32> to vector<128x32xf32>
      %165 = tpu.concatenate %158, %160, %162, %164 in 1 : vector<128x32xf32>, vector<128x32xf32>, vector<128x32xf32>, vector<128x32xf32> -> vector<128x128xf32>
      %c0_100 = arith.constant 0 : index
      %c0_101 = arith.constant 0 : index
      %c0_102 = arith.constant 0 : index
      %166 = vector.load %arg6[%c0_100, %c0_101, %c0_102] : memref<1x128x128xf32, #tpu.memory_space<vmem>>, vector<1x128x128xf32>
      %167 = vector.shape_cast %166 : vector<1x128x128xf32> to vector<128x128xf32>
      %168 = vector.shape_cast %165 : vector<128x128xf32> to vector<1x128x128xf32>
      tpu.vector_store %arg6[%c0_100, %c0_101, %c0_102], %168 {strides = array<i32>} : memref<1x128x128xf32, #tpu.memory_space<vmem>>, vector<1x128x128xf32>,
    } else {
    }
    return
  }
  func.func @transform_0(%arg0: i32, %arg1: i32, %arg2: i32) -> (i32, i32, i32) {
    %c0_i32 = arith.constant 0 : i32
    %c0_i32_0 = arith.constant 0 : i32
    return %arg0, %arg1, %c0_i32 : i32, i32, i32
  }
  func.func @transform_1(%arg0: i32, %arg1: i32, %arg2: i32) -> (i32, i32, i32) {
    %c0_i32 = arith.constant 0 : i32
    %c0_i32_0 = arith.constant 0 : i32
    return %arg0, %arg2, %c0_i32 : i32, i32, i32
  }
  func.func @transform_2(%arg0: i32, %arg1: i32, %arg2: i32) -> (i32, i32, i32) {
    %c0_i32 = arith.constant 0 : i32
    %c0_i32_0 = arith.constant 0 : i32
    return %arg0, %arg2, %c0_i32 : i32, i32, i32
  }
  func.func @transform_3(%arg0: i32, %arg1: i32, %arg2: i32) -> (i32, i32, i32) {
    %c0_i32 = arith.constant 0 : i32
    %c0_i32_0 = arith.constant 0 : i32
    return %arg0, %arg1, %c0_i32 : i32, i32, i32
  }
}

module attributes {stable_mosaic.version = 11 : i64} {
  func.func @_ln_qkv_kernel(%arg0: i32, %arg1: i32, %arg2: memref<1x128x128xf32, #tpu.memory_space<vmem>>, %arg3: memref<1x128xf32, #tpu.memory_space<vmem>>, %arg4: memref<1x128xf32, #tpu.memory_space<vmem>>, %arg5: memref<128x384xf32, #tpu.memory_space<vmem>>, %arg6: memref<1x128x128xf32, #tpu.memory_space<vmem>>, %arg7: memref<1x128x128xf32, #tpu.memory_space<vmem>>, %arg8: memref<1x128x128xf32, #tpu.memory_space<vmem>>) attributes {dimension_semantics = [#tpu.dimension_semantics<parallel>, #tpu.dimension_semantics<parallel>], iteration_bounds = array<i64: 2, 2>, scalar_prefetch = 0 : i64, scratch_operands = 0 : i64, tpu.core_type = #tpu.core_type<tc>, window_params = [{transform_indices = @transform_0, window_bounds = array<i64: 1, 128, 128>}, {pipeline_mode = #tpu.pipeline_mode<synchronous>, transform_indices = @transform_1, window_bounds = array<i64: 1, 128>}, {pipeline_mode = #tpu.pipeline_mode<synchronous>, transform_indices = @transform_2, window_bounds = array<i64: 1, 128>}, {pipeline_mode = #tpu.pipeline_mode<synchronous>, transform_indices = @transform_3, window_bounds = array<i64: 128, 384>}, {transform_indices = @transform_4, window_bounds = array<i64: 1, 128, 128>}, {transform_indices = @transform_5, window_bounds = array<i64: 1, 128, 128>}, {transform_indices = @transform_6, window_bounds = array<i64: 1, 128, 128>}]} {
    %c0 = arith.constant 0 : index
    %c0_0 = arith.constant 0 : index
    %c0_1 = arith.constant 0 : index
    %0 = vector.load %arg2[%c0, %c0_0, %c0_1] : memref<1x128x128xf32, #tpu.memory_space<vmem>>, vector<1x128x128xf32>
    %1 = vector.shape_cast %0 : vector<1x128x128xf32> to vector<128x128xf32>
    %c0_2 = arith.constant 0 : index
    %c0_3 = arith.constant 0 : index
    %2 = vector.load %arg3[%c0_2, %c0_3] : memref<1x128xf32, #tpu.memory_space<vmem>>, vector<1x128xf32>
    %3 = vector.shape_cast %2 : vector<1x128xf32> to vector<128xf32>
    %c0_4 = arith.constant 0 : index
    %c0_5 = arith.constant 0 : index
    %4 = vector.load %arg4[%c0_4, %c0_5] : memref<1x128xf32, #tpu.memory_space<vmem>>, vector<1x128xf32>
    %5 = vector.shape_cast %4 : vector<1x128xf32> to vector<128xf32>
    %cst = arith.constant dense<0.000000e+00> : vector<128xf32>
    %6 = vector.multi_reduction <add>, %1, %cst [1] : vector<128x128xf32> to vector<128xf32>
    %7 = vector.shape_cast %6 : vector<128xf32> to vector<128x1xf32>
    %cst_6 = arith.constant 1.280000e+02 : f32
    %8 = vector.broadcast %cst_6 : f32 to vector<128x1xf32>
    %9 = arith.divf %7, %8 : vector<128x1xf32>
    %10 = vector.broadcast %9 : vector<128x1xf32> to vector<128x128xf32>
    %11 = arith.subf %1, %10 : vector<128x128xf32>
    %12 = arith.mulf %11, %11 : vector<128x128xf32>
    %cst_7 = arith.constant dense<0.000000e+00> : vector<128xf32>
    %13 = vector.multi_reduction <add>, %12, %cst_7 [1] : vector<128x128xf32> to vector<128xf32>
    %14 = vector.shape_cast %13 : vector<128xf32> to vector<128x1xf32>
    %cst_8 = arith.constant 1.280000e+02 : f32
    %15 = vector.broadcast %cst_8 : f32 to vector<128x1xf32>
    %16 = arith.divf %14, %15 : vector<128x1xf32>
    %17 = vector.broadcast %9 : vector<128x1xf32> to vector<128x128xf32>
    %18 = arith.subf %1, %17 : vector<128x128xf32>
    %cst_9 = arith.constant 9.99999974E-6 : f32
    %19 = vector.broadcast %cst_9 : f32 to vector<128x1xf32>
    %20 = arith.addf %16, %19 : vector<128x1xf32>
    %21 = math.rsqrt %20 : vector<128x1xf32>
    %22 = vector.broadcast %21 : vector<128x1xf32> to vector<128x128xf32>
    %23 = arith.mulf %18, %22 : vector<128x128xf32>
    %24 = vector.shape_cast %3 : vector<128xf32> to vector<1x128xf32>
    %25 = vector.broadcast %24 : vector<1x128xf32> to vector<128x128xf32>
    %26 = arith.mulf %23, %25 : vector<128x128xf32>
    %27 = vector.shape_cast %5 : vector<128xf32> to vector<1x128xf32>
    %28 = vector.broadcast %27 : vector<1x128xf32> to vector<128x128xf32>
    %29 = arith.addf %26, %28 : vector<128x128xf32>
    %c0_10 = arith.constant 0 : index
    %c0_11 = arith.constant 0 : index
    %30 = vector.load %arg5[%c0_10, %c0_11] : memref<128x384xf32, #tpu.memory_space<vmem>>, vector<128x384xf32>
    %cst_12 = arith.constant dense<0.000000e+00> : vector<128x384xf32>
    %31 = tpu.matmul %29, %30, %cst_12 {dimension_numbers = #tpu.dot_dimension_numbers<[1], [0], [0], [1], [0, 0, 1, 1], [], []>} : vector<128x128xf32>, vector<128x384xf32>, vector<128x384xf32> -> vector<128x384xf32>
    %32 = vector.extract_strided_slice %31 {offsets = [0, 0], sizes = [128, 128], strides = [1, 1]} : vector<128x384xf32> to vector<128x128xf32>
    %c0_13 = arith.constant 0 : index
    %c0_14 = arith.constant 0 : index
    %c0_15 = arith.constant 0 : index
    %33 = vector.load %arg6[%c0_13, %c0_14, %c0_15] : memref<1x128x128xf32, #tpu.memory_space<vmem>>, vector<1x128x128xf32>
    %34 = vector.shape_cast %33 : vector<1x128x128xf32> to vector<128x128xf32>
    %35 = vector.shape_cast %32 : vector<128x128xf32> to vector<1x128x128xf32>
    tpu.vector_store %arg6[%c0_13, %c0_14, %c0_15], %35 {strides = array<i32>} : memref<1x128x128xf32, #tpu.memory_space<vmem>>, vector<1x128x128xf32>,
    %36 = vector.extract_strided_slice %31 {offsets = [0, 128], sizes = [128, 128], strides = [1, 1]} : vector<128x384xf32> to vector<128x128xf32>
    %c0_16 = arith.constant 0 : index
    %c0_17 = arith.constant 0 : index
    %c0_18 = arith.constant 0 : index
    %37 = vector.load %arg7[%c0_16, %c0_17, %c0_18] : memref<1x128x128xf32, #tpu.memory_space<vmem>>, vector<1x128x128xf32>
    %38 = vector.shape_cast %37 : vector<1x128x128xf32> to vector<128x128xf32>
    %39 = vector.shape_cast %36 : vector<128x128xf32> to vector<1x128x128xf32>
    tpu.vector_store %arg7[%c0_16, %c0_17, %c0_18], %39 {strides = array<i32>} : memref<1x128x128xf32, #tpu.memory_space<vmem>>, vector<1x128x128xf32>,
    %40 = vector.extract_strided_slice %31 {offsets = [0, 256], sizes = [128, 128], strides = [1, 1]} : vector<128x384xf32> to vector<128x128xf32>
    %c0_19 = arith.constant 0 : index
    %c0_20 = arith.constant 0 : index
    %c0_21 = arith.constant 0 : index
    %41 = vector.load %arg8[%c0_19, %c0_20, %c0_21] : memref<1x128x128xf32, #tpu.memory_space<vmem>>, vector<1x128x128xf32>
    %42 = vector.shape_cast %41 : vector<1x128x128xf32> to vector<128x128xf32>
    %43 = vector.shape_cast %40 : vector<128x128xf32> to vector<1x128x128xf32>
    tpu.vector_store %arg8[%c0_19, %c0_20, %c0_21], %43 {strides = array<i32>} : memref<1x128x128xf32, #tpu.memory_space<vmem>>, vector<1x128x128xf32>,
    return
  }
  func.func @transform_0(%arg0: i32, %arg1: i32) -> (i32, i32, i32) {
    %c0_i32 = arith.constant 0 : i32
    %c0_i32_0 = arith.constant 0 : i32
    return %arg0, %arg1, %c0_i32 : i32, i32, i32
  }
  func.func @transform_1(%arg0: i32, %arg1: i32) -> (i32, i32) {
    %c0_i32 = arith.constant 0 : i32
    %c0_i32_0 = arith.constant 0 : i32
    %c0_i32_1 = arith.constant 0 : i32
    return %c0_i32, %c0_i32_0 : i32, i32
  }
  func.func @transform_2(%arg0: i32, %arg1: i32) -> (i32, i32) {
    %c0_i32 = arith.constant 0 : i32
    %c0_i32_0 = arith.constant 0 : i32
    %c0_i32_1 = arith.constant 0 : i32
    return %c0_i32, %c0_i32_0 : i32, i32
  }
  func.func @transform_3(%arg0: i32, %arg1: i32) -> (i32, i32) {
    %c0_i32 = arith.constant 0 : i32
    %c0_i32_0 = arith.constant 0 : i32
    %c0_i32_1 = arith.constant 0 : i32
    return %c0_i32, %c0_i32_0 : i32, i32
  }
  func.func @transform_4(%arg0: i32, %arg1: i32) -> (i32, i32, i32) {
    %c0_i32 = arith.constant 0 : i32
    %c0_i32_0 = arith.constant 0 : i32
    return %arg0, %arg1, %c0_i32 : i32, i32, i32
  }
  func.func @transform_5(%arg0: i32, %arg1: i32) -> (i32, i32, i32) {
    %c0_i32 = arith.constant 0 : i32
    %c0_i32_0 = arith.constant 0 : i32
    return %arg0, %arg1, %c0_i32 : i32, i32, i32
  }
  func.func @transform_6(%arg0: i32, %arg1: i32) -> (i32, i32, i32) {
    %c0_i32 = arith.constant 0 : i32
    %c0_i32_0 = arith.constant 0 : i32
    return %arg0, %arg1, %c0_i32 : i32, i32, i32
  }
}

module attributes {stable_mosaic.version = 11 : i64} {
  func.func @_proj_mlp_kernel(%arg0: i32, %arg1: i32, %arg2: i32, %arg3: memref<1x128x128xf32, #tpu.memory_space<vmem>>, %arg4: memref<1x128x128xf32, #tpu.memory_space<vmem>>, %arg5: memref<128x128xf32, #tpu.memory_space<vmem>>, %arg6: memref<1x128xf32, #tpu.memory_space<vmem>>, %arg7: memref<1x128xf32, #tpu.memory_space<vmem>>, %arg8: memref<1x128xf32, #tpu.memory_space<vmem>>, %arg9: memref<128x256xf32, #tpu.memory_space<vmem>>, %arg10: memref<1x256xf32, #tpu.memory_space<vmem>>, %arg11: memref<256x128xf32, #tpu.memory_space<vmem>>, %arg12: memref<1x128xf32, #tpu.memory_space<vmem>>, %arg13: memref<1x128x128xf32, #tpu.memory_space<vmem>>, %arg14: memref<128x128xf32, #tpu.memory_space<vmem>>, %arg15: memref<128x128xf32, #tpu.memory_space<vmem>>) attributes {dimension_semantics = [#tpu.dimension_semantics<parallel>, #tpu.dimension_semantics<parallel>, #tpu.dimension_semantics<arbitrary>], iteration_bounds = array<i64: 2, 2, 2>, scalar_prefetch = 0 : i64, scratch_operands = 2 : i64, tpu.core_type = #tpu.core_type<tc>, window_params = [{transform_indices = @transform_0, window_bounds = array<i64: 1, 128, 128>}, {transform_indices = @transform_1, window_bounds = array<i64: 1, 128, 128>}, {pipeline_mode = #tpu.pipeline_mode<synchronous>, transform_indices = @transform_2, window_bounds = array<i64: 128, 128>}, {pipeline_mode = #tpu.pipeline_mode<synchronous>, transform_indices = @transform_3, window_bounds = array<i64: 1, 128>}, {pipeline_mode = #tpu.pipeline_mode<synchronous>, transform_indices = @transform_4, window_bounds = array<i64: 1, 128>}, {pipeline_mode = #tpu.pipeline_mode<synchronous>, transform_indices = @transform_5, window_bounds = array<i64: 1, 128>}, {transform_indices = @transform_6, window_bounds = array<i64: 128, 256>}, {transform_indices = @transform_7, window_bounds = array<i64: 1, 256>}, {transform_indices = @transform_8, window_bounds = array<i64: 256, 128>}, {pipeline_mode = #tpu.pipeline_mode<synchronous>, transform_indices = @transform_9, window_bounds = array<i64: 1, 128>}, {transform_indices = @transform_10, window_bounds = array<i64: 1, 128, 128>}]} {
    %c0_i32 = arith.constant 0 : i32
    %0 = arith.cmpi eq, %arg2, %c0_i32 : i32
    %1 = arith.extui %0 : i1 to i32
    %c0_i32_0 = arith.constant 0 : i32
    %2 = arith.cmpi ne, %1, %c0_i32_0 : i32
    scf.if %2 {
      %c0_15 = arith.constant 0 : index
      %c0_16 = arith.constant 0 : index
      %c0_17 = arith.constant 0 : index
      %21 = vector.load %arg4[%c0_15, %c0_16, %c0_17] : memref<1x128x128xf32, #tpu.memory_space<vmem>>, vector<1x128x128xf32>
      %22 = vector.shape_cast %21 : vector<1x128x128xf32> to vector<128x128xf32>
      %c0_18 = arith.constant 0 : index
      %c0_19 = arith.constant 0 : index
      %23 = vector.load %arg5[%c0_18, %c0_19] : memref<128x128xf32, #tpu.memory_space<vmem>>, vector<128x128xf32>
      %cst_20 = arith.constant dense<0.000000e+00> : vector<128x128xf32>
      %24 = tpu.matmul %22, %23, %cst_20 {dimension_numbers = #tpu.dot_dimension_numbers<[1], [0], [0], [1], [0, 0, 1, 1], [], []>} : vector<128x128xf32>, vector<128x128xf32>, vector<128x128xf32> -> vector<128x128xf32>
      %c0_21 = arith.constant 0 : index
      %c0_22 = arith.constant 0 : index
      %c0_23 = arith.constant 0 : index
      %25 = vector.load %arg3[%c0_21, %c0_22, %c0_23] : memref<1x128x128xf32, #tpu.memory_space<vmem>>, vector<1x128x128xf32>
      %26 = vector.shape_cast %25 : vector<1x128x128xf32> to vector<128x128xf32>
      %27 = arith.addf %26, %24 : vector<128x128xf32>
      %c0_24 = arith.constant 0 : index
      %c0_25 = arith.constant 0 : index
      %28 = vector.load %arg6[%c0_24, %c0_25] : memref<1x128xf32, #tpu.memory_space<vmem>>, vector<1x128xf32>
      %29 = vector.shape_cast %28 : vector<1x128xf32> to vector<128xf32>
      %30 = vector.shape_cast %29 : vector<128xf32> to vector<1x128xf32>
      %31 = vector.broadcast %30 : vector<1x128xf32> to vector<128x128xf32>
      %32 = arith.addf %27, %31 : vector<128x128xf32>
      %c0_26 = arith.constant 0 : index
      %c0_27 = arith.constant 0 : index
      %33 = vector.load %arg14[%c0_26, %c0_27] : memref<128x128xf32, #tpu.memory_space<vmem>>, vector<128x128xf32>
      tpu.vector_store %arg14[%c0_26, %c0_27], %32 {strides = array<i32>} : memref<128x128xf32, #tpu.memory_space<vmem>>, vector<128x128xf32>,
      %c0_28 = arith.constant 0 : index
      %c0_29 = arith.constant 0 : index
      %34 = vector.load %arg7[%c0_28, %c0_29] : memref<1x128xf32, #tpu.memory_space<vmem>>, vector<1x128xf32>
      %35 = vector.shape_cast %34 : vector<1x128xf32> to vector<128xf32>
      %c0_30 = arith.constant 0 : index
      %c0_31 = arith.constant 0 : index
      %36 = vector.load %arg8[%c0_30, %c0_31] : memref<1x128xf32, #tpu.memory_space<vmem>>, vector<1x128xf32>
      %37 = vector.shape_cast %36 : vector<1x128xf32> to vector<128xf32>
      %cst_32 = arith.constant dense<0.000000e+00> : vector<128xf32>
      %38 = vector.multi_reduction <add>, %32, %cst_32 [1] : vector<128x128xf32> to vector<128xf32>
      %39 = vector.shape_cast %38 : vector<128xf32> to vector<128x1xf32>
      %cst_33 = arith.constant 1.280000e+02 : f32
      %40 = vector.broadcast %cst_33 : f32 to vector<128x1xf32>
      %41 = arith.divf %39, %40 : vector<128x1xf32>
      %42 = vector.broadcast %41 : vector<128x1xf32> to vector<128x128xf32>
      %43 = arith.subf %32, %42 : vector<128x128xf32>
      %44 = arith.mulf %43, %43 : vector<128x128xf32>
      %cst_34 = arith.constant dense<0.000000e+00> : vector<128xf32>
      %45 = vector.multi_reduction <add>, %44, %cst_34 [1] : vector<128x128xf32> to vector<128xf32>
      %46 = vector.shape_cast %45 : vector<128xf32> to vector<128x1xf32>
      %cst_35 = arith.constant 1.280000e+02 : f32
      %47 = vector.broadcast %cst_35 : f32 to vector<128x1xf32>
      %48 = arith.divf %46, %47 : vector<128x1xf32>
      %49 = vector.broadcast %41 : vector<128x1xf32> to vector<128x128xf32>
      %50 = arith.subf %32, %49 : vector<128x128xf32>
      %cst_36 = arith.constant 9.99999974E-6 : f32
      %51 = vector.broadcast %cst_36 : f32 to vector<128x1xf32>
      %52 = arith.addf %48, %51 : vector<128x1xf32>
      %53 = math.rsqrt %52 : vector<128x1xf32>
      %54 = vector.broadcast %53 : vector<128x1xf32> to vector<128x128xf32>
      %55 = arith.mulf %50, %54 : vector<128x128xf32>
      %56 = vector.shape_cast %35 : vector<128xf32> to vector<1x128xf32>
      %57 = vector.broadcast %56 : vector<1x128xf32> to vector<128x128xf32>
      %58 = arith.mulf %55, %57 : vector<128x128xf32>
      %59 = vector.shape_cast %37 : vector<128xf32> to vector<1x128xf32>
      %60 = vector.broadcast %59 : vector<1x128xf32> to vector<128x128xf32>
      %61 = arith.addf %58, %60 : vector<128x128xf32>
      %c0_37 = arith.constant 0 : index
      %c0_38 = arith.constant 0 : index
      %62 = vector.load %arg15[%c0_37, %c0_38] : memref<128x128xf32, #tpu.memory_space<vmem>>, vector<128x128xf32>
      tpu.vector_store %arg15[%c0_37, %c0_38], %61 {strides = array<i32>} : memref<128x128xf32, #tpu.memory_space<vmem>>, vector<128x128xf32>,
    } else {
    }
    %c0 = arith.constant 0 : index
    %c0_1 = arith.constant 0 : index
    %3 = vector.load %arg15[%c0, %c0_1] : memref<128x128xf32, #tpu.memory_space<vmem>>, vector<128x128xf32>
    %c0_2 = arith.constant 0 : index
    %c0_3 = arith.constant 0 : index
    %4 = vector.load %arg9[%c0_2, %c0_3] : memref<128x256xf32, #tpu.memory_space<vmem>>, vector<128x256xf32>
    %cst = arith.constant dense<0.000000e+00> : vector<128x256xf32>
    %5 = tpu.matmul %3, %4, %cst {dimension_numbers = #tpu.dot_dimension_numbers<[1], [0], [0], [1], [0, 0, 1, 1], [], []>} : vector<128x128xf32>, vector<128x256xf32>, vector<128x256xf32> -> vector<128x256xf32>
    %c0_4 = arith.constant 0 : index
    %c0_5 = arith.constant 0 : index
    %6 = vector.load %arg10[%c0_4, %c0_5] : memref<1x256xf32, #tpu.memory_space<vmem>>, vector<1x256xf32>
    %7 = vector.shape_cast %6 : vector<1x256xf32> to vector<256xf32>
    %8 = vector.shape_cast %7 : vector<256xf32> to vector<1x256xf32>
    %9 = vector.broadcast %8 : vector<1x256xf32> to vector<128x256xf32>
    %10 = arith.addf %5, %9 : vector<128x256xf32>
    %cst_6 = arith.constant 0.000000e+00 : f32
    %11 = vector.broadcast %cst_6 : f32 to vector<128x256xf32>
    %12 = arith.maximumf %10, %11 : vector<128x256xf32>
    %c0_7 = arith.constant 0 : index
    %c0_8 = arith.constant 0 : index
    %13 = vector.load %arg14[%c0_7, %c0_8] : memref<128x128xf32, #tpu.memory_space<vmem>>, vector<128x128xf32>
    %c0_9 = arith.constant 0 : index
    %c0_10 = arith.constant 0 : index
    %14 = vector.load %arg11[%c0_9, %c0_10] : memref<256x128xf32, #tpu.memory_space<vmem>>, vector<256x128xf32>
    %cst_11 = arith.constant dense<0.000000e+00> : vector<128x128xf32>
    %15 = tpu.matmul %12, %14, %cst_11 {dimension_numbers = #tpu.dot_dimension_numbers<[1], [0], [0], [1], [0, 0, 1, 1], [], []>} : vector<128x256xf32>, vector<256x128xf32>, vector<128x128xf32> -> vector<128x128xf32>
    %16 = arith.addf %13, %15 : vector<128x128xf32>
    %c0_12 = arith.constant 0 : index
    %c0_13 = arith.constant 0 : index
    %17 = vector.load %arg14[%c0_12, %c0_13] : memref<128x128xf32, #tpu.memory_space<vmem>>, vector<128x128xf32>
    tpu.vector_store %arg14[%c0_12, %c0_13], %16 {strides = array<i32>} : memref<128x128xf32, #tpu.memory_space<vmem>>, vector<128x128xf32>,
    %c1_i32 = arith.constant 1 : i32
    %18 = arith.cmpi eq, %arg2, %c1_i32 : i32
    %19 = arith.extui %18 : i1 to i32
    %c0_i32_14 = arith.constant 0 : i32
    %20 = arith.cmpi ne, %19, %c0_i32_14 : i32
    scf.if %20 {
      %c0_15 = arith.constant 0 : index
      %c0_16 = arith.constant 0 : index
      %21 = vector.load %arg14[%c0_15, %c0_16] : memref<128x128xf32, #tpu.memory_space<vmem>>, vector<128x128xf32>
      %c0_17 = arith.constant 0 : index
      %c0_18 = arith.constant 0 : index
      %22 = vector.load %arg12[%c0_17, %c0_18] : memref<1x128xf32, #tpu.memory_space<vmem>>, vector<1x128xf32>
      %23 = vector.shape_cast %22 : vector<1x128xf32> to vector<128xf32>
      %24 = vector.shape_cast %23 : vector<128xf32> to vector<1x128xf32>
      %25 = vector.broadcast %24 : vector<1x128xf32> to vector<128x128xf32>
      %26 = arith.addf %21, %25 : vector<128x128xf32>
      %c0_19 = arith.constant 0 : index
      %c0_20 = arith.constant 0 : index
      %c0_21 = arith.constant 0 : index
      %27 = vector.load %arg13[%c0_19, %c0_20, %c0_21] : memref<1x128x128xf32, #tpu.memory_space<vmem>>, vector<1x128x128xf32>
      %28 = vector.shape_cast %27 : vector<1x128x128xf32> to vector<128x128xf32>
      %29 = vector.shape_cast %26 : vector<128x128xf32> to vector<1x128x128xf32>
      tpu.vector_store %arg13[%c0_19, %c0_20, %c0_21], %29 {strides = array<i32>} : memref<1x128x128xf32, #tpu.memory_space<vmem>>, vector<1x128x128xf32>,
    } else {
    }
    return
  }
  func.func @transform_0(%arg0: i32, %arg1: i32, %arg2: i32) -> (i32, i32, i32) {
    %c0_i32 = arith.constant 0 : i32
    %c0_i32_0 = arith.constant 0 : i32
    return %arg0, %arg1, %c0_i32 : i32, i32, i32
  }
  func.func @transform_1(%arg0: i32, %arg1: i32, %arg2: i32) -> (i32, i32, i32) {
    %c0_i32 = arith.constant 0 : i32
    %c0_i32_0 = arith.constant 0 : i32
    return %arg0, %arg1, %c0_i32 : i32, i32, i32
  }
  func.func @transform_2(%arg0: i32, %arg1: i32, %arg2: i32) -> (i32, i32) {
    %c0_i32 = arith.constant 0 : i32
    %c0_i32_0 = arith.constant 0 : i32
    %c0_i32_1 = arith.constant 0 : i32
    return %c0_i32, %c0_i32_0 : i32, i32
  }
  func.func @transform_3(%arg0: i32, %arg1: i32, %arg2: i32) -> (i32, i32) {
    %c0_i32 = arith.constant 0 : i32
    %c0_i32_0 = arith.constant 0 : i32
    %c0_i32_1 = arith.constant 0 : i32
    return %c0_i32, %c0_i32_0 : i32, i32
  }
  func.func @transform_4(%arg0: i32, %arg1: i32, %arg2: i32) -> (i32, i32) {
    %c0_i32 = arith.constant 0 : i32
    %c0_i32_0 = arith.constant 0 : i32
    %c0_i32_1 = arith.constant 0 : i32
    return %c0_i32, %c0_i32_0 : i32, i32
  }
  func.func @transform_5(%arg0: i32, %arg1: i32, %arg2: i32) -> (i32, i32) {
    %c0_i32 = arith.constant 0 : i32
    %c0_i32_0 = arith.constant 0 : i32
    %c0_i32_1 = arith.constant 0 : i32
    return %c0_i32, %c0_i32_0 : i32, i32
  }
  func.func @transform_6(%arg0: i32, %arg1: i32, %arg2: i32) -> (i32, i32) {
    %c0_i32 = arith.constant 0 : i32
    %c0_i32_0 = arith.constant 0 : i32
    return %c0_i32, %arg2 : i32, i32
  }
  func.func @transform_7(%arg0: i32, %arg1: i32, %arg2: i32) -> (i32, i32) {
    %c0_i32 = arith.constant 0 : i32
    %c0_i32_0 = arith.constant 0 : i32
    return %c0_i32, %arg2 : i32, i32
  }
  func.func @transform_8(%arg0: i32, %arg1: i32, %arg2: i32) -> (i32, i32) {
    %c0_i32 = arith.constant 0 : i32
    %c0_i32_0 = arith.constant 0 : i32
    return %arg2, %c0_i32 : i32, i32
  }
  func.func @transform_9(%arg0: i32, %arg1: i32, %arg2: i32) -> (i32, i32) {
    %c0_i32 = arith.constant 0 : i32
    %c0_i32_0 = arith.constant 0 : i32
    %c0_i32_1 = arith.constant 0 : i32
    return %c0_i32, %c0_i32_0 : i32, i32
  }
  func.func @transform_10(%arg0: i32, %arg1: i32, %arg2: i32) -> (i32, i32, i32) {
    %c0_i32 = arith.constant 0 : i32
    %c0_i32_0 = arith.constant 0 : i32
    return %arg0, %arg1, %c0_i32 : i32, i32, i32
  }
}

</mosaic_0001>

<bundles_post_ra>
// kernel: transformer_layer.3
= control target key start
LH: loop header
LB: loop body
LE: loop exit
PB: predicated region body
PF: predicated region fallthrough
CT: control target
= control target key end

     0   :  { %s1491_s21 = smov 0   ;;  %s1493_s22 = smov 0   ;;  %s1954_s0 = inlined_call_operand.vmem [shape: f32[2,256,128], index: 0, kind: input, shape index: {}]   ;;  %s1955_s1 = inlined_call_operand.vmem [shape: f32[1,128], index: 1, kind: input, shape index: {}]   ;;  %s1956_s2 = inlined_call_operand.vmem [shape: f32[1,128], index: 2, kind: input, shape index: {}]   ;;  %s1957_s3 = inlined_call_operand.vmem [shape: f32[128,384], index: 3, kind: input, shape index: {}]   ;;  %s1958_s4 = inlined_call_operand.vmem [shape: f32[2,256,128], index: 4, kind: output, shape index: {0}]   ;;  %s1959_s5 = inlined_call_operand.vmem [shape: f32[2,256,128], index: 5, kind: output, shape index: {1}]   ;;  %s1960_s6 = inlined_call_operand.vmem [shape: f32[2,256,128], index: 6, kind: output, shape index: {2}]  }
   0x1   :  { %s1495_s23 = smov 0   ;;  %s1497_s24 = smov 0  }
   0x2   :  { %s1499_s25 = smov 0  }
   0x3 LB: > { %s26_s26 = sadd.s32 1, %s1445_s23  ;;  %s29_s27 = sadd.s32 1, %s1449_s24  ;;  %s1453_s25 = sphi %s1499_s25, %s17_s25   ;;  %s1449_s24 = sphi %s1497_s24, %s1964_s24   ;;  %s1445_s23 = sphi %s1495_s23, %s1963_s23   ;;  %s1441_s22 = sphi %s1493_s22, %s1962_s22   ;;  %s1437_s21 = sphi %s1491_s21, %s1961_s21  }
   0x4   : > { %p27_p0 = scmp.ge.s32.totalorder %s26_s26, 2  ;;  %p1173_p1 = scmp.ge.s32.totalorder %s1453_s25, 1 }
   0x5   : > { %p242_p2 = scmp.lt.s32.totalorder %s1453_s25, 5 }
   0x6   : > { %s1966_s26 = smov (%p27_p0, %s26_s26), 0  ;;  %s1968_s27 = smov (!%p27_p0, %s29_s27), %s1449_s24 }
   0x7   : > { %p243_p3 = pnand %p1173_p1, %p242_p2  ;;  %p31_p4 = scmp.ge.s32.totalorder %s1968_s27, 2 }
   0x8   : > { %s1174_s28 = sshll.u32 (!%p243_p3), %s1437_s21, 4  ;;  %p299_p5 = scmp.lt.s32.totalorder (!%p243_p3), %s1441_s22, 1  ;;  %v578_v16 = vld [vmem:[%s1957_s3 + $0x8] sm:$0xff] (!%p243_p3)  ;;  %v581_v17 = vld [vmem:[%s1957_s3 + $0x20] sm:$0xff] (!%p243_p3)  ;;  %v580_v20 = vld [vmem:[%s1957_s3 + $0x18] sm:$0xff] (!%p243_p3) }
   0x9   : > { %s1970_s27 = smov (%p31_p4, %s1968_s27), 0  ;;  %246 = sbr.rel (%p243_p3) target bundleno = 607 (0x25f), region = 36 }
   0xa   : > { %p301_p6 = scmp.lt.s32.totalorder (!%p243_p3), %s1174_s28, 31  ;;  %v577_v18 = vld [vmem:[%s1957_s3] sm:$0xff] (!%p243_p3)  ;;  %v1278_v19 = vpack.c.bf16 (!%p243_p3), %v581_v17, %v578_v16  ;;  %v584_v21 = vld [vmem:[%s1957_s3 + $0x38] sm:$0xff] (!%p243_p3)  ;;  %v587_v22 = vld [vmem:[%s1957_s3 + $0x50] sm:$0xff] (!%p243_p3) }
   0xb   : > { %v1280_v23 = vpack.c.bf16 (!%p243_p3), %v580_v20, %v577_v18  ;;  %v1282_v24 = vpack.c.bf16 (!%p243_p3), %v587_v22, %v584_v21  ;;  %v579_v25 = vld [vmem:[%s1957_s3 + $0x10] sm:$0xff] (!%p243_p3)  ;;  %v582_v26 = vld [vmem:[%s1957_s3 + $0x28] sm:$0xff] (!%p243_p3)  ;;  %v593_v31 = vld [vmem:[%s1957_s3 + $0x80] sm:$0xff] (!%p243_p3) }
   0xc   : > { %v583_v27 = vld [vmem:[%s1957_s3 + $0x30] sm:$0xff] (!%p243_p3)  ;;  %1279 = vmatprep.subr.bf16.mxu0 (!%p243_p3), %v1278_v19  ;;  %v1310_v28 = vpack.c.bf16 (!%p243_p3), %v582_v26, %v579_v25  ;;  %v586_v29 = vld [vmem:[%s1957_s3 + $0x48] sm:$0xff] (!%p243_p3)  ;;  %v585_v33 = vld [vmem:[%s1957_s3 + $0x40] sm:$0xff] (!%p243_p3) }
   0xd   : > { %v590_v30 = vld [vmem:[%s1957_s3 + $0x68] sm:$0xff] (!%p243_p3)  ;;  %1281 = vmatpush1.bf16.msra.mxu0 (!%p243_p3), %v1280_v23  ;;  %v1284_v32 = vpack.c.bf16 (!%p243_p3), %v586_v29, %v583_v27  ;;  %v588_v34 = vld [vmem:[%s1957_s3 + $0x58] sm:$0xff] (!%p243_p3)  ;;  %v589_v37 = vld [vmem:[%s1957_s3 + $0x60] sm:$0xff] (!%p243_p3) }
   0xe   : > { %1283 = vmatprep.subr.bf16.mxu0 (!%p243_p3), %v1282_v24  ;;  %1311 = vmatprep.subr.bf16.mxu1 (!%p243_p3), %v1310_v28  ;;  %v1286_v35 = vpack.c.bf16 (!%p243_p3), %v593_v31, %v590_v30  ;;  %v1314_v36 = vpack.c.bf16 (!%p243_p3), %v588_v34, %v585_v33  ;;  %v592_v38 = vld [vmem:[%s1957_s3 + $0x78] sm:$0xff] (!%p243_p3)  ;;  %v599_v23 = vld [vmem:[%s1957_s3 + $0xb0] sm:$0xff] (!%p243_p3) }
   0xf   : > { %1313 = vmatpush3.bf16.msra.mxu1 (!%p243_p3), %v1310_v28  ;;  %v1288_v39 = vpack.c.bf16 (!%p243_p3), %v592_v38, %v589_v37  ;;  %v596_v22 = vld [vmem:[%s1957_s3 + $0x98] sm:$0xff] (!%p243_p3)  ;;  %v595_v27 = vld [vmem:[%s1957_s3 + $0x90] sm:$0xff] (!%p243_p3)  ;;  %v598_v28 = vld [vmem:[%s1957_s3 + $0xa8] sm:$0xff] (!%p243_p3) }
  0x10   : > { %s1972_s22 = smov (!%p299_p5, %s1441_s22), 1  ;;  %s1974_s28 = smov (!%p301_p6, %s1174_s28), 31  ;;  %1315 = vmatprep.subr.bf16.mxu1 %v1314_v36  ;;  %v1290_v26 = vpack.c.bf16 %v599_v23, %v596_v22  ;;  %v1292_v33 = vpack.c.bf16 %v598_v28, %v595_v27  ;;  %v617_v22 = vld [vmem:[%s1957_s3 + $0x140] sm:$0xff]  ;;  %v620_v28 = vld [vmem:[%s1957_s3 + $0x158] sm:$0xff] }
  0x11   : > { %s1175_s29 = sshll.u32 %s1972_s22, 5  ;;  %1285 = vmatpush1.bf16.msra.mxu0 %v1284_v32 }
  0x12   : > { %s304_s30 = sadd.s32 %s1175_s29, %s1974_s28  ;;  %1287 = vmatprep.subr.bf16.mxu0 %v1286_v35 }
  0x13   : > { %s1521_s7 = sshll.u32 %s304_s30, 3  ;;  %1317 = vmatpush3.bf16.msra.mxu1 %v1314_v36 }
  0x14   : > { %s306_s10 = scalar_lea.vmem %s1954_s0, %s1521_s7  ;;  %s1877_s28 = scalar_lea.vmem %s1958_s4, %s1521_s7 }
  0x15   : > { %v1527_v0 = vld [vmem:[%s306_s10] sm:$0xff]  ;;  %v1529_v1 = vld [vmem:[%s306_s10 + $0x10] sm:$0xff]  ;;  %v1533_v2 = vld [vmem:[%s306_s10 + $0x8] sm:$0xff]  ;;  %1289 = vmatpush1.bf16.msra.mxu0 %v1288_v39  ;;  %s1883_s8 = scalar_lea.vmem %s1959_s5, %s1521_s7  ;;  %s1891_s11 = scalar_lea.vmem %s1960_s6, %s1521_s7 }
  0x16   : > { %356 = vadd.xlane.f32.xlu0 %v1527_v0  ;;  %360 = vadd.xlane.f32.xlu1 %v1529_v1  ;;  %v1535_v3 = vld [vmem:[%s306_s10 + $0x18] sm:$0xff]  ;;  %v1539_v4 = vld [vmem:[%s306_s10 + $0x20] sm:$0xff]  ;;  %v1541_v5 = vld [vmem:[%s306_s10 + $0x28] sm:$0xff] }
  0x17   : > { %v1545_v6 = vld [vmem:[%s306_s10 + $0x30] sm:$0xff]  ;;  %v1547_v7 = vld [vmem:[%s306_s10 + $0x38] sm:$0xff]  ;;  %v1551_v8 = vld [vmem:[%s306_s10 + $0x40] sm:$0xff]  ;;  %1291 = vmatprep.subr.bf16.mxu0 %v1290_v26 }
  0x18   : > { %v1553_v9 = vld [vmem:[%s306_s10 + $0x48] sm:$0xff]  ;;  %v1557_v10 = vld [vmem:[%s306_s10 + $0x50] sm:$0xff]  ;;  %v1559_v11 = vld [vmem:[%s306_s10 + $0x58] sm:$0xff] }
  0x19   : > { %v1563_v12 = vld [vmem:[%s306_s10 + $0x60] sm:$0xff]  ;;  %v1565_v13 = vld [vmem:[%s306_s10 + $0x68] sm:$0xff]  ;;  %v1569_v14 = vld [vmem:[%s306_s10 + $0x70] sm:$0xff]  ;;  %1293 = vmatpush1.bf16.msra.mxu0 %v1292_v33 }
  0x1a   : > { %358 = vadd.xlane.f32.xlu0 %v1533_v2  ;;  %362 = vadd.xlane.f32.xlu1 %v1535_v3  ;;  %v1571_v15 = vld [vmem:[%s306_s10 + $0x78] sm:$0xff]  ;;  %v602_v39 = vld [vmem:[%s1957_s3 + $0xc8] sm:$0xff]  ;;  %v619_v33 = vld [vmem:[%s1957_s3 + $0x150] sm:$0xff] }
  0x1e   : > { %364 = vadd.xlane.f32.xlu0 %v1539_v4  ;;  %366 = vadd.xlane.f32.xlu1 %v1541_v5 }
  0x22   : > { %368 = vadd.xlane.f32.xlu0 %v1545_v6  ;;  %370 = vadd.xlane.f32.xlu1 %v1547_v7 }
  0x26   : > { %372 = vadd.xlane.f32.xlu0 %v1551_v8  ;;  %374 = vadd.xlane.f32.xlu1 %v1553_v9 }
  0x2a   : > { %376 = vadd.xlane.f32.xlu0 %v1557_v10  ;;  %378 = vadd.xlane.f32.xlu1 %v1559_v11 }
  0x2e   : > { %380 = vadd.xlane.f32.xlu0 %v1563_v12  ;;  %382 = vadd.xlane.f32.xlu1 %v1565_v13 }
  0x32   : > { %384 = vadd.xlane.f32.xlu0 %v1569_v14  ;;  %386 = vadd.xlane.f32.xlu1 %v1571_v15 }
  0xa3   : > { %v357_v40 = vpop.xlane.xlu0 %356  ;;  %v361_v41 = vpop.xlane.xlu1 %360 }
  0xa4   : > { %v389_v42 = vmul.f32 0.0078125, %v357_v40  ;;  %v391_v43 = vmul.f32 0.0078125, %v361_v41 }
  0xa6   : > { %v1624_v44 = vsub.f32 %v1527_v0, %v389_v42  ;;  %v1627_v45 = vsub.f32 %v1529_v1, %v391_v43  ;;  %v600_v43 = vld [vmem:[%s1957_s3 + $0xb8] sm:$0xff] }
  0xa7   : > { %v359_v46 = vpop.xlane.xlu0 %358  ;;  %v363_v47 = vpop.xlane.xlu1 %362 }
  0xa8   : > { %v390_v48 = vmul.f32 0.0078125, %v359_v46  ;;  %v421_v49 = vmul.f32 %v1624_v44, %v1624_v44  ;;  %v392_v50 = vmul.f32 0.0078125, %v363_v47  ;;  %v423_v53 = vmul.f32 %v1627_v45, %v1627_v45  ;;  %v601_v46 = vld [vmem:[%s1957_s3 + $0xc0] sm:$0xff]  ;;  %v604_v47 = vld [vmem:[%s1957_s3 + $0xd8] sm:$0xff] }
  0xaa   : > { %v1632_v51 = vsub.f32 %v1533_v2, %v390_v48  ;;  %437 = vadd.xlane.f32.xlu0 %v421_v49  ;;  %v1635_v52 = vsub.f32 %v1535_v3, %v392_v50  ;;  %v1296_v50 = vpack.c.bf16 %v604_v47, %v601_v46 }
  0xab   : > { %v365_v54 = vpop.xlane.xlu0 %364  ;;  %v367_v55 = vpop.xlane.xlu1 %366 }
  0xac   : > { %v393_v56 = vmul.f32 0.0078125, %v365_v54  ;;  %v422_v57 = vmul.f32 %v1632_v51, %v1632_v51  ;;  %v394_v58 = vmul.f32 0.0078125, %v367_v55  ;;  %v424_v61 = vmul.f32 %v1635_v52, %v1635_v52 }
  0xae   : > { %v1642_v59 = vsub.f32 %v1539_v4, %v393_v56  ;;  %441 = vadd.xlane.f32.xlu0 %v423_v53  ;;  %439 = vadd.xlane.f32.xlu1 %v422_v57  ;;  %v1645_v60 = vsub.f32 %v1541_v5, %v394_v58  ;;  %v608_v58 = vld [vmem:[%s1957_s3 + $0xf8] sm:$0xff] }
  0xaf   : > { %v369_v62 = vpop.xlane.xlu0 %368  ;;  %v371_v63 = vpop.xlane.xlu1 %370 }
  0xb0   : > { %v395_v0 = vmul.f32 0.0078125, %v369_v62  ;;  %v425_v1 = vmul.f32 %v1642_v59, %v1642_v59  ;;  %v396_v2 = vmul.f32 0.0078125, %v371_v63  ;;  %v426_v5 = vmul.f32 %v1645_v60, %v1645_v60 }
  0xb2   : > { %v1652_v3 = vsub.f32 %v1545_v6, %v395_v0  ;;  %443 = vadd.xlane.f32.xlu1 %v424_v61  ;;  %445 = vadd.xlane.f32.xlu0 %v425_v1  ;;  %v1655_v4 = vsub.f32 %v1547_v7, %v396_v2  ;;  %v606_v0 = vld [vmem:[%s1957_s3 + $0xe8] sm:$0xff]  ;;  %v607_v1 = vld [vmem:[%s1957_s3 + $0xf0] sm:$0xff] }
  0xb3   : > { %v373_v16 = vpop.xlane.xlu0 %372  ;;  %v375_v17 = vpop.xlane.xlu1 %374  ;;  %v610_v2 = vld [vmem:[%s1957_s3 + $0x108] sm:$0xff] }
  0xb4   : > { %v397_v18 = vmul.f32 0.0078125, %v373_v16  ;;  %v427_v19 = vmul.f32 %v1652_v3, %v1652_v3  ;;  %v398_v20 = vmul.f32 0.0078125, %v375_v17  ;;  %v428_v7 = vmul.f32 %v1655_v4, %v1655_v4 }
  0xb5   : > { %v1300_v17 = vpack.c.bf16 %v610_v2, %v607_v1 }
  0xb6   : > { %v1662_v21 = vsub.f32 %v1551_v8, %v397_v18  ;;  %447 = vadd.xlane.f32.xlu1 %v426_v5  ;;  %449 = vadd.xlane.f32.xlu0 %v427_v19  ;;  %v1665_v6 = vsub.f32 %v1553_v9, %v398_v20  ;;  %v591_v8 = vld [vmem:[%s1957_s3 + $0x70] sm:$0xff]  ;;  %v594_v9 = vld [vmem:[%s1957_s3 + $0x88] sm:$0xff] }
  0xb7   : > { %v377_v24 = vpop.xlane.xlu0 %376  ;;  %v379_v25 = vpop.xlane.xlu1 %378  ;;  %v1318_v32 = vpack.c.bf16 %v594_v9, %v591_v8  ;;  %v612_v8 = vld [vmem:[%s1957_s3 + $0x118] sm:$0xff] }
  0xb8   : > { %v399_v29 = vmul.f32 0.0078125, %v377_v24  ;;  %v429_v30 = vmul.f32 %v1662_v21, %v1662_v21  ;;  %v400_v31 = vmul.f32 0.0078125, %v379_v25  ;;  %v430_v36 = vmul.f32 %v1665_v6, %v1665_v6  ;;  %v613_v24 = vld [vmem:[%s1957_s3 + $0x120] sm:$0xff]  ;;  %v616_v25 = vld [vmem:[%s1957_s3 + $0x138] sm:$0xff] }
  0xb9   : > { %1319 = vmatprep.subr.bf16.mxu1 %v1318_v32  ;;  %v1304_v9 = vpack.c.bf16 %v616_v25, %v613_v24 }
  0xba   : > { %v1690_v34 = vsub.f32 %v1557_v10, %v399_v29  ;;  %451 = vadd.xlane.f32.xlu1 %v428_v7  ;;  %453 = vadd.xlane.f32.xlu0 %v429_v30  ;;  %v1693_v35 = vsub.f32 %v1559_v11, %v400_v31  ;;  %v605_v10 = vld [vmem:[%s1957_s3 + $0xe0] sm:$0xff]  ;;  %v614_v7 = vld [vmem:[%s1957_s3 + $0x128] sm:$0xff]  ;;  %v623_v29 = vld [vmem:[%s1957_s3 + $0x170] sm:$0xff] }
  0xbb   : > { %v381_v37 = vpop.xlane.xlu0 %380  ;;  %v383_v38 = vpop.xlane.xlu1 %382  ;;  %v597_v11 = vld [vmem:[%s1957_s3 + $0xa0] sm:$0xff]  ;;  %1321 = vmatpush3.bf16.msra.mxu1 %v1318_v32  ;;  %v1294_v48 = vpack.c.bf16 %v605_v10, %v602_v39  ;;  %v1302_v23 = vpack.c.bf16 %v617_v22, %v614_v7  ;;  %v615_v30 = vld [vmem:[%s1957_s3 + $0x130] sm:$0xff]  ;;  %v1306_v31 = vpack.c.bf16 %v623_v29, %v620_v28  ;;  %v618_v32 = vld [vmem:[%s1957_s3 + $0x148] sm:$0xff] }
  0xbc   : > { %v401_v40 = vmul.f32 0.0078125, %v381_v37  ;;  %v431_v41 = vmul.f32 %v1690_v34, %v1690_v34  ;;  %v402_v42 = vmul.f32 0.0078125, %v383_v38  ;;  %v1322_v49 = vpack.c.bf16 %v600_v43, %v597_v11  ;;  %v621_v39 = vld [vmem:[%s1957_s3 + $0x160] sm:$0xff]  ;;  %v624_v10 = vld [vmem:[%s1957_s3 + $0x178] sm:$0xff] }
  0xbd   : > { %v432_v55 = vmul.f32 %v1693_v35, %v1693_v35  ;;  %1295 = vmatprep.subr.bf16.mxu0 %v1294_v48  ;;  %v1334_v37 = vpack.c.bf16 %v618_v32, %v615_v30  ;;  %v1338_v11 = vpack.c.bf16 %v624_v10, %v621_v39 }
  0xbe   : > { %v1718_v53 = vsub.f32 %v1563_v12, %v401_v40  ;;  %455 = vadd.xlane.f32.xlu1 %v430_v36  ;;  %457 = vadd.xlane.f32.xlu0 %v431_v41  ;;  %v1721_v54 = vsub.f32 %v1565_v13, %v402_v42  ;;  %v611_v12 = vld [vmem:[%s1957_s3 + $0x110] sm:$0xff]  ;;  %v622_v36 = vld [vmem:[%s1957_s3 + $0x168] sm:$0xff]  ;;  %v1455_v40 = vmov 0.0  }
  0xbf   : > { %v385_v56 = vpop.xlane.xlu0 %384  ;;  %v387_v57 = vpop.xlane.xlu1 %386  ;;  %1323 = vmatprep.subr.bf16.mxu1 %v1322_v49  ;;  %v603_v13 = vld [vmem:[%s1957_s3 + $0xd0] sm:$0xff]  ;;  %1297 = vmatpush1.bf16.msra.mxu0 %v1296_v50  ;;  %v1298_v5 = vpack.c.bf16 %v611_v12, %v608_v58  ;;  %v1308_v38 = vpack.c.bf16 %v622_v36, %v619_v33 }
  0xc0   : > { %v403_v61 = vmul.f32 0.0078125, %v385_v56  ;;  %v433_v62 = vmul.f32 %v1718_v53, %v1718_v53  ;;  %v404_v63 = vmul.f32 0.0078125, %v387_v57  ;;  %1325 = vmatpush3.bf16.msra.mxu1 %v1322_v49  ;;  %v1326_v16 = vpack.c.bf16 %v606_v0, %v603_v13  ;;  %689 = vmatprep.mubr.f32.mxu0 %v1455_v40 }
  0xc1   : > { %v434_v20 = vmul.f32 %v1721_v54, %v1721_v54  ;;  %1299 = vmatprep.subr.bf16.mxu0 %v1298_v5 }
  0xc2   : > { %v1746_v18 = vsub.f32 %v1569_v14, %v403_v61  ;;  %459 = vadd.xlane.f32.xlu1 %v432_v55  ;;  %461 = vadd.xlane.f32.xlu0 %v433_v62  ;;  %v1749_v19 = vsub.f32 %v1571_v15, %v404_v63  ;;  %v609_v14 = vld [vmem:[%s1957_s3 + $0x100] sm:$0xff] }
  0xc3   : > { %1327 = vmatprep.subr.bf16.mxu1 %v1326_v16  ;;  %1301 = vmatpush1.bf16.msra.mxu0 %v1300_v17  ;;  %v1330_v26 = vpack.c.bf16 %v612_v8, %v609_v14  ;;  %v1803_v17 = vld [vmem:[%s1955_s1] ss:$0 sm:$0xff] }
  0xc4   : > { %v435_v15 = vmul.f32 %v1746_v18, %v1746_v18  ;;  %1329 = vmatpush3.bf16.msra.mxu1 %v1326_v16  ;;  %v436_v27 = vmul.f32 %v1749_v19, %v1749_v19  ;;  %1303 = vmatprep.subr.bf16.mxu0 %v1302_v23  ;;  %v1809_v23 = vld [vmem:[%s1956_s2] ss:$0 sm:$0xff] }
  0xc5   : > { %1331 = vmatprep.subr.bf16.mxu1 %v1330_v26 }
  0xc6   : > { %463 = vadd.xlane.f32.xlu1 %v434_v20  ;;  %465 = vadd.xlane.f32.xlu0 %v435_v15 }
  0xc7   : > { %1305 = vmatpush1.bf16.msra.mxu0 %v1304_v9 }
  0xc8   : > { %1333 = vmatpush3.bf16.msra.mxu1 %v1330_v26  ;;  %1307 = vmatprep.subr.bf16.mxu0 %v1306_v31 }
  0xc9   : > { %1335 = vmatprep.subr.bf16.mxu1 %v1334_v37 }
  0xca   : > { %467 = vadd.xlane.f32.xlu1 %v436_v27 }
  0xcb   : > { %1309 = vmatpush1.bf16.msra.mxu0 %v1308_v38 }
  0xcc   : > { %1337 = vmatpush3.bf16.msra.mxu1 %v1334_v37 }
  0xcd   : > { %1339 = vmatprep.subr.bf16.mxu1 %v1338_v11 }
  0xd0   : > { %1341 = vmatpush3.bf16.msra.mxu1 %v1338_v11 }
 0x137   : > { %v438_v41 = vpop.xlane.xlu0 %437 }
 0x138   : > { %v469_v42 = vmul.f32 0.0078125, %v438_v41 }
 0x13a   : > { %v485_v43 = vadd.f32 1e-05, %v469_v42 }
 0x13b   : > { %v440_v46 = vpop.xlane.xlu1 %439  ;;  %v442_v47 = vpop.xlane.xlu0 %441 }
 0x13c   : > { %1383 = vrsqrt.f32 %v485_v43  ;;  %v470_v48 = vmul.f32 0.0078125, %v440_v46  ;;  %v471_v49 = vmul.f32 0.0078125, %v442_v47 }
 0x13e   : > { %v486_v50 = vadd.f32 1e-05, %v470_v48  ;;  %v487_v55 = vadd.f32 1e-05, %v471_v49 }
 0x13f   : > { %v444_v56 = vpop.xlane.xlu1 %443  ;;  %v446_v57 = vpop.xlane.xlu0 %445 }
 0x140   : > { %1385 = vrsqrt.f32 %v486_v50  ;;  %v472_v58 = vmul.f32 0.0078125, %v444_v56  ;;  %v473_v12 = vmul.f32 0.0078125, %v446_v57 }
 0x141   : > { %1387 = vrsqrt.f32 %v487_v55 }
 0x142   : > { %v488_v13 = vadd.f32 1e-05, %v472_v58  ;;  %v489_v61 = vadd.f32 1e-05, %v473_v12 }
 0x143   : > { %v448_v62 = vpop.xlane.xlu1 %447  ;;  %v450_v63 = vpop.xlane.xlu0 %449 }
 0x144   : > { %1389 = vrsqrt.f32 %v488_v13  ;;  %v474_v0 = vmul.f32 0.0078125, %v448_v62  ;;  %v475_v1 = vmul.f32 0.0078125, %v450_v63 }
 0x145   : > { %1391 = vrsqrt.f32 %v489_v61 }
 0x146   : > { %v1384_v2 = vpop.eup %1383  ;;  %v490_v5 = vadd.f32 1e-05, %v474_v0  ;;  %v491_v16 = vadd.f32 1e-05, %v475_v1 }
 0x147   : > { %v452_v20 = vpop.xlane.xlu1 %451  ;;  %v454_v7 = vpop.xlane.xlu0 %453  ;;  %v517_v22 = vmul.f32 %v1384_v2, %v1624_v44 }
 0x148   : > { %1393 = vrsqrt.f32 %v490_v5  ;;  %v476_v14 = vmul.f32 0.0078125, %v452_v20  ;;  %v477_v15 = vmul.f32 0.0078125, %v454_v7 }
 0x149   : > { %1395 = vrsqrt.f32 %v491_v16  ;;  %v539_v8 = vmul.f32 %v1803_v17, %v517_v22 }
 0x14a   : > { %v1386_v24 = vpop.eup %1385  ;;  %v492_v25 = vadd.f32 1e-05, %v476_v14  ;;  %v493_v26 = vadd.f32 1e-05, %v477_v15 }
 0x14b   : > { %v1388_v9 = vpop.eup %1387  ;;  %v456_v27 = vpop.xlane.xlu1 %455  ;;  %v561_v29 = vadd.f32 %v1809_v23, %v539_v8  ;;  %v518_v44 = vmul.f32 %v1386_v24, %v1632_v51 }
 0x14c   : > { %v458_v28 = vpop.xlane.xlu0 %457  ;;  %1397 = vrsqrt.f32 %v492_v25  ;;  %v478_v30 = vmul.f32 0.0078125, %v456_v27  ;;  %v519_v32 = vmul.f32 %v1388_v9, %v1627_v45 }
 0x14d   : > { %v479_v31 = vmul.f32 0.0078125, %v458_v28  ;;  %1399 = vrsqrt.f32 %v493_v26  ;;  %690 = vmatmul.mubr.f32.vlgmr.msra.gmra.mrb[0].mxu0 %v561_v29  ;;  %1254 = vmatprep.mubr.f32.mxu1 %v561_v29  ;;  %v540_v33 = vmul.f32 %v1803_v17, %v518_v44 }
 0x14e   : > { %v1390_v36 = vpop.eup %1389  ;;  %v494_v37 = vadd.f32 1e-05, %v478_v30  ;;  %695 = vmatprep.mubr.f32.mxu0 %v1455_v40  ;;  %v541_v39 = vmul.f32 %v1803_v17, %v519_v32 }
 0x14f   : > { %v495_v38 = vadd.f32 1e-05, %v479_v31  ;;  %v1392_v10 = vpop.eup %1391  ;;  %v460_v11 = vpop.xlane.xlu1 %459  ;;  %v562_v41 = vadd.f32 %v1809_v23, %v540_v33  ;;  %v520_v42 = vmul.f32 %v1390_v36, %v1635_v52 }
 0x150   : > { %v462_v51 = vpop.xlane.xlu0 %461  ;;  %1401 = vrsqrt.f32 %v494_v37  ;;  %v480_v45 = vmul.f32 0.0078125, %v460_v11  ;;  %v563_v46 = vadd.f32 %v1809_v23, %v541_v39  ;;  %v521_v48 = vmul.f32 %v1392_v10, %v1642_v59 }
 0x151   : > { %v481_v43 = vmul.f32 0.0078125, %v462_v51  ;;  %1403 = vrsqrt.f32 %v495_v38  ;;  %696 = vmatmul.mubr.f32.gmra.mrb[2].mxu0 %v562_v41  ;;  %1255 = vmatmul.mubr.f32.vlgmr.msra.gmra.mrb[0].mxu1 %v562_v41  ;;  %v542_v47 = vmul.f32 %v1803_v17, %v520_v42 }
 0x152   : > { %v1394_v49 = vpop.eup %1393  ;;  %v496_v50 = vadd.f32 1e-05, %v480_v45  ;;  %1257 = vmatprep.mubr.f32.mxu1 %v563_v46  ;;  %701 = vmatprep.mubr.f32.mxu0 %v1455_v40  ;;  %v543_v12 = vmul.f32 %v1803_v17, %v521_v48 }
 0x153   : > { %v497_v55 = vadd.f32 1e-05, %v481_v43  ;;  %v1396_v56 = vpop.eup %1395  ;;  %v464_v52 = vpop.xlane.xlu1 %463  ;;  %v564_v58 = vadd.f32 %v1809_v23, %v542_v47  ;;  %v522_v13 = vmul.f32 %v1394_v49, %v1645_v60 }
 0x154   : > { %v466_v57 = vpop.xlane.xlu0 %465  ;;  %1405 = vrsqrt.f32 %v496_v50  ;;  %v482_v61 = vmul.f32 0.0078125, %v464_v52  ;;  %v523_v59 = vmul.f32 %v1396_v56, %v1652_v3  ;;  %v565_v63 = vadd.f32 %v1809_v23, %v543_v12 }
 0x155   : > { %v483_v62 = vmul.f32 0.0078125, %v466_v57  ;;  %1407 = vrsqrt.f32 %v497_v55  ;;  %702 = vmatmul.mubr.f32.gmra.mrb[4].mxu0 %v563_v46  ;;  %1258 = vmatmul.mubr.f32.gmra.mrb[2].mxu1 %v564_v58  ;;  %v544_v0 = vmul.f32 %v1803_v17, %v522_v13 }
 0x156   : > { %v1398_v1 = vpop.eup %1397  ;;  %v498_v2 = vadd.f32 1e-05, %v482_v61  ;;  %707 = vmatprep.mubr.f32.mxu0 %v1455_v40  ;;  %v545_v16 = vmul.f32 %v1803_v17, %v523_v59  ;;  %1260 = vmatprep.mubr.f32.mxu1 %v565_v63 }
 0x157   : > { %v499_v5 = vadd.f32 1e-05, %v483_v62  ;;  %v1400_v60 = vpop.eup %1399  ;;  %v468_v20 = vpop.xlane.xlu1 %467  ;;  %v566_v7 = vadd.f32 %v1809_v23, %v544_v0  ;;  %v524_v3 = vmul.f32 %v1398_v1, %v1655_v4 }
 0x158   : > { %1409 = vrsqrt.f32 %v498_v2  ;;  %v484_v22 = vmul.f32 0.0078125, %v468_v20  ;;  %v567_v14 = vadd.f32 %v1809_v23, %v545_v16  ;;  %v525_v15 = vmul.f32 %v1400_v60, %v1662_v21 }
 0x159   : > { %1411 = vrsqrt.f32 %v499_v5  ;;  %708 = vmatmul.mubr.f32.gmra.mrb[6].mxu0 %v564_v58  ;;  %1261 = vmatmul.mubr.f32.gmra.mrb[4].mxu1 %v566_v7  ;;  %v546_v8 = vmul.f32 %v1803_v17, %v524_v3 }
 0x15a   : > { %v1402_v24 = vpop.eup %1401  ;;  %v500_v25 = vadd.f32 1e-05, %v484_v22  ;;  %1263 = vmatprep.mubr.f32.mxu1 %v567_v14  ;;  %713 = vmatprep.mubr.f32.mxu0 %v1455_v40  ;;  %v547_v26 = vmul.f32 %v1803_v17, %v525_v15 }
 0x15b   : > { %v1404_v9 = vpop.eup %1403  ;;  %v568_v4 = vadd.f32 %v1809_v23, %v546_v8  ;;  %v526_v27 = vmul.f32 %v1402_v24, %v1665_v6 }
 0x15c   : > { %1413 = vrsqrt.f32 %v500_v25  ;;  %v569_v21 = vadd.f32 %v1809_v23, %v547_v26  ;;  %v527_v28 = vmul.f32 %v1404_v9, %v1690_v34 }
 0x15d   : > { %714 = vmatmul.mubr.f32.gmra.mrb[8].mxu0 %v565_v63  ;;  %1264 = vmatmul.mubr.f32.gmra.mrb[6].mxu1 %v568_v4  ;;  %v548_v29 = vmul.f32 %v1803_v17, %v526_v27 }
 0x15e   : > { %v1406_v44 = vpop.eup %1405  ;;  %1266 = vmatprep.mubr.f32.mxu1 %v569_v21  ;;  %719 = vmatprep.mubr.f32.mxu0 %v1455_v40  ;;  %v549_v30 = vmul.f32 %v1803_v17, %v527_v28 }
 0x15f   : > { %v1408_v31 = vpop.eup %1407  ;;  %v570_v32 = vadd.f32 %v1809_v23, %v548_v29  ;;  %v528_v6 = vmul.f32 %v1406_v44, %v1693_v35 }
 0x160   : > { %v571_v33 = vadd.f32 %v1809_v23, %v549_v30  ;;  %v529_v36 = vmul.f32 %v1408_v31, %v1718_v53 }
 0x161   : > { %720 = vmatmul.mubr.f32.gmra.mrb[10].mxu0 %v566_v7  ;;  %1267 = vmatmul.mubr.f32.gmra.mrb[8].mxu1 %v570_v32  ;;  %v550_v34 = vmul.f32 %v1803_v17, %v528_v6 }
 0x162   : > { %v1410_v37 = vpop.eup %1409  ;;  %1269 = vmatprep.mubr.f32.mxu1 %v571_v33  ;;  %725 = vmatprep.mubr.f32.mxu0 %v1455_v40  ;;  %v551_v38 = vmul.f32 %v1803_v17, %v529_v36 }
 0x163   : > { %v1412_v39 = vpop.eup %1411  ;;  %v572_v10 = vadd.f32 %v1809_v23, %v550_v34  ;;  %v530_v11 = vmul.f32 %v1410_v37, %v1721_v54 }
 0x164   : > { %v573_v35 = vadd.f32 %v1809_v23, %v551_v38  ;;  %v531_v51 = vmul.f32 %v1412_v39, %v1746_v18 }
 0x165   : > { %726 = vmatmul.mubr.f32.gmra.mrb[12].mxu0 %v567_v14  ;;  %1270 = vmatmul.mubr.f32.gmra.mrb[10].mxu1 %v572_v10  ;;  %v552_v53 = vmul.f32 %v1803_v17, %v530_v11 }
 0x166   : > { %v1414_v41 = vpop.eup %1413  ;;  %1272 = vmatprep.mubr.f32.mxu1 %v573_v35  ;;  %731 = vmatprep.mubr.f32.mxu0 %v1455_v40  ;;  %v553_v42 = vmul.f32 %v1803_v17, %v531_v51 }
 0x167   : > { %v574_v45 = vadd.f32 %v1809_v23, %v552_v53  ;;  %v532_v43 = vmul.f32 %v1414_v41, %v1749_v19 }
 0x168   : > { %v575_v54 = vadd.f32 %v1809_v23, %v553_v42 }
 0x169   : > { %732 = vmatmul.mubr.f32.gmra.mrb[14].mxu0 %v568_v4  ;;  %1273 = vmatmul.mubr.f32.gmra.mrb[12].mxu1 %v574_v45  ;;  %v554_v18 = vmul.f32 %v1803_v17, %v532_v43 }
 0x16a   : > { %1275 = vmatprep.mubr.f32.mxu1 %v575_v54  ;;  %737 = vmatprep.mubr.f32.mxu0 %v1455_v40 }
 0x16b   : > { %v576_v46 = vadd.f32 %v1809_v23, %v554_v18 }
 0x16d   : > { %738 = vmatmul.mubr.f32.gmra.mrb[16].mxu0 %v569_v21  ;;  %1276 = vmatmul.mubr.f32.gmra.mrb[14].mxu1 %v576_v46 }
 0x16e   : > { %743 = vmatprep.mubr.f32.mxu0 %v1455_v40 }
 0x171   : > { %744 = vmatmul.mubr.f32.gmra.mrb[18].mxu0 %v570_v32 }
 0x172   : > { %749 = vmatprep.mubr.f32.mxu0 %v1455_v40 }
 0x175   : > { %750 = vmatmul.mubr.f32.gmra.mrb[20].mxu0 %v571_v33 }
 0x176   : > { %755 = vmatprep.mubr.f32.mxu0 %v1455_v40 }
 0x179   : > { %756 = vmatmul.mubr.f32.gmra.mrb[22].mxu0 %v572_v10 }
 0x17a   : > { %761 = vmatprep.mubr.f32.mxu0 %v1455_v40 }
 0x17d   : > { %762 = vmatmul.mubr.f32.gmra.mrb[24].mxu0 %v573_v35 }
 0x17e   : > { %767 = vmatprep.mubr.f32.mxu0 %v1455_v40 }
 0x181   : > { %768 = vmatmul.mubr.f32.gmra.mrb[26].mxu0 %v574_v45 }
 0x182   : > { %773 = vmatprep.mubr.f32.mxu0 %v1455_v40 }
 0x185   : > { %774 = vmatmul.mubr.f32.gmra.mrb[28].mxu0 %v575_v54 }
 0x186   : > { %779 = vmatprep.mubr.f32.mxu0 %v1455_v40 }
 0x189   : > { %780 = vmatmul.mubr.f32.gmra.mrb[30].mxu0 %v576_v46 }
 0x220   : > { %v691_v19 = vpop.f32.mrb[0].mxu0 }
 0x221   : > { %931 = vst [vmem:[%s1877_s28] sm:$0xff] %v691_v19  ;;  %v693_v17 = vpop.f32.mrb[1].mxu0 }
 0x222   : > { %947 = vst [vmem:[%s1883_s8] sm:$0xff] %v693_v17 }
 0x224   : > { %v697_v40 = vpop.f32.mrb[2].mxu0  ;;  %v1256_v23 = vpop.f32.mrb[0].mxu1 }
 0x225   : > { %932 = vst [vmem:[%s1877_s28 + $0x8] sm:$0xff] %v697_v40  ;;  %964 = vst [vmem:[%s1891_s11 + $0x8] sm:$0xff] %v1256_v23  ;;  %v699_v47 = vpop.f32.mrb[3].mxu0  ;;  %v852_v48 = vpop.f32.mrb[1].mxu1 }
 0x226   : > { %948 = vst [vmem:[%s1883_s8 + $0x8] sm:$0xff] %v699_v47  ;;  %963 = vst [vmem:[%s1891_s11] sm:$0xff] %v852_v48 }
 0x228   : > { %v703_v49 = vpop.f32.mrb[4].mxu0  ;;  %v1259_v50 = vpop.f32.mrb[2].mxu1 }
 0x229   : > { %933 = vst [vmem:[%s1877_s28 + $0x10] sm:$0xff] %v703_v49  ;;  %966 = vst [vmem:[%s1891_s11 + $0x18] sm:$0xff] %v1259_v50  ;;  %v705_v55 = vpop.f32.mrb[5].mxu0  ;;  %v862_v56 = vpop.f32.mrb[3].mxu1 }
 0x22a   : > { %949 = vst [vmem:[%s1883_s8 + $0x10] sm:$0xff] %v705_v55  ;;  %965 = vst [vmem:[%s1891_s11 + $0x10] sm:$0xff] %v862_v56 }
 0x22c   : > { %v709_v52 = vpop.f32.mrb[6].mxu0  ;;  %v1262_v57 = vpop.f32.mrb[4].mxu1 }
 0x22d   : > { %934 = vst [vmem:[%s1877_s28 + $0x18] sm:$0xff] %v709_v52  ;;  %968 = vst [vmem:[%s1891_s11 + $0x28] sm:$0xff] %v1262_v57  ;;  %v711_v58 = vpop.f32.mrb[7].mxu0  ;;  %v872_v12 = vpop.f32.mrb[5].mxu1 }
 0x22e   : > { %950 = vst [vmem:[%s1883_s8 + $0x18] sm:$0xff] %v711_v58  ;;  %967 = vst [vmem:[%s1891_s11 + $0x20] sm:$0xff] %v872_v12 }
 0x230   : > { %v715_v13 = vpop.f32.mrb[8].mxu0  ;;  %v1265_v61 = vpop.f32.mrb[6].mxu1 }
 0x231   : > { %935 = vst [vmem:[%s1877_s28 + $0x20] sm:$0xff] %v715_v13  ;;  %970 = vst [vmem:[%s1891_s11 + $0x38] sm:$0xff] %v1265_v61  ;;  %v717_v62 = vpop.f32.mrb[9].mxu0  ;;  %v882_v59 = vpop.f32.mrb[7].mxu1 }
 0x232   : > { %951 = vst [vmem:[%s1883_s8 + $0x20] sm:$0xff] %v717_v62  ;;  %969 = vst [vmem:[%s1891_s11 + $0x30] sm:$0xff] %v882_v59 }
 0x234   : > { %v721_v63 = vpop.f32.mrb[10].mxu0  ;;  %v1268_v0 = vpop.f32.mrb[8].mxu1 }
 0x235   : > { %936 = vst [vmem:[%s1877_s28 + $0x28] sm:$0xff] %v721_v63  ;;  %972 = vst [vmem:[%s1891_s11 + $0x48] sm:$0xff] %v1268_v0  ;;  %v723_v1 = vpop.f32.mrb[11].mxu0  ;;  %v892_v2 = vpop.f32.mrb[9].mxu1 }
 0x236   : > { %952 = vst [vmem:[%s1883_s8 + $0x28] sm:$0xff] %v723_v1  ;;  %971 = vst [vmem:[%s1891_s11 + $0x40] sm:$0xff] %v892_v2 }
 0x238   : > { %v727_v5 = vpop.f32.mrb[12].mxu0  ;;  %v1271_v16 = vpop.f32.mrb[10].mxu1 }
 0x239   : > { %937 = vst [vmem:[%s1877_s28 + $0x30] sm:$0xff] %v727_v5  ;;  %974 = vst [vmem:[%s1891_s11 + $0x58] sm:$0xff] %v1271_v16  ;;  %v729_v60 = vpop.f32.mrb[13].mxu0  ;;  %v902_v20 = vpop.f32.mrb[11].mxu1 }
 0x23a   : > { %953 = vst [vmem:[%s1883_s8 + $0x30] sm:$0xff] %v729_v60  ;;  %973 = vst [vmem:[%s1891_s11 + $0x50] sm:$0xff] %v902_v20 }
 0x23c   : > { %v733_v7 = vpop.f32.mrb[14].mxu0  ;;  %v1274_v3 = vpop.f32.mrb[12].mxu1 }
 0x23d   : > { %938 = vst [vmem:[%s1877_s28 + $0x38] sm:$0xff] %v733_v7  ;;  %976 = vst [vmem:[%s1891_s11 + $0x68] sm:$0xff] %v1274_v3  ;;  %v735_v22 = vpop.f32.mrb[15].mxu0  ;;  %v912_v14 = vpop.f32.mrb[13].mxu1 }
 0x23e   : > { %954 = vst [vmem:[%s1883_s8 + $0x38] sm:$0xff] %v735_v22  ;;  %975 = vst [vmem:[%s1891_s11 + $0x60] sm:$0xff] %v912_v14 }
 0x240   : > { %v739_v15 = vpop.f32.mrb[16].mxu0  ;;  %v1277_v8 = vpop.f32.mrb[14].mxu1 }
 0x241   : > { %939 = vst [vmem:[%s1877_s28 + $0x40] sm:$0xff] %v739_v15  ;;  %978 = vst [vmem:[%s1891_s11 + $0x78] sm:$0xff] %v1277_v8  ;;  %v741_v24 = vpop.f32.mrb[17].mxu0  ;;  %v922_v25 = vpop.f32.mrb[15].mxu1 }
 0x242   : > { %955 = vst [vmem:[%s1883_s8 + $0x40] sm:$0xff] %v741_v24  ;;  %977 = vst [vmem:[%s1891_s11 + $0x70] sm:$0xff] %v922_v25 }
 0x244   : > { %v745_v26 = vpop.f32.mrb[18].mxu0 }
 0x245   : > { %940 = vst [vmem:[%s1877_s28 + $0x48] sm:$0xff] %v745_v26  ;;  %v747_v9 = vpop.f32.mrb[19].mxu0 }
 0x246   : > { %956 = vst [vmem:[%s1883_s8 + $0x48] sm:$0xff] %v747_v9 }
 0x248   : > { %v751_v4 = vpop.f32.mrb[20].mxu0 }
 0x249   : > { %941 = vst [vmem:[%s1877_s28 + $0x50] sm:$0xff] %v751_v4  ;;  %v753_v27 = vpop.f32.mrb[21].mxu0 }
 0x24a   : > { %957 = vst [vmem:[%s1883_s8 + $0x50] sm:$0xff] %v753_v27 }
 0x24c   : > { %v757_v21 = vpop.f32.mrb[22].mxu0 }
 0x24d   : > { %942 = vst [vmem:[%s1877_s28 + $0x58] sm:$0xff] %v757_v21  ;;  %v759_v28 = vpop.f32.mrb[23].mxu0 }
 0x24e   : > { %958 = vst [vmem:[%s1883_s8 + $0x58] sm:$0xff] %v759_v28 }
 0x250   : > { %v763_v29 = vpop.f32.mrb[24].mxu0 }
 0x251   : > { %943 = vst [vmem:[%s1877_s28 + $0x60] sm:$0xff] %v763_v29  ;;  %v765_v44 = vpop.f32.mrb[25].mxu0 }
 0x252   : > { %959 = vst [vmem:[%s1883_s8 + $0x60] sm:$0xff] %v765_v44 }
 0x254   : > { %v769_v30 = vpop.f32.mrb[26].mxu0 }
 0x255   : > { %944 = vst [vmem:[%s1877_s28 + $0x68] sm:$0xff] %v769_v30  ;;  %v771_v31 = vpop.f32.mrb[27].mxu0 }
 0x256   : > { %960 = vst [vmem:[%s1883_s8 + $0x68] sm:$0xff] %v771_v31 }
 0x258   : > { %v775_v32 = vpop.f32.mrb[28].mxu0 }
 0x259   : > { %945 = vst [vmem:[%s1877_s28 + $0x70] sm:$0xff] %v775_v32  ;;  %v777_v6 = vpop.f32.mrb[29].mxu0 }
 0x25a   : > { %961 = vst [vmem:[%s1883_s8 + $0x70] sm:$0xff] %v777_v6 }
 0x25c   : > { %v781_v33 = vpop.f32.mrb[30].mxu0 }
 0x25d   : > { %946 = vst [vmem:[%s1877_s28 + $0x78] sm:$0xff] %v781_v33  ;;  %v783_v36 = vpop.f32.mrb[31].mxu0 }
 0x25e   : > { %962 = vst [vmem:[%s1883_s8 + $0x78] sm:$0xff] %v783_v36 }
 0x25f PF: > { %s17_s25 = sadd.s32 1, %s1453_s25   ;;  %s1961_s21 = smov %s1445_s23 }
 0x260   : > { %p14_p7 = scmp.ge.s32.totalorder %s17_s25, 6   ;;  %s1962_s22 = smov %s1449_s24 }
 0x261   : > { %s1963_s23 = smov %s1966_s26  ;;  %s1964_s24 = smov %s1970_s27 }
 0x262   :  { %16 = sbr.rel (!%p14_p7) target bundleno = 3 (0x3), region = 90 }

// kernel: transformer_layer.5
= control target key start
LH: loop header
LB: loop body
LE: loop exit
PB: predicated region body
PF: predicated region fallthrough
CT: control target
= control target key end

     0   :  { %s3145_s0 = inlined_call_operand.vmem [shape: f32[2,256,128], index: 0, kind: input, shape index: {}]   ;;  %s3146_s1 = inlined_call_operand.vmem [shape: f32[2,256,128], index: 1, kind: input, shape index: {}]   ;;  %s3147_s2 = inlined_call_operand.vmem [shape: f32[128,128], index: 2, kind: input, shape index: {}]   ;;  %s3148_s3 = inlined_call_operand.vmem [shape: f32[1,128], index: 3, kind: input, shape index: {}]   ;;  %s3149_s4 = inlined_call_operand.vmem [shape: f32[1,128], index: 4, kind: input, shape index: {}]   ;;  %s3150_s5 = inlined_call_operand.vmem [shape: f32[1,128], index: 5, kind: input, shape index: {}]   ;;  %s3151_s6 = inlined_call_operand.vmem [shape: f32[128,512], index: 6, kind: input, shape index: {}]   ;;  %s3152_s7 = inlined_call_operand.vmem [shape: f32[1,512], index: 7, kind: input, shape index: {}]   ;;  %s3153_s8 = inlined_call_operand.vmem [shape: f32[512,128], index: 8, kind: input, shape index: {}]   ;;  %s3154_s9 = inlined_call_operand.vmem [shape: f32[1,128], index: 9, kind: input, shape index: {}]   ;;  %s3155_s10 = inlined_call_operand.hbm [shape: f32[2,256,128], index: 10, kind: output, shape index: {}]  }
   0x1   :  { %3166 = sst [smem:[#allocation18_spill]] %s3145_s0 }
   0x2   :  { %3167 = sst [smem:[#allocation19_spill]] %s3149_s4 }
   0x3   :  { %3168 = sst [smem:[#allocation20_spill]] %s3150_s5 }
   0x4   :  { %3169 = sst [smem:[#allocation21_spill]] %s3151_s6 }
   0x5   :  { %3170 = sst [smem:[#allocation22_spill]] %s3154_s9 }
   0x6   :  { %3171 = sst [smem:[#allocation23_spill]] %s3155_s10 }
   0x7   :  { %15 = vsyncpa [#allocation6], 0 }
   0x8   :  { %17 = vsyncpa [#allocation6 + $0x1], 0  ;;  %s2402_s13 = smov 0   ;;  %s2404_s14 = smov 0  }
   0x9   :  { %s2406_s15 = smov 0   ;;  %s2408_s16 = smov 0  }
   0xa   :  { %s2410_s17 = smov 0   ;;  %s2412_s18 = smov 0  }
   0xb   :  { %s2414_s19 = smov 0   ;;  %s2416_s20 = smov 0  }
   0xc   :  { %s2418_s21 = smov 0   ;;  %s2420_s22 = smov 0  }
   0xd   :  { %s2422_s23 = smov 0   ;;  %s2424_s24 = smov 0  }
   0xe LB: > { %3172 = sst [smem:[#allocation8_spill]] %s2305_s15  ;;  %s1765_s25 = sadd.s32 4294967295, %s2341_s24   ;;  %s2341_s24 = sphi %s2424_s24, %s23_s24   ;;  %s2337_s23 = sphi %s2422_s23, %s3202_s23   ;;  %s2333_s22 = sphi %s2420_s22, %s3201_s22   ;;  %s2329_s21 = sphi %s2418_s21, %s3200_s21   ;;  %s2325_s20 = sphi %s2416_s20, %s3199_s20   ;;  %s2321_s19 = sphi %s2414_s19, %s3198_s19   ;;  %s2317_s18 = sphi %s2412_s18, %s3197_s18   ;;  %s2313_s17 = sphi %s2410_s17, %s3196_s17   ;;  %s2309_s16 = sphi %s2408_s16, %s3195_s16   ;;  %s2305_s15 = sphi %s2406_s15, %s3194_s15   ;;  %s2301_s14 = sphi %s2404_s14, %s3204_s14   ;;  %s2297_s13 = sphi %s2402_s13, %s3203_s13  }
   0xf   : > { %3173 = sst [smem:[#allocation9_spill]] %s2313_s17  ;;  %s1766_s26 = sadd.s32 4294967294, %s2341_s24  }
  0x10   : > { %3174 = sst [smem:[#allocation10_spill]] %s2329_s21  ;;  %s35_s27 = sadd.s32 1, %s2329_s21 }
  0x11   : > { %3175 = sst [smem:[#allocation11_spill]] %s2333_s22  ;;  %p36_p0 = scmp.ge.s32.totalorder %s35_s27, 2 }
  0x12   : > { %3176 = sst [smem:[#allocation12_spill]] %s2337_s23  ;;  %s38_s28 = sadd.s32 1, %s2333_s22 }
  0x13   : > { %s42_s29 = sadd.s32 1, %s2337_s23  ;;  %p196_p1 = scmp.ne.s32.totalorder %s2313_s17, %s2309_s16 }
  0x14   : > { %s3206_s27 = smov (%p36_p0, %s35_s27), 0  ;;  %s3208_s28 = smov (!%p36_p0, %s38_s28), %s2333_s22 }
  0x15   : > { %3177 = sst [smem:[#allocation13_spill]] %s3206_s27  ;;  %s186_s30 = ssub.s32 %s2329_s21, %s3206_s27 }
  0x16   : > { %p197_p2 = scmp.eq.s32.totalorder %s2341_s24, 0  ;;  %p40_p3 = scmp.ge.s32.totalorder %s3208_s28, 2 }
  0x17   : > { %p187_p4 = scmp.eq.s32.totalorder %s186_s30, 0  ;;  %s189_s11 = sadd.s32 1, %s2313_s17 }
  0x18   : > { %p2476_p5 = por %p197_p2, %p196_p1  ;;  %s3210_s28 = smov (%p40_p3, %s3208_s28), 0 }
  0x19   : > { %3179 = sst [smem:[#allocation14_spill]] %s3210_s28  ;;  %s3212_s29 = smov (!%p40_p3, %s42_s29), %s2337_s23 }
  0x1a   : > { %s2484_s10 = scalar_select %p187_p4, %s2313_s17, %s189_s11  }
  0x1b   : > { %p44_p6 = scmp.ge.s32.totalorder %s3212_s29, 2  ;;  %s286_s9 = ssub.s32 %s2333_s22, %s3210_s28 }
  0x1c   : > { %3180 = sst [smem:[#allocation15_spill]] %s2484_s10  ;;  %p300_p7 = scmp.ne.s32.totalorder %s2305_s15, %s2301_s14 }
  0x1d   : > { %p301_p8 = scmp.eq.s32.totalorder %s1765_s25, 7  ;;  %s3214_s29 = smov (%p44_p6, %s3212_s29), 0 }
  0x1e   : > { %3181 = sst [smem:[#allocation16_spill]] %s3214_s29  ;;  %p306_p10 = scmp.ne.s32.totalorder %s2301_s14, %s2297_s13 }
  0x1f   : > { %p2492_p9 = por %p301_p8, %p300_p7  ;;  %s285_s27 = ssub.s32 %s2337_s23, %s3214_s29 }
  0x20   : > { %p307_p11 = scmp.eq.s32.totalorder %s1766_s26, 7  ;;  %s287_s5 = sor.u32 %s286_s9, %s285_s27 }
  0x21   : > { %s290_s4 = sadd.s32 1, %s2305_s15  ;;  %p288_p12 = scmp.eq.s32.totalorder %s287_s5, 0 }
  0x22   : > { %p2501_p13 = por %p307_p11, %p306_p10  ;;  %p1768_p0 = scmp.ge.s32.totalorder %s2341_s24, 8 }
  0x23   : > { %s2506_s28 = scalar_select %p288_p12, %s2305_s15, %s290_s4  }
  0x24   : > { %338 = sbr.rel (%p1768_p0) target bundleno = 69 (0x45), region = 36 }
  0x25   : > { %3184 = sst [smem:[#allocation17_spill]] %s2506_s28 }
  0x2b   : > { %367 = sbr.rel (!%p2476_p5) target bundleno = 69 (0x45), region = 48  ;;  %s369_s25 = sand.u32 (%p2476_p5), 1, %s2313_s17  }
  0x2c   : > { %s1796_s29 = sshll.u32 (%p2476_p5), %s2329_s21, 4  ;;  %s1769_s26 = sshll.u32 (%p2476_p5), %s369_s25, 8 }
  0x2d   : > { %s3185_s6 = sld [smem:[#allocation21_spill]] (%p2476_p5)  ;;  %s2521_s4 = scalar_lea.vmem (%p2476_p5), [#allocation4], %s1769_s26 }
  0x33   : > { %s2516_s5 = scalar_lea.vmem %s3185_s6, %s1796_s29 }
  0x34   : > { %v387_v0 = vld [vmem:[%s2516_s5] sm:$0xff]  ;;  %v389_v1 = vld [vmem:[%s2516_s5 + $0x8] sm:$0xff] }
  0x35   : > { %v391_v2 = vld [vmem:[%s2516_s5 + $0x20] sm:$0xff]  ;;  %388 = vst [vmem:[%s2521_s4] sm:$0xff] %v387_v0  ;;  %390 = vst [vmem:[%s2521_s4 + $0x8] sm:$0xff] %v389_v1  ;;  %v393_v3 = vld [vmem:[%s2516_s5 + $0x28] sm:$0xff] }
  0x36   : > { %392 = vst [vmem:[%s2521_s4 + $0x10] sm:$0xff] %v391_v2  ;;  %v395_v4 = vld [vmem:[%s2516_s5 + $0x40] sm:$0xff]  ;;  %v397_v5 = vld [vmem:[%s2516_s5 + $0x48] sm:$0xff]  ;;  %394 = vst [vmem:[%s2521_s4 + $0x18] sm:$0xff] %v393_v3 }
  0x37   : > { %396 = vst [vmem:[%s2521_s4 + $0x20] sm:$0xff] %v395_v4  ;;  %398 = vst [vmem:[%s2521_s4 + $0x28] sm:$0xff] %v397_v5  ;;  %v399_v6 = vld [vmem:[%s2516_s5 + $0x60] sm:$0xff]  ;;  %v401_v7 = vld [vmem:[%s2516_s5 + $0x68] sm:$0xff] }
  0x38   : > { %v403_v8 = vld [vmem:[%s2516_s5 + $0x80] sm:$0xff]  ;;  %400 = vst [vmem:[%s2521_s4 + $0x30] sm:$0xff] %v399_v6  ;;  %402 = vst [vmem:[%s2521_s4 + $0x38] sm:$0xff] %v401_v7  ;;  %v405_v9 = vld [vmem:[%s2516_s5 + $0x88] sm:$0xff] }
  0x39   : > { %404 = vst [vmem:[%s2521_s4 + $0x40] sm:$0xff] %v403_v8  ;;  %v407_v10 = vld [vmem:[%s2516_s5 + $0xa0] sm:$0xff]  ;;  %v409_v11 = vld [vmem:[%s2516_s5 + $0xa8] sm:$0xff]  ;;  %406 = vst [vmem:[%s2521_s4 + $0x48] sm:$0xff] %v405_v9 }
  0x3a   : > { %408 = vst [vmem:[%s2521_s4 + $0x50] sm:$0xff] %v407_v10  ;;  %410 = vst [vmem:[%s2521_s4 + $0x58] sm:$0xff] %v409_v11  ;;  %v411_v12 = vld [vmem:[%s2516_s5 + $0xc0] sm:$0xff]  ;;  %v413_v13 = vld [vmem:[%s2516_s5 + $0xc8] sm:$0xff] }
  0x3b   : > { %v415_v14 = vld [vmem:[%s2516_s5 + $0xe0] sm:$0xff]  ;;  %412 = vst [vmem:[%s2521_s4 + $0x60] sm:$0xff] %v411_v12  ;;  %414 = vst [vmem:[%s2521_s4 + $0x68] sm:$0xff] %v413_v13  ;;  %v417_v15 = vld [vmem:[%s2516_s5 + $0xe8] sm:$0xff] }
  0x3c   : > { %416 = vst [vmem:[%s2521_s4 + $0x70] sm:$0xff] %v415_v14  ;;  %v419_v16 = vld [vmem:[%s2516_s5 + $0x100] sm:$0xff]  ;;  %v421_v17 = vld [vmem:[%s2516_s5 + $0x108] sm:$0xff]  ;;  %418 = vst [vmem:[%s2521_s4 + $0x78] sm:$0xff] %v417_v15 }
  0x3d   : > { %420 = vst [vmem:[%s2521_s4 + $0x80] sm:$0xff] %v419_v16  ;;  %422 = vst [vmem:[%s2521_s4 + $0x88] sm:$0xff] %v421_v17  ;;  %v423_v18 = vld [vmem:[%s2516_s5 + $0x120] sm:$0xff]  ;;  %v425_v19 = vld [vmem:[%s2516_s5 + $0x128] sm:$0xff] }
  0x3e   : > { %v427_v20 = vld [vmem:[%s2516_s5 + $0x140] sm:$0xff]  ;;  %424 = vst [vmem:[%s2521_s4 + $0x90] sm:$0xff] %v423_v18  ;;  %426 = vst [vmem:[%s2521_s4 + $0x98] sm:$0xff] %v425_v19  ;;  %v429_v21 = vld [vmem:[%s2516_s5 + $0x148] sm:$0xff] }
  0x3f   : > { %428 = vst [vmem:[%s2521_s4 + $0xa0] sm:$0xff] %v427_v20  ;;  %v431_v22 = vld [vmem:[%s2516_s5 + $0x160] sm:$0xff]  ;;  %v433_v23 = vld [vmem:[%s2516_s5 + $0x168] sm:$0xff]  ;;  %430 = vst [vmem:[%s2521_s4 + $0xa8] sm:$0xff] %v429_v21 }
  0x40   : > { %432 = vst [vmem:[%s2521_s4 + $0xb0] sm:$0xff] %v431_v22  ;;  %434 = vst [vmem:[%s2521_s4 + $0xb8] sm:$0xff] %v433_v23  ;;  %v435_v24 = vld [vmem:[%s2516_s5 + $0x180] sm:$0xff]  ;;  %v437_v25 = vld [vmem:[%s2516_s5 + $0x188] sm:$0xff] }
  0x41   : > { %v439_v26 = vld [vmem:[%s2516_s5 + $0x1a0] sm:$0xff]  ;;  %436 = vst [vmem:[%s2521_s4 + $0xc0] sm:$0xff] %v435_v24  ;;  %438 = vst [vmem:[%s2521_s4 + $0xc8] sm:$0xff] %v437_v25  ;;  %v441_v27 = vld [vmem:[%s2516_s5 + $0x1a8] sm:$0xff] }
  0x42   : > { %440 = vst [vmem:[%s2521_s4 + $0xd0] sm:$0xff] %v439_v26  ;;  %v443_v28 = vld [vmem:[%s2516_s5 + $0x1c0] sm:$0xff]  ;;  %v445_v29 = vld [vmem:[%s2516_s5 + $0x1c8] sm:$0xff]  ;;  %442 = vst [vmem:[%s2521_s4 + $0xd8] sm:$0xff] %v441_v27 }
  0x43   : > { %444 = vst [vmem:[%s2521_s4 + $0xe0] sm:$0xff] %v443_v28  ;;  %446 = vst [vmem:[%s2521_s4 + $0xe8] sm:$0xff] %v445_v29  ;;  %v447_v30 = vld [vmem:[%s2516_s5 + $0x1e0] sm:$0xff]  ;;  %v449_v31 = vld [vmem:[%s2516_s5 + $0x1e8] sm:$0xff] }
  0x44   : > { %448 = vst [vmem:[%s2521_s4 + $0xf0] sm:$0xff] %v447_v30  ;;  %450 = vst [vmem:[%s2521_s4 + $0xf8] sm:$0xff] %v449_v31 }
  0x45 PF: > { %p1772_p1 = scmp.ge.s32.totalorder %s2341_s24, 1  ;;  %p472_p2 = scmp.lt.s32.totalorder %s2341_s24, 9 }
  0x47   : > { %p473_p3 = pnand %p1772_p1, %p472_p2 }
  0x48   : > { %s479_s29 = sand.u32 (!%p473_p3), 1, %s2309_s16   ;;  %s3163_s12 = sand.u32 (!%p473_p3), 1, %s2301_s14  }
  0x49   : > { %476 = sbr.rel (%p473_p3) target bundleno = 1248 (0x4e0), region = 79  ;;  %s1773_s25 = sshll.u32 (!%p473_p3), %s479_s29, 8 }
  0x4a   : > { %s1774_s26 = sshll.u32 (!%p473_p3), %s3163_s12, 7  ;;  %s2591_s9 = sshll.u32 (!%p473_p3), %s2321_s19, 4 }
  0x4b   : > { %p544_p4 = scmp.lt.s32.totalorder (!%p473_p3), %s2325_s20, 1  ;;  %p546_p5 = scmp.lt.s32.totalorder (!%p473_p3), %s2591_s9, 31 }
  0x4c   : > { %s1781_s27 = sshll.u32 (!%p473_p3), %s2317_s18, 1  ;;  %s1782_s22 = sshll.u32 (!%p473_p3), %s2317_s18, 5 }
  0x4d   : > { %p565_p6 = scmp.lt.s32.totalorder (!%p473_p3), %s1781_s27, 3  ;;  %p570_p7 = scmp.lt.s32.totalorder (!%p473_p3), %s1782_s22, 63 }
  0x4e   : > { %s3186_s0 = sld [smem:[#allocation18_spill]] (!%p473_p3)  ;;  %s2620_s16 = scalar_lea.vmem (!%p473_p3), [#allocation4], %s1773_s25 }
  0x4f   : > { %p1784_p8 = scmp.ne.s32.totalorder (!%p473_p3), %s2317_s18, 0 }
  0x50   : > { %s545_s5 = scalar_select %p544_p4, %s2325_s20, 1 }
  0x51   : > { %s547_s4 = scalar_select %p546_p5, %s2591_s9, 31 }
  0x52   : > { %s1776_s6 = sshll.u32 %s545_s5, 5  ;;  %s3216_s27 = smov (!%p565_p6, %s1781_s27), 3  ;;  %v596_v32 = vld [vmem:[%s3147_s2] sm:$0xff] (!%p1784_p8)  ;;  %v597_v33 = vld [vmem:[%s3147_s2 + $0x8] sm:$0xff] (!%p1784_p8)  ;;  %v598_v34 = vld [vmem:[%s3147_s2 + $0x10] sm:$0xff] (!%p1784_p8) }
  0x53   : > { %s549_s23 = sadd.s32 %s1776_s6, %s547_s4  ;;  %s3218_s22 = smov (!%p570_p7, %s1782_s22), 63  ;;  %v1965_v35 = vpack.c.bf16 (!%p1784_p8), %v597_v33, %v596_v32  ;;  %v599_v36 = vld [vmem:[%s3147_s2 + $0x18] sm:$0xff] (!%p1784_p8)  ;;  %v600_v38 = vld [vmem:[%s3147_s2 + $0x20] sm:$0xff] (!%p1784_p8)  ;;  %v601_v39 = vld [vmem:[%s3147_s2 + $0x28] sm:$0xff] (!%p1784_p8) }
  0x54   : > { %s1777_s21 = sshll.u32 %s549_s23, 3  ;;  %s567_s6 = scalar_lea.vmem %s3152_s7, %s3216_s27  ;;  %v1969_v37 = vpack.c.bf16 (!%p1784_p8), %v599_v36, %v598_v34  ;;  %v1973_v40 = vpack.c.bf16 (!%p1784_p8), %v601_v39, %v600_v38  ;;  %v602_v43 = vld [vmem:[%s3147_s2 + $0x30] sm:$0xff] (!%p1784_p8)  ;;  %v603_v44 = vld [vmem:[%s3147_s2 + $0x38] sm:$0xff] (!%p1784_p8)  ;;  %v604_v46 = vld [vmem:[%s3147_s2 + $0x40] sm:$0xff] (!%p1784_p8) }
  0x55   : > { %s2602_s29 = scalar_lea.vmem %s3186_s0, %s1777_s21  ;;  %s2607_s17 = scalar_lea.vmem %s3146_s1, %s1777_s21  ;;  %1966 = vmatprep.subr.bf16.mxu0 (!%p1784_p8), %v1965_v35  ;;  %2061 = vmatprep.subr.bf16.mxu1 (!%p1784_p8), %v1965_v35  ;;  %v1977_v45 = vpack.c.bf16 (!%p1784_p8), %v603_v44, %v602_v43  ;;  %v605_v47 = vld [vmem:[%s3147_s2 + $0x48] sm:$0xff] (!%p1784_p8)  ;;  %v606_v49 = vld [vmem:[%s3147_s2 + $0x50] sm:$0xff] (!%p1784_p8)  ;;  %v607_v50 = vld [vmem:[%s3147_s2 + $0x58] sm:$0xff] (!%p1784_p8) }
  0x56   : > { %s1783_s23 = sshll.u32 %s3218_s22, 3  ;;  %s2622_s0 = scalar_lea.vmem [#allocation5], %s1774_s26  ;;  %1968 = vmatpush3.bf16.msra.mxu0 (!%p1784_p8), %v1965_v35  ;;  %2069 = vmatpush3.bf16.msra.mxu1 (!%p1784_p8), %v1965_v35  ;;  %v580_v41 = vld [vmem:[%s2607_s17] sm:$0xff] (!%p1784_p8)  ;;  %v1981_v48 = vpack.c.bf16 (!%p1784_p8), %v605_v47, %v604_v46  ;;  %v1985_v51 = vpack.c.bf16 (!%p1784_p8), %v607_v50, %v606_v49  ;;  %v609_v53 = vld [vmem:[%s3147_s2 + $0x68] sm:$0xff] (!%p1784_p8)  ;;  %v610_v55 = vld [vmem:[%s3147_s2 + $0x70] sm:$0xff] (!%p1784_p8) }
  0x57   : > { %s2618_s10 = scalar_lea.vmem %s3153_s8, %s1783_s23  ;;  %579 = sbr.rel (%p1784_p8) target bundleno = 678 (0x2a6), region = 87  ;;  %1970 = vmatprep.subr.bf16.mxu0 (!%p1784_p8), %v1969_v37  ;;  %2062 = vmatprep.subr.bf16.mxu1 (!%p1784_p8), %v1969_v37  ;;  %v588_v42 = vld [vmem:[%s2607_s17 + $0x40] sm:$0xff] (!%p1784_p8)  ;;  %v611_v56 = vld [vmem:[%s3147_s2 + $0x78] sm:$0xff] (!%p1784_p8)  ;;  %v581_v58 = vld [vmem:[%s2607_s17 + $0x8] sm:$0xff] (!%p1784_p8) }
  0x58   : > { %1941 = vmatprep.mubr.f32.mxu0 (!%p1784_p8), %v580_v41  ;;  %1953 = vmatprep.mubr.f32.mxu1 (!%p1784_p8), %v588_v42  ;;  %v608_v52 = vld [vmem:[%s3147_s2 + $0x60] sm:$0xff] (!%p1784_p8)  ;;  %v1993_v57 = vpack.c.bf16 (!%p1784_p8), %v611_v56, %v610_v55  ;;  %v589_v59 = vld [vmem:[%s2607_s17 + $0x48] sm:$0xff] (!%p1784_p8)  ;;  %v582_v60 = vld [vmem:[%s2607_s17 + $0x10] sm:$0xff] (!%p1784_p8)  ;;  %s3187_s12 = sld [smem:[#allocation19_spill]] (!%p1784_p8)  ;;  %s3188_s15 = sld [smem:[#allocation20_spill]] (!%p1784_p8) }
  0x59   : > { %v1989_v54 = vpack.c.bf16 (!%p1784_p8), %v609_v53, %v608_v52  ;;  %v590_v61 = vld [vmem:[%s2607_s17 + $0x50] sm:$0xff] (!%p1784_p8)  ;;  %v583_v62 = vld [vmem:[%s2607_s17 + $0x18] sm:$0xff] (!%p1784_p8)  ;;  %v584_v0 = vld [vmem:[%s2607_s17 + $0x20] sm:$0xff] (!%p1784_p8) }
  0x5a   : > { %1972 = vmatpush3.bf16.msra.mxu0 (!%p1784_p8), %v1969_v37  ;;  %2070 = vmatpush3.bf16.msra.mxu1 (!%p1784_p8), %v1969_v37  ;;  %v591_v63 = vld [vmem:[%s2607_s17 + $0x58] sm:$0xff] (!%p1784_p8)  ;;  %v592_v1 = vld [vmem:[%s2607_s17 + $0x60] sm:$0xff] (!%p1784_p8)  ;;  %v585_v2 = vld [vmem:[%s2607_s17 + $0x28] sm:$0xff] (!%p1784_p8) }
  0x5b   : > { %1974 = vmatprep.subr.bf16.mxu0 (!%p1784_p8), %v1973_v40  ;;  %2063 = vmatprep.subr.bf16.mxu1 (!%p1784_p8), %v1973_v40  ;;  %v593_v3 = vld [vmem:[%s2607_s17 + $0x68] sm:$0xff] (!%p1784_p8)  ;;  %v586_v4 = vld [vmem:[%s2607_s17 + $0x30] sm:$0xff] (!%p1784_p8)  ;;  %v587_v6 = vld [vmem:[%s2607_s17 + $0x38] sm:$0xff] (!%p1784_p8) }
  0x5c   : > { %v594_v5 = vld [vmem:[%s2607_s17 + $0x70] sm:$0xff] (!%p1784_p8)  ;;  %v595_v7 = vld [vmem:[%s2607_s17 + $0x78] sm:$0xff] (!%p1784_p8)  ;;  %v758_v8 = vld [vmem:[%s2602_s29 + $0x8] sm:$0xff] (!%p1784_p8) }
  0x5d   : > { %v766_v9 = vld [vmem:[%s2602_s29 + $0x48] sm:$0xff] (!%p1784_p8)  ;;  %v757_v10 = vld [vmem:[%s2602_s29] sm:$0xff] (!%p1784_p8)  ;;  %v760_v21 = vld [vmem:[%s2602_s29 + $0x18] sm:$0xff] (!%p1784_p8) }
  0x5e   : > { %1976 = vmatpush3.bf16.msra.mxu0 %v1973_v40  ;;  %2071 = vmatpush3.bf16.msra.mxu1 %v1973_v40  ;;  %v765_v11 = vld [vmem:[%s2602_s29 + $0x40] sm:$0xff]  ;;  %v768_v22 = vld [vmem:[%s2602_s29 + $0x58] sm:$0xff]  ;;  %v759_v25 = vld [vmem:[%s2602_s29 + $0x10] sm:$0xff] }
  0x5f   : > { %1978 = vmatprep.subr.bf16.mxu0 %v1977_v45  ;;  %2064 = vmatprep.subr.bf16.mxu1 %v1977_v45  ;;  %v2696_v13 = vld [vmem:[%s3148_s3] ss:$0 sm:$0xff]  ;;  %v767_v26 = vld [vmem:[%s2602_s29 + $0x50] sm:$0xff]  ;;  %v762_v37 = vld [vmem:[%s2602_s29 + $0x28] sm:$0xff] }
  0x60   : > { %v770_v38 = vld [vmem:[%s2602_s29 + $0x68] sm:$0xff]  ;;  %v761_v41 = vld [vmem:[%s2602_s29 + $0x20] sm:$0xff]  ;;  %v764_v53 = vld [vmem:[%s2602_s29 + $0x38] sm:$0xff] }
  0x61   : > { %v769_v42 = vld [vmem:[%s2602_s29 + $0x60] sm:$0xff] }
  0x62   : > { %1980 = vmatpush3.bf16.msra.mxu0 %v1977_v45  ;;  %2072 = vmatpush3.bf16.msra.mxu1 %v1977_v45 }
  0x63   : > { %1982 = vmatprep.subr.bf16.mxu0 %v1981_v48  ;;  %2065 = vmatprep.subr.bf16.mxu1 %v1981_v48 }
  0x66   : > { %1984 = vmatpush3.bf16.msra.mxu0 %v1981_v48  ;;  %2073 = vmatpush3.bf16.msra.mxu1 %v1981_v48 }
  0x67   : > { %1986 = vmatprep.subr.bf16.mxu0 %v1985_v51  ;;  %2066 = vmatprep.subr.bf16.mxu1 %v1985_v51 }
  0x6a   : > { %1988 = vmatpush3.bf16.msra.mxu0 %v1985_v51  ;;  %2074 = vmatpush3.bf16.msra.mxu1 %v1985_v51 }
  0x6b   : > { %1990 = vmatprep.subr.bf16.mxu0 %v1989_v54  ;;  %2067 = vmatprep.subr.bf16.mxu1 %v1989_v54 }
  0x6e   : > { %1992 = vmatpush3.bf16.msra.mxu0 %v1989_v54  ;;  %2075 = vmatpush3.bf16.msra.mxu1 %v1989_v54  ;;  %v772_v54 = vld [vmem:[%s2602_s29 + $0x78] sm:$0xff] }
  0x6f   : > { %1994 = vmatprep.subr.bf16.mxu0 %v1993_v57  ;;  %2068 = vmatprep.subr.bf16.mxu1 %v1993_v57 }
  0x72   : > { %1996 = vmatpush3.bf16.msra.mxu0 %v1993_v57  ;;  %2076 = vmatpush3.bf16.msra.mxu1 %v1993_v57  ;;  %v763_v57 = vld [vmem:[%s2602_s29 + $0x30] sm:$0xff] }
  0x75   : > { %1942 = vmatmul.mubr.f32.vlgmr.msra.gmra.mrb[0].mxu0 %v581_v58  ;;  %1954 = vmatmul.mubr.f32.vlgmr.msra.gmra.mrb[0].mxu1 %v589_v59  ;;  %v771_v58 = vld [vmem:[%s2602_s29 + $0x70] sm:$0xff] }
  0x76   : > { %1944 = vmatprep.mubr.f32.mxu0 %v582_v60  ;;  %1956 = vmatprep.mubr.f32.mxu1 %v590_v61 }
  0x79   : > { %1945 = vmatmul.mubr.f32.gmra.mrb[2].mxu0 %v583_v62  ;;  %1957 = vmatmul.mubr.f32.gmra.mrb[2].mxu1 %v591_v63 }
  0x7a   : > { %1947 = vmatprep.mubr.f32.mxu0 %v584_v0  ;;  %1959 = vmatprep.mubr.f32.mxu1 %v592_v1 }
  0x7d   : > { %1948 = vmatmul.mubr.f32.gmra.mrb[4].mxu0 %v585_v2  ;;  %1960 = vmatmul.mubr.f32.gmra.mrb[4].mxu1 %v593_v3 }
  0x7e   : > { %1950 = vmatprep.mubr.f32.mxu0 %v586_v4  ;;  %1962 = vmatprep.mubr.f32.mxu1 %v594_v5 }
  0x81   : > { %1951 = vmatmul.mubr.f32.gmra.mrb[6].mxu0 %v587_v6  ;;  %1963 = vmatmul.mubr.f32.gmra.mrb[6].mxu1 %v595_v7 }
 0x148   : > { %v1943_v12 = vpop.f32.mrb[0].mxu0  ;;  %v1955_v14 = vpop.f32.mrb[0].mxu1 }
 0x149   : > { %v774_v15 = vadd.f32 %v1943_v12, %v758_v8  ;;  %v782_v16 = vadd.f32 %v1955_v14, %v766_v9  ;;  %v678_v17 = vpop.f32.mrb[1].mxu0  ;;  %v718_v18 = vpop.f32.mrb[1].mxu1 }
 0x14a   : > { %v773_v19 = vadd.f32 %v757_v10, %v678_v17  ;;  %v781_v20 = vadd.f32 %v765_v11, %v718_v18 }
 0x14b   : > { %v2701_v23 = vadd.f32 %v2696_v13, %v774_v15  ;;  %v2704_v24 = vadd.f32 %v2696_v13, %v782_v16 }
 0x14c   : > { %v2709_v27 = vadd.f32 %v2696_v13, %v773_v19  ;;  %v2712_v28 = vadd.f32 %v2696_v13, %v781_v20  ;;  %v1946_v29 = vpop.f32.mrb[2].mxu0  ;;  %v1958_v30 = vpop.f32.mrb[2].mxu1 }
 0x14d   : > { %813 = vst [vmem:[#allocation2 + $0x8] sm:$0xff] %v2701_v23  ;;  %821 = vst [vmem:[#allocation2 + $0x48] sm:$0xff] %v2704_v24  ;;  %v776_v31 = vadd.f32 %v1946_v29, %v760_v21  ;;  %848 = vadd.xlane.f32.xlu1 %v2704_v24  ;;  %832 = vadd.xlane.f32.xlu0 %v2701_v23  ;;  %v688_v32 = vpop.f32.mrb[3].mxu0  ;;  %v784_v33 = vadd.f32 %v1958_v30, %v768_v22  ;;  %v728_v34 = vpop.f32.mrb[3].mxu1 }
 0x14e   : > { %812 = vst [vmem:[#allocation2] sm:$0xff] %v2709_v27  ;;  %820 = vst [vmem:[#allocation2 + $0x40] sm:$0xff] %v2712_v28  ;;  %v775_v35 = vadd.f32 %v759_v25, %v688_v32  ;;  %v783_v36 = vadd.f32 %v767_v26, %v728_v34 }
 0x14f   : > { %v2723_v39 = vadd.f32 %v2696_v13, %v776_v31  ;;  %v2726_v40 = vadd.f32 %v2696_v13, %v784_v33 }
 0x150   : > { %v2731_v43 = vadd.f32 %v2696_v13, %v775_v35  ;;  %v2734_v44 = vadd.f32 %v2696_v13, %v783_v36  ;;  %v1949_v45 = vpop.f32.mrb[4].mxu0  ;;  %v1961_v46 = vpop.f32.mrb[4].mxu1 }
 0x151   : > { %815 = vst [vmem:[#allocation2 + $0x18] sm:$0xff] %v2723_v39  ;;  %823 = vst [vmem:[#allocation2 + $0x58] sm:$0xff] %v2726_v40  ;;  %830 = vadd.xlane.f32.xlu0 %v2709_v27  ;;  %836 = vadd.xlane.f32.xlu1 %v2723_v39  ;;  %v778_v47 = vadd.f32 %v1949_v45, %v762_v37  ;;  %v698_v48 = vpop.f32.mrb[5].mxu0  ;;  %v786_v49 = vadd.f32 %v1961_v46, %v770_v38  ;;  %v738_v50 = vpop.f32.mrb[5].mxu1 }
 0x152   : > { %814 = vst [vmem:[#allocation2 + $0x10] sm:$0xff] %v2731_v43  ;;  %822 = vst [vmem:[#allocation2 + $0x50] sm:$0xff] %v2734_v44  ;;  %v777_v51 = vadd.f32 %v761_v41, %v698_v48  ;;  %v785_v52 = vadd.f32 %v769_v42, %v738_v50 }
 0x153   : > { %v2745_v55 = vadd.f32 %v2696_v13, %v778_v47  ;;  %v2748_v56 = vadd.f32 %v2696_v13, %v786_v49 }
 0x154   : > { %v2753_v59 = vadd.f32 %v2696_v13, %v777_v51  ;;  %v2756_v60 = vadd.f32 %v2696_v13, %v785_v52  ;;  %v1952_v61 = vpop.f32.mrb[6].mxu0  ;;  %v1964_v62 = vpop.f32.mrb[6].mxu1 }
 0x155   : > { %846 = vadd.xlane.f32.xlu0 %v2712_v28  ;;  %852 = vadd.xlane.f32.xlu1 %v2726_v40  ;;  %817 = vst [vmem:[#allocation2 + $0x28] sm:$0xff] %v2745_v55  ;;  %825 = vst [vmem:[#allocation2 + $0x68] sm:$0xff] %v2748_v56  ;;  %v780_v63 = vadd.f32 %v1952_v61, %v764_v53  ;;  %v708_v0 = vpop.f32.mrb[7].mxu0  ;;  %v788_v1 = vadd.f32 %v1964_v62, %v772_v54  ;;  %v748_v2 = vpop.f32.mrb[7].mxu1 }
 0x156   : > { %816 = vst [vmem:[#allocation2 + $0x20] sm:$0xff] %v2753_v59  ;;  %824 = vst [vmem:[#allocation2 + $0x60] sm:$0xff] %v2756_v60  ;;  %v779_v3 = vadd.f32 %v763_v57, %v708_v0  ;;  %v787_v4 = vadd.f32 %v771_v58, %v748_v2 }
 0x157   : > { %v2765_v5 = vadd.f32 %v2696_v13, %v780_v63  ;;  %v2768_v6 = vadd.f32 %v2696_v13, %v788_v1 }
 0x158   : > { %v2771_v7 = vadd.f32 %v2696_v13, %v779_v3  ;;  %v2774_v8 = vadd.f32 %v2696_v13, %v787_v4 }
 0x159   : > { %850 = vadd.xlane.f32.xlu0 %v2734_v44  ;;  %834 = vadd.xlane.f32.xlu1 %v2731_v43  ;;  %819 = vst [vmem:[#allocation2 + $0x38] sm:$0xff] %v2765_v5  ;;  %827 = vst [vmem:[#allocation2 + $0x78] sm:$0xff] %v2768_v6 }
 0x15a   : > { %818 = vst [vmem:[#allocation2 + $0x30] sm:$0xff] %v2771_v7  ;;  %826 = vst [vmem:[#allocation2 + $0x70] sm:$0xff] %v2774_v8 }
 0x15d   : > { %840 = vadd.xlane.f32.xlu1 %v2745_v55  ;;  %838 = vadd.xlane.f32.xlu0 %v2753_v59 }
 0x161   : > { %856 = vadd.xlane.f32.xlu1 %v2748_v56  ;;  %854 = vadd.xlane.f32.xlu0 %v2756_v60 }
 0x165   : > { %844 = vadd.xlane.f32.xlu1 %v2765_v5  ;;  %842 = vadd.xlane.f32.xlu0 %v2771_v7 }
 0x169   : > { %860 = vadd.xlane.f32.xlu1 %v2768_v6  ;;  %858 = vadd.xlane.f32.xlu0 %v2774_v8 }
 0x1da   : > { %v849_v9 = vpop.xlane.xlu1 %848  ;;  %v833_v10 = vpop.xlane.xlu0 %832 }
 0x1db   : > { %v872_v11 = vmul.f32 0.0078125, %v849_v9  ;;  %v864_v12 = vmul.f32 0.0078125, %v833_v10 }
 0x1dd   : > { %v2791_v13 = vsub.f32 %v2701_v23, %v864_v12  ;;  %v2794_v16 = vsub.f32 %v2704_v24, %v872_v11 }
 0x1de   : > { %v831_v14 = vpop.xlane.xlu0 %830  ;;  %v837_v15 = vpop.xlane.xlu1 %836 }
 0x1df   : > { %v863_v17 = vmul.f32 0.0078125, %v831_v14  ;;  %v866_v18 = vmul.f32 0.0078125, %v837_v15  ;;  %v896_v19 = vmul.f32 %v2791_v13, %v2791_v13  ;;  %v904_v24 = vmul.f32 %v2794_v16, %v2794_v16 }
 0x1e1   : > { %v2799_v20 = vsub.f32 %v2709_v27, %v863_v17  ;;  %913 = vadd.xlane.f32.xlu1 %v896_v19  ;;  %v2802_v21 = vsub.f32 %v2723_v39, %v866_v18 }
 0x1e2   : > { %v847_v22 = vpop.xlane.xlu0 %846  ;;  %v853_v23 = vpop.xlane.xlu1 %852 }
 0x1e3   : > { %v871_v25 = vmul.f32 0.0078125, %v847_v22  ;;  %v874_v26 = vmul.f32 0.0078125, %v853_v23  ;;  %v895_v29 = vmul.f32 %v2799_v20, %v2799_v20  ;;  %v898_v32 = vmul.f32 %v2802_v21, %v2802_v21 }
 0x1e5   : > { %v2809_v30 = vsub.f32 %v2712_v28, %v871_v25  ;;  %929 = vadd.xlane.f32.xlu1 %v904_v24  ;;  %911 = vadd.xlane.f32.xlu0 %v895_v29  ;;  %v2814_v33 = vsub.f32 %v2726_v40, %v874_v26 }
 0x1e6   : > { %v851_v27 = vpop.xlane.xlu0 %850  ;;  %v835_v31 = vpop.xlane.xlu1 %834 }
 0x1e7   : > { %v873_v34 = vmul.f32 0.0078125, %v851_v27  ;;  %v865_v35 = vmul.f32 0.0078125, %v835_v31  ;;  %v903_v36 = vmul.f32 %v2809_v30, %v2809_v30  ;;  %v906_v40 = vmul.f32 %v2814_v33, %v2814_v33 }
 0x1e9   : > { %v2819_v37 = vsub.f32 %v2731_v43, %v865_v35  ;;  %917 = vadd.xlane.f32.xlu1 %v898_v32  ;;  %927 = vadd.xlane.f32.xlu0 %v903_v36  ;;  %v2822_v28 = vsub.f32 %v2734_v44, %v873_v34  ;;  %v2873_v36 = vld [vmem:[%s3187_s12] ss:$0 sm:$0xff] }
 0x1ea   : > { %v841_v38 = vpop.xlane.xlu1 %840  ;;  %v839_v39 = vpop.xlane.xlu0 %838 }
 0x1eb   : > { %v868_v41 = vmul.f32 0.0078125, %v841_v38  ;;  %v867_v42 = vmul.f32 0.0078125, %v839_v39  ;;  %v897_v45 = vmul.f32 %v2819_v37, %v2819_v37  ;;  %v905_v44 = vmul.f32 %v2822_v28, %v2822_v28 }
 0x1ed   : > { %v2829_v46 = vsub.f32 %v2745_v55, %v868_v41  ;;  %933 = vadd.xlane.f32.xlu1 %v906_v40  ;;  %915 = vadd.xlane.f32.xlu0 %v897_v45  ;;  %v2834_v48 = vsub.f32 %v2753_v59, %v867_v42  ;;  %v2879_v45 = vld [vmem:[%s3188_s15] ss:$0 sm:$0xff] }
 0x1ee   : > { %v857_v43 = vpop.xlane.xlu1 %856  ;;  %v855_v47 = vpop.xlane.xlu0 %854 }
 0x1ef   : > { %v876_v49 = vmul.f32 0.0078125, %v857_v43  ;;  %v875_v50 = vmul.f32 0.0078125, %v855_v47  ;;  %v900_v51 = vmul.f32 %v2829_v46, %v2829_v46  ;;  %v899_v61 = vmul.f32 %v2834_v48, %v2834_v48 }
 0x1f1   : > { %v2839_v52 = vsub.f32 %v2748_v56, %v876_v49  ;;  %921 = vadd.xlane.f32.xlu1 %v900_v51  ;;  %931 = vadd.xlane.f32.xlu0 %v905_v44  ;;  %v2842_v53 = vsub.f32 %v2756_v60, %v875_v50 }
 0x1f2   : > { %v845_v54 = vpop.xlane.xlu1 %844  ;;  %v843_v55 = vpop.xlane.xlu0 %842 }
 0x1f3   : > { %v870_v57 = vmul.f32 0.0078125, %v845_v54  ;;  %v869_v58 = vmul.f32 0.0078125, %v843_v55  ;;  %v908_v59 = vmul.f32 %v2839_v52, %v2839_v52  ;;  %v907_v60 = vmul.f32 %v2842_v53, %v2842_v53 }
 0x1f5   : > { %v2849_v62 = vsub.f32 %v2765_v5, %v870_v57  ;;  %937 = vadd.xlane.f32.xlu1 %v908_v59  ;;  %919 = vadd.xlane.f32.xlu0 %v899_v61  ;;  %v2854_v0 = vsub.f32 %v2771_v7, %v869_v58 }
 0x1f6   : > { %v861_v56 = vpop.xlane.xlu1 %860  ;;  %v859_v63 = vpop.xlane.xlu0 %858 }
 0x1f7   : > { %v878_v1 = vmul.f32 0.0078125, %v861_v56  ;;  %v877_v2 = vmul.f32 0.0078125, %v859_v63  ;;  %v902_v3 = vmul.f32 %v2849_v62, %v2849_v62  ;;  %v901_v7 = vmul.f32 %v2854_v0, %v2854_v0 }
 0x1f9   : > { %v2859_v4 = vsub.f32 %v2768_v6, %v878_v1  ;;  %925 = vadd.xlane.f32.xlu1 %v902_v3  ;;  %935 = vadd.xlane.f32.xlu0 %v907_v60  ;;  %v2862_v5 = vsub.f32 %v2774_v8, %v877_v2 }
 0x1fb   : > { %v910_v9 = vmul.f32 %v2859_v4, %v2859_v4  ;;  %v909_v10 = vmul.f32 %v2862_v5, %v2862_v5 }
 0x1fd   : > { %941 = vadd.xlane.f32.xlu1 %v910_v9  ;;  %923 = vadd.xlane.f32.xlu0 %v901_v7 }
 0x201   : > { %939 = vadd.xlane.f32.xlu0 %v909_v10 }
 0x26e   : > { %v914_v11 = vpop.xlane.xlu1 %913 }
 0x26f   : > { %v944_v6 = vmul.f32 0.0078125, %v914_v11 }
 0x271   : > { %v960_v12 = vadd.f32 1e-05, %v944_v6 }
 0x272   : > { %v930_v14 = vpop.xlane.xlu1 %929  ;;  %v912_v15 = vpop.xlane.xlu0 %911 }
 0x273   : > { %2183 = vrsqrt.f32 %v960_v12  ;;  %v952_v8 = vmul.f32 0.0078125, %v930_v14  ;;  %v943_v17 = vmul.f32 0.0078125, %v912_v15 }
 0x275   : > { %v968_v18 = vadd.f32 1e-05, %v952_v8  ;;  %v959_v19 = vadd.f32 1e-05, %v943_v17 }
 0x276   : > { %v918_v22 = vpop.xlane.xlu1 %917  ;;  %v928_v23 = vpop.xlane.xlu0 %927 }
 0x277   : > { %2185 = vrsqrt.f32 %v968_v18  ;;  %v946_v25 = vmul.f32 0.0078125, %v918_v22  ;;  %v951_v26 = vmul.f32 0.0078125, %v928_v23 }
 0x278   : > { %2187 = vrsqrt.f32 %v959_v19 }
 0x279   : > { %v962_v24 = vadd.f32 1e-05, %v946_v25  ;;  %v967_v29 = vadd.f32 1e-05, %v951_v26 }
 0x27a   : > { %v934_v27 = vpop.xlane.xlu1 %933  ;;  %v916_v31 = vpop.xlane.xlu0 %915 }
 0x27b   : > { %2189 = vrsqrt.f32 %v962_v24  ;;  %v954_v32 = vmul.f32 0.0078125, %v934_v27  ;;  %v945_v34 = vmul.f32 0.0078125, %v916_v31 }
 0x27c   : > { %2191 = vrsqrt.f32 %v967_v29 }
 0x27d   : > { %v2184_v35 = vpop.eup %2183  ;;  %v970_v38 = vadd.f32 1e-05, %v954_v32  ;;  %v961_v39 = vadd.f32 1e-05, %v945_v34 }
 0x27e   : > { %v992_v41 = vmul.f32 %v2184_v35, %v2791_v13  ;;  %v922_v42 = vpop.xlane.xlu1 %921  ;;  %v932_v40 = vpop.xlane.xlu0 %931 }
 0x27f   : > { %2193 = vrsqrt.f32 %v970_v38  ;;  %v948_v43 = vmul.f32 0.0078125, %v922_v42  ;;  %v953_v47 = vmul.f32 0.0078125, %v932_v40 }
 0x280   : > { %v1014_v44 = vmul.f32 %v2873_v36, %v992_v41  ;;  %2195 = vrsqrt.f32 %v961_v39 }
 0x281   : > { %v2186_v49 = vpop.eup %2185  ;;  %v964_v50 = vadd.f32 1e-05, %v948_v43  ;;  %v969_v51 = vadd.f32 1e-05, %v953_v47 }
 0x282   : > { %v2188_v54 = vpop.eup %2187  ;;  %v1036_v55 = vadd.f32 %v2879_v45, %v1014_v44  ;;  %v1000_v13 = vmul.f32 %v2186_v49, %v2794_v16  ;;  %v938_v57 = vpop.xlane.xlu1 %937 }
 0x283   : > { %v920_v58 = vpop.xlane.xlu0 %919  ;;  %v991_v59 = vmul.f32 %v2188_v54, %v2799_v20  ;;  %2197 = vrsqrt.f32 %v964_v50  ;;  %v956_v61 = vmul.f32 0.0078125, %v938_v57 }
 0x284   : > { %v947_v56 = vmul.f32 0.0078125, %v920_v58  ;;  %1052 = vst [vmem:[#allocation3 + $0x8] sm:$0xff] %v1036_v55  ;;  %v1022_v63 = vmul.f32 %v2873_v36, %v1000_v13  ;;  %2199 = vrsqrt.f32 %v969_v51 }
 0x285   : > { %v2190_v60 = vpop.eup %2189  ;;  %v1013_v1 = vmul.f32 %v2873_v36, %v991_v59  ;;  %v972_v2 = vadd.f32 1e-05, %v956_v61 }
 0x286   : > { %v963_v3 = vadd.f32 1e-05, %v947_v56  ;;  %v2192_v9 = vpop.eup %2191  ;;  %v1044_v7 = vadd.f32 %v2879_v45, %v1022_v63  ;;  %v994_v16 = vmul.f32 %v2190_v60, %v2802_v21  ;;  %v926_v10 = vpop.xlane.xlu1 %925 }
 0x287   : > { %v936_v11 = vpop.xlane.xlu0 %935  ;;  %v1035_v20 = vadd.f32 %v2879_v45, %v1013_v1  ;;  %v999_v6 = vmul.f32 %v2192_v9, %v2809_v30  ;;  %2201 = vrsqrt.f32 %v972_v2  ;;  %v950_v12 = vmul.f32 0.0078125, %v926_v10 }
 0x288   : > { %1060 = vst [vmem:[#allocation3 + $0x48] sm:$0xff] %v1044_v7  ;;  %v1016_v14 = vmul.f32 %v2873_v36, %v994_v16  ;;  %2203 = vrsqrt.f32 %v963_v3  ;;  %v955_v15 = vmul.f32 0.0078125, %v936_v11 }
 0x289   : > { %v2194_v8 = vpop.eup %2193  ;;  %1051 = vst [vmem:[#allocation3] sm:$0xff] %v1035_v20  ;;  %v1021_v17 = vmul.f32 %v2873_v36, %v999_v6  ;;  %v966_v18 = vadd.f32 1e-05, %v950_v12 }
 0x28a   : > { %v2196_v19 = vpop.eup %2195  ;;  %v1038_v21 = vadd.f32 %v2879_v45, %v1016_v14  ;;  %v1002_v22 = vmul.f32 %v2194_v8, %v2814_v33  ;;  %v971_v23 = vadd.f32 1e-05, %v955_v15  ;;  %v942_v25 = vpop.xlane.xlu1 %941 }
 0x28b   : > { %v924_v30 = vpop.xlane.xlu0 %923  ;;  %v1043_v26 = vadd.f32 %v2879_v45, %v1021_v17  ;;  %v993_v24 = vmul.f32 %v2196_v19, %v2819_v37  ;;  %2205 = vrsqrt.f32 %v966_v18  ;;  %v958_v29 = vmul.f32 0.0078125, %v942_v25 }
 0x28c   : > { %1054 = vst [vmem:[#allocation3 + $0x18] sm:$0xff] %v1038_v21  ;;  %v1024_v27 = vmul.f32 %v2873_v36, %v1002_v22  ;;  %2207 = vrsqrt.f32 %v971_v23  ;;  %v949_v31 = vmul.f32 0.0078125, %v924_v30 }
 0x28d   : > { %v2198_v32 = vpop.eup %2197  ;;  %1059 = vst [vmem:[#allocation3 + $0x40] sm:$0xff] %v1043_v26  ;;  %v1015_v34 = vmul.f32 %v2873_v36, %v993_v24  ;;  %v974_v35 = vadd.f32 1e-05, %v958_v29 }
 0x28e   : > { %v2200_v33 = vpop.eup %2199  ;;  %v1046_v38 = vadd.f32 %v2879_v45, %v1024_v27  ;;  %v996_v39 = vmul.f32 %v2198_v32, %v2829_v46  ;;  %v965_v41 = vadd.f32 1e-05, %v949_v31 }
 0x28f   : > { %v940_v42 = vpop.xlane.xlu0 %939  ;;  %v1037_v37 = vadd.f32 %v2879_v45, %v1015_v34  ;;  %v1001_v40 = vmul.f32 %v2200_v33, %v2822_v28  ;;  %2209 = vrsqrt.f32 %v974_v35 }
 0x290   : > { %v957_v43 = vmul.f32 0.0078125, %v940_v42  ;;  %1062 = vst [vmem:[#allocation3 + $0x58] sm:$0xff] %v1046_v38  ;;  %v1018_v47 = vmul.f32 %v2873_v36, %v996_v39  ;;  %2211 = vrsqrt.f32 %v965_v41 }
 0x291   : > { %v2202_v44 = vpop.eup %2201  ;;  %1053 = vst [vmem:[#allocation3 + $0x10] sm:$0xff] %v1037_v37  ;;  %v1023_v49 = vmul.f32 %v2873_v36, %v1001_v40 }
 0x292   : > { %v973_v50 = vadd.f32 1e-05, %v957_v43  ;;  %v2204_v51 = vpop.eup %2203  ;;  %v1040_v46 = vadd.f32 %v2879_v45, %v1018_v47  ;;  %v1004_v54 = vmul.f32 %v2202_v44, %v2839_v52 }
 0x293   : > { %v1045_v55 = vadd.f32 %v2879_v45, %v1023_v49  ;;  %v995_v28 = vmul.f32 %v2204_v51, %v2834_v48 }
 0x294   : > { %2213 = vrsqrt.f32 %v973_v50  ;;  %1056 = vst [vmem:[#allocation3 + $0x28] sm:$0xff] %v1040_v46  ;;  %v1026_v13 = vmul.f32 %v2873_v36, %v1004_v54 }
 0x295   : > { %v2206_v57 = vpop.eup %2205  ;;  %1061 = vst [vmem:[#allocation3 + $0x50] sm:$0xff] %v1045_v55  ;;  %v1017_v58 = vmul.f32 %v2873_v36, %v995_v28 }
 0x296   : > { %v2208_v59 = vpop.eup %2207  ;;  %v1048_v61 = vadd.f32 %v2879_v45, %v1026_v13  ;;  %v998_v56 = vmul.f32 %v2206_v57, %v2849_v62 }
 0x297   : > { %v1039_v63 = vadd.f32 %v2879_v45, %v1017_v58  ;;  %v1003_v52 = vmul.f32 %v2208_v59, %v2842_v53 }
 0x298   : > { %1064 = vst [vmem:[#allocation3 + $0x68] sm:$0xff] %v1048_v61  ;;  %v1020_v48 = vmul.f32 %v2873_v36, %v998_v56 }
 0x299   : > { %v2210_v60 = vpop.eup %2209  ;;  %1055 = vst [vmem:[#allocation3 + $0x20] sm:$0xff] %v1039_v63  ;;  %v1025_v1 = vmul.f32 %v2873_v36, %v1003_v52 }
 0x29a   : > { %v2212_v2 = vpop.eup %2211  ;;  %v1042_v3 = vadd.f32 %v2879_v45, %v1020_v48  ;;  %v1006_v9 = vmul.f32 %v2210_v60, %v2859_v4 }
 0x29b   : > { %v1047_v7 = vadd.f32 %v2879_v45, %v1025_v1  ;;  %v997_v62 = vmul.f32 %v2212_v2, %v2854_v0 }
 0x29c   : > { %1058 = vst [vmem:[#allocation3 + $0x38] sm:$0xff] %v1042_v3  ;;  %v1028_v16 = vmul.f32 %v2873_v36, %v1006_v9 }
 0x29d   : > { %1063 = vst [vmem:[#allocation3 + $0x60] sm:$0xff] %v1047_v7  ;;  %v1019_v10 = vmul.f32 %v2873_v36, %v997_v62 }
 0x29e   : > { %v2214_v53 = vpop.eup %2213  ;;  %v1050_v11 = vadd.f32 %v2879_v45, %v1028_v16 }
 0x29f   : > { %v1005_v20 = vmul.f32 %v2214_v53, %v2862_v5  ;;  %v1041_v6 = vadd.f32 %v2879_v45, %v1019_v10 }
 0x2a0   : > { %1066 = vst [vmem:[#allocation3 + $0x78] sm:$0xff] %v1050_v11 }
 0x2a1   : > { %v1027_v4 = vmul.f32 %v2873_v36, %v1005_v20  ;;  %1057 = vst [vmem:[#allocation3 + $0x30] sm:$0xff] %v1041_v6 }
 0x2a3   : > { %v1049_v12 = vadd.f32 %v2879_v45, %v1027_v4 }
 0x2a5   : > { %1065 = vst [vmem:[#allocation3 + $0x70] sm:$0xff] %v1049_v12 }
 0x2a6 PF: > { %v1084_v0 = vld [vmem:[%s2620_s16 + $0x8] sm:$0xff]  ;;  %v1086_v5 = vld [vmem:[%s2620_s16 + $0x18] sm:$0xff]  ;;  %v1083_v14 = vld [vmem:[%s2620_s16] sm:$0xff]  ;;  %v2343_v17 = vmov 0.0   ;;  %p1788_p10 = scmp.ne.s32.totalorder %s2317_s18, 1 }
 0x2a7   : > { %v1997_v15 = vpack.c.bf16 %v1086_v5, %v1084_v0  ;;  %v1085_v36 = vld [vmem:[%s2620_s16 + $0x10] sm:$0xff]  ;;  %v1088_v8 = vld [vmem:[%s2620_s16 + $0x28] sm:$0xff]  ;;  %v1090_v45 = vld [vmem:[%s2620_s16 + $0x38] sm:$0xff]  ;;  %1191 = vmatprep.mubr.f32.mxu0 %v2343_v17 }
 0x2a8   : > { %v1999_v18 = vpack.c.bf16 %v1085_v36, %v1083_v14  ;;  %v2001_v19 = vpack.c.bf16 %v1090_v45, %v1088_v8  ;;  %v1087_v21 = vld [vmem:[%s2620_s16 + $0x20] sm:$0xff]  ;;  %v1089_v22 = vld [vmem:[%s2620_s16 + $0x30] sm:$0xff]  ;;  %v1092_v23 = vld [vmem:[%s2620_s16 + $0x48] sm:$0xff] }
 0x2a9   : > { %1998 = vmatprep.subr.bf16.mxu0 %v1997_v15  ;;  %v1094_v25 = vld [vmem:[%s2620_s16 + $0x58] sm:$0xff]  ;;  %v2003_v30 = vpack.c.bf16 %v1089_v22, %v1087_v21  ;;  %v1091_v24 = vld [vmem:[%s2620_s16 + $0x40] sm:$0xff]  ;;  %v1093_v29 = vld [vmem:[%s2620_s16 + $0x50] sm:$0xff] }
 0x2aa   : > { %2000 = vmatpush1.bf16.msra.mxu0 %v1999_v18  ;;  %v2005_v26 = vpack.c.bf16 %v1094_v25, %v1092_v23  ;;  %v1096_v27 = vld [vmem:[%s2620_s16 + $0x68] sm:$0xff]  ;;  %v1098_v31 = vld [vmem:[%s2620_s16 + $0x78] sm:$0xff]  ;;  %v2007_v32 = vpack.c.bf16 %v1093_v29, %v1091_v24  ;;  %v1095_v35 = vld [vmem:[%s2620_s16 + $0x60] sm:$0xff] }
 0x2ab   : > { %2002 = vmatprep.subr.bf16.mxu0 %v2001_v19  ;;  %v2009_v34 = vpack.c.bf16 %v1098_v31, %v1096_v27  ;;  %v1097_v33 = vld [vmem:[%s2620_s16 + $0x70] sm:$0xff]  ;;  %v1100_v38 = vld [vmem:[%s2620_s16 + $0x88] sm:$0xff]  ;;  %v1102_v39 = vld [vmem:[%s2620_s16 + $0x98] sm:$0xff] }
 0x2ac   : > { %v2011_v41 = vpack.c.bf16 %v1097_v33, %v1095_v35  ;;  %v2013_v42 = vpack.c.bf16 %v1102_v39, %v1100_v38  ;;  %v1099_v37 = vld [vmem:[%s2620_s16 + $0x80] sm:$0xff]  ;;  %v1101_v40 = vld [vmem:[%s2620_s16 + $0x90] sm:$0xff]  ;;  %v1104_v43 = vld [vmem:[%s2620_s16 + $0xa8] sm:$0xff] }
 0x2ad   : > { %v1106_v47 = vld [vmem:[%s2620_s16 + $0xb8] sm:$0xff]  ;;  %v1103_v44 = vld [vmem:[%s2620_s16 + $0xa0] sm:$0xff]  ;;  %v1105_v49 = vld [vmem:[%s2620_s16 + $0xb0] sm:$0xff]  ;;  %v2015_v50 = vpack.c.bf16 %v1101_v40, %v1099_v37 }
 0x2ae   : > { %2004 = vmatpush1.bf16.msra.mxu0 %v2003_v30  ;;  %v1108_v51 = vld [vmem:[%s2620_s16 + $0xc8] sm:$0xff]  ;;  %v1110_v46 = vld [vmem:[%s2620_s16 + $0xd8] sm:$0xff]  ;;  %v1352_v54 = vld [vmem:[%s2618_s10 + $0x80] sm:$0xff]  ;;  %v2017_v13 = vpack.c.bf16 %v1106_v47, %v1104_v43  ;;  %v2019_v2 = vpack.c.bf16 %v1105_v49, %v1103_v44 }
 0x2af   : > { %2006 = vmatprep.subr.bf16.mxu0 %v2005_v26  ;;  %v1353_v55 = vld [vmem:[%s2618_s10 + $0x88] sm:$0xff]  ;;  %v1336_v28 = vld [vmem:[%s2618_s10] sm:$0xff]  ;;  %v1354_v59 = vld [vmem:[%s2618_s10 + $0x90] sm:$0xff]  ;;  %v2021_v62 = vpack.c.bf16 %v1110_v46, %v1108_v51 }
 0x2b0   : > { %v2029_v57 = vpack.c.bf16 %v1353_v55, %v1352_v54  ;;  %v1337_v58 = vld [vmem:[%s2618_s10 + $0x8] sm:$0xff]  ;;  %v1355_v61 = vld [vmem:[%s2618_s10 + $0x98] sm:$0xff]  ;;  %v1338_v52 = vld [vmem:[%s2618_s10 + $0x10] sm:$0xff] }
 0x2b1   : > { %v2031_v56 = vpack.c.bf16 %v1337_v58, %v1336_v28  ;;  %v2033_v63 = vpack.c.bf16 %v1355_v61, %v1354_v59  ;;  %v1339_v48 = vld [vmem:[%s2618_s10 + $0x18] sm:$0xff]  ;;  %v1356_v60 = vld [vmem:[%s2618_s10 + $0xa0] sm:$0xff]  ;;  %v1357_v1 = vld [vmem:[%s2618_s10 + $0xa8] sm:$0xff] }
 0x2b2   : > { %2008 = vmatpush1.bf16.msra.mxu0 %v2007_v32  ;;  %2030 = vmatprep.subr.bf16.mxu1 %v2029_v57  ;;  %v1107_v3 = vld [vmem:[%s2620_s16 + $0xc0] sm:$0xff]  ;;  %v1109_v9 = vld [vmem:[%s2620_s16 + $0xd0] sm:$0xff]  ;;  %v2035_v7 = vpack.c.bf16 %v1339_v48, %v1338_v52  ;;  %v1112_v16 = vld [vmem:[%s2620_s16 + $0xe8] sm:$0xff]  ;;  %v2037_v53 = vpack.c.bf16 %v1357_v1, %v1356_v60  ;;  %v1117_v1 = vlaneseq }
 0x2b3   : > { %2010 = vmatprep.subr.bf16.mxu0 %v2009_v34  ;;  %2032 = vmatpush3.bf16.msra.mxu1 %v2031_v56  ;;  %v1340_v10 = vld [vmem:[%s2618_s10 + $0x20] sm:$0xff]  ;;  %v1341_v11 = vld [vmem:[%s2618_s10 + $0x28] sm:$0xff]  ;;  %v1114_v20 = vld [vmem:[%s2620_s16 + $0xf8] sm:$0xff]  ;;  %v2023_v12 = vpack.c.bf16 %v1109_v9, %v1107_v3 }
 0x2b4   : > { %2034 = vmatprep.subr.bf16.mxu1 %v2033_v63  ;;  %v1358_v6 = vld [vmem:[%s2618_s10 + $0xb0] sm:$0xff]  ;;  %v1359_v4 = vld [vmem:[%s2618_s10 + $0xb8] sm:$0xff]  ;;  %v1111_v0 = vld [vmem:[%s2620_s16 + $0xe0] sm:$0xff]  ;;  %v2039_v5 = vpack.c.bf16 %v1341_v11, %v1340_v10  ;;  %v2025_v14 = vpack.c.bf16 %v1114_v20, %v1112_v16 }
 0x2b5   : > { %v1113_v15 = vld [vmem:[%s2620_s16 + $0xf0] sm:$0xff]  ;;  %v2041_v36 = vpack.c.bf16 %v1359_v4, %v1358_v6  ;;  %v1343_v45 = vld [vmem:[%s2618_s10 + $0x38] sm:$0xff]  ;;  %v1360_v18 = vld [vmem:[%s2618_s10 + $0xc0] sm:$0xff] }
 0x2b6   : > { %2012 = vmatpush1.bf16.msra.mxu0 %v2011_v41  ;;  %v1342_v8 = vld [vmem:[%s2618_s10 + $0x30] sm:$0xff]  ;;  %v1361_v19 = vld [vmem:[%s2618_s10 + $0xc8] sm:$0xff]  ;;  %v2027_v21 = vpack.c.bf16 %v1113_v15, %v1111_v0  ;;  %v1344_v25 = vld [vmem:[%s2618_s10 + $0x40] sm:$0xff] }
 0x2b7   : > { %2014 = vmatprep.subr.bf16.mxu0 %v2013_v42  ;;  %2036 = vmatpush3.bf16.msra.mxu1 %v2035_v7  ;;  %v2043_v22 = vpack.c.bf16 %v1343_v45, %v1342_v8  ;;  %v2045_v23 = vpack.c.bf16 %v1361_v19, %v1360_v18  ;;  %v1345_v30 = vld [vmem:[%s2618_s10 + $0x48] sm:$0xff]  ;;  %v1362_v26 = vld [vmem:[%s2618_s10 + $0xd0] sm:$0xff]  ;;  %v1363_v24 = vld [vmem:[%s2618_s10 + $0xd8] sm:$0xff] }
 0x2b8   : > { %2038 = vmatprep.subr.bf16.mxu1 %v2037_v53  ;;  %v1067_v29 = vld [vmem:[#allocation3] sm:$0xff]  ;;  %v2047_v27 = vpack.c.bf16 %v1345_v30, %v1344_v25  ;;  %v2049_v31 = vpack.c.bf16 %v1363_v24, %v1362_v26  ;;  %v1346_v32 = vld [vmem:[%s2618_s10 + $0x50] sm:$0xff]  ;;  %v1347_v34 = vld [vmem:[%s2618_s10 + $0x58] sm:$0xff] }
 0x2b9   : > { %v1364_v35 = vld [vmem:[%s2618_s10 + $0xe0] sm:$0xff]  ;;  %v1365_v33 = vld [vmem:[%s2618_s10 + $0xe8] sm:$0xff]  ;;  %v2051_v39 = vpack.c.bf16 %v1347_v34, %v1346_v32  ;;  %v1069_v42 = vld [vmem:[#allocation3 + $0x10] sm:$0xff] }
 0x2ba   : > { %2016 = vmatpush1.bf16.msra.mxu0 %v2015_v50  ;;  %v1068_v38 = vld [vmem:[#allocation3 + $0x8] sm:$0xff]  ;;  %v2053_v41 = vpack.c.bf16 %v1365_v33, %v1364_v35  ;;  %v1070_v37 = vld [vmem:[#allocation3 + $0x18] sm:$0xff]  ;;  %v1071_v40 = vld [vmem:[#allocation3 + $0x20] sm:$0xff] }
 0x2bb   : > { %2018 = vmatprep.subr.bf16.mxu0 %v2017_v13  ;;  %2040 = vmatpush3.bf16.msra.mxu1 %v2039_v5  ;;  %v1072_v43 = vld [vmem:[#allocation3 + $0x28] sm:$0xff]  ;;  %v1073_v47 = vld [vmem:[#allocation3 + $0x30] sm:$0xff]  ;;  %v1074_v44 = vld [vmem:[#allocation3 + $0x38] sm:$0xff] }
 0x2bc   : > { %2042 = vmatprep.subr.bf16.mxu1 %v2041_v36  ;;  %v1075_v49 = vld [vmem:[#allocation3 + $0x40] sm:$0xff]  ;;  %v1076_v50 = vld [vmem:[#allocation3 + $0x48] sm:$0xff]  ;;  %v1077_v51 = vld [vmem:[#allocation3 + $0x50] sm:$0xff] }
 0x2bd   : > { %v1078_v46 = vld [vmem:[#allocation3 + $0x58] sm:$0xff]  ;;  %v1079_v54 = vld [vmem:[#allocation3 + $0x60] sm:$0xff]  ;;  %v1080_v55 = vld [vmem:[#allocation3 + $0x68] sm:$0xff] }
 0x2be   : > { %2020 = vmatpush1.bf16.msra.mxu0 %v2019_v2  ;;  %v1081_v28 = vld [vmem:[#allocation3 + $0x70] sm:$0xff]  ;;  %v1082_v13 = vld [vmem:[#allocation3 + $0x78] sm:$0xff]  ;;  %v1348_v57 = vld [vmem:[%s2618_s10 + $0x60] sm:$0xff]  ;;  %v1118_v2 = vshrl.u32 %v1117_v1, 7 }
 0x2bf   : > { %2022 = vmatprep.subr.bf16.mxu0 %v2021_v62  ;;  %2044 = vmatpush3.bf16.msra.mxu1 %v2043_v22  ;;  %v1349_v58 = vld [vmem:[%s2618_s10 + $0x68] sm:$0xff]  ;;  %v1366_v61 = vld [vmem:[%s2618_s10 + $0xf0] sm:$0xff]  ;;  %v1367_v56 = vld [vmem:[%s2618_s10 + $0xf8] sm:$0xff] }
 0x2c0   : > { %2046 = vmatprep.subr.bf16.mxu1 %v2045_v23  ;;  %v2055_v59 = vpack.c.bf16 %v1349_v58, %v1348_v57  ;;  %v2057_v63 = vpack.c.bf16 %v1367_v56, %v1366_v61  ;;  %v1350_v52 = vld [vmem:[%s2618_s10 + $0x70] sm:$0xff]  ;;  %v1351_v48 = vld [vmem:[%s2618_s10 + $0x78] sm:$0xff]  ;;  %v1119_v3 = vsub.s32 0, %v1118_v2  ;;  %v1123_v9 = vsub.s32 1, %v1118_v2  ;;  %s3189_s10 = sld [smem:[#allocation22_spill]] (!%p1788_p10) }
 0x2c1   : > { %v2059_v60 = vpack.c.bf16 %v1351_v48, %v1350_v52 }
 0x2c2   : > { %2024 = vmatpush1.bf16.msra.mxu0 %v2023_v12 }
 0x2c3   : > { %2026 = vmatprep.subr.bf16.mxu0 %v2025_v14  ;;  %2048 = vmatpush3.bf16.msra.mxu1 %v2047_v27 }
 0x2c4   : > { %2050 = vmatprep.subr.bf16.mxu1 %v2049_v31 }
 0x2c6   : > { %2028 = vmatpush1.bf16.msra.mxu0 %v2027_v21 }
 0x2c7   : > { %2052 = vmatpush3.bf16.msra.mxu1 %v2051_v39 }
 0x2c8   : > { %2054 = vmatprep.subr.bf16.mxu1 %v2053_v41 }
 0x2c9   : > { %1192 = vmatmul.mubr.f32.vlgmr.msra.gmra.mrb[0].mxu0 %v1067_v29 }
 0x2ca   : > { %1197 = vmatprep.mubr.f32.mxu0 %v2343_v17 }
 0x2cb   : > { %2056 = vmatpush3.bf16.msra.mxu1 %v2055_v59 }
 0x2cc   : > { %2058 = vmatprep.subr.bf16.mxu1 %v2057_v63 }
 0x2cd   : > { %1198 = vmatmul.mubr.f32.gmra.mrb[2].mxu0 %v1068_v38 }
 0x2ce   : > { %1203 = vmatprep.mubr.f32.mxu0 %v2343_v17 }
 0x2cf   : > { %2060 = vmatpush3.bf16.msra.mxu1 %v2059_v60 }
 0x2d1   : > { %1204 = vmatmul.mubr.f32.gmra.mrb[4].mxu0 %v1069_v42 }
 0x2d2   : > { %1209 = vmatprep.mubr.f32.mxu0 %v2343_v17 }
 0x2d5   : > { %1210 = vmatmul.mubr.f32.gmra.mrb[6].mxu0 %v1070_v37 }
 0x2d6   : > { %1215 = vmatprep.mubr.f32.mxu0 %v2343_v17 }
 0x2d9   : > { %1216 = vmatmul.mubr.f32.gmra.mrb[8].mxu0 %v1071_v40 }
 0x2da   : > { %1221 = vmatprep.mubr.f32.mxu0 %v2343_v17 }
 0x2dd   : > { %1222 = vmatmul.mubr.f32.gmra.mrb[10].mxu0 %v1072_v43 }
 0x2de   : > { %1227 = vmatprep.mubr.f32.mxu0 %v2343_v17 }
 0x2e1   : > { %1228 = vmatmul.mubr.f32.gmra.mrb[12].mxu0 %v1073_v47 }
 0x2e2   : > { %1233 = vmatprep.mubr.f32.mxu0 %v2343_v17 }
 0x2e5   : > { %1234 = vmatmul.mubr.f32.gmra.mrb[14].mxu0 %v1074_v44 }
 0x2e6   : > { %1239 = vmatprep.mubr.f32.mxu0 %v2343_v17 }
 0x2e9   : > { %1240 = vmatmul.mubr.f32.gmra.mrb[16].mxu0 %v1075_v49 }
 0x2ea   : > { %1245 = vmatprep.mubr.f32.mxu0 %v2343_v17 }
 0x2ed   : > { %1246 = vmatmul.mubr.f32.gmra.mrb[18].mxu0 %v1076_v50 }
 0x2ee   : > { %1251 = vmatprep.mubr.f32.mxu0 %v2343_v17 }
 0x2f1   : > { %1252 = vmatmul.mubr.f32.gmra.mrb[20].mxu0 %v1077_v51 }
 0x2f2   : > { %1257 = vmatprep.mubr.f32.mxu0 %v2343_v17 }
 0x2f5   : > { %1258 = vmatmul.mubr.f32.gmra.mrb[22].mxu0 %v1078_v46 }
 0x2f6   : > { %1263 = vmatprep.mubr.f32.mxu0 %v2343_v17 }
 0x2f9   : > { %1264 = vmatmul.mubr.f32.gmra.mrb[24].mxu0 %v1079_v54 }
 0x2fa   : > { %1269 = vmatprep.mubr.f32.mxu0 %v2343_v17 }
 0x2fd   : > { %1270 = vmatmul.mubr.f32.gmra.mrb[26].mxu0 %v1080_v55 }
 0x2fe   : > { %1275 = vmatprep.mubr.f32.mxu0 %v2343_v17 }
 0x301   : > { %1276 = vmatmul.mubr.f32.gmra.mrb[28].mxu0 %v1081_v28 }
 0x302   : > { %1281 = vmatprep.mubr.f32.mxu0 %v2343_v17  ;;  %v1115_v17 = vld [vmem:[%s567_s6] sm:$0x3] }
 0x303   : > { %v3013_v7 = vrot.slane %v1115_v17, %v1119_v3  ;;  %v3015_v62 = vrot.slane %v1115_v17, %v1123_v9 }
 0x305   : > { %1282 = vmatmul.mubr.f32.gmra.mrb[30].mxu0 %v1082_v13 }
 0x39c   : > { %v1193_v16 = vpop.f32.mrb[0].mxu0 }
 0x39d   : > { %v1194_v53 = vadd.f32 %v1193_v16, %v3013_v7  ;;  %v1195_v10 = vpop.f32.mrb[1].mxu0 }
 0x39e   : > { %v1196_v11 = vadd.f32 %v1195_v10, %v3015_v62 }
 0x39f   : > { %v1288_v4 = vmax.f32 %v1194_v53, 0.0 }
 0x3a0   : > { %v1199_v20 = vpop.f32.mrb[2].mxu0  ;;  %v1289_v6 = vmax.f32 %v1196_v11, 0.0 }
 0x3a1   : > { %v1200_v12 = vadd.f32 %v1199_v20, %v3013_v7  ;;  %v1201_v0 = vpop.f32.mrb[3].mxu0 }
 0x3a2   : > { %v1202_v5 = vadd.f32 %v1201_v0, %v3015_v62  ;;  %1432 = vmatprep.mubr.f32.mxu1 %v1289_v6 }
 0x3a3   : > { %1433 = vmatmul.mubr.f32.vlgmr.msra.gmra.mrb[0].mxu1 %v1288_v4  ;;  %v1290_v36 = vmax.f32 %v1200_v12, 0.0 }
 0x3a4   : > { %v1291_v14 = vmax.f32 %v1202_v5, 0.0  ;;  %v1205_v15 = vpop.f32.mrb[4].mxu0 }
 0x3a5   : > { %v1206_v8 = vadd.f32 %v1205_v15, %v3013_v7  ;;  %v1207_v45 = vpop.f32.mrb[5].mxu0 }
 0x3a6   : > { %v1208_v18 = vadd.f32 %v1207_v45, %v3015_v62  ;;  %1437 = vmatprep.mubr.f32.mxu1 %v1291_v14 }
 0x3a7   : > { %1438 = vmatmul.mubr.f32.gmra.mrb[2].mxu1 %v1290_v36  ;;  %v1292_v22 = vmax.f32 %v1206_v8, 0.0 }
 0x3a8   : > { %v1293_v19 = vmax.f32 %v1208_v18, 0.0  ;;  %v1211_v21 = vpop.f32.mrb[6].mxu0 }
 0x3a9   : > { %v1212_v23 = vadd.f32 %v1211_v21, %v3013_v7  ;;  %v1213_v25 = vpop.f32.mrb[7].mxu0 }
 0x3aa   : > { %v1214_v30 = vadd.f32 %v1213_v25, %v3015_v62  ;;  %1442 = vmatprep.mubr.f32.mxu1 %v1293_v19 }
 0x3ab   : > { %1443 = vmatmul.mubr.f32.gmra.mrb[4].mxu1 %v1292_v22  ;;  %v1294_v29 = vmax.f32 %v1212_v23, 0.0 }
 0x3ac   : > { %v1295_v26 = vmax.f32 %v1214_v30, 0.0  ;;  %v1217_v24 = vpop.f32.mrb[8].mxu0 }
 0x3ad   : > { %v1218_v27 = vadd.f32 %v1217_v24, %v3013_v7  ;;  %v1219_v31 = vpop.f32.mrb[9].mxu0 }
 0x3ae   : > { %v1220_v32 = vadd.f32 %v1219_v31, %v3015_v62  ;;  %1447 = vmatprep.mubr.f32.mxu1 %v1295_v26 }
 0x3af   : > { %1448 = vmatmul.mubr.f32.gmra.mrb[6].mxu1 %v1294_v29  ;;  %v1296_v33 = vmax.f32 %v1218_v27, 0.0 }
 0x3b0   : > { %v1297_v34 = vmax.f32 %v1220_v32, 0.0  ;;  %v1223_v35 = vpop.f32.mrb[10].mxu0 }
 0x3b1   : > { %v1224_v38 = vadd.f32 %v1223_v35, %v3013_v7  ;;  %v1225_v39 = vpop.f32.mrb[11].mxu0 }
 0x3b2   : > { %v1226_v41 = vadd.f32 %v1225_v39, %v3015_v62  ;;  %1452 = vmatprep.mubr.f32.mxu1 %v1297_v34 }
 0x3b3   : > { %1453 = vmatmul.mubr.f32.gmra.mrb[8].mxu1 %v1296_v33  ;;  %v1298_v40 = vmax.f32 %v1224_v38, 0.0 }
 0x3b4   : > { %v1299_v42 = vmax.f32 %v1226_v41, 0.0  ;;  %v1229_v37 = vpop.f32.mrb[12].mxu0 }
 0x3b5   : > { %v1230_v43 = vadd.f32 %v1229_v37, %v3013_v7  ;;  %v1231_v47 = vpop.f32.mrb[13].mxu0  ;;  %v1320_v37 = vld [vmem:[#allocation2] sm:$0xff] }
 0x3b6   : > { %v1232_v44 = vadd.f32 %v1231_v47, %v3015_v62  ;;  %1457 = vmatprep.mubr.f32.mxu1 %v1299_v42 }
 0x3b7   : > { %1458 = vmatmul.mubr.f32.gmra.mrb[10].mxu1 %v1298_v40  ;;  %v1300_v51 = vmax.f32 %v1230_v43, 0.0 }
 0x3b8   : > { %v1301_v49 = vmax.f32 %v1232_v44, 0.0  ;;  %v1235_v50 = vpop.f32.mrb[14].mxu0 }
 0x3b9   : > { %v1236_v46 = vadd.f32 %v1235_v50, %v3013_v7  ;;  %v1237_v54 = vpop.f32.mrb[15].mxu0 }
 0x3ba   : > { %v1238_v55 = vadd.f32 %v1237_v54, %v3015_v62  ;;  %1462 = vmatprep.mubr.f32.mxu1 %v1301_v49  ;;  %v1321_v49 = vld [vmem:[#allocation2 + $0x8] sm:$0xff]  ;;  %v1322_v54 = vld [vmem:[#allocation2 + $0x10] sm:$0xff] }
 0x3bb   : > { %1463 = vmatmul.mubr.f32.gmra.mrb[12].mxu1 %v1300_v51  ;;  %v1302_v57 = vmax.f32 %v1236_v46, 0.0 }
 0x3bc   : > { %v1303_v28 = vmax.f32 %v1238_v55, 0.0  ;;  %v1241_v13 = vpop.f32.mrb[16].mxu0 }
 0x3bd   : > { %v1242_v58 = vadd.f32 %v1241_v13, %v3013_v7  ;;  %v1243_v59 = vpop.f32.mrb[17].mxu0 }
 0x3be   : > { %v1244_v61 = vadd.f32 %v1243_v59, %v3015_v62  ;;  %1467 = vmatprep.mubr.f32.mxu1 %v1303_v28 }
 0x3bf   : > { %1468 = vmatmul.mubr.f32.gmra.mrb[14].mxu1 %v1302_v57  ;;  %v1304_v52 = vmax.f32 %v1242_v58, 0.0  ;;  %v1323_v57 = vld [vmem:[#allocation2 + $0x18] sm:$0xff] }
 0x3c0   : > { %v1305_v56 = vmax.f32 %v1244_v61, 0.0  ;;  %v1247_v63 = vpop.f32.mrb[18].mxu0 }
 0x3c1   : > { %v1248_v48 = vadd.f32 %v1247_v63, %v3013_v7  ;;  %v1249_v60 = vpop.f32.mrb[19].mxu0  ;;  %v1324_v63 = vld [vmem:[#allocation2 + $0x20] sm:$0xff] }
 0x3c2   : > { %v1250_v1 = vadd.f32 %v1249_v60, %v3015_v62  ;;  %1472 = vmatprep.mubr.f32.mxu1 %v1305_v56 }
 0x3c3   : > { %1473 = vmatmul.mubr.f32.gmra.mrb[16].mxu1 %v1304_v52  ;;  %v1306_v17 = vmax.f32 %v1248_v48, 0.0 }
 0x3c4   : > { %v1307_v2 = vmax.f32 %v1250_v1, 0.0  ;;  %v1253_v3 = vpop.f32.mrb[20].mxu0 }
 0x3c5   : > { %v1254_v9 = vadd.f32 %v1253_v3, %v3013_v7  ;;  %v1255_v16 = vpop.f32.mrb[21].mxu0 }
 0x3c6   : > { %v1256_v53 = vadd.f32 %v1255_v16, %v3015_v62  ;;  %1477 = vmatprep.mubr.f32.mxu1 %v1307_v2  ;;  %v1325_v2 = vld [vmem:[#allocation2 + $0x28] sm:$0xff] }
 0x3c7   : > { %1478 = vmatmul.mubr.f32.gmra.mrb[18].mxu1 %v1306_v17  ;;  %v1308_v20 = vmax.f32 %v1254_v9, 0.0 }
 0x3c8   : > { %v1309_v10 = vmax.f32 %v1256_v53, 0.0  ;;  %v1259_v11 = vpop.f32.mrb[22].mxu0  ;;  %v1326_v53 = vld [vmem:[#allocation2 + $0x30] sm:$0xff] }
 0x3c9   : > { %v1260_v6 = vadd.f32 %v1259_v11, %v3013_v7  ;;  %v1261_v4 = vpop.f32.mrb[23].mxu0 }
 0x3ca   : > { %v1262_v12 = vadd.f32 %v1261_v4, %v3015_v62  ;;  %1482 = vmatprep.mubr.f32.mxu1 %v1309_v10  ;;  %v1327_v4 = vld [vmem:[#allocation2 + $0x38] sm:$0xff] }
 0x3cb   : > { %1483 = vmatmul.mubr.f32.gmra.mrb[20].mxu1 %v1308_v20  ;;  %v1310_v14 = vmax.f32 %v1260_v6, 0.0 }
 0x3cc   : > { %v1311_v0 = vmax.f32 %v1262_v12, 0.0  ;;  %v1265_v5 = vpop.f32.mrb[24].mxu0 }
 0x3cd   : > { %v1266_v15 = vadd.f32 %v1265_v5, %v3013_v7  ;;  %v1267_v36 = vpop.f32.mrb[25].mxu0 }
 0x3ce   : > { %v1268_v8 = vadd.f32 %v1267_v36, %v3015_v62  ;;  %1487 = vmatprep.mubr.f32.mxu1 %v1311_v0 }
 0x3cf   : > { %1488 = vmatmul.mubr.f32.gmra.mrb[22].mxu1 %v1310_v14  ;;  %v1312_v19 = vmax.f32 %v1266_v15, 0.0  ;;  %v1328_v15 = vld [vmem:[#allocation2 + $0x40] sm:$0xff] }
 0x3d0   : > { %v1313_v45 = vmax.f32 %v1268_v8, 0.0  ;;  %v1271_v18 = vpop.f32.mrb[26].mxu0 }
 0x3d1   : > { %v1272_v21 = vadd.f32 %v1271_v18, %v3013_v7  ;;  %v1273_v22 = vpop.f32.mrb[27].mxu0 }
 0x3d2   : > { %v1274_v23 = vadd.f32 %v1273_v22, %v3015_v62  ;;  %1492 = vmatprep.mubr.f32.mxu1 %v1313_v45 }
 0x3d3   : > { %1493 = vmatmul.mubr.f32.gmra.mrb[24].mxu1 %v1312_v19  ;;  %v1314_v26 = vmax.f32 %v1272_v21, 0.0  ;;  %v1329_v19 = vld [vmem:[#allocation2 + $0x48] sm:$0xff] }
 0x3d4   : > { %v1315_v25 = vmax.f32 %v1274_v23, 0.0  ;;  %v1277_v30 = vpop.f32.mrb[28].mxu0 }
 0x3d5   : > { %v1278_v24 = vadd.f32 %v1277_v30, %v3013_v7  ;;  %v1279_v29 = vpop.f32.mrb[29].mxu0  ;;  %v1330_v30 = vld [vmem:[#allocation2 + $0x50] sm:$0xff] }
 0x3d6   : > { %v1280_v27 = vadd.f32 %v1279_v29, %v3015_v62  ;;  %1497 = vmatprep.mubr.f32.mxu1 %v1315_v25 }
 0x3d7   : > { %1498 = vmatmul.mubr.f32.gmra.mrb[26].mxu1 %v1314_v26  ;;  %v1316_v34 = vmax.f32 %v1278_v24, 0.0 }
 0x3d8   : > { %v1317_v31 = vmax.f32 %v1280_v27, 0.0  ;;  %v1283_v32 = vpop.f32.mrb[30].mxu0 }
 0x3d9   : > { %v1284_v35 = vadd.f32 %v1283_v32, %v3013_v7  ;;  %v1285_v33 = vpop.f32.mrb[31].mxu0 }
 0x3da   : > { %v1286_v38 = vadd.f32 %v1285_v33, %v3015_v62  ;;  %1502 = vmatprep.mubr.f32.mxu1 %v1317_v31  ;;  %v1331_v31 = vld [vmem:[#allocation2 + $0x58] sm:$0xff] }
 0x3db   : > { %1503 = vmatmul.mubr.f32.gmra.mrb[28].mxu1 %v1316_v34  ;;  %v1318_v41 = vmax.f32 %v1284_v35, 0.0 }
 0x3dc   : > { %v1319_v39 = vmax.f32 %v1286_v38, 0.0  ;;  %v1332_v38 = vld [vmem:[#allocation2 + $0x60] sm:$0xff] }
 0x3de   : > { %1507 = vmatprep.mubr.f32.mxu1 %v1319_v39 }
 0x3df   : > { %1508 = vmatmul.mubr.f32.gmra.mrb[30].mxu1 %v1318_v41 }
 0x476   : > { %v1861_v42 = vpop.f32.mrb[0].mxu1 }
 0x477   : > { %v1862_v40 = vpop.f32.mrb[1].mxu1 }
 0x478   : > { %v1863_v43 = vadd.f32 %v1862_v40, %v1861_v42  ;;  %v1333_v40 = vld [vmem:[#allocation2 + $0x68] sm:$0xff] }
 0x47a   : > { %v1513_v47 = vadd.f32 %v1863_v43, %v1320_v37  ;;  %v1864_v44 = vpop.f32.mrb[2].mxu1 }
 0x47b   : > { %v1865_v50 = vpop.f32.mrb[3].mxu1 }
 0x47c   : > { %1529 = vst [vmem:[#allocation2] sm:$0xff] %v1513_v47  ;;  %v1866_v51 = vadd.f32 %v1865_v50, %v1864_v44  ;;  %v1334_v50 = vld [vmem:[#allocation2 + $0x70] sm:$0xff] }
 0x47e   : > { %v1514_v7 = vadd.f32 %v1866_v51, %v1321_v49  ;;  %v1867_v46 = vpop.f32.mrb[4].mxu1 }
 0x47f   : > { %v1868_v62 = vpop.f32.mrb[5].mxu1 }
 0x480   : > { %1530 = vst [vmem:[#allocation2 + $0x8] sm:$0xff] %v1514_v7  ;;  %v1869_v55 = vadd.f32 %v1868_v62, %v1867_v46  ;;  %v1335_v62 = vld [vmem:[#allocation2 + $0x78] sm:$0xff] }
 0x482   : > { %v1515_v28 = vadd.f32 %v1869_v55, %v1322_v54  ;;  %v1870_v13 = vpop.f32.mrb[6].mxu1 }
 0x483   : > { %v1871_v58 = vpop.f32.mrb[7].mxu1 }
 0x484   : > { %1531 = vst [vmem:[#allocation2 + $0x10] sm:$0xff] %v1515_v28  ;;  %v1872_v59 = vadd.f32 %v1871_v58, %v1870_v13  ;;  %v1789_v58 = vld [vmem:[%s3189_s10] ss:$0 sm:$0xff] (!%p1788_p10) }
 0x486   : > { %v1516_v61 = vadd.f32 %v1872_v59, %v1323_v57  ;;  %v1873_v56 = vpop.f32.mrb[8].mxu1  ;;  %v1549_v57 = vld [vmem:[#allocation2] sm:$0xff] (!%p1788_p10) }
 0x487   : > { %v1874_v52 = vpop.f32.mrb[9].mxu1  ;;  %v1550_v59 = vld [vmem:[#allocation2 + $0x8] sm:$0xff] (!%p1788_p10) }
 0x488   : > { %1532 = vst [vmem:[#allocation2 + $0x18] sm:$0xff] %v1516_v61  ;;  %v1875_v48 = vadd.f32 %v1874_v52, %v1873_v56  ;;  %v1572_v61 = vadd.f32 (!%p1788_p10), %v1789_v58, %v1549_v57  ;;  %v1573_v56 = vadd.f32 (!%p1788_p10), %v1789_v58, %v1550_v59 }
 0x48a   : > { %v1517_v60 = vadd.f32 %v1875_v48, %v1324_v63  ;;  %v1876_v1 = vpop.f32.mrb[10].mxu1  ;;  %1588 = vst [vmem:[%s2622_s0] sm:$0xff] (!%p1788_p10), %v1572_v61  ;;  %1589 = vst [vmem:[%s2622_s0 + $0x8] sm:$0xff] (!%p1788_p10), %v1573_v56 }
 0x48b   : > { %v1877_v3 = vpop.f32.mrb[11].mxu1  ;;  %v1551_v63 = vld [vmem:[#allocation2 + $0x10] sm:$0xff] (!%p1788_p10) }
 0x48c   : > { %1533 = vst [vmem:[#allocation2 + $0x20] sm:$0xff] %v1517_v60  ;;  %v1878_v17 = vadd.f32 %v1877_v3, %v1876_v1  ;;  %v1574_v60 = vadd.f32 (!%p1788_p10), %v1789_v58, %v1551_v63 }
 0x48e   : > { %v1518_v9 = vadd.f32 %v1878_v17, %v1325_v2  ;;  %v1879_v16 = vpop.f32.mrb[12].mxu1  ;;  %1590 = vst [vmem:[%s2622_s0 + $0x10] sm:$0xff] (!%p1788_p10), %v1574_v60 }
 0x48f   : > { %v1880_v10 = vpop.f32.mrb[13].mxu1  ;;  %v1552_v52 = vld [vmem:[#allocation2 + $0x18] sm:$0xff] (!%p1788_p10) }
 0x490   : > { %1534 = vst [vmem:[#allocation2 + $0x28] sm:$0xff] %v1518_v9  ;;  %v1881_v11 = vadd.f32 %v1880_v10, %v1879_v16  ;;  %v1575_v1 = vadd.f32 (!%p1788_p10), %v1789_v58, %v1552_v52 }
 0x492   : > { %v1519_v20 = vadd.f32 %v1881_v11, %v1326_v53  ;;  %v1882_v6 = vpop.f32.mrb[14].mxu1  ;;  %1591 = vst [vmem:[%s2622_s0 + $0x18] sm:$0xff] (!%p1788_p10), %v1575_v1 }
 0x493   : > { %v1883_v12 = vpop.f32.mrb[15].mxu1  ;;  %v1553_v48 = vld [vmem:[#allocation2 + $0x20] sm:$0xff] (!%p1788_p10) }
 0x494   : > { %1535 = vst [vmem:[#allocation2 + $0x30] sm:$0xff] %v1519_v20  ;;  %v1884_v0 = vadd.f32 %v1883_v12, %v1882_v6  ;;  %v1576_v2 = vadd.f32 (!%p1788_p10), %v1789_v58, %v1553_v48 }
 0x496   : > { %v1520_v5 = vadd.f32 %v1884_v0, %v1327_v4  ;;  %v1885_v14 = vpop.f32.mrb[16].mxu1  ;;  %1592 = vst [vmem:[%s2622_s0 + $0x20] sm:$0xff] (!%p1788_p10), %v1576_v2 }
 0x497   : > { %v1886_v36 = vpop.f32.mrb[17].mxu1  ;;  %v1554_v3 = vld [vmem:[#allocation2 + $0x28] sm:$0xff] (!%p1788_p10) }
 0x498   : > { %1536 = vst [vmem:[#allocation2 + $0x38] sm:$0xff] %v1520_v5  ;;  %v1887_v8 = vadd.f32 %v1886_v36, %v1885_v14  ;;  %v1577_v16 = vadd.f32 (!%p1788_p10), %v1789_v58, %v1554_v3 }
 0x49a   : > { %v1521_v45 = vadd.f32 %v1887_v8, %v1328_v15  ;;  %v1888_v18 = vpop.f32.mrb[18].mxu1  ;;  %1593 = vst [vmem:[%s2622_s0 + $0x28] sm:$0xff] (!%p1788_p10), %v1577_v16 }
 0x49b   : > { %v1889_v21 = vpop.f32.mrb[19].mxu1  ;;  %v1555_v17 = vld [vmem:[#allocation2 + $0x30] sm:$0xff] (!%p1788_p10) }
 0x49c   : > { %1537 = vst [vmem:[#allocation2 + $0x40] sm:$0xff] %v1521_v45  ;;  %v1890_v22 = vadd.f32 %v1889_v21, %v1888_v18  ;;  %v1578_v53 = vadd.f32 (!%p1788_p10), %v1789_v58, %v1555_v17 }
 0x49e   : > { %v1522_v23 = vadd.f32 %v1890_v22, %v1329_v19  ;;  %v1891_v25 = vpop.f32.mrb[20].mxu1  ;;  %1594 = vst [vmem:[%s2622_s0 + $0x30] sm:$0xff] (!%p1788_p10), %v1578_v53 }
 0x49f   : > { %v1892_v26 = vpop.f32.mrb[21].mxu1  ;;  %v1556_v9 = vld [vmem:[#allocation2 + $0x38] sm:$0xff] (!%p1788_p10) }
 0x4a0   : > { %1538 = vst [vmem:[#allocation2 + $0x48] sm:$0xff] %v1522_v23  ;;  %v1893_v24 = vadd.f32 %v1892_v26, %v1891_v25  ;;  %v1579_v10 = vadd.f32 (!%p1788_p10), %v1789_v58, %v1556_v9 }
 0x4a2   : > { %v1523_v29 = vadd.f32 %v1893_v24, %v1330_v30  ;;  %v1894_v27 = vpop.f32.mrb[22].mxu1  ;;  %1595 = vst [vmem:[%s2622_s0 + $0x38] sm:$0xff] (!%p1788_p10), %v1579_v10 }
 0x4a3   : > { %v1895_v32 = vpop.f32.mrb[23].mxu1  ;;  %v1557_v11 = vld [vmem:[#allocation2 + $0x40] sm:$0xff] (!%p1788_p10) }
 0x4a4   : > { %1539 = vst [vmem:[#allocation2 + $0x50] sm:$0xff] %v1523_v29  ;;  %v1896_v34 = vadd.f32 %v1895_v32, %v1894_v27  ;;  %v1580_v4 = vadd.f32 (!%p1788_p10), %v1789_v58, %v1557_v11 }
 0x4a6   : > { %v1524_v35 = vadd.f32 %v1896_v34, %v1331_v31  ;;  %v1897_v33 = vpop.f32.mrb[24].mxu1  ;;  %1596 = vst [vmem:[%s2622_s0 + $0x40] sm:$0xff] (!%p1788_p10), %v1580_v4 }
 0x4a7   : > { %v1898_v39 = vpop.f32.mrb[25].mxu1  ;;  %v1558_v20 = vld [vmem:[#allocation2 + $0x48] sm:$0xff] (!%p1788_p10) }
 0x4a8   : > { %1540 = vst [vmem:[#allocation2 + $0x58] sm:$0xff] %v1524_v35  ;;  %v1899_v41 = vadd.f32 %v1898_v39, %v1897_v33  ;;  %v1581_v12 = vadd.f32 (!%p1788_p10), %v1789_v58, %v1558_v20 }
 0x4aa   : > { %v1525_v42 = vadd.f32 %v1899_v41, %v1332_v38  ;;  %v1900_v37 = vpop.f32.mrb[26].mxu1  ;;  %1597 = vst [vmem:[%s2622_s0 + $0x48] sm:$0xff] (!%p1788_p10), %v1581_v12 }
 0x4ab   : > { %v1901_v43 = vpop.f32.mrb[27].mxu1  ;;  %v1559_v6 = vld [vmem:[#allocation2 + $0x50] sm:$0xff] (!%p1788_p10) }
 0x4ac   : > { %1541 = vst [vmem:[#allocation2 + $0x60] sm:$0xff] %v1525_v42  ;;  %v1902_v47 = vadd.f32 %v1901_v43, %v1900_v37  ;;  %v1582_v0 = vadd.f32 (!%p1788_p10), %v1789_v58, %v1559_v6 }
 0x4ae   : > { %v1526_v44 = vadd.f32 %v1902_v47, %v1333_v40  ;;  %v1903_v49 = vpop.f32.mrb[28].mxu1  ;;  %1598 = vst [vmem:[%s2622_s0 + $0x50] sm:$0xff] (!%p1788_p10), %v1582_v0 }
 0x4af   : > { %v1904_v51 = vpop.f32.mrb[29].mxu1  ;;  %v1560_v5 = vld [vmem:[#allocation2 + $0x58] sm:$0xff] (!%p1788_p10) }
 0x4b0   : > { %1542 = vst [vmem:[#allocation2 + $0x68] sm:$0xff] %v1526_v44  ;;  %v1905_v7 = vadd.f32 %v1904_v51, %v1903_v49  ;;  %v1583_v36 = vadd.f32 (!%p1788_p10), %v1789_v58, %v1560_v5 }
 0x4b2   : > { %v1527_v46 = vadd.f32 %v1905_v7, %v1334_v50  ;;  %v1906_v54 = vpop.f32.mrb[30].mxu1  ;;  %1548 = sbr.rel (%p1788_p10) target bundleno = 1219 (0x4c3), region = 91  ;;  %1599 = vst [vmem:[%s2622_s0 + $0x58] sm:$0xff] (!%p1788_p10), %v1583_v36 }
 0x4b3   : > { %v1907_v55 = vpop.f32.mrb[31].mxu1  ;;  %v1561_v14 = vld [vmem:[#allocation2 + $0x60] sm:$0xff] (!%p1788_p10) }
 0x4b4   : > { %1543 = vst [vmem:[#allocation2 + $0x70] sm:$0xff] %v1527_v46  ;;  %v1908_v28 = vadd.f32 %v1907_v55, %v1906_v54  ;;  %v1584_v8 = vadd.f32 (!%p1788_p10), %v1789_v58, %v1561_v14 }
 0x4b6   : > { %v1528_v13 = vadd.f32 %v1908_v28, %v1335_v62  ;;  %1600 = vst [vmem:[%s2622_s0 + $0x60] sm:$0xff] (!%p1788_p10), %v1584_v8 }
 0x4b7   : > { %v1562_v15 = vld [vmem:[#allocation2 + $0x68] sm:$0xff] (!%p1788_p10) }
 0x4b8   : > { %1544 = vst [vmem:[#allocation2 + $0x78] sm:$0xff] %v1528_v13  ;;  %v1585_v45 = vadd.f32 (!%p1788_p10), %v1789_v58, %v1562_v15 }
 0x4ba   : > { %1601 = vst [vmem:[%s2622_s0 + $0x68] sm:$0xff] %v1585_v45 }
 0x4bb   : > { %v1563_v18 = vld [vmem:[#allocation2 + $0x70] sm:$0xff] }
 0x4bc   : > { %v1586_v21 = vadd.f32 %v1789_v58, %v1563_v18 }
 0x4be   : > { %1602 = vst [vmem:[%s2622_s0 + $0x70] sm:$0xff] %v1586_v21 }
 0x4bf   : > { %v1564_v19 = vld [vmem:[#allocation2 + $0x78] sm:$0xff] }
 0x4c0   : > { %v1587_v22 = vadd.f32 %v1789_v58, %v1564_v19 }
 0x4c2   : > { %1603 = vst [vmem:[%s2622_s0 + $0x78] sm:$0xff] %v1587_v22 }
 0x4c3 PF: > { %s1792_s18 = sshll.u32 %s2325_s20, 5  ;;  %s1620_s26 = sshll.u32 %s2622_s0, 4  ;;  %s3072_s26 = int_to_ptr.vmem [resolvable:$true] %s1620_s26 }
 0x4c4   : > { %s1617_s25 = sadd.s32 %s1792_s18, %s2591_s9  ;;  %s3190_s21 = sld [smem:[#allocation23_spill]] }
 0x4c5   : > { %s1793_s5 = sshll.u32 %s1617_s25, 7  ;;  %s3192_s12 = sand.u32 1, %s2301_s14  }
 0x4c6   : > { %s3081_s28 = scalar_lea.sflag [#allocation6], %s3192_s12  ;;  %s2215_s19 = scalar_lea.vmem %s3072_s26, 2048 }
 0x4c7   : > { %p2216_p11 = scmp.ne.s32.totalorder %s3072_s26, %s2215_s19  ;;  %s2344_s0 = smov [#allocation5]  }
 0x4c8   : > { %s2219_s20 = sshll.u32 %s2344_s0, 4  ;;  %s2220_s20 = int_to_ptr.vmem [resolvable:$false] %s2219_s20 }
 0x4c9   : > { %p2217_p12 = pnand %p2216_p11, %p2492_p9  ;;  %s2221_s9 = scalar_lea.vmem %s2220_s20, 4096 }
 0x4ca   : > { %s3191_s29 = smov %s3190_s21  ;;  %s3077_s17 = scalar_lea.hbm %s3190_s21, %s1793_s5 }
 0x4cb   : > { %p2218_p0 = pneg %p2217_p12  ;;  %p2222_p1 = scmp.lt.s32.totalorder %s3072_s26, %s2220_s20 }
 0x4cc   : > { %p2223_p2 = scmp.lt.s32.totalorder %s2221_s9, %s2215_s19 }
 0x4ce   : > { %p2224_p3 = por %p2223_p2, %p2222_p1 }
 0x4d0   : > { %p2225_p4 = pnand %p2224_p3, %p2218_p0 }
 0x4d2   : > { %2228 = shalt.err (!%p2225_p4)
}
 0x4d3   : > { %s2229_s15 = scalar_lea.hbm %s3077_s17, 2048  ;;  %s2233_s27 = scalar_lea.hbm %s3191_s29, 8192 }
 0x4d4   : > { %p2230_p5 = scmp.ne.s32.totalorder %s3077_s17, %s2229_s15  ;;  %p2234_p8 = scmp.lt.u32.totalorder %s3077_s17, %s3191_s29 }
 0x4d5   : > { %p2235_p10 = scmp.lt.u32.totalorder %s2233_s27, %s2229_s15  ;;  %p2237_p12 = scmp.lt.u32.totalorder %s2229_s15, %s3077_s17 }
 0x4d6   : > { %p2231_p6 = pnand %p2230_p5, %p2492_p9 }
 0x4d7   : > { %p2236_p11 = por %p2235_p10, %p2234_p8 }
 0x4d8   : > { %p2232_p7 = pneg %p2231_p6 }
 0x4d9   : > { %p2238_p0 = por %p2237_p12, %p2236_p11 }
 0x4db   : > { %p2239_p1 = pnand %p2238_p0, %p2232_p7 }
 0x4dd   : > { %2242 = shalt.err (!%p2239_p1)
}
 0x4de   : > { %s2345_s18 = smov 128   ;;  %s2346_s25 = smov 8  }
 0x4df   : > { %2077 = dma.vmem_to_hbm [thread:$0]  (%p2492_p9), %s3072_s26, 2048, %s3077_s17, %s3081_s28, %s2345_s18, %s2345_s18, %s2346_s25  }
 0x4e0 PF: > { %p2083_p2 = scmp.ge.s32.totalorder %s2341_s24, 2  ;;  %s1635_s5 = sand.u32 1, %s2297_s13  }
 0x4e1   : > { %s1636_s23 = scalar_lea.sflag [#allocation6], %s1635_s5 }
 0x4e2   : > { %p2080_p3 = pnand %p2083_p2, %p2501_p13 }
 0x4e4   : > { %2292 = dma.done.wait (!%p2080_p3), %s1636_s23, 2048  }
 0x4e5   : > { %2294 = vsyncadd (!%p2080_p3), %s1636_s23, 4294965248  ;;  %s23_s24 = sadd.s32 1, %s2341_s24   ;;  %s3193_s4 = sld [smem:[#allocation8_spill]] }
 0x4e6   : > { %p20_p4 = scmp.ge.s32.totalorder %s23_s24, 10   ;;  %s3194_s15 = sld [smem:[#allocation17_spill]] }
 0x4e7   : > { %s3195_s16 = sld [smem:[#allocation9_spill]]  ;;  %s3196_s17 = sld [smem:[#allocation15_spill]] }
 0x4e8   : > { %s3197_s18 = sld [smem:[#allocation10_spill]]  ;;  %s3198_s19 = sld [smem:[#allocation11_spill]] }
 0x4e9   : > { %s3199_s20 = sld [smem:[#allocation12_spill]]  ;;  %s3200_s21 = sld [smem:[#allocation13_spill]] }
 0x4ea   : > { %s3201_s22 = sld [smem:[#allocation14_spill]]  ;;  %s3202_s23 = sld [smem:[#allocation16_spill]] }
 0x4eb   : > { %s3203_s13 = smov %s2301_s14  ;;  %s3204_s14 = smov %s3193_s4 }
 0x4ec   :  { %22 = sbr.rel (!%p20_p4) target bundleno = 14 (0xe), region = 143 }
 0x4f3   :  { %1641 = vsyncpa [#allocation6], 1 }
 0x4f4   :  { %1643 = vsyncpa [#allocation6 + $0x1], 1 }

// kernel: transformer_layer.4
= control target key start
LH: loop header
LB: loop body
LE: loop exit
PB: predicated region body
PF: predicated region fallthrough
CT: control target
= control target key end

     0   :  { %s7337_s12 = smov 0   ;;  %s7339_s13 = smov 0   ;;  %s10547_s0 = inlined_call_operand.vmem [shape: f32[2,256,128], index: 0, kind: input, shape index: {}]   ;;  %s10548_s1 = inlined_call_operand.vmem [shape: f32[2,256,128], index: 1, kind: input, shape index: {}]   ;;  %s10549_s2 = inlined_call_operand.vmem [shape: f32[2,256,128], index: 2, kind: input, shape index: {}]   ;;  %s10550_s3 = inlined_call_operand.vmem [shape: f32[2,256,128], index: 3, kind: output, shape index: {}]  }
   0x1   :  { %s7341_s14 = smov 0   ;;  %s7343_s15 = smov 0  }
   0x2   :  { %s7345_s16 = smov 0   ;;  %s7347_s17 = smov 0  }
   0x3   :  { %s7349_s18 = smov 0  }
   0x4 LB: > { %s25_s19 = sadd.s32 1, %s7293_s15  ;;  %s28_s20 = sadd.s32 1, %s7297_s16  ;;  %s7305_s18 = sphi %s7349_s18, %s13_s18   ;;  %s7301_s17 = sphi %s7347_s17, %s11099_s17   ;;  %s7297_s16 = sphi %s7345_s16, %s11098_s16   ;;  %s7293_s15 = sphi %s7343_s15, %s11097_s15   ;;  %s7289_s14 = sphi %s7341_s14, %s11096_s14   ;;  %s7285_s13 = sphi %s7339_s13, %s11095_s13   ;;  %s7281_s12 = sphi %s7337_s12, %s11094_s12  }
   0x5   : > { %p26_p0 = scmp.ge.s32.totalorder %s25_s19, 2  ;;  %p5304_p1 = scmp.ge.s32.totalorder %s7305_s18, 1 }
   0x6   : > { %p199_p2 = scmp.lt.s32.totalorder %s7305_s18, 9  ;;  %s32_s21 = sadd.s32 1, %s7301_s17 }
   0x7   : > { %s11101_s19 = smov (%p26_p0, %s25_s19), 0  ;;  %s11103_s20 = smov (!%p26_p0, %s28_s20), %s7297_s16 }
   0x8   : > { %p200_p3 = pnand %p5304_p1, %p199_p2  ;;  %p30_p4 = scmp.ge.s32.totalorder %s11103_s20, 2 }
   0xa   : > { %s11105_s20 = smov (%p30_p4, %s11103_s20), 0  ;;  %s11107_s21 = smov (!%p30_p4, %s32_s21), %s7301_s17 }
   0xb   : > { %p34_p5 = scmp.ge.s32.totalorder %s11107_s21, 2  ;;  %203 = sbr.rel (%p200_p3) target bundleno = 3086 (0xc0e), region = 32 }
   0xd   : > { %s11109_s21 = smov (%p34_p5, %s11107_s21), 0 }
  0x12   : > { %s5305_s22 = sshll.u32 %s7285_s13, 4  ;;  %p250_p6 = scmp.lt.s32.totalorder %s7289_s14, 1 }
  0x13   : > { %p252_p7 = scmp.lt.s32.totalorder %s5305_s22, 31  ;;  %s5308_s23 = sshll.u32 %s7281_s12, 4 }
  0x14   : > { %s11111_s14 = smov (!%p250_p6, %s7289_s14), 1  ;;  %p262_p8 = scmp.lt.s32.totalorder %s5308_s23, 31 }
  0x15   : > { %s11113_s22 = smov (!%p252_p7, %s5305_s22), 31  ;;  %s5306_s24 = sshll.u32 %s11111_s14, 5 }
  0x16   : > { %s255_s25 = sadd.s32 %s5306_s24, %s11113_s22  ;;  %s11115_s23 = smov (!%p262_p8, %s5308_s23), 31 }
  0x17   : > { %s5307_s26 = sshll.u32 %s255_s25, 3  ;;  %s265_s6 = sadd.s32 %s5306_s24, %s11115_s23 }
  0x18   : > { %s7385_s29 = scalar_lea.vmem %s10547_s0, %s5307_s26  ;;  %s7390_s5 = scalar_lea.vmem %s10550_s3, %s5307_s26 }
  0x19   : > { %s5310_s7 = sshll.u32 %s265_s6, 3  ;;  %p5317_p9 = scmp.ne.s32.totalorder %s7281_s12, 0 }
  0x1a   : > { %s7395_s10 = scalar_lea.vmem %s10548_s1, %s5310_s7  ;;  %s7400_s14 = scalar_lea.vmem %s10549_s2, %s5310_s7  ;;  %vm293_vm0 = vcmask (!%p5317_p9), 7168   ;;  %vm422_vm1 = vcmask (!%p5317_p9), 261120   ;;  %v7307_v0 = vmov (!%p5317_p9), -inf   ;;  %v7308_v1 = vmov (!%p5317_p9), 0.0  }
  0x1b   : > { %292 = sbr.rel (%p5317_p9) target bundleno = 123 (0x7b), region = 36  ;;  %294 = vst.msk [vmem:[#allocation2] sm:$0xff] (!%p5317_p9), %vm293_vm0, %v7307_v0  ;;  %295 = vst.msk [vmem:[#allocation2 + $0x8] sm:$0xff] (!%p5317_p9), %vm293_vm0, %v7307_v0 }
  0x1c   : > { %296 = vst.msk [vmem:[#allocation2 + $0x10] sm:$0xff] (!%p5317_p9), %vm293_vm0, %v7307_v0  ;;  %297 = vst.msk [vmem:[#allocation2 + $0x18] sm:$0xff] (!%p5317_p9), %vm293_vm0, %v7307_v0 }
  0x1d   : > { %298 = vst.msk [vmem:[#allocation2 + $0x20] sm:$0xff] (!%p5317_p9), %vm293_vm0, %v7307_v0  ;;  %299 = vst.msk [vmem:[#allocation2 + $0x28] sm:$0xff] (!%p5317_p9), %vm293_vm0, %v7307_v0 }
  0x1e   : > { %300 = vst.msk [vmem:[#allocation2 + $0x30] sm:$0xff] (!%p5317_p9), %vm293_vm0, %v7307_v0  ;;  %301 = vst.msk [vmem:[#allocation2 + $0x38] sm:$0xff] (!%p5317_p9), %vm293_vm0, %v7307_v0 }
  0x1f   : > { %302 = vst.msk [vmem:[#allocation2 + $0x40] sm:$0xff] (!%p5317_p9), %vm293_vm0, %v7307_v0  ;;  %303 = vst.msk [vmem:[#allocation2 + $0x48] sm:$0xff] (!%p5317_p9), %vm293_vm0, %v7307_v0 }
  0x20   : > { %304 = vst.msk [vmem:[#allocation2 + $0x50] sm:$0xff] (!%p5317_p9), %vm293_vm0, %v7307_v0  ;;  %305 = vst.msk [vmem:[#allocation2 + $0x58] sm:$0xff] (!%p5317_p9), %vm293_vm0, %v7307_v0 }
  0x21   : > { %306 = vst.msk [vmem:[#allocation2 + $0x60] sm:$0xff] (!%p5317_p9), %vm293_vm0, %v7307_v0  ;;  %307 = vst.msk [vmem:[#allocation2 + $0x68] sm:$0xff] (!%p5317_p9), %vm293_vm0, %v7307_v0 }
  0x22   : > { %308 = vst.msk [vmem:[#allocation2 + $0x70] sm:$0xff] %vm293_vm0, %v7307_v0  ;;  %309 = vst.msk [vmem:[#allocation2 + $0x78] sm:$0xff] %vm293_vm0, %v7307_v0 }
  0x23   : > { %310 = vst.msk [vmem:[#allocation2 + $0x80] sm:$0xff] %vm293_vm0, %v7307_v0  ;;  %311 = vst.msk [vmem:[#allocation2 + $0x88] sm:$0xff] %vm293_vm0, %v7307_v0 }
  0x24   : > { %312 = vst.msk [vmem:[#allocation2 + $0x90] sm:$0xff] %vm293_vm0, %v7307_v0  ;;  %313 = vst.msk [vmem:[#allocation2 + $0x98] sm:$0xff] %vm293_vm0, %v7307_v0 }
  0x25   : > { %314 = vst.msk [vmem:[#allocation2 + $0xa0] sm:$0xff] %vm293_vm0, %v7307_v0  ;;  %315 = vst.msk [vmem:[#allocation2 + $0xa8] sm:$0xff] %vm293_vm0, %v7307_v0 }
  0x26   : > { %316 = vst.msk [vmem:[#allocation2 + $0xb0] sm:$0xff] %vm293_vm0, %v7307_v0  ;;  %317 = vst.msk [vmem:[#allocation2 + $0xb8] sm:$0xff] %vm293_vm0, %v7307_v0 }
  0x27   : > { %318 = vst.msk [vmem:[#allocation2 + $0xc0] sm:$0xff] %vm293_vm0, %v7307_v0  ;;  %319 = vst.msk [vmem:[#allocation2 + $0xc8] sm:$0xff] %vm293_vm0, %v7307_v0 }
  0x28   : > { %320 = vst.msk [vmem:[#allocation2 + $0xd0] sm:$0xff] %vm293_vm0, %v7307_v0  ;;  %321 = vst.msk [vmem:[#allocation2 + $0xd8] sm:$0xff] %vm293_vm0, %v7307_v0 }
  0x29   : > { %322 = vst.msk [vmem:[#allocation2 + $0xe0] sm:$0xff] %vm293_vm0, %v7307_v0  ;;  %323 = vst.msk [vmem:[#allocation2 + $0xe8] sm:$0xff] %vm293_vm0, %v7307_v0 }
  0x2a   : > { %324 = vst.msk [vmem:[#allocation2 + $0xf0] sm:$0xff] %vm293_vm0, %v7307_v0  ;;  %325 = vst.msk [vmem:[#allocation2 + $0xf8] sm:$0xff] %vm293_vm0, %v7307_v0 }
  0x2b   : > { %326 = vst.msk [vmem:[#allocation2 + $0x100] sm:$0xff] %vm293_vm0, %v7307_v0  ;;  %327 = vst.msk [vmem:[#allocation2 + $0x108] sm:$0xff] %vm293_vm0, %v7307_v0 }
  0x2c   : > { %328 = vst.msk [vmem:[#allocation2 + $0x110] sm:$0xff] %vm293_vm0, %v7307_v0  ;;  %329 = vst.msk [vmem:[#allocation2 + $0x118] sm:$0xff] %vm293_vm0, %v7307_v0 }
  0x2d   : > { %330 = vst.msk [vmem:[#allocation2 + $0x120] sm:$0xff] %vm293_vm0, %v7307_v0  ;;  %331 = vst.msk [vmem:[#allocation2 + $0x128] sm:$0xff] %vm293_vm0, %v7307_v0 }
  0x2e   : > { %332 = vst.msk [vmem:[#allocation2 + $0x130] sm:$0xff] %vm293_vm0, %v7307_v0  ;;  %333 = vst.msk [vmem:[#allocation2 + $0x138] sm:$0xff] %vm293_vm0, %v7307_v0 }
  0x2f   : > { %334 = vst.msk [vmem:[#allocation2 + $0x140] sm:$0xff] %vm293_vm0, %v7307_v0  ;;  %335 = vst.msk [vmem:[#allocation2 + $0x148] sm:$0xff] %vm293_vm0, %v7307_v0 }
  0x30   : > { %336 = vst.msk [vmem:[#allocation2 + $0x150] sm:$0xff] %vm293_vm0, %v7307_v0  ;;  %337 = vst.msk [vmem:[#allocation2 + $0x158] sm:$0xff] %vm293_vm0, %v7307_v0 }
  0x31   : > { %338 = vst.msk [vmem:[#allocation2 + $0x160] sm:$0xff] %vm293_vm0, %v7307_v0  ;;  %339 = vst.msk [vmem:[#allocation2 + $0x168] sm:$0xff] %vm293_vm0, %v7307_v0 }
  0x32   : > { %340 = vst.msk [vmem:[#allocation2 + $0x170] sm:$0xff] %vm293_vm0, %v7307_v0  ;;  %341 = vst.msk [vmem:[#allocation2 + $0x178] sm:$0xff] %vm293_vm0, %v7307_v0 }
  0x33   : > { %342 = vst.msk [vmem:[#allocation2 + $0x180] sm:$0xff] %vm293_vm0, %v7307_v0  ;;  %343 = vst.msk [vmem:[#allocation2 + $0x188] sm:$0xff] %vm293_vm0, %v7307_v0 }
  0x34   : > { %344 = vst.msk [vmem:[#allocation2 + $0x190] sm:$0xff] %vm293_vm0, %v7307_v0  ;;  %345 = vst.msk [vmem:[#allocation2 + $0x198] sm:$0xff] %vm293_vm0, %v7307_v0 }
  0x35   : > { %346 = vst.msk [vmem:[#allocation2 + $0x1a0] sm:$0xff] %vm293_vm0, %v7307_v0  ;;  %347 = vst.msk [vmem:[#allocation2 + $0x1a8] sm:$0xff] %vm293_vm0, %v7307_v0 }
  0x36   : > { %348 = vst.msk [vmem:[#allocation2 + $0x1b0] sm:$0xff] %vm293_vm0, %v7307_v0  ;;  %349 = vst.msk [vmem:[#allocation2 + $0x1b8] sm:$0xff] %vm293_vm0, %v7307_v0 }
  0x37   : > { %350 = vst.msk [vmem:[#allocation2 + $0x1c0] sm:$0xff] %vm293_vm0, %v7307_v0  ;;  %351 = vst.msk [vmem:[#allocation2 + $0x1c8] sm:$0xff] %vm293_vm0, %v7307_v0 }
  0x38   : > { %352 = vst.msk [vmem:[#allocation2 + $0x1d0] sm:$0xff] %vm293_vm0, %v7307_v0  ;;  %353 = vst.msk [vmem:[#allocation2 + $0x1d8] sm:$0xff] %vm293_vm0, %v7307_v0 }
  0x39   : > { %354 = vst.msk [vmem:[#allocation2 + $0x1e0] sm:$0xff] %vm293_vm0, %v7307_v0  ;;  %355 = vst.msk [vmem:[#allocation2 + $0x1e8] sm:$0xff] %vm293_vm0, %v7307_v0 }
  0x3a   : > { %356 = vst.msk [vmem:[#allocation2 + $0x1f0] sm:$0xff] %vm293_vm0, %v7307_v0  ;;  %357 = vst.msk [vmem:[#allocation2 + $0x1f8] sm:$0xff] %vm293_vm0, %v7307_v0 }
  0x3b   : > { %358 = vst.msk [vmem:[#allocation3] sm:$0xff] %vm293_vm0, %v7308_v1  ;;  %359 = vst.msk [vmem:[#allocation3 + $0x8] sm:$0xff] %vm293_vm0, %v7308_v1 }
  0x3c   : > { %360 = vst.msk [vmem:[#allocation3 + $0x10] sm:$0xff] %vm293_vm0, %v7308_v1  ;;  %361 = vst.msk [vmem:[#allocation3 + $0x18] sm:$0xff] %vm293_vm0, %v7308_v1 }
  0x3d   : > { %362 = vst.msk [vmem:[#allocation3 + $0x20] sm:$0xff] %vm293_vm0, %v7308_v1  ;;  %363 = vst.msk [vmem:[#allocation3 + $0x28] sm:$0xff] %vm293_vm0, %v7308_v1 }
  0x3e   : > { %364 = vst.msk [vmem:[#allocation3 + $0x30] sm:$0xff] %vm293_vm0, %v7308_v1  ;;  %365 = vst.msk [vmem:[#allocation3 + $0x38] sm:$0xff] %vm293_vm0, %v7308_v1 }
  0x3f   : > { %366 = vst.msk [vmem:[#allocation3 + $0x40] sm:$0xff] %vm293_vm0, %v7308_v1  ;;  %367 = vst.msk [vmem:[#allocation3 + $0x48] sm:$0xff] %vm293_vm0, %v7308_v1 }
  0x40   : > { %368 = vst.msk [vmem:[#allocation3 + $0x50] sm:$0xff] %vm293_vm0, %v7308_v1  ;;  %369 = vst.msk [vmem:[#allocation3 + $0x58] sm:$0xff] %vm293_vm0, %v7308_v1 }
  0x41   : > { %370 = vst.msk [vmem:[#allocation3 + $0x60] sm:$0xff] %vm293_vm0, %v7308_v1  ;;  %371 = vst.msk [vmem:[#allocation3 + $0x68] sm:$0xff] %vm293_vm0, %v7308_v1 }
  0x42   : > { %372 = vst.msk [vmem:[#allocation3 + $0x70] sm:$0xff] %vm293_vm0, %v7308_v1  ;;  %373 = vst.msk [vmem:[#allocation3 + $0x78] sm:$0xff] %vm293_vm0, %v7308_v1 }
  0x43   : > { %374 = vst.msk [vmem:[#allocation3 + $0x80] sm:$0xff] %vm293_vm0, %v7308_v1  ;;  %375 = vst.msk [vmem:[#allocation3 + $0x88] sm:$0xff] %vm293_vm0, %v7308_v1 }
  0x44   : > { %376 = vst.msk [vmem:[#allocation3 + $0x90] sm:$0xff] %vm293_vm0, %v7308_v1  ;;  %377 = vst.msk [vmem:[#allocation3 + $0x98] sm:$0xff] %vm293_vm0, %v7308_v1 }
  0x45   : > { %378 = vst.msk [vmem:[#allocation3 + $0xa0] sm:$0xff] %vm293_vm0, %v7308_v1  ;;  %379 = vst.msk [vmem:[#allocation3 + $0xa8] sm:$0xff] %vm293_vm0, %v7308_v1 }
  0x46   : > { %380 = vst.msk [vmem:[#allocation3 + $0xb0] sm:$0xff] %vm293_vm0, %v7308_v1  ;;  %381 = vst.msk [vmem:[#allocation3 + $0xb8] sm:$0xff] %vm293_vm0, %v7308_v1 }
  0x47   : > { %382 = vst.msk [vmem:[#allocation3 + $0xc0] sm:$0xff] %vm293_vm0, %v7308_v1  ;;  %383 = vst.msk [vmem:[#allocation3 + $0xc8] sm:$0xff] %vm293_vm0, %v7308_v1 }
  0x48   : > { %384 = vst.msk [vmem:[#allocation3 + $0xd0] sm:$0xff] %vm293_vm0, %v7308_v1  ;;  %385 = vst.msk [vmem:[#allocation3 + $0xd8] sm:$0xff] %vm293_vm0, %v7308_v1 }
  0x49   : > { %386 = vst.msk [vmem:[#allocation3 + $0xe0] sm:$0xff] %vm293_vm0, %v7308_v1  ;;  %387 = vst.msk [vmem:[#allocation3 + $0xe8] sm:$0xff] %vm293_vm0, %v7308_v1 }
  0x4a   : > { %388 = vst.msk [vmem:[#allocation3 + $0xf0] sm:$0xff] %vm293_vm0, %v7308_v1  ;;  %389 = vst.msk [vmem:[#allocation3 + $0xf8] sm:$0xff] %vm293_vm0, %v7308_v1 }
  0x4b   : > { %390 = vst.msk [vmem:[#allocation3 + $0x100] sm:$0xff] %vm293_vm0, %v7308_v1  ;;  %391 = vst.msk [vmem:[#allocation3 + $0x108] sm:$0xff] %vm293_vm0, %v7308_v1 }
  0x4c   : > { %392 = vst.msk [vmem:[#allocation3 + $0x110] sm:$0xff] %vm293_vm0, %v7308_v1  ;;  %393 = vst.msk [vmem:[#allocation3 + $0x118] sm:$0xff] %vm293_vm0, %v7308_v1 }
  0x4d   : > { %394 = vst.msk [vmem:[#allocation3 + $0x120] sm:$0xff] %vm293_vm0, %v7308_v1  ;;  %395 = vst.msk [vmem:[#allocation3 + $0x128] sm:$0xff] %vm293_vm0, %v7308_v1 }
  0x4e   : > { %396 = vst.msk [vmem:[#allocation3 + $0x130] sm:$0xff] %vm293_vm0, %v7308_v1  ;;  %397 = vst.msk [vmem:[#allocation3 + $0x138] sm:$0xff] %vm293_vm0, %v7308_v1 }
  0x4f   : > { %398 = vst.msk [vmem:[#allocation3 + $0x140] sm:$0xff] %vm293_vm0, %v7308_v1  ;;  %399 = vst.msk [vmem:[#allocation3 + $0x148] sm:$0xff] %vm293_vm0, %v7308_v1 }
  0x50   : > { %400 = vst.msk [vmem:[#allocation3 + $0x150] sm:$0xff] %vm293_vm0, %v7308_v1  ;;  %401 = vst.msk [vmem:[#allocation3 + $0x158] sm:$0xff] %vm293_vm0, %v7308_v1 }
  0x51   : > { %402 = vst.msk [vmem:[#allocation3 + $0x160] sm:$0xff] %vm293_vm0, %v7308_v1  ;;  %403 = vst.msk [vmem:[#allocation3 + $0x168] sm:$0xff] %vm293_vm0, %v7308_v1 }
  0x52   : > { %404 = vst.msk [vmem:[#allocation3 + $0x170] sm:$0xff] %vm293_vm0, %v7308_v1  ;;  %405 = vst.msk [vmem:[#allocation3 + $0x178] sm:$0xff] %vm293_vm0, %v7308_v1 }
  0x53   : > { %406 = vst.msk [vmem:[#allocation3 + $0x180] sm:$0xff] %vm293_vm0, %v7308_v1  ;;  %407 = vst.msk [vmem:[#allocation3 + $0x188] sm:$0xff] %vm293_vm0, %v7308_v1 }
  0x54   : > { %408 = vst.msk [vmem:[#allocation3 + $0x190] sm:$0xff] %vm293_vm0, %v7308_v1  ;;  %409 = vst.msk [vmem:[#allocation3 + $0x198] sm:$0xff] %vm293_vm0, %v7308_v1 }
  0x55   : > { %410 = vst.msk [vmem:[#allocation3 + $0x1a0] sm:$0xff] %vm293_vm0, %v7308_v1  ;;  %411 = vst.msk [vmem:[#allocation3 + $0x1a8] sm:$0xff] %vm293_vm0, %v7308_v1 }
  0x56   : > { %412 = vst.msk [vmem:[#allocation3 + $0x1b0] sm:$0xff] %vm293_vm0, %v7308_v1  ;;  %413 = vst.msk [vmem:[#allocation3 + $0x1b8] sm:$0xff] %vm293_vm0, %v7308_v1 }
  0x57   : > { %414 = vst.msk [vmem:[#allocation3 + $0x1c0] sm:$0xff] %vm293_vm0, %v7308_v1  ;;  %415 = vst.msk [vmem:[#allocation3 + $0x1c8] sm:$0xff] %vm293_vm0, %v7308_v1 }
  0x58   : > { %416 = vst.msk [vmem:[#allocation3 + $0x1d0] sm:$0xff] %vm293_vm0, %v7308_v1  ;;  %417 = vst.msk [vmem:[#allocation3 + $0x1d8] sm:$0xff] %vm293_vm0, %v7308_v1 }
  0x59   : > { %418 = vst.msk [vmem:[#allocation3 + $0x1e0] sm:$0xff] %vm293_vm0, %v7308_v1  ;;  %419 = vst.msk [vmem:[#allocation3 + $0x1e8] sm:$0xff] %vm293_vm0, %v7308_v1 }
  0x5a   : > { %420 = vst.msk [vmem:[#allocation3 + $0x1f0] sm:$0xff] %vm293_vm0, %v7308_v1  ;;  %421 = vst.msk [vmem:[#allocation3 + $0x1f8] sm:$0xff] %vm293_vm0, %v7308_v1 }
  0x5b   : > { %423 = vst.msk [vmem:[#allocation4] sm:$0xff] %vm422_vm1, %v7308_v1  ;;  %424 = vst.msk [vmem:[#allocation4 + $0x8] sm:$0xff] %vm422_vm1, %v7308_v1 }
  0x5c   : > { %425 = vst.msk [vmem:[#allocation4 + $0x10] sm:$0xff] %vm422_vm1, %v7308_v1  ;;  %426 = vst.msk [vmem:[#allocation4 + $0x18] sm:$0xff] %vm422_vm1, %v7308_v1 }
  0x5d   : > { %427 = vst.msk [vmem:[#allocation4 + $0x20] sm:$0xff] %vm422_vm1, %v7308_v1  ;;  %428 = vst.msk [vmem:[#allocation4 + $0x28] sm:$0xff] %vm422_vm1, %v7308_v1 }
  0x5e   : > { %429 = vst.msk [vmem:[#allocation4 + $0x30] sm:$0xff] %vm422_vm1, %v7308_v1  ;;  %430 = vst.msk [vmem:[#allocation4 + $0x38] sm:$0xff] %vm422_vm1, %v7308_v1 }
  0x5f   : > { %431 = vst.msk [vmem:[#allocation4 + $0x40] sm:$0xff] %vm422_vm1, %v7308_v1  ;;  %432 = vst.msk [vmem:[#allocation4 + $0x48] sm:$0xff] %vm422_vm1, %v7308_v1 }
  0x60   : > { %433 = vst.msk [vmem:[#allocation4 + $0x50] sm:$0xff] %vm422_vm1, %v7308_v1  ;;  %434 = vst.msk [vmem:[#allocation4 + $0x58] sm:$0xff] %vm422_vm1, %v7308_v1 }
  0x61   : > { %435 = vst.msk [vmem:[#allocation4 + $0x60] sm:$0xff] %vm422_vm1, %v7308_v1  ;;  %436 = vst.msk [vmem:[#allocation4 + $0x68] sm:$0xff] %vm422_vm1, %v7308_v1 }
  0x62   : > { %437 = vst.msk [vmem:[#allocation4 + $0x70] sm:$0xff] %vm422_vm1, %v7308_v1  ;;  %438 = vst.msk [vmem:[#allocation4 + $0x78] sm:$0xff] %vm422_vm1, %v7308_v1 }
  0x63   : > { %439 = vst.msk [vmem:[#allocation4 + $0x80] sm:$0xff] %vm422_vm1, %v7308_v1  ;;  %440 = vst.msk [vmem:[#allocation4 + $0x88] sm:$0xff] %vm422_vm1, %v7308_v1 }
  0x64   : > { %441 = vst.msk [vmem:[#allocation4 + $0x90] sm:$0xff] %vm422_vm1, %v7308_v1  ;;  %442 = vst.msk [vmem:[#allocation4 + $0x98] sm:$0xff] %vm422_vm1, %v7308_v1 }
  0x65   : > { %443 = vst.msk [vmem:[#allocation4 + $0xa0] sm:$0xff] %vm422_vm1, %v7308_v1  ;;  %444 = vst.msk [vmem:[#allocation4 + $0xa8] sm:$0xff] %vm422_vm1, %v7308_v1 }
  0x66   : > { %445 = vst.msk [vmem:[#allocation4 + $0xb0] sm:$0xff] %vm422_vm1, %v7308_v1  ;;  %446 = vst.msk [vmem:[#allocation4 + $0xb8] sm:$0xff] %vm422_vm1, %v7308_v1 }
  0x67   : > { %447 = vst.msk [vmem:[#allocation4 + $0xc0] sm:$0xff] %vm422_vm1, %v7308_v1  ;;  %448 = vst.msk [vmem:[#allocation4 + $0xc8] sm:$0xff] %vm422_vm1, %v7308_v1 }
  0x68   : > { %449 = vst.msk [vmem:[#allocation4 + $0xd0] sm:$0xff] %vm422_vm1, %v7308_v1  ;;  %450 = vst.msk [vmem:[#allocation4 + $0xd8] sm:$0xff] %vm422_vm1, %v7308_v1 }
  0x69   : > { %451 = vst.msk [vmem:[#allocation4 + $0xe0] sm:$0xff] %vm422_vm1, %v7308_v1  ;;  %452 = vst.msk [vmem:[#allocation4 + $0xe8] sm:$0xff] %vm422_vm1, %v7308_v1 }
  0x6a   : > { %453 = vst.msk [vmem:[#allocation4 + $0xf0] sm:$0xff] %vm422_vm1, %v7308_v1  ;;  %454 = vst.msk [vmem:[#allocation4 + $0xf8] sm:$0xff] %vm422_vm1, %v7308_v1 }
  0x6b   : > { %455 = vst.msk [vmem:[#allocation4 + $0x100] sm:$0xff] %vm422_vm1, %v7308_v1  ;;  %456 = vst.msk [vmem:[#allocation4 + $0x108] sm:$0xff] %vm422_vm1, %v7308_v1 }
  0x6c   : > { %457 = vst.msk [vmem:[#allocation4 + $0x110] sm:$0xff] %vm422_vm1, %v7308_v1  ;;  %458 = vst.msk [vmem:[#allocation4 + $0x118] sm:$0xff] %vm422_vm1, %v7308_v1 }
  0x6d   : > { %459 = vst.msk [vmem:[#allocation4 + $0x120] sm:$0xff] %vm422_vm1, %v7308_v1  ;;  %460 = vst.msk [vmem:[#allocation4 + $0x128] sm:$0xff] %vm422_vm1, %v7308_v1 }
  0x6e   : > { %461 = vst.msk [vmem:[#allocation4 + $0x130] sm:$0xff] %vm422_vm1, %v7308_v1  ;;  %462 = vst.msk [vmem:[#allocation4 + $0x138] sm:$0xff] %vm422_vm1, %v7308_v1 }
  0x6f   : > { %463 = vst.msk [vmem:[#allocation4 + $0x140] sm:$0xff] %vm422_vm1, %v7308_v1  ;;  %464 = vst.msk [vmem:[#allocation4 + $0x148] sm:$0xff] %vm422_vm1, %v7308_v1 }
  0x70   : > { %465 = vst.msk [vmem:[#allocation4 + $0x150] sm:$0xff] %vm422_vm1, %v7308_v1  ;;  %466 = vst.msk [vmem:[#allocation4 + $0x158] sm:$0xff] %vm422_vm1, %v7308_v1 }
  0x71   : > { %467 = vst.msk [vmem:[#allocation4 + $0x160] sm:$0xff] %vm422_vm1, %v7308_v1  ;;  %468 = vst.msk [vmem:[#allocation4 + $0x168] sm:$0xff] %vm422_vm1, %v7308_v1 }
  0x72   : > { %469 = vst.msk [vmem:[#allocation4 + $0x170] sm:$0xff] %vm422_vm1, %v7308_v1  ;;  %470 = vst.msk [vmem:[#allocation4 + $0x178] sm:$0xff] %vm422_vm1, %v7308_v1 }
  0x73   : > { %471 = vst.msk [vmem:[#allocation4 + $0x180] sm:$0xff] %vm422_vm1, %v7308_v1  ;;  %472 = vst.msk [vmem:[#allocation4 + $0x188] sm:$0xff] %vm422_vm1, %v7308_v1 }
  0x74   : > { %473 = vst.msk [vmem:[#allocation4 + $0x190] sm:$0xff] %vm422_vm1, %v7308_v1  ;;  %474 = vst.msk [vmem:[#allocation4 + $0x198] sm:$0xff] %vm422_vm1, %v7308_v1 }
  0x75   : > { %475 = vst.msk [vmem:[#allocation4 + $0x1a0] sm:$0xff] %vm422_vm1, %v7308_v1  ;;  %476 = vst.msk [vmem:[#allocation4 + $0x1a8] sm:$0xff] %vm422_vm1, %v7308_v1 }
  0x76   : > { %477 = vst.msk [vmem:[#allocation4 + $0x1b0] sm:$0xff] %vm422_vm1, %v7308_v1  ;;  %478 = vst.msk [vmem:[#allocation4 + $0x1b8] sm:$0xff] %vm422_vm1, %v7308_v1 }
  0x77   : > { %479 = vst.msk [vmem:[#allocation4 + $0x1c0] sm:$0xff] %vm422_vm1, %v7308_v1  ;;  %480 = vst.msk [vmem:[#allocation4 + $0x1c8] sm:$0xff] %vm422_vm1, %v7308_v1 }
  0x78   : > { %481 = vst.msk [vmem:[#allocation4 + $0x1d0] sm:$0xff] %vm422_vm1, %v7308_v1  ;;  %482 = vst.msk [vmem:[#allocation4 + $0x1d8] sm:$0xff] %vm422_vm1, %v7308_v1 }
  0x79   : > { %483 = vst.msk [vmem:[#allocation4 + $0x1e0] sm:$0xff] %vm422_vm1, %v7308_v1  ;;  %484 = vst.msk [vmem:[#allocation4 + $0x1e8] sm:$0xff] %vm422_vm1, %v7308_v1 }
  0x7a   : > { %485 = vst.msk [vmem:[#allocation4 + $0x1f0] sm:$0xff] %vm422_vm1, %v7308_v1  ;;  %486 = vst.msk [vmem:[#allocation4 + $0x1f8] sm:$0xff] %vm422_vm1, %v7308_v1 }
  0x7b PF: > { %v7788_v2 = vld [vmem:[%s7395_s10] sm:$0xff]  ;;  %v7791_v3 = vld [vmem:[%s7395_s10 + $0x8] sm:$0xff]  ;;  %vm535_vm2 = vcmask 261120   ;;  %v7794_v4 = vld [vmem:[%s7395_s10 + $0x10] sm:$0xff]  ;;  %v7309_v53 = vmov 0   ;;  %vm1097_vm4 = vcmask 7168  }
  0x7c   : > { %v6153_v5 = vpack.c.bf16 %v7791_v3, %v7788_v2  ;;  %vm7800_vm3 = vmpackc.low %vm535_vm2, %vm535_vm2  ;;  %v7805_v7 = vld [vmem:[%s7395_s10 + $0x18] sm:$0xff]  ;;  %v7816_v9 = vld [vmem:[%s7385_s29] sm:$0xff]  ;;  %6539 = vset.pattern.permute.xlu0 %v7309_v53  ;;  %6540 = vset.pattern.permute.xlu1 %v7309_v53  ;;  %s7310_s22 = smov 96   ;;  %s7311_s23 = smov 64  }
  0x7d   : > { %v6159_v8 = vpack.c.bf16 %v7805_v7, %v7794_v4  ;;  %v7819_v10 = vld [vmem:[%s7395_s10 + $0x20] sm:$0xff]  ;;  %v7822_v11 = vld [vmem:[%s7395_s10 + $0x28] sm:$0xff]  ;;  %5737 = vmatprep.mubr.msk.f32.mxu0 %vm535_vm2, %v7816_v9  ;;  %v7833_v13 = vld [vmem:[%s7395_s10 + $0x30] sm:$0xff]  ;;  %s7312_s24 = smov 32   ;;  %p5446_p10 = scmp.ne.s32.totalorder %s7281_s12, 1 }
  0x7e   : > { %6155 = vmatprep.subr.msk.bf16.mxu0 %vm7800_vm3, %v6153_v5  ;;  %v6165_v12 = vpack.c.bf16 %v7822_v11, %v7819_v10  ;;  %v7836_v14 = vld [vmem:[%s7395_s10 + $0x38] sm:$0xff]  ;;  %v7845_v16 = vld [vmem:[%s7395_s10 + $0x40] sm:$0xff]  ;;  %v7848_v17 = vld [vmem:[%s7395_s10 + $0x48] sm:$0xff]  ;;  %s7314_s12 = smov (!%p5446_p10), 32   ;;  %s7315_s25 = smov (!%p5446_p10), 64   ;;  %vm5118_vm5 = vcmask (!%p5446_p10), 523264  }
  0x7f   : > { %6158 = vmatpush3.bf16.xpose.msk.msra.mxu0 %vm7800_vm3, %v6153_v5  ;;  %v6171_v15 = vpack.c.bf16 %v7836_v14, %v7833_v13  ;;  %v6177_v18 = vpack.c.bf16 %v7848_v17, %v7845_v16  ;;  %v7857_v19 = vld [vmem:[%s7395_s10 + $0x50] sm:$0xff]  ;;  %v7860_v20 = vld [vmem:[%s7395_s10 + $0x58] sm:$0xff]  ;;  %v7869_v22 = vld [vmem:[%s7395_s10 + $0x60] sm:$0xff]  ;;  %s7316_s26 = smov (!%p5446_p10), 96   ;;  %vm5135_vm6 = vcmask (!%p5446_p10), 785408  }
  0x80   : > { %6161 = vmatprep.subr.msk.bf16.mxu0 %vm7800_vm3, %v6159_v8  ;;  %v6183_v21 = vpack.c.bf16 %v7860_v20, %v7857_v19  ;;  %v7872_v23 = vld [vmem:[%s7395_s10 + $0x68] sm:$0xff]  ;;  %v7881_v25 = vld [vmem:[%s7395_s10 + $0x70] sm:$0xff]  ;;  %v7884_v26 = vld [vmem:[%s7395_s10 + $0x78] sm:$0xff] }
  0x81   : > { %v6189_v24 = vpack.c.bf16 %v7872_v23, %v7869_v22  ;;  %v6195_v27 = vpack.c.bf16 %v7884_v26, %v7881_v25  ;;  %v7895_v28 = vld [vmem:[%s7385_s29 + $0x8] sm:$0xff]  ;;  %v7898_v29 = vld [vmem:[%s7385_s29 + $0x10] sm:$0xff]  ;;  %v7905_v30 = vld [vmem:[%s7385_s29 + $0x18] sm:$0xff] }
  0x82   : > { %v7908_v31 = vld [vmem:[%s7385_s29 + $0x20] sm:$0xff]  ;;  %v7915_v32 = vld [vmem:[%s7385_s29 + $0x28] sm:$0xff]  ;;  %v7918_v33 = vld [vmem:[%s7385_s29 + $0x30] sm:$0xff] }
  0x83   : > { %v7925_v34 = vld [vmem:[%s7385_s29 + $0x38] sm:$0xff]  ;;  %v7928_v35 = vld [vmem:[%s7385_s29 + $0x40] sm:$0xff]  ;;  %v7935_v36 = vld [vmem:[%s7385_s29 + $0x48] sm:$0xff] }
  0x84   : > { %v7938_v37 = vld [vmem:[%s7385_s29 + $0x50] sm:$0xff]  ;;  %v7945_v38 = vld [vmem:[%s7385_s29 + $0x58] sm:$0xff]  ;;  %v7948_v39 = vld [vmem:[%s7385_s29 + $0x60] sm:$0xff] }
  0x85   : > { %v7955_v40 = vld [vmem:[%s7385_s29 + $0x68] sm:$0xff]  ;;  %v7958_v41 = vld [vmem:[%s7385_s29 + $0x70] sm:$0xff]  ;;  %v7965_v42 = vld [vmem:[%s7385_s29 + $0x78] sm:$0xff] }
  0x86   : > { %v8018_v60 = vld [vmem:[%s7400_s14] sm:$0xff]  ;;  %v8021_v61 = vld [vmem:[%s7400_s14 + $0x8] sm:$0xff]  ;;  %v8024_v62 = vld [vmem:[%s7400_s14 + $0x10] sm:$0xff] }
  0x87   : > { %6164 = vmatpush3.bf16.xpose.msk.msra.mxu0 %vm7800_vm3, %v6159_v8  ;;  %10680 = vst [vmem:[#allocation5_spill] sm:$0xff] %v8024_v62  ;;  %v6201_v63 = vpack.c.bf16 %v8021_v61, %v8018_v60  ;;  %v8029_v0 = vld [vmem:[%s7400_s14 + $0x18] sm:$0xff]  ;;  %v8034_v5 = vld [vmem:[%s7400_s14 + $0x20] sm:$0xff]  ;;  %v8037_v8 = vld [vmem:[%s7400_s14 + $0x28] sm:$0xff] }
  0x88   : > { %6167 = vmatprep.subr.msk.bf16.mxu0 %vm7800_vm3, %v6165_v12  ;;  %10681 = vst [vmem:[#allocation6_spill] sm:$0xff] %v8029_v0  ;;  %v6205_v1 = vpack.c.bf16 %v8029_v0, %v8024_v62  ;;  %10682 = vst [vmem:[#allocation7_spill] sm:$0xff] %v8034_v5 }
  0x89   : > { %10683 = vst [vmem:[#allocation8_spill] sm:$0xff] %v8037_v8  ;;  %6202 = vmatprep.subr.bf16.mxu1 %v6201_v63 }
  0x8a   : > { %6204 = vmatpush3.bf16.msra.mxu1 %v6201_v63  ;;  %v8057_v63 = vld [vmem:[#allocation2] sm:$0xff] }
  0x8b   : > { %6206 = vmatprep.subr.bf16.mxu1 %v6205_v1  ;;  %10688 = vst [vmem:[#allocation13_spill] sm:$0xff] %v8057_v63 }
  0x8e   : > { %6208 = vmatpush3.bf16.msra.mxu1 %v6205_v1 }
  0x8f   : > { %6170 = vmatpush3.bf16.xpose.msk.msra.mxu0 %vm7800_vm3, %v6165_v12  ;;  %v6209_v12 = vpack.c.bf16 %v8037_v8, %v8034_v5  ;;  %v8070_v5 = vld [vmem:[#allocation2 + $0x8] sm:$0xff] }
  0x90   : > { %6173 = vmatprep.subr.msk.bf16.mxu0 %vm7800_vm3, %v6171_v15  ;;  %10693 = vst [vmem:[#allocation18_spill] sm:$0xff] %v8070_v5 }
  0x91   : > { %6210 = vmatprep.subr.bf16.mxu1 %v6209_v12 }
  0x92   : > { %6212 = vmatpush3.bf16.msra.mxu1 %v6209_v12  ;;  %v8068_v12 = vld [vmem:[%s7400_s14 + $0x58] sm:$0xff] }
  0x93   : > { %10692 = vst [vmem:[#allocation17_spill] sm:$0xff] %v8068_v12 }
  0x97   : > { %6176 = vmatpush3.bf16.xpose.msk.msra.mxu0 %vm7800_vm3, %v6171_v15  ;;  %v8042_v15 = vld [vmem:[%s7400_s14 + $0x30] sm:$0xff] }
  0x98   : > { %6179 = vmatprep.subr.msk.bf16.mxu0 %vm7800_vm3, %v6177_v18  ;;  %10684 = vst [vmem:[#allocation9_spill] sm:$0xff] %v8042_v15 }
  0x9f   : > { %6182 = vmatpush3.bf16.xpose.msk.msra.mxu0 %vm7800_vm3, %v6177_v18  ;;  %v8045_v18 = vld [vmem:[%s7400_s14 + $0x38] sm:$0xff] }
  0xa0   : > { %6185 = vmatprep.subr.msk.bf16.mxu0 %vm7800_vm3, %v6183_v21  ;;  %10685 = vst [vmem:[#allocation10_spill] sm:$0xff] %v8045_v18 }
  0xa7   : > { %6188 = vmatpush3.bf16.xpose.msk.msra.mxu0 %vm7800_vm3, %v6183_v21  ;;  %v6213_v21 = vpack.c.bf16 %v8045_v18, %v8042_v15  ;;  %v8062_v18 = vld [vmem:[#allocation2 + $0x18] sm:$0xff]  ;;  %v8065_v15 = vld [vmem:[%s7400_s14 + $0x50] sm:$0xff] }
  0xa8   : > { %6191 = vmatprep.subr.msk.bf16.mxu0 %vm7800_vm3, %v6189_v24  ;;  %10690 = vst [vmem:[#allocation15_spill] sm:$0xff] %v8062_v18  ;;  %10691 = vst [vmem:[#allocation16_spill] sm:$0xff] %v8065_v15 }
  0xa9   : > { %6214 = vmatprep.subr.bf16.mxu1 %v6213_v21 }
  0xaa   : > { %6216 = vmatpush3.bf16.msra.mxu1 %v6213_v21  ;;  %v6221_v21 = vpack.c.bf16 %v8068_v12, %v8065_v15  ;;  %v8087_v12 = vld [vmem:[#allocation2 + $0x10] sm:$0xff] }
  0xab   : > { %10695 = vst [vmem:[#allocation20_spill] sm:$0xff] %v8087_v12 }
  0xaf   : > { %6194 = vmatpush3.bf16.xpose.msk.msra.mxu0 %vm7800_vm3, %v6189_v24  ;;  %v8050_v24 = vld [vmem:[%s7400_s14 + $0x40] sm:$0xff] }
  0xb0   : > { %6197 = vmatprep.subr.msk.bf16.mxu0 %vm7800_vm3, %v6195_v27  ;;  %10686 = vst [vmem:[#allocation11_spill] sm:$0xff] %v8050_v24 }
  0xb7   : > { %6200 = vmatpush3.bf16.xpose.msk.msra.mxu0 %vm7800_vm3, %v6195_v27  ;;  %v8053_v27 = vld [vmem:[%s7400_s14 + $0x48] sm:$0xff] }
  0xb8   : > { %10687 = vst [vmem:[#allocation12_spill] sm:$0xff] %v8053_v27  ;;  %v6217_v53 = vpack.c.bf16 %v8053_v27, %v8050_v24  ;;  %v6556_v27 = vpack.i.bf16 %v7836_v14, %v7833_v13  ;;  %v8099_v13 = vld [vmem:[#allocation2 + $0x20] sm:$0xff] }
  0xba   : > { %6218 = vmatprep.subr.bf16.mxu1 %v6217_v53 }
  0xbb   : > { %6220 = vmatpush3.bf16.msra.mxu1 %v6217_v53  ;;  %v8090_v53 = vld [vmem:[%s7400_s14 + $0x60] sm:$0xff] }
  0xbc   : > { %6222 = vmatprep.subr.bf16.mxu1 %v6221_v21 }
  0xbe   : > { %5738 = vmatmul.mubr.msk.f32.vlgmr.msra.gmra.mrb[0].mxu0 %vm535_vm2, %v7895_v28 }
  0xbf   : > { %5740 = vmatprep.mubr.msk.f32.mxu0 %vm535_vm2, %v7898_v29  ;;  %6224 = vmatpush3.bf16.msra.mxu1 %v6221_v21 }
  0xc2   : > { %5741 = vmatmul.mubr.msk.f32.gmra.mrb[2].mxu0 %vm535_vm2, %v7905_v30 }
  0xc3   : > { %5743 = vmatprep.mubr.msk.f32.mxu0 %vm535_vm2, %v7908_v31 }
  0xc6   : > { %5744 = vmatmul.mubr.msk.f32.gmra.mrb[4].mxu0 %vm535_vm2, %v7915_v32 }
  0xc7   : > { %5746 = vmatprep.mubr.msk.f32.mxu0 %vm535_vm2, %v7918_v33 }
  0xca   : > { %5747 = vmatmul.mubr.msk.f32.gmra.mrb[6].mxu0 %vm535_vm2, %v7925_v34 }
  0xcb   : > { %5749 = vmatprep.mubr.msk.f32.mxu0 %vm535_vm2, %v7928_v35 }
  0xce   : > { %5750 = vmatmul.mubr.msk.f32.gmra.mrb[8].mxu0 %vm535_vm2, %v7935_v36 }
  0xcf   : > { %5752 = vmatprep.mubr.msk.f32.mxu0 %vm535_vm2, %v7938_v37 }
  0xd2   : > { %5753 = vmatmul.mubr.msk.f32.gmra.mrb[10].mxu0 %vm535_vm2, %v7945_v38 }
  0xd3   : > { %5755 = vmatprep.mubr.msk.f32.mxu0 %vm535_vm2, %v7948_v39 }
  0xd6   : > { %5756 = vmatmul.mubr.msk.f32.gmra.mrb[12].mxu0 %vm535_vm2, %v7955_v40 }
  0xd7   : > { %5758 = vmatprep.mubr.msk.f32.mxu0 %vm535_vm2, %v7958_v41 }
  0xda   : > { %5759 = vmatmul.mubr.msk.f32.gmra.mrb[14].mxu0 %vm535_vm2, %v7965_v42 }
 0x191   : > { %v7969_v43 = vpop.f32.mrb[0].mxu0 }
 0x192   : > { %v7971_v44 = vpop.f32.mrb[1].mxu0 }
 0x193   : > { %793 = vmax.xlane.f32.xlu0 %v7971_v44 }
 0x195   : > { %v7974_v45 = vpop.f32.mrb[2].mxu0 }
 0x196   : > { %799 = vmax.xlane.f32.xlu1 %v7974_v45  ;;  %v7977_v46 = vpop.f32.mrb[3].mxu0 }
 0x197   : > { %795 = vmax.xlane.f32.xlu0 %v7969_v43 }
 0x199   : > { %v7980_v47 = vpop.f32.mrb[4].mxu0 }
 0x19a   : > { %797 = vmax.xlane.f32.xlu1 %v7977_v46  ;;  %v7983_v48 = vpop.f32.mrb[5].mxu0 }
 0x19b   : > { %801 = vmax.xlane.f32.xlu0 %v7983_v48 }
 0x19d   : > { %v7986_v49 = vpop.f32.mrb[6].mxu0 }
 0x19e   : > { %803 = vmax.xlane.f32.xlu1 %v7980_v47  ;;  %v7989_v50 = vpop.f32.mrb[7].mxu0 }
 0x19f   : > { %805 = vmax.xlane.f32.xlu0 %v7989_v50 }
 0x1a1   : > { %v7992_v51 = vpop.f32.mrb[8].mxu0 }
 0x1a2   : > { %807 = vmax.xlane.f32.xlu1 %v7986_v49  ;;  %v7995_v52 = vpop.f32.mrb[9].mxu0 }
 0x1a3   : > { %809 = vmax.xlane.f32.xlu0 %v7995_v52 }
 0x1a5   : > { %v7998_v54 = vpop.f32.mrb[10].mxu0 }
 0x1a6   : > { %811 = vmax.xlane.f32.xlu1 %v7992_v51  ;;  %v8001_v55 = vpop.f32.mrb[11].mxu0 }
 0x1a7   : > { %813 = vmax.xlane.f32.xlu0 %v8001_v55 }
 0x1a9   : > { %v8004_v56 = vpop.f32.mrb[12].mxu0 }
 0x1aa   : > { %815 = vmax.xlane.f32.xlu1 %v7998_v54  ;;  %v8007_v57 = vpop.f32.mrb[13].mxu0 }
 0x1ab   : > { %817 = vmax.xlane.f32.xlu0 %v8007_v57 }
 0x1ad   : > { %v8010_v58 = vpop.f32.mrb[14].mxu0 }
 0x1ae   : > { %v8012_v59 = vpop.f32.mrb[15].mxu0  ;;  %819 = vmax.xlane.f32.xlu1 %v8004_v56 }
 0x1af   : > { %821 = vmax.xlane.f32.xlu0 %v8012_v59 }
 0x1b2   : > { %823 = vmax.xlane.f32.xlu1 %v8010_v58 }
 0x220   : > { %v794_v1 = vpop.xlane.xlu0 %793 }
 0x221   : > { %v8060_v8 = vmax.f32 %v8057_v63, %v794_v1  ;;  %v8093_v63 = vld [vmem:[%s7400_s14 + $0x68] sm:$0xff] }
 0x222   : > { %10696 = vst [vmem:[#allocation21_spill] sm:$0xff] %v8093_v63  ;;  %v6225_v14 = vpack.c.bf16 %v8093_v63, %v8090_v53 }
 0x223   : > { %10689 = vst [vmem:[#allocation14_spill] sm:$0xff] %v8060_v8  ;;  %1403 = vst.msk [vmem:[#allocation2] sm:$0xff] %vm1097_vm4, %v8060_v8  ;;  %v800_v1 = vpop.xlane.xlu1 %799  ;;  %891 = vperm.xlu0 %6539, %v8060_v8  }
 0x224   : > { %v8082_v24 = vmax.f32 %v8062_v18, %v800_v1  ;;  %v796_v0 = vpop.xlane.xlu0 %795  ;;  %v6541_v1 = vpack.i.bf16 %v7791_v3, %v7788_v2  ;;  %6226 = vmatprep.subr.bf16.mxu1 %v6225_v14  ;;  %v8129_v3 = vld [vmem:[#allocation2 + $0x30] sm:$0xff] }
 0x225   : > { %v8085_v62 = vmax.f32 %v8070_v5, %v796_v0  ;;  %v8117_v0 = vld [vmem:[#allocation2 + $0x28] sm:$0xff]  ;;  %6228 = vmatpush3.bf16.msra.mxu1 %v6225_v14  ;;  %v8120_v5 = vld [vmem:[%s7400_s14 + $0x70] sm:$0xff]  ;;  %10699 = vst [vmem:[#allocation24_spill] sm:$0xff] %v8129_v3 }
 0x226   : > { %1406 = vst.msk [vmem:[#allocation2 + $0x18] sm:$0xff] %vm1097_vm4, %v8082_v24  ;;  %10697 = vst [vmem:[#allocation22_spill] sm:$0xff] %v8117_v0 }
 0x227   : > { %10694 = vst [vmem:[#allocation19_spill] sm:$0xff] %v8085_v62  ;;  %1404 = vst.msk [vmem:[#allocation2 + $0x8] sm:$0xff] %vm1097_vm4, %v8085_v62  ;;  %v798_v21 = vpop.xlane.xlu1 %797  ;;  %896 = vperm.xlu1 %6540, %v8085_v62   ;;  %6557 = vrot.lane.b32.xlu0 %v6556_v27, %s7310_s22  ;;  %v8123_v62 = vld [vmem:[%s7400_s14 + $0x78] sm:$0xff] }
 0x228   : > { %v8112_v8 = vmax.f32 %v8087_v12, %v798_v21  ;;  %v802_v18 = vpop.xlane.xlu0 %801  ;;  %10698 = vst [vmem:[#allocation23_spill] sm:$0xff] %v8123_v62  ;;  %v6229_v27 = vpack.c.bf16 %v8123_v62, %v8120_v5  ;;  %v6546_v21 = vpack.i.bf16 %v7805_v7, %v7794_v4  ;;  %v8146_v62 = vld [vmem:[#allocation2 + $0x38] sm:$0xff] }
 0x229   : > { %v8115_v15 = vmax.f32 %v8099_v13, %v802_v18  ;;  %10701 = vst [vmem:[#allocation26_spill] sm:$0xff] %v8146_v62  ;;  %v8165_v18 = vld [vmem:[#allocation2 + $0x48] sm:$0xff] }
 0x22a   : > { %1405 = vst.msk [vmem:[#allocation2 + $0x10] sm:$0xff] %vm1097_vm4, %v8112_v8  ;;  %6230 = vmatprep.subr.bf16.mxu1 %v6229_v27  ;;  %10703 = vst [vmem:[#allocation28_spill] sm:$0xff] %v8165_v18 }
 0x22b   : > { %1407 = vst.msk [vmem:[#allocation2 + $0x20] sm:$0xff] %vm1097_vm4, %v8115_v15  ;;  %v804_v14 = vpop.xlane.xlu1 %803  ;;  %6542 = vrot.lane.b32.xlu1 %v6541_v1, %s7310_s22  ;;  %6232 = vmatpush3.bf16.msra.mxu1 %v6229_v27  ;;  %v8152_v1 = vld [vmem:[#allocation2 + $0x40] sm:$0xff] }
 0x22c   : > { %v8141_v2 = vmax.f32 %v8117_v0, %v804_v14  ;;  %v806_v12 = vpop.xlane.xlu0 %805  ;;  %10702 = vst [vmem:[#allocation27_spill] sm:$0xff] %v8152_v1 }
 0x22d   : > { %v8144_v63 = vmax.f32 %v8129_v3, %v806_v12  ;;  %v6551_v12 = vpack.i.bf16 %v7822_v11, %v7819_v10  ;;  %v8194_v10 = vld [vmem:[#allocation2 + $0x60] sm:$0xff] }
 0x22e   : > { %1408 = vst.msk [vmem:[#allocation2 + $0x28] sm:$0xff] %vm1097_vm4, %v8141_v2  ;;  %10707 = vst [vmem:[#allocation32_spill] sm:$0xff] %v8194_v10 }
 0x22f   : > { %10700 = vst [vmem:[#allocation25_spill] sm:$0xff] %v8144_v63  ;;  %1409 = vst.msk [vmem:[#allocation2 + $0x30] sm:$0xff] %vm1097_vm4, %v8144_v63  ;;  %v808_v7 = vpop.xlane.xlu1 %807  ;;  %6547 = vrot.lane.b32.xlu1 %v6546_v21, %s7310_s22  ;;  %921 = vperm.xlu0 %6539, %v8144_v63   ;;  %v8174_v21 = vld [vmem:[#allocation2 + $0x50] sm:$0xff] }
 0x230   : > { %v8163_v27 = vmax.f32 %v8146_v62, %v808_v7  ;;  %v810_v14 = vpop.xlane.xlu0 %809  ;;  %10704 = vst [vmem:[#allocation29_spill] sm:$0xff] %v8174_v21 }
 0x231   : > { %v8168_v0 = vmax.f32 %v8152_v1, %v810_v14  ;;  %v8184_v14 = vld [vmem:[#allocation2 + $0x58] sm:$0xff]  ;;  %v8207_v1 = vld [vmem:[#allocation2 + $0x68] sm:$0xff] }
 0x232   : > { %1410 = vst.msk [vmem:[#allocation2 + $0x38] sm:$0xff] %vm1097_vm4, %v8163_v27  ;;  %10706 = vst [vmem:[#allocation31_spill] sm:$0xff] %v8184_v14 }
 0x233   : > { %v812_v63 = vpop.xlane.xlu1 %811  ;;  %1411 = vst.msk [vmem:[#allocation2 + $0x40] sm:$0xff] %vm1097_vm4, %v8168_v0  ;;  %6552 = vrot.lane.b32.xlu1 %v6551_v12, %s7310_s22  ;;  %10708 = vst [vmem:[#allocation33_spill] sm:$0xff] %v8207_v1 }
 0x234   : > { %v8182_v11 = vmax.f32 %v8165_v18, %v812_v63  ;;  %v814_v7 = vpop.xlane.xlu0 %813  ;;  %v8214_v63 = vld [vmem:[#allocation2 + $0x70] sm:$0xff] }
 0x235   : > { %v8187_v4 = vmax.f32 %v8174_v21, %v814_v7 }
 0x236   : > { %10705 = vst [vmem:[#allocation30_spill] sm:$0xff] %v8182_v11  ;;  %1412 = vst.msk [vmem:[#allocation2 + $0x48] sm:$0xff] %vm1097_vm4, %v8182_v11  ;;  %936 = vperm.xlu0 %6539, %v8182_v11  }
 0x237   : > { %v816_v12 = vpop.xlane.xlu1 %815  ;;  %1413 = vst.msk [vmem:[#allocation2 + $0x50] sm:$0xff] %vm1097_vm4, %v8187_v4  ;;  %906 = vperm.xlu1 %6540, %v8082_v24  }
 0x238   : > { %v8202_v7 = vmax.f32 %v8184_v14, %v816_v12  ;;  %v818_v62 = vpop.xlane.xlu0 %817  ;;  %v8227_v14 = vld [vmem:[#allocation2 + $0x78] sm:$0xff]  ;;  %v10733_v12 = vld [vmem:[#allocation9_spill] sm:$0xff] }
 0x239   : > { %v8205_v18 = vmax.f32 %v8194_v10, %v818_v62  ;;  %10709 = vst [vmem:[#allocation34_spill] sm:$0xff] %v8227_v14  ;;  %v6576_v10 = vpack.i.bf16 %v7884_v26, %v7881_v25 }
 0x23a   : > { %1414 = vst.msk [vmem:[#allocation2 + $0x58] sm:$0xff] %vm1097_vm4, %v8202_v7  ;;  %946 = vperm.xlu0 %6539, %v8202_v7  }
 0x23b   : > { %1415 = vst.msk [vmem:[#allocation2 + $0x60] sm:$0xff] %vm1097_vm4, %v8205_v18  ;;  %901 = vperm.xlu1 %6540, %v8112_v8   ;;  %v820_v62 = vpop.xlane.xlu1 %819 }
 0x23c   : > { %v822_v21 = vpop.xlane.xlu0 %821  ;;  %v8222_v3 = vmax.f32 %v8207_v1, %v820_v62  ;;  %v6566_v1 = vpack.i.bf16 %v7860_v20, %v7857_v19  ;;  %v6561_v19 = vpack.i.bf16 %v7848_v17, %v7845_v16  ;;  %v6571_v20 = vpack.i.bf16 %v7872_v23, %v7869_v22 }
 0x23d   : > { %v8225_v11 = vmax.f32 %v8214_v63, %v822_v21 }
 0x23e   : > { %951 = vperm.xlu0 %6539, %v8205_v18   ;;  %1416 = vst.msk [vmem:[#allocation2 + $0x68] sm:$0xff] %vm1097_vm4, %v8222_v3 }
 0x23f   : > { %916 = vperm.xlu1 %6540, %v8141_v2   ;;  %1417 = vst.msk [vmem:[#allocation2 + $0x70] sm:$0xff] %vm1097_vm4, %v8225_v11  ;;  %v824_v21 = vpop.xlane.xlu1 %823 }
 0x240   : > { %v8240_v62 = vmax.f32 %v8227_v14, %v824_v21 }
 0x242   : > { %10710 = vst [vmem:[#allocation35_spill] sm:$0xff] %v8240_v62  ;;  %961 = vperm.xlu0 %6539, %v8225_v11   ;;  %1418 = vst.msk [vmem:[#allocation2 + $0x78] sm:$0xff] %vm1097_vm4, %v8240_v62 }
 0x243   : > { %911 = vperm.xlu1 %6540, %v8115_v15  }
 0x246   : > { %6567 = vrot.lane.b32.xlu0 %v6566_v1, %s7310_s22 }
 0x247   : > { %926 = vperm.xlu1 %6540, %v8163_v27  }
 0x24a   : > { %6577 = vrot.lane.b32.xlu0 %v6576_v10, %s7310_s22 }
 0x24b   : > { %931 = vperm.xlu1 %6540, %v8168_v0  }
 0x24e   : > { %1421 = vrot.lane.b32.xlu0 %v7895_v28, %s7310_s22 }
 0x24f   : > { %941 = vperm.xlu1 %6540, %v8187_v4  }
 0x252   : > { %1425 = vrot.lane.b32.xlu0 %v7905_v30, %s7310_s22 }
 0x253   : > { %6562 = vrot.lane.b32.xlu1 %v6561_v19, %s7310_s22 }
 0x256   : > { %1429 = vrot.lane.b32.xlu0 %v7915_v32, %s7310_s22 }
 0x257   : > { %956 = vperm.xlu1 %6540, %v8222_v3  }
 0x25a   : > { %1433 = vrot.lane.b32.xlu0 %v7925_v34, %s7310_s22 }
 0x25b   : > { %966 = vperm.xlu1 %6540, %v8240_v62  }
 0x25e   : > { %1437 = vrot.lane.b32.xlu0 %v7935_v36, %s7310_s22 }
 0x25f   : > { %6572 = vrot.lane.b32.xlu1 %v6571_v20, %s7310_s22 }
 0x262   : > { %1441 = vrot.lane.b32.xlu0 %v7945_v38, %s7310_s22 }
 0x263   : > { %1419 = vrot.lane.b32.xlu1 %v7816_v9, %s7310_s22 }
 0x266   : > { %1445 = vrot.lane.b32.xlu0 %v7955_v40, %s7310_s22 }
 0x267   : > { %1423 = vrot.lane.b32.xlu1 %v7898_v29, %s7310_s22 }
 0x26a   : > { %1449 = vrot.lane.b32.xlu0 %v7965_v42, %s7310_s22 }
 0x26b   : > { %1427 = vrot.lane.b32.xlu1 %v7908_v31, %s7310_s22 }
 0x26f   : > { %1431 = vrot.lane.b32.xlu1 %v7918_v33, %s7310_s22 }
 0x273   : > { %1435 = vrot.lane.b32.xlu1 %v7928_v35, %s7310_s22 }
 0x277   : > { %1439 = vrot.lane.b32.xlu1 %v7938_v37, %s7310_s22 }
 0x27b   : > { %1443 = vrot.lane.b32.xlu1 %v7948_v39, %s7310_s22 }
 0x27f   : > { %1447 = vrot.lane.b32.xlu1 %v7958_v41, %s7310_s22 }
 0x2a2   : > { %v892_v9 = vpop.permute.xlu0 %891 }
 0x2a3   : > { %v969_v16 = vsub.f32 %v7971_v44, %v892_v9 }
 0x2a5   : > { %v985_v17 = vmul.f32 1.442695, %v969_v16 }
 0x2a6   : > { %v897_v22 = vpop.permute.xlu1 %896  ;;  %v6558_v31 = vpop.permute.xlu0 %6557 }
 0x2a7   : > { %6781 = vpow2.f32 %v985_v17  ;;  %v970_v23 = vsub.f32 %v7969_v43, %v897_v22  ;;  %v6560_v22 = vunpack.i.h.bf16 %v6558_v31 }
 0x2a9   : > { %v987_v25 = vmul.f32 1.442695, %v970_v23  ;;  %v6559_v23 = vunpack.i.l.bf16 %v6558_v31 }
 0x2aa   : > { %v6543_v26 = vpop.permute.xlu1 %6542 }
 0x2ab   : > { %6783 = vpow2.f32 %v987_v25  ;;  %v6545_v28 = vunpack.i.h.bf16 %v6543_v26  ;;  %v6544_v29 = vunpack.i.l.bf16 %v6543_v26 }
 0x2ad   : > { %v6233_v30 = vpack.c.bf16 %v6545_v28, %v6544_v29 }
 0x2ae   : > { %v6548_v32 = vpop.permute.xlu1 %6547  ;;  %v922_v37 = vpop.permute.xlu0 %921 }
 0x2af   : > { %6235 = vmatprep.subr.msk.bf16.mxu1 %vm7800_vm3, %v6233_v30  ;;  %v6550_v34 = vunpack.i.h.bf16 %v6548_v32  ;;  %v6549_v35 = vunpack.i.l.bf16 %v6548_v32  ;;  %v975_v17 = vsub.f32 %v7989_v50, %v922_v37  ;;  %v6251_v32 = vpack.c.bf16 %v6560_v22, %v6559_v23 }
 0x2b1   : > { %v8301_v33 = vpop.eup %6781  ;;  %v6239_v39 = vpack.c.bf16 %v6550_v34, %v6549_v35  ;;  %v997_v29 = vmul.f32 1.442695, %v975_v17 }
 0x2b2   : > { %v6553_v36 = vpop.permute.xlu1 %6552  ;;  %5793 = vmatprep.mubr.f32.mxu1 %v8301_v33 }
 0x2b3   : > { %v6555_v43 = vunpack.i.h.bf16 %v6553_v36  ;;  %v6554_v44 = vunpack.i.l.bf16 %v6553_v36 }
 0x2b5   : > { %v8304_v38 = vpop.eup %6783  ;;  %v937_v41 = vpop.permute.xlu0 %936  ;;  %v6245_v20 = vpack.c.bf16 %v6555_v43, %v6554_v44 }
 0x2b6   : > { %v907_v40 = vpop.permute.xlu1 %906  ;;  %5794 = vmatmul.mubr.f32.vlgmr.msra.gmra.mrb[0].mxu1 %v8304_v38 }
 0x2b7   : > { %6238 = vmatpush3.bf16.xpose.msk.msra.mxu1 %vm7800_vm3, %v6233_v30  ;;  %v972_v42 = vsub.f32 %v7974_v45, %v907_v40 }
 0x2b8   : > { %6241 = vmatprep.subr.msk.bf16.mxu1 %vm7800_vm3, %v6239_v39 }
 0x2b9   : > { %v991_v21 = vmul.f32 1.442695, %v972_v42  ;;  %v947_v9 = vpop.permute.xlu0 %946 }
 0x2ba   : > { %v902_v1 = vpop.permute.xlu1 %901 }
 0x2bb   : > { %v971_v10 = vsub.f32 %v7977_v46, %v902_v1 }
 0x2bd   : > { %v989_v19 = vmul.f32 1.442695, %v971_v10  ;;  %v952_v26 = vpop.permute.xlu0 %951 }
 0x2be   : > { %v917_v16 = vpop.permute.xlu1 %916  ;;  %v981_v40 = vsub.f32 %v8007_v57, %v952_v26 }
 0x2bf   : > { %6785 = vpow2.f32 %v989_v19  ;;  %6244 = vmatpush3.bf16.xpose.msk.msra.mxu1 %vm7800_vm3, %v6239_v39  ;;  %v974_v45 = vsub.f32 %v7980_v47, %v917_v16  ;;  %v978_v47 = vsub.f32 %v7992_v51, %v937_v41  ;;  %v980_v39 = vsub.f32 %v7998_v54, %v947_v9 }
 0x2c0   : > { %6787 = vpow2.f32 %v991_v21  ;;  %6247 = vmatprep.subr.msk.bf16.mxu1 %vm7800_vm3, %v6245_v20 }
 0x2c1   : > { %v995_v28 = vmul.f32 1.442695, %v974_v45  ;;  %v962_v36 = vpop.permute.xlu0 %961  ;;  %v1003_v51 = vmul.f32 1.442695, %v978_v47  ;;  %v1007_v1 = vmul.f32 1.442695, %v980_v39 }
 0x2c2   : > { %v912_v46 = vpop.permute.xlu1 %911  ;;  %v983_v45 = vsub.f32 %v8012_v59, %v962_v36 }
 0x2c3   : > { %v973_v25 = vsub.f32 %v7983_v48, %v912_v46 }
 0x2c4   : > { %v1013_v26 = vmul.f32 1.442695, %v983_v45 }
 0x2c5   : > { %v993_v30 = vmul.f32 1.442695, %v973_v25  ;;  %v6568_v43 = vpop.permute.xlu0 %6567 }
 0x2c6   : > { %v927_v34 = vpop.permute.xlu1 %926  ;;  %v6570_v19 = vunpack.i.h.bf16 %v6568_v43 }
 0x2c7   : > { %6789 = vpow2.f32 %v993_v30  ;;  %v976_v35 = vsub.f32 %v7986_v49, %v927_v34  ;;  %6250 = vmatpush3.bf16.xpose.msk.msra.mxu1 %vm7800_vm3, %v6245_v20  ;;  %v6569_v20 = vunpack.i.l.bf16 %v6568_v43 }
 0x2c8   : > { %6791 = vpow2.f32 %v995_v28  ;;  %6253 = vmatprep.subr.msk.bf16.mxu1 %vm7800_vm3, %v6251_v32 }
 0x2c9   : > { %v8326_v50 = vpop.eup %6785  ;;  %6793 = vpow2.f32 %v997_v29  ;;  %v999_v48 = vmul.f32 1.442695, %v976_v35  ;;  %v6263_v23 = vpack.c.bf16 %v6570_v19, %v6569_v20 }
 0x2ca   : > { %v8328_v31 = vpop.eup %6787  ;;  %v932_v37 = vpop.permute.xlu1 %931  ;;  %5796 = vmatprep.mubr.f32.mxu1 %v8326_v50 }
 0x2cb   : > { %6795 = vpow2.f32 %v999_v48  ;;  %v977_v49 = vsub.f32 %v7995_v52, %v932_v37  ;;  %5797 = vmatmul.mubr.f32.gmra.mrb[2].mxu1 %v8328_v31  ;;  %v1009_v52 = vmul.f32 1.442695, %v981_v40  ;;  %v6578_v48 = vpop.permute.xlu0 %6577 }
 0x2cc   : > { %v6579_v39 = vunpack.i.l.bf16 %v6578_v48 }
 0x2cd   : > { %v1001_v41 = vmul.f32 1.442695, %v977_v49 }
 0x2ce   : > { %v942_v42 = vpop.permute.xlu1 %941 }
 0x2cf   : > { %6797 = vpow2.f32 %v1001_v41  ;;  %v979_v44 = vsub.f32 %v8001_v55, %v942_v42  ;;  %6256 = vmatpush3.bf16.xpose.msk.msra.mxu1 %vm7800_vm3, %v6251_v32 }
 0x2d0   : > { %6799 = vpow2.f32 %v1003_v51  ;;  %v6580_v51 = vunpack.i.h.bf16 %v6578_v48  ;;  %v10713_v48 = vld [vmem:[#allocation7_spill] sm:$0xff] }
 0x2d1   : > { %v8338_v10 = vpop.eup %6789  ;;  %v1005_v21 = vmul.f32 1.442695, %v979_v44  ;;  %v1422_v44 = vpop.permute.xlu0 %1421 }
 0x2d2   : > { %v8340_v54 = vpop.eup %6791  ;;  %v6563_v57 = vpop.permute.xlu1 %6562  ;;  %5799 = vmatprep.mubr.f32.mxu1 %v8338_v10  ;;  %v6275_v41 = vpack.c.bf16 %v6580_v51, %v6579_v39 }
 0x2d3   : > { %v8343_v9 = vpop.eup %6793  ;;  %6801 = vpow2.f32 %v1005_v21  ;;  %v6565_v55 = vunpack.i.h.bf16 %v6563_v57  ;;  %v6564_v16 = vunpack.i.l.bf16 %v6563_v57  ;;  %5800 = vmatmul.mubr.f32.gmra.mrb[4].mxu1 %v8340_v54 }
 0x2d4   : > { %6803 = vpow2.f32 %v1007_v1  ;;  %5802 = vmatprep.mubr.f32.mxu1 %v8343_v9 }
 0x2d5   : > { %v8348_v17 = vpop.eup %6795  ;;  %6805 = vpow2.f32 %v1009_v52  ;;  %v6257_v22 = vpack.c.bf16 %v6565_v55, %v6564_v16  ;;  %v1426_v21 = vpop.permute.xlu0 %1425 }
 0x2d6   : > { %v957_v46 = vpop.permute.xlu1 %956 }
 0x2d7   : > { %v982_v25 = vsub.f32 %v8004_v56, %v957_v46  ;;  %5803 = vmatmul.mubr.f32.gmra.mrb[6].mxu1 %v8348_v17  ;;  %6259 = vmatprep.subr.msk.bf16.mxu1 %vm7800_vm3, %v6257_v22 }
 0x2d8   : > { %6262 = vmatpush3.bf16.xpose.msk.msra.mxu1 %vm7800_vm3, %v6257_v22 }
 0x2d9   : > { %v8356_v59 = vpop.eup %6797  ;;  %v1011_v28 = vmul.f32 1.442695, %v982_v25  ;;  %6265 = vmatprep.subr.msk.bf16.mxu1 %vm7800_vm3, %v6263_v23  ;;  %v1430_v20 = vpop.permute.xlu0 %1429 }
 0x2da   : > { %v8360_v29 = vpop.eup %6799  ;;  %v967_v30 = vpop.permute.xlu1 %966  ;;  %5805 = vmatprep.mubr.f32.mxu1 %v8356_v59 }
 0x2db   : > { %6807 = vpow2.f32 %v1011_v28  ;;  %v984_v56 = vsub.f32 %v8010_v58, %v967_v30  ;;  %5806 = vmatmul.mubr.f32.gmra.mrb[8].mxu1 %v8360_v29  ;;  %v6581_v30 = vpack.i.bf16 %v8021_v61, %v8018_v60 }
 0x2dc   : > { %6809 = vpow2.f32 %v1013_v26 }
 0x2dd   : > { %v8365_v32 = vpop.eup %6801  ;;  %v1015_v34 = vmul.f32 1.442695, %v984_v56  ;;  %v1434_v55 = vpop.permute.xlu0 %1433  ;;  %6582 = vrot.lane.b32.xlu0 %v6581_v30, %s7310_s22  ;;  %v10711_v56 = vld [vmem:[#allocation5_spill] sm:$0xff] }
 0x2de   : > { %v8367_v35 = vpop.eup %6803  ;;  %5808 = vmatprep.mubr.f32.mxu1 %v8365_v32  ;;  %v6573_v47 = vpop.permute.xlu1 %6572 }
 0x2df   : > { %v8370_v36 = vpop.eup %6805  ;;  %6811 = vpow2.f32 %v1015_v34  ;;  %5809 = vmatmul.mubr.f32.gmra.mrb[10].mxu1 %v8367_v35  ;;  %v6575_v37 = vunpack.i.h.bf16 %v6573_v47  ;;  %v6574_v49 = vunpack.i.l.bf16 %v6573_v47  ;;  %v10712_v34 = vld [vmem:[#allocation6_spill] sm:$0xff] }
 0x2e0   : > { %5811 = vmatprep.mubr.f32.mxu1 %v8370_v36  ;;  %6268 = vmatpush3.bf16.xpose.msk.msra.mxu1 %vm7800_vm3, %v6263_v23  ;;  %v6586_v47 = vpack.i.bf16 %v10712_v34, %v10711_v56 }
 0x2e1   : > { %v6269_v58 = vpack.c.bf16 %v6575_v37, %v6574_v49  ;;  %v1438_v45 = vpop.permute.xlu0 %1437  ;;  %v10714_v37 = vld [vmem:[#allocation8_spill] sm:$0xff] }
 0x2e2   : > { %v1420_v42 = vpop.permute.xlu1 %1419  ;;  %6587 = vrot.lane.b32.xlu1 %v6586_v47, %s7310_s22  ;;  %v6591_v49 = vpack.i.bf16 %v10714_v37, %v10713_v48 }
 0x2e3   : > { %6271 = vmatprep.subr.msk.bf16.mxu1 %vm7800_vm3, %v6269_v58 }
 0x2e4   : > { %6592 = vrot.lane.b32.xlu0 %v6591_v49, %s7310_s22 }
 0x2e5   : > { %v8378_v40 = vpop.eup %6807  ;;  %v1442_v23 = vpop.permute.xlu0 %1441 }
 0x2e6   : > { %v8380_v43 = vpop.eup %6809  ;;  %5812 = vmatmul.mubr.f32.gmra.mrb[12].mxu1 %v8378_v40  ;;  %v1424_v52 = vpop.permute.xlu1 %1423 }
 0x2e7   : > { %5814 = vmatprep.mubr.f32.mxu1 %v8380_v43 }
 0x2e8   : > { %6274 = vmatpush3.bf16.xpose.msk.msra.mxu1 %vm7800_vm3, %v6269_v58 }
 0x2e9   : > { %v8386_v1 = vpop.eup %6811  ;;  %6277 = vmatprep.subr.msk.bf16.mxu1 %vm7800_vm3, %v6275_v41  ;;  %v1446_v25 = vpop.permute.xlu0 %1445 }
 0x2ea   : > { %5815 = vmatmul.mubr.f32.gmra.mrb[14].mxu1 %v8386_v1  ;;  %v1428_v19 = vpop.permute.xlu1 %1427 }
 0x2eb   : > { %5849 = vmatprep.mubr.msk.f32.mxu1 %vm535_vm2, %v1420_v42 }
 0x2ed   : > { %v1450_v28 = vpop.permute.xlu0 %1449 }
 0x2ee   : > { %v1432_v57 = vpop.permute.xlu1 %1431 }
 0x2f0   : > { %6280 = vmatpush3.bf16.xpose.msk.msra.mxu1 %vm7800_vm3, %v6275_v41 }
 0x2f2   : > { %v1436_v16 = vpop.permute.xlu1 %1435 }
 0x2f6   : > { %v1440_v22 = vpop.permute.xlu1 %1439 }
 0x2f7   : > { %5850 = vmatmul.mubr.msk.f32.vlgmr.msra.gmra.mrb[16].mxu1 %vm535_vm2, %v1422_v44 }
 0x2f8   : > { %5852 = vmatprep.mubr.msk.f32.mxu1 %vm535_vm2, %v1424_v52 }
 0x2fa   : > { %v1444_v46 = vpop.permute.xlu1 %1443 }
 0x2fb   : > { %5853 = vmatmul.mubr.msk.f32.gmra.mrb[18].mxu1 %vm535_vm2, %v1426_v21 }
 0x2fc   : > { %5855 = vmatprep.mubr.msk.f32.mxu1 %vm535_vm2, %v1428_v19 }
 0x2fe   : > { %v1448_v26 = vpop.permute.xlu1 %1447 }
 0x2ff   : > { %5856 = vmatmul.mubr.msk.f32.gmra.mrb[20].mxu1 %vm535_vm2, %v1430_v20 }
 0x300   : > { %5858 = vmatprep.mubr.msk.f32.mxu1 %vm535_vm2, %v1432_v57 }
 0x303   : > { %5859 = vmatmul.mubr.msk.f32.gmra.mrb[22].mxu1 %vm535_vm2, %v1434_v55 }
 0x304   : > { %5861 = vmatprep.mubr.msk.f32.mxu1 %vm535_vm2, %v1436_v16 }
 0x307   : > { %5862 = vmatmul.mubr.msk.f32.gmra.mrb[24].mxu1 %vm535_vm2, %v1438_v45 }
 0x308   : > { %5864 = vmatprep.mubr.msk.f32.mxu1 %vm535_vm2, %v1440_v22 }
 0x30b   : > { %5865 = vmatmul.mubr.msk.f32.gmra.mrb[26].mxu1 %vm535_vm2, %v1442_v23 }
 0x30c   : > { %5867 = vmatprep.mubr.msk.f32.mxu1 %vm535_vm2, %v1444_v46 }
 0x30f   : > { %5868 = vmatmul.mubr.msk.f32.gmra.mrb[28].mxu1 %vm535_vm2, %v1446_v25 }
 0x310   : > { %5870 = vmatprep.mubr.msk.f32.mxu1 %vm535_vm2, %v1448_v26 }
 0x313   : > { %5871 = vmatmul.mubr.msk.f32.gmra.mrb[30].mxu1 %vm535_vm2, %v1450_v28 }
 0x34f   : > { %v6583_v39 = vpop.permute.xlu0 %6582 }
 0x350   : > { %v6585_v41 = vunpack.i.h.bf16 %v6583_v39  ;;  %v6584_v42 = vunpack.i.l.bf16 %v6583_v39 }
 0x352   : > { %v6281_v60 = vpack.c.bf16 %v6585_v41, %v6584_v42 }
 0x354   : > { %v6588_v61 = vpop.permute.xlu1 %6587  ;;  %6282 = vmatprep.subr.bf16.mxu0 %v6281_v60 }
 0x355   : > { %v6590_v44 = vunpack.i.h.bf16 %v6588_v61  ;;  %v6589_v52 = vunpack.i.l.bf16 %v6588_v61  ;;  %6284 = vmatpush3.bf16.msra.mxu0 %v6281_v60 }
 0x356   : > { %v6593_v57 = vpop.permute.xlu0 %6592 }
 0x357   : > { %v6285_v21 = vpack.c.bf16 %v6590_v44, %v6589_v52  ;;  %v6595_v55 = vunpack.i.h.bf16 %v6593_v57  ;;  %v6594_v16 = vunpack.i.l.bf16 %v6593_v57  ;;  %v10732_v57 = vld [vmem:[#allocation12_spill] sm:$0xff] }
 0x359   : > { %6286 = vmatprep.subr.bf16.mxu0 %v6285_v21  ;;  %v6289_v45 = vpack.c.bf16 %v6595_v55, %v6594_v16 }
 0x35a   : > { %6288 = vmatpush3.bf16.msra.mxu0 %v6285_v21  ;;  %v10731_v21 = vld [vmem:[#allocation11_spill] sm:$0xff] }
 0x35b   : > { %6290 = vmatprep.subr.bf16.mxu0 %v6289_v45  ;;  %v6601_v55 = vpack.i.bf16 %v10732_v57, %v10731_v21 }
 0x35e   : > { %6292 = vmatpush3.bf16.msra.mxu0 %v6289_v45 }
 0x389   : > { %v8418_v58 = vpop.f32.mrb[0].mxu1 }
 0x38a   : > { %10715 = vst [vmem:[#allocation5_spill] sm:$0xff] %v8418_v58  ;;  %v8420_v51 = vpop.f32.mrb[1].mxu1 }
 0x38b   : > { %10716 = vst [vmem:[#allocation6_spill] sm:$0xff] %v8420_v51 }
 0x39e   : > { %v8422_v19 = vpop.f32.mrb[2].mxu1 }
 0x39f   : > { %10717 = vst [vmem:[#allocation7_spill] sm:$0xff] %v8422_v19  ;;  %v8424_v20 = vpop.f32.mrb[3].mxu1 }
 0x3a0   : > { %10718 = vst [vmem:[#allocation8_spill] sm:$0xff] %v8424_v20 }
 0x3a6   : > { %v8426_v22 = vpop.f32.mrb[4].mxu1 }
 0x3a7   : > { %10719 = vst [vmem:[#allocation36_spill] sm:$0xff] %v8426_v22  ;;  %v8428_v23 = vpop.f32.mrb[5].mxu1 }
 0x3a8   : > { %10720 = vst [vmem:[#allocation37_spill] sm:$0xff] %v8428_v23  ;;  %v10741_v23 = vld [vmem:[#allocation17_spill] sm:$0xff] }
 0x3aa   : > { %v8430_v46 = vpop.f32.mrb[6].mxu1 }
 0x3ab   : > { %10721 = vst [vmem:[#allocation38_spill] sm:$0xff] %v8430_v46  ;;  %v8432_v25 = vpop.f32.mrb[7].mxu1  ;;  %v10740_v46 = vld [vmem:[#allocation16_spill] sm:$0xff] }
 0x3ac   : > { %10722 = vst [vmem:[#allocation39_spill] sm:$0xff] %v8432_v25  ;;  %v10739_v25 = vld [vmem:[#allocation21_spill] sm:$0xff]  ;;  %v6606_v19 = vpack.i.bf16 %v10741_v23, %v10740_v46  ;;  %v10742_v23 = vld [vmem:[#allocation23_spill] sm:$0xff] }
 0x3ad   : > { %v6611_v22 = vpack.i.bf16 %v10739_v25, %v8090_v53  ;;  %v7037_v25 = vld [vmem:[%s7395_s10] sm:$0xff]  ;;  %v6616_v46 = vpack.i.bf16 %v10742_v23, %v8120_v5  ;;  %v7043_v5 = vld [vmem:[%s7395_s10 + $0x30] sm:$0xff] }
 0x3ae   : > { %v8434_v26 = vpop.f32.mrb[8].mxu1 }
 0x3af   : > { %10723 = vst [vmem:[#allocation40_spill] sm:$0xff] %v8434_v26  ;;  %v8436_v28 = vpop.f32.mrb[9].mxu1 }
 0x3b0   : > { %10724 = vst [vmem:[#allocation41_spill] sm:$0xff] %v8436_v28 }
 0x3b2   : > { %v8438_v30 = vpop.f32.mrb[10].mxu1 }
 0x3b3   : > { %10725 = vst [vmem:[#allocation42_spill] sm:$0xff] %v8438_v30  ;;  %v8440_v56 = vpop.f32.mrb[11].mxu1 }
 0x3b4   : > { %10726 = vst [vmem:[#allocation43_spill] sm:$0xff] %v8440_v56 }
 0x3b9   : > { %v8442_v34 = vpop.f32.mrb[12].mxu1 }
 0x3ba   : > { %10727 = vst [vmem:[#allocation44_spill] sm:$0xff] %v8442_v34  ;;  %v8444_v47 = vpop.f32.mrb[13].mxu1 }
 0x3bb   : > { %10728 = vst [vmem:[#allocation45_spill] sm:$0xff] %v8444_v47 }
 0x3bd   : > { %v8446_v48 = vpop.f32.mrb[14].mxu1 }
 0x3be   : > { %10729 = vst [vmem:[#allocation46_spill] sm:$0xff] %v8446_v48  ;;  %v8448_v37 = vpop.f32.mrb[15].mxu1  ;;  %v10734_v48 = vld [vmem:[#allocation10_spill] sm:$0xff] }
 0x3bf   : > { %10730 = vst [vmem:[#allocation47_spill] sm:$0xff] %v8448_v37  ;;  %v6596_v37 = vpack.i.bf16 %v10734_v48, %v10733_v12  ;;  %v8504_v12 = vld [vmem:[#allocation2 + $0x88] sm:$0xff]  ;;  %v8506_v48 = vld [vmem:[#allocation2 + $0x80] sm:$0xff] }
 0x3c0   : > { %10735 = vst [vmem:[#allocation11_spill] sm:$0xff] %v8504_v12  ;;  %10736 = vst [vmem:[#allocation12_spill] sm:$0xff] %v8506_v48 }
 0x3ca   : > { %v8450_v49 = vpop.f32.mrb[16].mxu1 }
 0x3cb   : > { %1711 = vmax.xlane.f32.xlu0 %v8450_v49  ;;  %v8453_v39 = vpop.f32.mrb[17].mxu1 }
 0x3cc   : > { %1709 = vmax.xlane.f32.xlu1 %v8453_v39 }
 0x3ce   : > { %v8456_v41 = vpop.f32.mrb[18].mxu1 }
 0x3cf   : > { %v8458_v42 = vpop.f32.mrb[19].mxu1 }
 0x3d2   : > { %v8460_v60 = vpop.f32.mrb[20].mxu1 }
 0x3d3   : > { %v8462_v61 = vpop.f32.mrb[21].mxu1 }
 0x3d6   : > { %v8464_v44 = vpop.f32.mrb[22].mxu1 }
 0x3d7   : > { %v8466_v52 = vpop.f32.mrb[23].mxu1 }
 0x3da   : > { %v8470_v16 = vpop.f32.mrb[24].mxu1 }
 0x3db   : > { %v8472_v45 = vpop.f32.mrb[25].mxu1 }
 0x3dd   : > { %6602 = vrot.lane.b32.xlu1 %v6601_v55, %s7310_s22 }
 0x3de   : > { %v8477_v34 = vpop.f32.mrb[26].mxu1 }
 0x3df   : > { %v8479_v47 = vpop.f32.mrb[27].mxu1 }
 0x3e1   : > { %6597 = vrot.lane.b32.xlu0 %v6596_v37, %s7310_s22 }
 0x3e2   : > { %v8482_v30 = vpop.f32.mrb[28].mxu1 }
 0x3e3   : > { %v8484_v56 = vpop.f32.mrb[29].mxu1 }
 0x3e6   : > { %v8486_v21 = vpop.f32.mrb[30].mxu1 }
 0x3e7   : > { %v8488_v57 = vpop.f32.mrb[31].mxu1 }
 0x400   : > { %1713 = vmax.xlane.f32.xlu0 %v8458_v42 }
 0x401   : > { %1715 = vmax.xlane.f32.xlu1 %v8456_v41 }
 0x404   : > { %1717 = vmax.xlane.f32.xlu0 %v8462_v61 }
 0x405   : > { %1719 = vmax.xlane.f32.xlu1 %v8460_v60 }
 0x408   : > { %1721 = vmax.xlane.f32.xlu0 %v8466_v52 }
 0x409   : > { %1723 = vmax.xlane.f32.xlu1 %v8464_v44 }
 0x40c   : > { %1725 = vmax.xlane.f32.xlu0 %v8472_v45 }
 0x40d   : > { %1727 = vmax.xlane.f32.xlu1 %v8470_v16 }
 0x410   : > { %1729 = vmax.xlane.f32.xlu0 %v8479_v47 }
 0x411   : > { %1731 = vmax.xlane.f32.xlu1 %v8477_v34 }
 0x414   : > { %1733 = vmax.xlane.f32.xlu0 %v8484_v56 }
 0x415   : > { %1735 = vmax.xlane.f32.xlu1 %v8482_v30 }
 0x419   : > { %1739 = vmax.xlane.f32.xlu1 %v8486_v21 }
 0x41d   : > { %1737 = vmax.xlane.f32.xlu1 %v8488_v57 }
 0x458   : > { %v1712_v37 = vpop.xlane.xlu0 %1711 }
 0x459   : > { %v8509_v55 = vmax.f32 %v8504_v12, %v1712_v37  ;;  %v1710_v26 = vpop.xlane.xlu1 %1709  ;;  %v7038_v37 = vld [vmem:[%s7395_s10 + $0x8] sm:$0xff] }
 0x45a   : > { %v8512_v28 = vmax.f32 %v8506_v48, %v1710_v26  ;;  %v6621_v48 = vpack.i.bf16 %v7038_v37, %v7037_v25 }
 0x45b   : > { %10737 = vst [vmem:[#allocation9_spill] sm:$0xff] %v8509_v55  ;;  %2385 = vst.msk [vmem:[#allocation2 + $0x88] sm:$0xff] %vm1097_vm4, %v8509_v55  ;;  %1812 = vperm.xlu1 %6540, %v8509_v55  }
 0x45c   : > { %10738 = vst [vmem:[#allocation10_spill] sm:$0xff] %v8512_v28  ;;  %2384 = vst.msk [vmem:[#allocation2 + $0x80] sm:$0xff] %vm1097_vm4, %v8512_v28  ;;  %v6598_v26 = vpop.permute.xlu0 %6597  ;;  %1807 = vperm.xlu0 %6539, %v8512_v28  }
 0x45d   : > { %v6600_v20 = vunpack.i.h.bf16 %v6598_v26  ;;  %v6599_v12 = vunpack.i.l.bf16 %v6598_v26  ;;  %v6603_v51 = vpop.permute.xlu1 %6602  ;;  %v8545_v26 = vld [vmem:[#allocation2 + $0x90] sm:$0xff] }
 0x45e   : > { %v6605_v55 = vunpack.i.h.bf16 %v6603_v51  ;;  %v6604_v58 = vunpack.i.l.bf16 %v6603_v51  ;;  %v7039_v51 = vld [vmem:[%s7395_s10 + $0x20] sm:$0xff]  ;;  %10743 = vst [vmem:[#allocation21_spill] sm:$0xff] %v8545_v26 }
 0x45f   : > { %v6293_v53 = vpack.c.bf16 %v6600_v20, %v6599_v12  ;;  %6612 = vrot.lane.b32.xlu1 %v6611_v22, %s7310_s22  ;;  %v7040_v20 = vld [vmem:[%s7395_s10 + $0x28] sm:$0xff]  ;;  %v7041_v12 = vld [vmem:[%s7395_s10 + $0x10] sm:$0xff] }
 0x460   : > { %v6297_v62 = vpack.c.bf16 %v6605_v55, %v6604_v58  ;;  %6607 = vrot.lane.b32.xlu0 %v6606_v19, %s7310_s22  ;;  %v6631_v22 = vpack.i.bf16 %v7040_v20, %v7039_v51  ;;  %v7042_v58 = vld [vmem:[%s7395_s10 + $0x18] sm:$0xff]  ;;  %v8562_v20 = vld [vmem:[#allocation2 + $0xa8] sm:$0xff]  ;;  %v8595_v51 = vld [vmem:[#allocation2 + $0xc0] sm:$0xff] }
 0x461   : > { %6294 = vmatprep.subr.bf16.mxu0 %v6293_v53  ;;  %v6626_v55 = vpack.i.bf16 %v7042_v58, %v7041_v12  ;;  %v7044_v19 = vld [vmem:[%s7395_s10 + $0x38] sm:$0xff]  ;;  %10748 = vst [vmem:[#allocation49_spill] sm:$0xff] %v8562_v20  ;;  %10755 = vst [vmem:[#allocation56_spill] sm:$0xff] %v8595_v51 }
 0x462   : > { %6296 = vmatpush3.bf16.msra.mxu0 %v6293_v53  ;;  %v6636_v37 = vpack.i.bf16 %v7044_v19, %v7043_v5  ;;  %v8575_v19 = vld [vmem:[#allocation2 + $0xb0] sm:$0xff] }
 0x463   : > { %6298 = vmatprep.subr.bf16.mxu0 %v6297_v62  ;;  %6622 = vrot.lane.b32.xlu1 %v6621_v48, %s7311_s23  ;;  %v8547_v48 = vld [vmem:[#allocation2 + $0x98] sm:$0xff]  ;;  %10751 = vst [vmem:[#allocation52_spill] sm:$0xff] %v8575_v19 }
 0x464   : > { %6617 = vrot.lane.b32.xlu0 %v6616_v46, %s7310_s22  ;;  %10744 = vst [vmem:[#allocation16_spill] sm:$0xff] %v8547_v48  ;;  %v8555_v46 = vld [vmem:[#allocation2 + $0xa0] sm:$0xff] }
 0x465   : > { %10747 = vst [vmem:[#allocation48_spill] sm:$0xff] %v8555_v46 }
 0x466   : > { %6300 = vmatpush3.bf16.msra.mxu0 %v6297_v62 }
 0x467   : > { %6632 = vrot.lane.b32.xlu1 %v6631_v22, %s7311_s23 }
 0x468   : > { %6627 = vrot.lane.b32.xlu0 %v6626_v55, %s7311_s23 }
 0x46c   : > { %6637 = vrot.lane.b32.xlu0 %v6636_v37, %s7311_s23 }
 0x48d   : > { %v1714_v53 = vpop.xlane.xlu0 %1713 }
 0x48e   : > { %v8550_v25 = vmax.f32 %v8545_v26, %v1714_v53  ;;  %v1716_v23 = vpop.xlane.xlu1 %1715  ;;  %v8581_v53 = vld [vmem:[#allocation2 + $0xb8] sm:$0xff] }
 0x48f   : > { %v8553_v62 = vmax.f32 %v8547_v48, %v1716_v23  ;;  %10752 = vst [vmem:[#allocation53_spill] sm:$0xff] %v8581_v53 }
 0x490   : > { %10745 = vst [vmem:[#allocation17_spill] sm:$0xff] %v8550_v25  ;;  %2386 = vst.msk [vmem:[#allocation2 + $0x90] sm:$0xff] %vm1097_vm4, %v8550_v25  ;;  %1817 = vperm.xlu1 %6540, %v8550_v25  }
 0x491   : > { %10746 = vst [vmem:[#allocation23_spill] sm:$0xff] %v8553_v62  ;;  %2387 = vst.msk [vmem:[#allocation2 + $0x98] sm:$0xff] %vm1097_vm4, %v8553_v62  ;;  %1822 = vperm.xlu0 %6539, %v8553_v62   ;;  %v1718_v12 = vpop.xlane.xlu0 %1717 }
 0x492   : > { %v1720_v58 = vpop.xlane.xlu1 %1719  ;;  %v8570_v55 = vmax.f32 %v8555_v46, %v1718_v12 }
 0x493   : > { %v8573_v5 = vmax.f32 %v8562_v20, %v1720_v58  ;;  %v8601_v20 = vld [vmem:[#allocation2 + $0xc8] sm:$0xff] }
 0x494   : > { %10749 = vst [vmem:[#allocation50_spill] sm:$0xff] %v8570_v55  ;;  %2388 = vst.msk [vmem:[#allocation2 + $0xa0] sm:$0xff] %vm1097_vm4, %v8570_v55 }
 0x495   : > { %10750 = vst [vmem:[#allocation51_spill] sm:$0xff] %v8573_v5  ;;  %2389 = vst.msk [vmem:[#allocation2 + $0xa8] sm:$0xff] %vm1097_vm4, %v8573_v5  ;;  %1827 = vperm.xlu0 %6539, %v8570_v55   ;;  %1832 = vperm.xlu1 %6540, %v8573_v5   ;;  %v1722_v12 = vpop.xlane.xlu0 %1721 }
 0x496   : > { %v1724_v58 = vpop.xlane.xlu1 %1723  ;;  %v8590_v22 = vmax.f32 %v8575_v19, %v1722_v12  ;;  %10756 = vst [vmem:[#allocation57_spill] sm:$0xff] %v8601_v20  ;;  %v8615_v19 = vld [vmem:[#allocation2 + $0xd0] sm:$0xff] }
 0x497   : > { %v8593_v37 = vmax.f32 %v8581_v53, %v1724_v58  ;;  %10759 = vst [vmem:[#allocation60_spill] sm:$0xff] %v8615_v19  ;;  %v8621_v53 = vld [vmem:[#allocation2 + $0xd8] sm:$0xff] }
 0x498   : > { %10753 = vst [vmem:[#allocation54_spill] sm:$0xff] %v8590_v22  ;;  %2390 = vst.msk [vmem:[#allocation2 + $0xb0] sm:$0xff] %vm1097_vm4, %v8590_v22 }
 0x499   : > { %10754 = vst [vmem:[#allocation55_spill] sm:$0xff] %v8593_v37  ;;  %2391 = vst.msk [vmem:[#allocation2 + $0xb8] sm:$0xff] %vm1097_vm4, %v8593_v37  ;;  %1837 = vperm.xlu0 %6539, %v8590_v22   ;;  %1842 = vperm.xlu1 %6540, %v8593_v37   ;;  %v1726_v12 = vpop.xlane.xlu0 %1725  ;;  %v8635_v22 = vld [vmem:[#allocation2 + $0xe0] sm:$0xff] }
 0x49a   : > { %v1728_v58 = vpop.xlane.xlu1 %1727  ;;  %v8610_v62 = vmax.f32 %v8595_v51, %v1726_v12  ;;  %10760 = vst [vmem:[#allocation61_spill] sm:$0xff] %v8621_v53  ;;  %10763 = vst [vmem:[#allocation64_spill] sm:$0xff] %v8635_v22 }
 0x49b   : > { %v8613_v23 = vmax.f32 %v8601_v20, %v1728_v58  ;;  %v7048_v20 = vld [vmem:[%s7395_s10 + $0x68] sm:$0xff] }
 0x49c   : > { %10757 = vst [vmem:[#allocation58_spill] sm:$0xff] %v8610_v62  ;;  %2392 = vst.msk [vmem:[#allocation2 + $0xc0] sm:$0xff] %vm1097_vm4, %v8610_v62 }
 0x49d   : > { %10758 = vst [vmem:[#allocation59_spill] sm:$0xff] %v8613_v23  ;;  %2393 = vst.msk [vmem:[#allocation2 + $0xc8] sm:$0xff] %vm1097_vm4, %v8613_v23  ;;  %1852 = vperm.xlu0 %6539, %v8613_v23   ;;  %1847 = vperm.xlu1 %6540, %v8610_v62   ;;  %v1730_v12 = vpop.xlane.xlu0 %1729  ;;  %v8641_v23 = vld [vmem:[#allocation2 + $0xe8] sm:$0xff] }
 0x49e   : > { %v1732_v58 = vpop.xlane.xlu1 %1731  ;;  %v8630_v5 = vmax.f32 %v8615_v19, %v1730_v12  ;;  %10764 = vst [vmem:[#allocation65_spill] sm:$0xff] %v8641_v23  ;;  %v7046_v62 = vld [vmem:[%s7395_s10 + $0x48] sm:$0xff] }
 0x49f   : > { %v8633_v51 = vmax.f32 %v8621_v53, %v1732_v58  ;;  %v7045_v58 = vld [vmem:[%s7395_s10 + $0x40] sm:$0xff] }
 0x4a0   : > { %10761 = vst [vmem:[#allocation62_spill] sm:$0xff] %v8630_v5  ;;  %2394 = vst.msk [vmem:[#allocation2 + $0xd0] sm:$0xff] %vm1097_vm4, %v8630_v5  ;;  %v6641_v48 = vpack.i.bf16 %v7046_v62, %v7045_v58  ;;  %v7047_v58 = vld [vmem:[%s7395_s10 + $0x60] sm:$0xff] }
 0x4a1   : > { %10762 = vst [vmem:[#allocation63_spill] sm:$0xff] %v8633_v51  ;;  %2395 = vst.msk [vmem:[#allocation2 + $0xd8] sm:$0xff] %vm1097_vm4, %v8633_v51  ;;  %1862 = vperm.xlu0 %6539, %v8633_v51   ;;  %1857 = vperm.xlu1 %6540, %v8630_v5   ;;  %v1734_v12 = vpop.xlane.xlu0 %1733  ;;  %v8661_v51 = vld [vmem:[#allocation2 + $0xf8] sm:$0xff] }
 0x4a2   : > { %v1736_v37 = vpop.xlane.xlu1 %1735  ;;  %v8652_v19 = vmax.f32 %v8635_v22, %v1734_v12  ;;  %10767 = vst [vmem:[#allocation68_spill] sm:$0xff] %v8661_v51  ;;  %v8672_v12 = vld [vmem:[#allocation2 + $0xf0] sm:$0xff] }
 0x4a3   : > { %v8655_v55 = vmax.f32 %v8641_v23, %v1736_v37  ;;  %10769 = vst [vmem:[#allocation70_spill] sm:$0xff] %v8672_v12 }
 0x4a4   : > { %10765 = vst [vmem:[#allocation66_spill] sm:$0xff] %v8652_v19  ;;  %2396 = vst.msk [vmem:[#allocation2 + $0xe0] sm:$0xff] %vm1097_vm4, %v8652_v19 }
 0x4a5   : > { %10766 = vst [vmem:[#allocation67_spill] sm:$0xff] %v8655_v55  ;;  %2397 = vst.msk [vmem:[#allocation2 + $0xe8] sm:$0xff] %vm1097_vm4, %v8655_v55  ;;  %1867 = vperm.xlu0 %6539, %v8652_v19   ;;  %6642 = vrot.lane.b32.xlu1 %v6641_v48, %s7311_s23 }
 0x4a6   : > { %v1740_v62 = vpop.xlane.xlu1 %1739 }
 0x4a7   : > { %v8670_v37 = vmax.f32 %v8661_v51, %v1740_v62  ;;  %v6651_v51 = vpack.i.bf16 %v7048_v20, %v7047_v58  ;;  %v7051_v62 = vld [vmem:[%s7395_s10 + $0x70] sm:$0xff]  ;;  %v7060_v58 = vld [vmem:[%s7385_s29 + $0x40] sm:$0xff] }
 0x4a8   : > { %v7054_v20 = vld [vmem:[%s7385_s29 + $0x10] sm:$0xff] }
 0x4a9   : > { %10768 = vst [vmem:[#allocation69_spill] sm:$0xff] %v8670_v37  ;;  %2399 = vst.msk [vmem:[#allocation2 + $0xf8] sm:$0xff] %vm1097_vm4, %v8670_v37  ;;  %1872 = vperm.xlu1 %6540, %v8655_v55   ;;  %v7049_v55 = vld [vmem:[%s7395_s10 + $0x50] sm:$0xff] }
 0x4aa   : > { %v1738_v53 = vpop.xlane.xlu1 %1737 }
 0x4ab   : > { %v8680_v48 = vmax.f32 %v8672_v12, %v1738_v53  ;;  %v7050_v53 = vld [vmem:[%s7395_s10 + $0x58] sm:$0xff] }
 0x4ac   : > { %v6646_v23 = vpack.i.bf16 %v7050_v53, %v7049_v55  ;;  %v7055_v55 = vld [vmem:[%s7385_s29 + $0x8] sm:$0xff] }
 0x4ad   : > { %10770 = vst [vmem:[#allocation71_spill] sm:$0xff] %v8680_v48  ;;  %2398 = vst.msk [vmem:[#allocation2 + $0xf0] sm:$0xff] %vm1097_vm4, %v8680_v48  ;;  %1882 = vperm.xlu1 %6540, %v8670_v37   ;;  %1877 = vperm.xlu0 %6539, %v8680_v48   ;;  %v7052_v37 = vld [vmem:[%s7395_s10 + $0x78] sm:$0xff]  ;;  %v7053_v48 = vld [vmem:[%s7385_s29] sm:$0xff] }
 0x4ae   : > { %v6656_v12 = vpack.i.bf16 %v7052_v37, %v7051_v62  ;;  %v7058_v37 = vld [vmem:[%s7385_s29 + $0x30] sm:$0xff]  ;;  %v7063_v53 = vld [vmem:[%s7385_s29 + $0x48] sm:$0xff] }
 0x4af   : > { %v7062_v62 = vld [vmem:[%s7385_s29 + $0x50] sm:$0xff] }
 0x4b1   : > { %6652 = vrot.lane.b32.xlu1 %v6651_v51, %s7311_s23  ;;  %6647 = vrot.lane.b32.xlu0 %v6646_v23, %s7311_s23  ;;  %v7056_v51 = vld [vmem:[%s7385_s29 + $0x20] sm:$0xff]  ;;  %v7057_v23 = vld [vmem:[%s7385_s29 + $0x18] sm:$0xff] }
 0x4b5   : > { %2400 = vrot.lane.b32.xlu1 %v7053_v48, %s7311_s23  ;;  %6657 = vrot.lane.b32.xlu0 %v6656_v12, %s7311_s23  ;;  %v7059_v12 = vld [vmem:[%s7385_s29 + $0x28] sm:$0xff]  ;;  %v7061_v48 = vld [vmem:[%s7385_s29 + $0x38] sm:$0xff] }
 0x4b9   : > { %2404 = vrot.lane.b32.xlu1 %v7054_v20, %s7311_s23  ;;  %2402 = vrot.lane.b32.xlu0 %v7055_v55, %s7311_s23  ;;  %v7064_v20 = vld [vmem:[%s7385_s29 + $0x60] sm:$0xff]  ;;  %v7065_v55 = vld [vmem:[%s7385_s29 + $0x58] sm:$0xff] }
 0x4bd   : > { %2408 = vrot.lane.b32.xlu1 %v7056_v51, %s7311_s23  ;;  %2406 = vrot.lane.b32.xlu0 %v7057_v23, %s7311_s23  ;;  %v7066_v51 = vld [vmem:[%s7385_s29 + $0x70] sm:$0xff]  ;;  %v7067_v23 = vld [vmem:[%s7385_s29 + $0x68] sm:$0xff] }
 0x4c1   : > { %2412 = vrot.lane.b32.xlu1 %v7058_v37, %s7311_s23  ;;  %2410 = vrot.lane.b32.xlu0 %v7059_v12, %s7311_s23  ;;  %v7068_v37 = vld [vmem:[%s7385_s29 + $0x78] sm:$0xff] }
 0x4c5   : > { %2416 = vrot.lane.b32.xlu1 %v7060_v58, %s7311_s23  ;;  %2414 = vrot.lane.b32.xlu0 %v7061_v48, %s7311_s23 }
 0x4c9   : > { %2420 = vrot.lane.b32.xlu1 %v7062_v62, %s7311_s23  ;;  %2418 = vrot.lane.b32.xlu0 %v7063_v53, %s7311_s23 }
 0x4cd   : > { %2424 = vrot.lane.b32.xlu1 %v7064_v20, %s7311_s23  ;;  %2422 = vrot.lane.b32.xlu0 %v7065_v55, %s7311_s23 }
 0x4d1   : > { %2428 = vrot.lane.b32.xlu1 %v7066_v51, %s7311_s23  ;;  %2426 = vrot.lane.b32.xlu0 %v7067_v23, %s7311_s23 }
 0x4d5   : > { %2430 = vrot.lane.b32.xlu0 %v7068_v37, %s7311_s23 }
 0x4da   : > { %v1813_v12 = vpop.permute.xlu1 %1812 }
 0x4db   : > { %v1808_v58 = vpop.permute.xlu0 %1807  ;;  %v1886_v62 = vsub.f32 %v8450_v49, %v1813_v12 }
 0x4dc   : > { %v1885_v48 = vsub.f32 %v8453_v39, %v1808_v58 }
 0x4dd   : > { %v1903_v46 = vmul.f32 1.442695, %v1886_v62 }
 0x4de   : > { %v1901_v53 = vmul.f32 1.442695, %v1885_v48  ;;  %v6613_v20 = vpop.permute.xlu1 %6612 }
 0x4df   : > { %v6608_v19 = vpop.permute.xlu0 %6607  ;;  %v6615_v22 = vunpack.i.h.bf16 %v6613_v20  ;;  %v6614_v55 = vunpack.i.l.bf16 %v6613_v20 }
 0x4e0   : > { %6813 = vpow2.f32 %v1901_v53  ;;  %v6610_v5 = vunpack.i.h.bf16 %v6608_v19  ;;  %v6609_v51 = vunpack.i.l.bf16 %v6608_v19 }
 0x4e1   : > { %v6305_v23 = vpack.c.bf16 %v6615_v22, %v6614_v55  ;;  %6815 = vpow2.f32 %v1903_v46 }
 0x4e2   : > { %v6301_v25 = vpack.c.bf16 %v6610_v5, %v6609_v51  ;;  %v6623_v28 = vpop.permute.xlu1 %6622  ;;  %v10774_v51 = vld [vmem:[#allocation13_spill] sm:$0xff] }
 0x4e3   : > { %v6618_v26 = vpop.permute.xlu0 %6617  ;;  %v6625_v39 = vunpack.i.h.bf16 %v6623_v28  ;;  %v6624_v12 = vunpack.i.l.bf16 %v6623_v28 }
 0x4e4   : > { %6302 = vmatprep.subr.bf16.mxu0 %v6301_v25  ;;  %v6620_v37 = vunpack.i.h.bf16 %v6618_v26  ;;  %v6619_v14 = vunpack.i.l.bf16 %v6618_v26 }
 0x4e5   : > { %6304 = vmatpush3.bf16.msra.mxu0 %v6301_v25  ;;  %v6313_v48 = vpack.c.bf16 %v6625_v39, %v6624_v12 }
 0x4e6   : > { %6306 = vmatprep.subr.bf16.mxu0 %v6305_v23  ;;  %v6309_v49 = vpack.c.bf16 %v6620_v37, %v6619_v14  ;;  %v6633_v28 = vpop.permute.xlu1 %6632 }
 0x4e7   : > { %v6628_v5 = vpop.permute.xlu0 %6627  ;;  %v6635_v46 = vunpack.i.h.bf16 %v6633_v28  ;;  %v6634_v19 = vunpack.i.l.bf16 %v6633_v28 }
 0x4e8   : > { %v6630_v26 = vunpack.i.h.bf16 %v6628_v5  ;;  %v6629_v25 = vunpack.i.l.bf16 %v6628_v5 }
 0x4e9   : > { %6308 = vmatpush3.bf16.msra.mxu0 %v6305_v23  ;;  %v6325_v62 = vpack.c.bf16 %v6635_v46, %v6634_v19 }
 0x4ea   : > { %v8731_v58 = vpop.eup %6813  ;;  %6310 = vmatprep.subr.bf16.mxu0 %v6309_v49  ;;  %v6319_v14 = vpack.c.bf16 %v6630_v26, %v6629_v25 }
 0x4eb   : > { %5905 = vmatprep.mubr.f32.mxu0 %v8731_v58  ;;  %v8736_v22 = vpop.eup %6815  ;;  %v6638_v53 = vpop.permute.xlu0 %6637 }
 0x4ed   : > { %6312 = vmatpush3.bf16.msra.mxu0 %v6309_v49 }
 0x4ee   : > { %6315 = vmatprep.subr.msk.bf16.mxu0 %vm7800_vm3, %v6313_v48 }
 0x4f0   : > { %5906 = vmatmul.mubr.f32.vlgmr.msra.gmra.mrb[16].mxu0 %v8736_v22 }
 0x4f4   : > { %1051 = vadd.xlane.f32.xlu0 %v8304_v38  ;;  %v6639_v38 = vunpack.i.l.bf16 %v6638_v53 }
 0x4f5   : > { %1049 = vadd.xlane.f32.xlu1 %v8301_v33  ;;  %v6640_v33 = vunpack.i.h.bf16 %v6638_v53 }
 0x4f6   : > { %6318 = vmatpush3.bf16.xpose.msk.msra.mxu0 %vm7800_vm3, %v6313_v48 }
 0x4f7   : > { %6321 = vmatprep.subr.msk.bf16.mxu0 %vm7800_vm3, %v6319_v14 }
 0x4f8   : > { %1053 = vadd.xlane.f32.xlu0 %v8326_v50  ;;  %v6331_v50 = vpack.c.bf16 %v6640_v33, %v6639_v38 }
 0x4f9   : > { %1055 = vadd.xlane.f32.xlu1 %v8328_v31 }
 0x4fc   : > { %1057 = vadd.xlane.f32.xlu0 %v8338_v10 }
 0x4fd   : > { %1059 = vadd.xlane.f32.xlu1 %v8340_v54 }
 0x4fe   : > { %6324 = vmatpush3.bf16.xpose.msk.msra.mxu0 %vm7800_vm3, %v6319_v14 }
 0x4ff   : > { %6327 = vmatprep.subr.msk.bf16.mxu0 %vm7800_vm3, %v6325_v62 }
 0x500   : > { %1061 = vadd.xlane.f32.xlu0 %v8343_v9 }
 0x501   : > { %1063 = vadd.xlane.f32.xlu1 %v8348_v17 }
 0x504   : > { %1065 = vadd.xlane.f32.xlu0 %v8356_v59  ;;  %v10771_v59 = vld [vmem:[#allocation18_spill] sm:$0xff] }
 0x505   : > { %1067 = vadd.xlane.f32.xlu1 %v8360_v29  ;;  %v10772_v29 = vld [vmem:[#allocation19_spill] sm:$0xff] }
 0x506   : > { %6330 = vmatpush3.bf16.xpose.msk.msra.mxu0 %vm7800_vm3, %v6325_v62 }
 0x507   : > { %6333 = vmatprep.subr.msk.bf16.mxu0 %vm7800_vm3, %v6331_v50 }
 0x508   : > { %1069 = vadd.xlane.f32.xlu0 %v8365_v32  ;;  %v10773_v32 = vsub.f32 %v10771_v59, %v10772_v29 }
 0x509   : > { %1071 = vadd.xlane.f32.xlu1 %v8367_v35 }
 0x50a   : > { %v859_v35 = vmul.f32 1.442695, %v10773_v32 }
 0x50c   : > { %1073 = vadd.xlane.f32.xlu0 %v8370_v36 }
 0x50d   : > { %1075 = vadd.xlane.f32.xlu1 %v8378_v40 }
 0x50e   : > { %6336 = vmatpush3.bf16.xpose.msk.msra.mxu0 %vm7800_vm3, %v6331_v50 }
 0x50f   : > { %v1818_v31 = vpop.permute.xlu1 %1817 }
 0x510   : > { %v1887_v10 = vsub.f32 %v8458_v42, %v1818_v31  ;;  %v1823_v54 = vpop.permute.xlu0 %1822  ;;  %1077 = vadd.xlane.f32.xlu0 %v8380_v43  ;;  %v10775_v43 = vld [vmem:[#allocation14_spill] sm:$0xff] }
 0x511   : > { %v1888_v9 = vsub.f32 %v8456_v41, %v1823_v54  ;;  %1079 = vadd.xlane.f32.xlu1 %v8386_v1  ;;  %v10776_v23 = vsub.f32 %v10774_v51, %v10775_v43 }
 0x512   : > { %v1905_v17 = vmul.f32 1.442695, %v1887_v10 }
 0x513   : > { %v1907_v36 = vmul.f32 1.442695, %v1888_v9  ;;  %v857_v41 = vmul.f32 1.442695, %v10776_v23 }
 0x514   : > { %6817 = vpow2.f32 %v1905_v17  ;;  %v1828_v40 = vpop.permute.xlu0 %1827  ;;  %v1833_v20 = vpop.permute.xlu1 %1832 }
 0x515   : > { %6819 = vpow2.f32 %v1907_v36  ;;  %v1889_v55 = vsub.f32 %v8462_v61, %v1828_v40  ;;  %v1890_v42 = vsub.f32 %v8460_v60, %v1833_v20 }
 0x516   : > { %6821 = vpow2.f32 %v859_v35 }
 0x517   : > { %v1909_v1 = vmul.f32 1.442695, %v1889_v55  ;;  %v1911_v37 = vmul.f32 1.442695, %v1890_v42 }
 0x518   : > { %v1838_v49 = vpop.permute.xlu0 %1837  ;;  %v1843_v39 = vpop.permute.xlu1 %1842 }
 0x519   : > { %6823 = vpow2.f32 %v1909_v1  ;;  %v1891_v12 = vsub.f32 %v8466_v52, %v1838_v49  ;;  %v1892_v48 = vsub.f32 %v8464_v44, %v1843_v39 }
 0x51a   : > { %6825 = vpow2.f32 %v1911_v37 }
 0x51b   : > { %6827 = vpow2.f32 %v857_v41  ;;  %v1913_v5 = vmul.f32 1.442695, %v1891_v12  ;;  %v1915_v61 = vmul.f32 1.442695, %v1892_v48 }
 0x51c   : > { %v1853_v26 = vpop.permute.xlu0 %1852  ;;  %v1848_v60 = vpop.permute.xlu1 %1847 }
 0x51d   : > { %6829 = vpow2.f32 %v1913_v5  ;;  %v1894_v25 = vsub.f32 %v8470_v16, %v1853_v26  ;;  %v1893_v14 = vsub.f32 %v8472_v45, %v1848_v60 }
 0x51e   : > { %v8783_v28 = vpop.eup %6817  ;;  %6831 = vpow2.f32 %v1915_v61 }
 0x51f   : > { %v8785_v46 = vpop.eup %6819  ;;  %v1919_v19 = vmul.f32 1.442695, %v1894_v25  ;;  %v1917_v52 = vmul.f32 1.442695, %v1893_v14  ;;  %5908 = vmatprep.mubr.f32.mxu0 %v8783_v28 }
 0x520   : > { %v1863_v44 = vpop.permute.xlu0 %1862  ;;  %v1858_v62 = vpop.permute.xlu1 %1857  ;;  %5909 = vmatmul.mubr.f32.gmra.mrb[18].mxu0 %v8785_v46 }
 0x521   : > { %v8789_v53 = vpop.eup %6821  ;;  %6833 = vpow2.f32 %v1919_v19  ;;  %v1896_v16 = vsub.f32 %v8477_v34, %v1863_v44  ;;  %v1895_v45 = vsub.f32 %v8479_v47, %v1858_v62 }
 0x522   : > { %6835 = vpow2.f32 %v1917_v52  ;;  %1137 = vperm.xlu1 %6540, %v8789_v53  }
 0x523   : > { %v8794_v33 = vpop.eup %6823  ;;  %v1923_v38 = vmul.f32 1.442695, %v1896_v16  ;;  %v1921_v50 = vmul.f32 1.442695, %v1895_v45 }
 0x524   : > { %v8796_v31 = vpop.eup %6825  ;;  %v1868_v10 = vpop.permute.xlu0 %1867  ;;  %5911 = vmatprep.mubr.f32.mxu0 %v8794_v33 }
 0x525   : > { %v6643_v54 = vpop.permute.xlu1 %6642  ;;  %v8799_v9 = vpop.eup %6827  ;;  %6837 = vpow2.f32 %v1923_v38  ;;  %v1897_v34 = vsub.f32 %v8484_v56, %v1868_v10  ;;  %5912 = vmatmul.mubr.f32.gmra.mrb[20].mxu0 %v8796_v31 }
 0x526   : > { %v6645_v17 = vunpack.i.h.bf16 %v6643_v54  ;;  %v6644_v47 = vunpack.i.l.bf16 %v6643_v54  ;;  %6839 = vpow2.f32 %v1921_v50  ;;  %1132 = vperm.xlu0 %6539, %v8799_v9  }
 0x527   : > { %v8804_v59 = vpop.eup %6829  ;;  %v1925_v29 = vmul.f32 1.442695, %v1897_v34 }
 0x528   : > { %v6337_v32 = vpack.c.bf16 %v6645_v17, %v6644_v47  ;;  %v8806_v35 = vpop.eup %6831  ;;  %5914 = vmatprep.mubr.f32.mxu0 %v8804_v59 }
 0x529   : > { %v1873_v36 = vpop.permute.xlu1 %1872  ;;  %6841 = vpow2.f32 %v1925_v29  ;;  %5915 = vmatmul.mubr.f32.gmra.mrb[22].mxu0 %v8806_v35 }
 0x52a   : > { %v1898_v40 = vsub.f32 %v8482_v30, %v1873_v36  ;;  %6339 = vmatprep.subr.msk.bf16.mxu0 %vm7800_vm3, %v6337_v32 }
 0x52b   : > { %6342 = vmatpush3.bf16.xpose.msk.msra.mxu0 %vm7800_vm3, %v6337_v32  ;;  %v8815_v56 = vpop.eup %6833 }
 0x52c   : > { %v1927_v20 = vmul.f32 1.442695, %v1898_v40  ;;  %v8817_v55 = vpop.eup %6835  ;;  %v1878_v42 = vpop.permute.xlu0 %1877 }
 0x52d   : > { %v1883_v51 = vpop.permute.xlu1 %1882  ;;  %v1899_v43 = vsub.f32 %v8488_v57, %v1878_v42  ;;  %5917 = vmatprep.mubr.f32.mxu0 %v8817_v55 }
 0x52e   : > { %6843 = vpow2.f32 %v1927_v20  ;;  %v1900_v30 = vsub.f32 %v8486_v21, %v1883_v51  ;;  %5918 = vmatmul.mubr.f32.gmra.mrb[24].mxu0 %v8815_v56 }
 0x52f   : > { %v8823_v23 = vpop.eup %6837  ;;  %v1929_v41 = vmul.f32 1.442695, %v1899_v43  ;;  %v10777_v43 = vld [vmem:[#allocation20_spill] sm:$0xff] }
 0x530   : > { %v1931_v1 = vmul.f32 1.442695, %v1900_v30  ;;  %v8825_v37 = vpop.eup %6839  ;;  %v6648_v49 = vpop.permute.xlu0 %6647  ;;  %v10778_v30 = vsub.f32 %v10777_v43, %v8112_v8 }
 0x531   : > { %v6653_v39 = vpop.permute.xlu1 %6652  ;;  %6845 = vpow2.f32 %v1929_v41  ;;  %v6650_v12 = vunpack.i.h.bf16 %v6648_v49  ;;  %v6649_v48 = vunpack.i.l.bf16 %v6648_v49  ;;  %5920 = vmatprep.mubr.f32.mxu0 %v8825_v37 }
 0x532   : > { %v6655_v57 = vunpack.i.h.bf16 %v6653_v39  ;;  %6847 = vpow2.f32 %v1931_v1  ;;  %5921 = vmatmul.mubr.f32.gmra.mrb[26].mxu0 %v8823_v23  ;;  %v6654_v21 = vunpack.i.l.bf16 %v6653_v39  ;;  %v861_v41 = vmul.f32 1.442695, %v10778_v30  ;;  %v10779_v1 = vld [vmem:[#allocation15_spill] sm:$0xff] }
 0x533   : > { %v8829_v5 = vpop.eup %6841  ;;  %v6343_v61 = vpack.c.bf16 %v6650_v12, %v6649_v48  ;;  %v10780_v49 = vsub.f32 %v10779_v1, %v8082_v24  ;;  %v7069_v12 = vld [vmem:[%s7400_s14] sm:$0xff]  ;;  %v7070_v48 = vld [vmem:[%s7400_s14 + $0x8] sm:$0xff]  ;;  %v10784_v24 = vld [vmem:[#allocation24_spill] sm:$0xff] }
 0x534   : > { %5923 = vmatprep.mubr.f32.mxu0 %v8829_v5  ;;  %v6349_v26 = vpack.c.bf16 %v6655_v57, %v6654_v21  ;;  %v6658_v60 = vpop.permute.xlu0 %6657  ;;  %v6661_v57 = vpack.i.bf16 %v7070_v48, %v7069_v12  ;;  %6849 = vpow2.f32 %v861_v41  ;;  %v10781_v21 = vsub.f32 %v8099_v13, %v8115_v15  ;;  %v1020_v1 = vld [vmem:[#allocation3 + $0x18] sm:$0xff]  ;;  %v10796_v48 = vld [vmem:[#allocation31_spill] sm:$0xff] }
 0x535   : > { %6345 = vmatprep.subr.msk.bf16.mxu0 %vm7800_vm3, %v6343_v61  ;;  %v6660_v14 = vunpack.i.h.bf16 %v6658_v60  ;;  %v6659_v19 = vunpack.i.l.bf16 %v6658_v60  ;;  %v2401_v62 = vpop.permute.xlu1 %2400  ;;  %v863_v39 = vmul.f32 1.442695, %v10780_v49 }
 0x536   : > { %6348 = vmatpush3.bf16.xpose.msk.msra.mxu0 %vm7800_vm3, %v6343_v61  ;;  %6662 = vrot.lane.b32.xlu0 %v6661_v57, %s7311_s23  ;;  %v865_v61 = vmul.f32 1.442695, %v10781_v21 }
 0x537   : > { %6351 = vmatprep.subr.msk.bf16.mxu0 %vm7800_vm3, %v6349_v26  ;;  %v6355_v44 = vpack.c.bf16 %v6660_v14, %v6659_v19  ;;  %6851 = vpow2.f32 %v863_v39  ;;  %v7071_v14 = vld [vmem:[%s7400_s14 + $0x10] sm:$0xff]  ;;  %v7072_v19 = vld [vmem:[%s7400_s14 + $0x18] sm:$0xff] }
 0x538   : > { %v8836_v25 = vpop.eup %6843  ;;  %v2403_v45 = vpop.permute.xlu0 %2402  ;;  %6853 = vpow2.f32 %v865_v61 }
 0x539   : > { %5924 = vmatmul.mubr.f32.gmra.mrb[28].mxu0 %v8836_v25  ;;  %v2405_v38 = vpop.permute.xlu1 %2404 }
 0x53b   : > { %v8841_v52 = vpop.eup %6845 }
 0x53c   : > { %v8843_v16 = vpop.eup %6847  ;;  %5926 = vmatprep.mubr.f32.mxu0 %v8841_v52  ;;  %v2407_v50 = vpop.permute.xlu0 %2406 }
 0x53d   : > { %5927 = vmatmul.mubr.f32.gmra.mrb[30].mxu0 %v8843_v16  ;;  %v2409_v10 = vpop.permute.xlu1 %2408 }
 0x53e   : > { %6354 = vmatpush3.bf16.xpose.msk.msra.mxu0 %vm7800_vm3, %v6349_v26  ;;  %5961 = vmatprep.mubr.msk.f32.mxu0 %vm535_vm2, %v2401_v62  ;;  %v10782_v26 = vld [vmem:[#allocation22_spill] sm:$0xff]  ;;  %v10785_v62 = vld [vmem:[#allocation25_spill] sm:$0xff] }
 0x53f   : > { %6357 = vmatprep.subr.msk.bf16.mxu0 %vm7800_vm3, %v6355_v44  ;;  %v10783_v60 = vsub.f32 %v10782_v26, %v8141_v2  ;;  %v10789_v2 = vld [vmem:[#allocation27_spill] sm:$0xff] }
 0x540   : > { %v2411_v54 = vpop.permute.xlu0 %2410 }
 0x541   : > { %v2413_v34 = vpop.permute.xlu1 %2412  ;;  %v867_v8 = vmul.f32 1.442695, %v10783_v60  ;;  %v1021_v60 = vld [vmem:[#allocation3 + $0x20] sm:$0xff] }
 0x543   : > { %6855 = vpow2.f32 %v867_v8 }
 0x544   : > { %v2415_v17 = vpop.permute.xlu0 %2414 }
 0x545   : > { %v2417_v47 = vpop.permute.xlu1 %2416 }
 0x546   : > { %6360 = vmatpush3.bf16.xpose.msk.msra.mxu0 %vm7800_vm3, %v6355_v44  ;;  %v6666_v44 = vpack.i.bf16 %v7072_v19, %v7071_v14  ;;  %v1022_v19 = vld [vmem:[#allocation3 + $0x28] sm:$0xff] }
 0x548   : > { %v2419_v29 = vpop.permute.xlu0 %2418  ;;  %6667 = vrot.lane.b32.xlu1 %v6666_v44, %s7311_s23 }
 0x549   : > { %v2421_v32 = vpop.permute.xlu1 %2420 }
 0x54c   : > { %v2423_v36 = vpop.permute.xlu0 %2422 }
 0x54d   : > { %5962 = vmatmul.mubr.msk.f32.vlgmr.msra.gmra.mrb[32].mxu0 %vm535_vm2, %v2403_v45  ;;  %v2425_v40 = vpop.permute.xlu1 %2424  ;;  %v10786_v45 = vsub.f32 %v10784_v24, %v10785_v62 }
 0x54e   : > { %5964 = vmatprep.mubr.msk.f32.mxu0 %vm535_vm2, %v2405_v38 }
 0x54f   : > { %v869_v38 = vmul.f32 1.442695, %v10786_v45  ;;  %v10800_v45 = vld [vmem:[#allocation33_spill] sm:$0xff] }
 0x550   : > { %v2427_v20 = vpop.permute.xlu0 %2426 }
 0x551   : > { %5965 = vmatmul.mubr.msk.f32.gmra.mrb[34].mxu0 %vm535_vm2, %v2407_v50  ;;  %v2429_v42 = vpop.permute.xlu1 %2428  ;;  %v10787_v50 = vld [vmem:[#allocation26_spill] sm:$0xff]  ;;  %6857 = vpow2.f32 %v869_v38  ;;  %v10801_v38 = vsub.f32 %v10800_v45, %v8222_v3  ;;  %v1024_v3 = vld [vmem:[#allocation3 + $0x38] sm:$0xff] }
 0x552   : > { %5967 = vmatprep.mubr.msk.f32.mxu0 %vm535_vm2, %v2409_v10  ;;  %v10788_v15 = vsub.f32 %v10787_v50, %v8163_v27  ;;  %v1018_v10 = vld [vmem:[#allocation3 + $0x8] sm:$0xff]  ;;  %v1028_v45 = vld [vmem:[#allocation3 + $0x58] sm:$0xff] }
 0x553   : > { %v883_v50 = vmul.f32 1.442695, %v10801_v38 }
 0x554   : > { %v2431_v51 = vpop.permute.xlu0 %2430  ;;  %v871_v13 = vmul.f32 1.442695, %v10788_v15 }
 0x555   : > { %5968 = vmatmul.mubr.msk.f32.gmra.mrb[36].mxu0 %vm535_vm2, %v2411_v54  ;;  %v1017_v54 = vld [vmem:[#allocation3] sm:$0xff] }
 0x556   : > { %5970 = vmatprep.mubr.msk.f32.mxu0 %vm535_vm2, %v2413_v34  ;;  %v10790_v34 = vsub.f32 %v10789_v2, %v8168_v0  ;;  %6859 = vpow2.f32 %v871_v13  ;;  %v1033_v27 = vmul.f32 %v8799_v9, %v1017_v54  ;;  %v10794_v0 = vld [vmem:[#allocation29_spill] sm:$0xff]  ;;  %v1023_v54 = vld [vmem:[#allocation3 + $0x30] sm:$0xff] }
 0x557   : > { %v10795_v49 = vsub.f32 %v10794_v0, %v8187_v4 }
 0x559   : > { %5971 = vmatmul.mubr.msk.f32.gmra.mrb[38].mxu0 %vm535_vm2, %v2415_v17  ;;  %v873_v17 = vmul.f32 1.442695, %v10790_v34  ;;  %v877_v39 = vmul.f32 1.442695, %v10795_v49  ;;  %v1025_v49 = vld [vmem:[#allocation3 + $0x40] sm:$0xff] }
 0x55a   : > { %5973 = vmatprep.mubr.msk.f32.mxu0 %vm535_vm2, %v2417_v47  ;;  %v10791_v47 = vld [vmem:[#allocation28_spill] sm:$0xff] }
 0x55b   : > { %6861 = vpow2.f32 %v873_v17 }
 0x55d   : > { %5974 = vmatmul.mubr.msk.f32.gmra.mrb[40].mxu0 %vm535_vm2, %v2419_v29  ;;  %v10792_v29 = vld [vmem:[#allocation30_spill] sm:$0xff] }
 0x55e   : > { %5976 = vmatprep.mubr.msk.f32.mxu0 %vm535_vm2, %v2421_v32  ;;  %v10793_v32 = vsub.f32 %v10791_v47, %v10792_v29  ;;  %v10802_v47 = vsub.f32 %v8214_v63, %v8225_v11 }
 0x560   : > { %v885_v29 = vmul.f32 1.442695, %v10802_v47  ;;  %v1030_v47 = vld [vmem:[#allocation3 + $0x68] sm:$0xff] }
 0x561   : > { %5977 = vmatmul.mubr.msk.f32.gmra.mrb[42].mxu0 %vm535_vm2, %v2423_v36  ;;  %v875_v36 = vmul.f32 1.442695, %v10793_v32 }
 0x562   : > { %5979 = vmatprep.mubr.msk.f32.mxu0 %vm535_vm2, %v2425_v40  ;;  %v1034_v40 = vmul.f32 %v8789_v53, %v1018_v10  ;;  %v10797_v53 = vsub.f32 %v10796_v48, %v8202_v7  ;;  %v10798_v7 = vld [vmem:[#allocation32_spill] sm:$0xff] }
 0x563   : > { %6863 = vpow2.f32 %v875_v36  ;;  %v10799_v44 = vsub.f32 %v10798_v7, %v8205_v18  ;;  %v10803_v36 = vld [vmem:[#allocation34_spill] sm:$0xff] }
 0x564   : > { %v879_v57 = vmul.f32 1.442695, %v10797_v53  ;;  %6865 = vpow2.f32 %v877_v39  ;;  %v1026_v53 = vld [vmem:[#allocation3 + $0x48] sm:$0xff] }
 0x565   : > { %5980 = vmatmul.mubr.msk.f32.gmra.mrb[44].mxu0 %vm535_vm2, %v2427_v20  ;;  %v8900_v20 = vpop.eup %6849  ;;  %v881_v24 = vmul.f32 1.442695, %v10799_v44 }
 0x566   : > { %5982 = vmatprep.mubr.msk.f32.mxu0 %vm535_vm2, %v2429_v42  ;;  %v8903_v43 = vpop.eup %6851  ;;  %6867 = vpow2.f32 %v879_v57 }
 0x567   : > { %v8913_v21 = vpop.eup %6853  ;;  %v1036_v26 = vmul.f32 %v8903_v43, %v1020_v1  ;;  %6869 = vpow2.f32 %v881_v24 }
 0x568   : > { %v8917_v4 = vpop.eup %6855  ;;  %v1037_v15 = vmul.f32 %v8913_v21, %v1021_v60  ;;  %6871 = vpow2.f32 %v883_v50 }
 0x569   : > { %5983 = vmatmul.mubr.msk.f32.gmra.mrb[46].mxu0 %vm535_vm2, %v2431_v51  ;;  %v1019_v51 = vld [vmem:[#allocation3 + $0x10] sm:$0xff]  ;;  %v8927_v13 = vpop.eup %6857  ;;  %v1038_v18 = vmul.f32 %v8917_v4, %v1022_v19  ;;  %6873 = vpow2.f32 %v885_v29  ;;  %v7076_v19 = vld [vmem:[%s7400_s14 + $0x38] sm:$0xff] }
 0x56a   : > { %v1035_v9 = vmul.f32 %v8900_v20, %v1019_v51  ;;  %v8931_v2 = vpop.eup %6859  ;;  %v1039_v51 = vmul.f32 %v8927_v13, %v1023_v54  ;;  %v1029_v54 = vld [vmem:[#allocation3 + $0x60] sm:$0xff] }
 0x56b   : > { %v8945_v0 = vpop.eup %6861  ;;  %v1040_v63 = vmul.f32 %v8931_v2, %v1024_v3 }
 0x56d   : > { %v8949_v39 = vpop.eup %6863 }
 0x56e   : > { %v1042_v60 = vmul.f32 %v8949_v39, %v1026_v53 }
 0x581   : > { %v1052_v42 = vpop.xlane.xlu0 %1051 }
 0x582   : > { %v1082_v30 = vadd.f32 %v1052_v42, %v1034_v40  ;;  %v1050_v41 = vpop.xlane.xlu1 %1049  ;;  %v10804_v40 = vld [vmem:[#allocation35_spill] sm:$0xff] }
 0x583   : > { %v1081_v12 = vadd.f32 %v1050_v41, %v1033_v27  ;;  %v10805_v42 = vsub.f32 %v10803_v36, %v10804_v40  ;;  %v7074_v41 = vld [vmem:[%s7400_s14 + $0x28] sm:$0xff] }
 0x584   : > { %1099 = vst.msk [vmem:[#allocation3 + $0x8] sm:$0xff] %vm1097_vm4, %v1082_v30  ;;  %v7073_v30 = vld [vmem:[%s7400_s14 + $0x20] sm:$0xff] }
 0x585   : > { %1098 = vst.msk [vmem:[#allocation3] sm:$0xff] %vm1097_vm4, %v1081_v12  ;;  %v1054_v61 = vpop.xlane.xlu0 %1053  ;;  %v887_v27 = vmul.f32 1.442695, %v10805_v42  ;;  %v8943_v1 = vpack.i.bf16 %v7074_v41, %v7073_v30 }
 0x586   : > { %v1083_v8 = vadd.f32 %v1054_v61, %v1035_v9  ;;  %v1056_v14 = vpop.xlane.xlu1 %1055  ;;  %v1041_v9 = vmul.f32 %v8945_v0, %v1025_v49  ;;  %v8955_v61 = vpop.eup %6865 }
 0x587   : > { %v1084_v62 = vadd.f32 %v1056_v14, %v1036_v26  ;;  %10806 = vst [vmem:[#allocation18_spill] sm:$0xff] %v8943_v1  ;;  %6672 = vrot.lane.b32.xlu0 %v8943_v1, %s7311_s23  ;;  %6875 = vpow2.f32 %v887_v27  ;;  %v7075_v14 = vld [vmem:[%s7400_s14 + $0x30] sm:$0xff]  ;;  %v8963_v44 = vpop.eup %6867 }
 0x588   : > { %1100 = vst.msk [vmem:[#allocation3 + $0x10] sm:$0xff] %vm1097_vm4, %v1083_v8  ;;  %v1027_v8 = vld [vmem:[#allocation3 + $0x50] sm:$0xff]  ;;  %v8961_v7 = vpack.i.bf16 %v7076_v19, %v7075_v14  ;;  %v1114_v14 = vld [vmem:[#allocation4] sm:$0xff] }
 0x589   : > { %1101 = vst.msk [vmem:[#allocation3 + $0x18] sm:$0xff] %vm1097_vm4, %v1084_v62  ;;  %v1058_v10 = vpop.xlane.xlu0 %1057  ;;  %v1043_v50 = vmul.f32 %v8955_v61, %v1027_v8  ;;  %v1031_v27 = vld [vmem:[#allocation3 + $0x70] sm:$0xff]  ;;  %v10810_v19 = vld [vmem:[#allocation5_spill] sm:$0xff] }
 0x58a   : > { %v1085_v34 = vadd.f32 %v1058_v10, %v1037_v15  ;;  %v1060_v17 = vpop.xlane.xlu1 %1059  ;;  %10807 = vst [vmem:[#allocation19_spill] sm:$0xff] %v8961_v7  ;;  %v8969_v15 = vpop.eup %6869 }
 0x58b   : > { %v1086_v32 = vadd.f32 %v1060_v17, %v1038_v18  ;;  %6677 = vrot.lane.b32.xlu0 %v8961_v7, %s7311_s23  ;;  %v1044_v18 = vmul.f32 %v8963_v44, %v1028_v45 }
 0x58c   : > { %1102 = vst.msk [vmem:[#allocation3 + $0x20] sm:$0xff] %vm1097_vm4, %v1085_v34  ;;  %v8973_v34 = vpop.eup %6871 }
 0x58d   : > { %1103 = vst.msk [vmem:[#allocation3 + $0x28] sm:$0xff] %vm1097_vm4, %v1086_v32  ;;  %v1062_v11 = vpop.xlane.xlu0 %1061  ;;  %10808 = vst [vmem:[#allocation13_spill] sm:$0xff] %v8973_v34  ;;  %v1045_v32 = vmul.f32 %v8969_v15, %v1029_v54  ;;  %v8977_v36 = vpop.eup %6873  ;;  %v1046_v42 = vmul.f32 %v8973_v34, %v1030_v47 }
 0x58e   : > { %v1087_v12 = vadd.f32 %v1062_v11, %v1039_v51  ;;  %v1064_v48 = vpop.xlane.xlu1 %1063  ;;  %v1032_v11 = vld [vmem:[#allocation3 + $0x78] sm:$0xff]  ;;  %v1047_v49 = vmul.f32 %v8977_v36, %v1031_v27 }
 0x58f   : > { %v1088_v57 = vadd.f32 %v1064_v48, %v1040_v63 }
 0x590   : > { %1104 = vst.msk [vmem:[#allocation3 + $0x30] sm:$0xff] %vm1097_vm4, %v1087_v12 }
 0x591   : > { %1105 = vst.msk [vmem:[#allocation3 + $0x38] sm:$0xff] %vm1097_vm4, %v1088_v57  ;;  %v1066_v26 = vpop.xlane.xlu0 %1065  ;;  %v8981_v51 = vpop.eup %6875 }
 0x592   : > { %v1089_v24 = vadd.f32 %v1066_v26, %v1041_v9  ;;  %v1068_v62 = vpop.xlane.xlu1 %1067  ;;  %10809 = vst [vmem:[#allocation14_spill] sm:$0xff] %v8981_v51  ;;  %v1048_v48 = vmul.f32 %v8981_v51, %v1032_v11  ;;  %v1115_v26 = vld [vmem:[#allocation4 + $0x8] sm:$0xff] }
 0x593   : > { %v1090_v38 = vadd.f32 %v1068_v62, %v1042_v60 }
 0x594   : > { %1106 = vst.msk [vmem:[#allocation3 + $0x40] sm:$0xff] %vm1097_vm4, %v1089_v24 }
 0x595   : > { %1107 = vst.msk [vmem:[#allocation3 + $0x48] sm:$0xff] %vm1097_vm4, %v1090_v38  ;;  %v1070_v10 = vpop.xlane.xlu0 %1069  ;;  %v10811_v38 = vld [vmem:[#allocation6_spill] sm:$0xff] }
 0x596   : > { %v1091_v17 = vadd.f32 %v1070_v10, %v1043_v50  ;;  %v1072_v3 = vpop.xlane.xlu1 %1071 }
 0x597   : > { %v1092_v29 = vadd.f32 %v1072_v3, %v1044_v18 }
 0x598   : > { %1108 = vst.msk [vmem:[#allocation3 + $0x50] sm:$0xff] %vm1097_vm4, %v1091_v17 }
 0x599   : > { %1109 = vst.msk [vmem:[#allocation3 + $0x58] sm:$0xff] %vm1097_vm4, %v1092_v29  ;;  %v1074_v40 = vpop.xlane.xlu0 %1073 }
 0x59a   : > { %v1093_v30 = vadd.f32 %v1074_v40, %v1045_v32  ;;  %v1076_v41 = vpop.xlane.xlu1 %1075 }
 0x59b   : > { %v1094_v63 = vadd.f32 %v1076_v41, %v1046_v42 }
 0x59c   : > { %1110 = vst.msk [vmem:[#allocation3 + $0x60] sm:$0xff] %vm1097_vm4, %v1093_v30 }
 0x59d   : > { %1111 = vst.msk [vmem:[#allocation3 + $0x68] sm:$0xff] %vm1097_vm4, %v1094_v63  ;;  %v1078_v12 = vpop.xlane.xlu0 %1077 }
 0x59e   : > { %v1095_v53 = vadd.f32 %v1078_v12, %v1047_v49  ;;  %v1080_v57 = vpop.xlane.xlu1 %1079 }
 0x59f   : > { %v1096_v9 = vadd.f32 %v1080_v57, %v1048_v48 }
 0x5a0   : > { %1112 = vst.msk [vmem:[#allocation3 + $0x70] sm:$0xff] %vm1097_vm4, %v1095_v53 }
 0x5a1   : > { %1113 = vst.msk [vmem:[#allocation3 + $0x78] sm:$0xff] %vm1097_vm4, %v1096_v9 }
 0x5a2   : > { %v1138_v60 = vpop.permute.xlu1 %1137 }
 0x5a3   : > { %v1211_v8 = vmul.f32 %v1138_v60, %v1115_v26 }
 0x5a5   : > { %v1372_v24 = vadd.f32 %v10810_v19, %v1211_v8  ;;  %v1133_v62 = vpop.permute.xlu0 %1132 }
 0x5a6   : > { %v1210_v45 = vmul.f32 %v1133_v62, %v1114_v14 }
 0x5a7   : > { %1388 = vst.msk [vmem:[#allocation4 + $0x8] sm:$0xff] %vm535_vm2, %v1372_v24 }
 0x5a8   : > { %v1371_v50 = vadd.f32 %v10811_v38, %v1210_v45 }
 0x5a9   : > { %v6663_v54 = vpop.permute.xlu0 %6662 }
 0x5aa   : > { %1387 = vst.msk [vmem:[#allocation4] sm:$0xff] %vm535_vm2, %v1371_v50  ;;  %v6665_v17 = vunpack.i.h.bf16 %v6663_v54  ;;  %v6664_v3 = vunpack.i.l.bf16 %v6663_v54 }
 0x5ac   : > { %v6361_v40 = vpack.c.bf16 %v6665_v17, %v6664_v3 }
 0x5ae   : > { %6362 = vmatprep.subr.bf16.mxu1 %v6361_v40 }
 0x5af   : > { %6364 = vmatpush3.bf16.msra.mxu1 %v6361_v40 }
 0x5ba   : > { %v6668_v47 = vpop.permute.xlu1 %6667 }
 0x5bb   : > { %v6670_v29 = vunpack.i.h.bf16 %v6668_v47  ;;  %v6669_v32 = vunpack.i.l.bf16 %v6668_v47 }
 0x5bd   : > { %v6365_v42 = vpack.c.bf16 %v6670_v29, %v6669_v32 }
 0x5bf   : > { %6366 = vmatprep.subr.bf16.mxu1 %v6365_v42 }
 0x5c0   : > { %6368 = vmatpush3.bf16.msra.mxu1 %v6365_v42 }
 0x5c3   : > { %v8993_v10 = vpop.f32.mrb[16].mxu0 }
 0x5c4   : > { %10812 = vst [vmem:[#allocation20_spill] sm:$0xff] %v8993_v10  ;;  %v8995_v18 = vpop.f32.mrb[17].mxu0 }
 0x5c5   : > { %10813 = vst [vmem:[#allocation15_spill] sm:$0xff] %v8995_v18 }
 0x5f3   : > { %v8997_v27 = vpop.f32.mrb[18].mxu0 }
 0x5f4   : > { %10814 = vst [vmem:[#allocation22_spill] sm:$0xff] %v8997_v27  ;;  %v8999_v30 = vpop.f32.mrb[19].mxu0 }
 0x5f5   : > { %10815 = vst [vmem:[#allocation24_spill] sm:$0xff] %v8999_v30  ;;  %v7084_v30 = vld [vmem:[%s7400_s14 + $0x58] sm:$0xff] }
 0x5f8   : > { %v9001_v41 = vpop.f32.mrb[20].mxu0 }
 0x5f9   : > { %10816 = vst [vmem:[#allocation25_spill] sm:$0xff] %v9001_v41  ;;  %v9003_v11 = vpop.f32.mrb[21].mxu0  ;;  %v6673_v12 = vpop.permute.xlu0 %6672 }
 0x5fa   : > { %10817 = vst [vmem:[#allocation26_spill] sm:$0xff] %v9003_v11  ;;  %v6675_v53 = vunpack.i.h.bf16 %v6673_v12  ;;  %v6674_v57 = vunpack.i.l.bf16 %v6673_v12 }
 0x5fc   : > { %v9005_v63 = vpop.f32.mrb[22].mxu0  ;;  %v6369_v26 = vpack.c.bf16 %v6675_v53, %v6674_v57 }
 0x5fd   : > { %10818 = vst [vmem:[#allocation27_spill] sm:$0xff] %v9005_v63  ;;  %v9007_v49 = vpop.f32.mrb[23].mxu0  ;;  %v6678_v8 = vpop.permute.xlu0 %6677  ;;  %v7080_v63 = vld [vmem:[%s7400_s14 + $0x68] sm:$0xff] }
 0x5fe   : > { %10819 = vst [vmem:[#allocation28_spill] sm:$0xff] %v9007_v49  ;;  %6370 = vmatprep.subr.bf16.mxu1 %v6369_v26  ;;  %v6680_v19 = vunpack.i.h.bf16 %v6678_v8  ;;  %v6679_v24 = vunpack.i.l.bf16 %v6678_v8  ;;  %v7078_v8 = vld [vmem:[%s7400_s14 + $0x48] sm:$0xff] }
 0x5ff   : > { %6372 = vmatpush3.bf16.msra.mxu1 %v6369_v26  ;;  %v7077_v26 = vld [vmem:[%s7400_s14 + $0x40] sm:$0xff] }
 0x600   : > { %v6373_v62 = vpack.c.bf16 %v6680_v19, %v6679_v24  ;;  %v9052_v19 = vpack.i.bf16 %v7078_v8, %v7077_v26  ;;  %v9079_v8 = vld [vmem:[#allocation2 + $0x108] sm:$0xff] }
 0x601   : > { %v9009_v48 = vpop.f32.mrb[24].mxu0  ;;  %10829 = vst [vmem:[#allocation72_spill] sm:$0xff] %v9079_v8 }
 0x602   : > { %10820 = vst [vmem:[#allocation30_spill] sm:$0xff] %v9009_v48  ;;  %v9011_v9 = vpop.f32.mrb[25].mxu0  ;;  %6374 = vmatprep.subr.bf16.mxu1 %v6373_v62  ;;  %10828 = vst [vmem:[#allocation6_spill] sm:$0xff] %v9052_v19  ;;  %v7079_v48 = vld [vmem:[%s7400_s14 + $0x60] sm:$0xff] }
 0x603   : > { %10821 = vst [vmem:[#allocation29_spill] sm:$0xff] %v9011_v9  ;;  %6376 = vmatpush3.bf16.msra.mxu1 %v6373_v62  ;;  %v9093_v49 = vpack.i.bf16 %v7080_v63, %v7079_v48  ;;  %v7081_v63 = vld [vmem:[%s7395_s10] sm:$0xff]  ;;  %v7082_v48 = vld [vmem:[%s7395_s10 + $0x8] sm:$0xff] }
 0x605   : > { %v9013_v60 = vpop.f32.mrb[26].mxu0  ;;  %10832 = vst [vmem:[#allocation75_spill] sm:$0xff] %v9093_v49 }
 0x606   : > { %10822 = vst [vmem:[#allocation31_spill] sm:$0xff] %v9013_v60  ;;  %v9015_v14 = vpop.f32.mrb[27].mxu0 }
 0x607   : > { %10823 = vst [vmem:[#allocation32_spill] sm:$0xff] %v9015_v14 }
 0x60c   : > { %v9017_v45 = vpop.f32.mrb[28].mxu0 }
 0x60d   : > { %10824 = vst [vmem:[#allocation33_spill] sm:$0xff] %v9017_v45  ;;  %v9019_v38 = vpop.f32.mrb[29].mxu0  ;;  %v9084_v45 = vld [vmem:[#allocation2 + $0x100] sm:$0xff] }
 0x60e   : > { %10825 = vst [vmem:[#allocation34_spill] sm:$0xff] %v9019_v38  ;;  %10831 = vst [vmem:[#allocation74_spill] sm:$0xff] %v9084_v45 }
 0x610   : > { %v9021_v50 = vpop.f32.mrb[30].mxu0 }
 0x611   : > { %10826 = vst [vmem:[#allocation35_spill] sm:$0xff] %v9021_v50  ;;  %v9023_v54 = vpop.f32.mrb[31].mxu0 }
 0x612   : > { %10827 = vst [vmem:[#allocation5_spill] sm:$0xff] %v9023_v54 }
 0x620   : > { %v9025_v17 = vpop.f32.mrb[32].mxu0 }
 0x621   : > { %2692 = vmax.xlane.f32.xlu1 %v9025_v17  ;;  %v9028_v3 = vpop.f32.mrb[33].mxu0 }
 0x624   : > { %v9030_v47 = vpop.f32.mrb[34].mxu0 }
 0x625   : > { %2690 = vmax.xlane.f32.xlu1 %v9028_v3  ;;  %v9033_v29 = vpop.f32.mrb[35].mxu0 }
 0x626   : > { %2694 = vmax.xlane.f32.xlu0 %v9033_v29 }
 0x628   : > { %v9036_v32 = vpop.f32.mrb[36].mxu0 }
 0x629   : > { %v9038_v40 = vpop.f32.mrb[37].mxu0 }
 0x62a   : > { %2700 = vmax.xlane.f32.xlu0 %v9036_v32 }
 0x62c   : > { %v9041_v42 = vpop.f32.mrb[38].mxu0 }
 0x62d   : > { %v9043_v12 = vpop.f32.mrb[39].mxu0 }
 0x62e   : > { %2698 = vmax.xlane.f32.xlu0 %v9038_v40 }
 0x630   : > { %v9046_v53 = vpop.f32.mrb[40].mxu0 }
 0x631   : > { %v9048_v57 = vpop.f32.mrb[41].mxu0 }
 0x632   : > { %2702 = vmax.xlane.f32.xlu0 %v9043_v12 }
 0x634   : > { %v9055_v24 = vpop.f32.mrb[42].mxu0 }
 0x635   : > { %v9057_v62 = vpop.f32.mrb[43].mxu0 }
 0x636   : > { %6682 = vrot.lane.b32.xlu1 %v9052_v19, %s7311_s23  ;;  %2706 = vmax.xlane.f32.xlu0 %v9048_v57 }
 0x638   : > { %v9062_v54 = vpop.f32.mrb[44].mxu0 }
 0x639   : > { %v9064_v38 = vpop.f32.mrb[45].mxu0 }
 0x63a   : > { %2710 = vmax.xlane.f32.xlu0 %v9057_v62 }
 0x63c   : > { %v9067_v14 = vpop.f32.mrb[46].mxu0 }
 0x63d   : > { %v9069_v26 = vpop.f32.mrb[47].mxu0 }
 0x63e   : > { %2714 = vmax.xlane.f32.xlu0 %v9064_v38 }
 0x65a   : > { %2696 = vmax.xlane.f32.xlu1 %v9030_v47 }
 0x65e   : > { %2704 = vmax.xlane.f32.xlu1 %v9041_v42 }
 0x662   : > { %2708 = vmax.xlane.f32.xlu1 %v9046_v53 }
 0x666   : > { %2712 = vmax.xlane.f32.xlu1 %v9055_v24 }
 0x66a   : > { %2716 = vmax.xlane.f32.xlu1 %v9062_v54 }
 0x66e   : > { %2720 = vmax.xlane.f32.xlu1 %v9067_v14 }
 0x672   : > { %2718 = vmax.xlane.f32.xlu1 %v9069_v26 }
 0x6ae   : > { %v2693_v9 = vpop.xlane.xlu1 %2692 }
 0x6af   : > { %v9082_v50 = vmax.f32 %v9079_v8, %v2693_v9  ;;  %v9095_v9 = vld [vmem:[#allocation2 + $0x110] sm:$0xff] }
 0x6b0   : > { %10833 = vst [vmem:[#allocation76_spill] sm:$0xff] %v9095_v9 }
 0x6b1   : > { %10830 = vst [vmem:[#allocation73_spill] sm:$0xff] %v9082_v50  ;;  %3350 = vst.msk [vmem:[#allocation2 + $0x108] sm:$0xff] %vm1097_vm4, %v9082_v50  ;;  %2793 = vperm.xlu1 %6540, %v9082_v50   ;;  %v9112_v50 = vld [vmem:[#allocation2 + $0x128] sm:$0xff] }
 0x6b2   : > { %v2691_v41 = vpop.xlane.xlu1 %2690  ;;  %10836 = vst [vmem:[#allocation79_spill] sm:$0xff] %v9112_v50 }
 0x6b3   : > { %v9098_v27 = vmax.f32 %v9084_v45, %v2691_v41  ;;  %v2695_v11 = vpop.xlane.xlu0 %2694  ;;  %v6701_v41 = vpack.i.bf16 %v7082_v48, %v7081_v63 }
 0x6b4   : > { %v9101_v60 = vmax.f32 %v9095_v9, %v2695_v11  ;;  %v7083_v11 = vld [vmem:[%s7400_s14 + $0x50] sm:$0xff]  ;;  %v7088_v9 = vld [vmem:[%s7400_s14 + $0x78] sm:$0xff] }
 0x6b5   : > { %10834 = vst [vmem:[#allocation77_spill] sm:$0xff] %v9098_v27  ;;  %3349 = vst.msk [vmem:[#allocation2 + $0x100] sm:$0xff] %vm1097_vm4, %v9098_v27  ;;  %2788 = vperm.xlu0 %6539, %v9098_v27   ;;  %6692 = vrot.lane.b32.xlu1 %v9093_v49, %s7311_s23  ;;  %v9116_v18 = vpack.i.bf16 %v7084_v30, %v7083_v11  ;;  %v7085_v30 = vld [vmem:[%s7395_s10 + $0x20] sm:$0xff]  ;;  %v7086_v11 = vld [vmem:[%s7395_s10 + $0x28] sm:$0xff] }
 0x6b6   : > { %10835 = vst [vmem:[#allocation78_spill] sm:$0xff] %v9101_v60  ;;  %v6683_v8 = vpop.permute.xlu1 %6682  ;;  %3351 = vst.msk [vmem:[#allocation2 + $0x110] sm:$0xff] %vm1097_vm4, %v9101_v60  ;;  %v6711_v49 = vpack.i.bf16 %v7086_v11, %v7085_v30  ;;  %v7087_v27 = vld [vmem:[%s7400_s14 + $0x70] sm:$0xff] }
 0x6b7   : > { %10837 = vst [vmem:[#allocation80_spill] sm:$0xff] %v9116_v18  ;;  %v6685_v45 = vunpack.i.h.bf16 %v6683_v8  ;;  %v6684_v10 = vunpack.i.l.bf16 %v6683_v8  ;;  %v2701_v7 = vpop.xlane.xlu0 %2700  ;;  %v9132_v19 = vpack.i.bf16 %v7088_v9, %v7087_v27  ;;  %v9134_v8 = vld [vmem:[#allocation2 + $0x120] sm:$0xff]  ;;  %v7089_v27 = vld [vmem:[%s7395_s10 + $0x10] sm:$0xff]  ;;  %v7090_v9 = vld [vmem:[%s7395_s10 + $0x18] sm:$0xff] }
 0x6b8   : > { %v9123_v63 = vmax.f32 %v9112_v50, %v2701_v7  ;;  %10840 = vst [vmem:[#allocation83_spill] sm:$0xff] %v9134_v8  ;;  %v9148_v30 = vld [vmem:[#allocation2 + $0x130] sm:$0xff]  ;;  %v7092_v7 = vld [vmem:[%s7395_s10 + $0x38] sm:$0xff] }
 0x6b9   : > { %6702 = vrot.lane.b32.xlu1 %v6701_v41, %s7312_s24  ;;  %v6377_v48 = vpack.c.bf16 %v6685_v45, %v6684_v10  ;;  %6687 = vrot.lane.b32.xlu0 %v9116_v18, %s7311_s23  ;;  %10839 = vst [vmem:[#allocation82_spill] sm:$0xff] %v9132_v19  ;;  %v6706_v41 = vpack.i.bf16 %v7090_v9, %v7089_v27  ;;  %10842 = vst [vmem:[#allocation85_spill] sm:$0xff] %v9148_v30  ;;  %v9161_v27 = vld [vmem:[#allocation2 + $0x140] sm:$0xff] }
 0x6ba   : > { %10838 = vst [vmem:[#allocation81_spill] sm:$0xff] %v9123_v63  ;;  %3354 = vst.msk [vmem:[#allocation2 + $0x128] sm:$0xff] %vm1097_vm4, %v9123_v63  ;;  %v9181_v9 = vld [vmem:[#allocation2 + $0x160] sm:$0xff] }
 0x6bb   : > { %6378 = vmatprep.subr.bf16.mxu1 %v6377_v48  ;;  %v2699_v10 = vpop.xlane.xlu0 %2698  ;;  %10844 = vst [vmem:[#allocation87_spill] sm:$0xff] %v9161_v27  ;;  %10848 = vst [vmem:[#allocation91_spill] sm:$0xff] %v9181_v9 }
 0x6bc   : > { %6380 = vmatpush3.bf16.msra.mxu1 %v6377_v48  ;;  %v9141_v45 = vmax.f32 %v9134_v8, %v2699_v10 }
 0x6bd   : > { %6712 = vrot.lane.b32.xlu1 %v6711_v49, %s7312_s24  ;;  %6697 = vrot.lane.b32.xlu0 %v9132_v19, %s7311_s23  ;;  %v7091_v49 = vld [vmem:[%s7395_s10 + $0x30] sm:$0xff] }
 0x6be   : > { %10841 = vst [vmem:[#allocation84_spill] sm:$0xff] %v9141_v45  ;;  %3353 = vst.msk [vmem:[#allocation2 + $0x120] sm:$0xff] %vm1097_vm4, %v9141_v45  ;;  %v6716_v50 = vpack.i.bf16 %v7092_v7, %v7091_v49 }
 0x6bf   : > { %v2703_v48 = vpop.xlane.xlu0 %2702 }
 0x6c0   : > { %v9155_v10 = vmax.f32 %v9148_v30, %v2703_v48 }
 0x6c1   : > { %2798 = vperm.xlu1 %6540, %v9101_v60   ;;  %6707 = vrot.lane.b32.xlu0 %v6706_v41, %s7312_s24  ;;  %v9172_v41 = vld [vmem:[#allocation2 + $0x150] sm:$0xff] }
 0x6c2   : > { %10843 = vst [vmem:[#allocation86_spill] sm:$0xff] %v9155_v10  ;;  %3355 = vst.msk [vmem:[#allocation2 + $0x130] sm:$0xff] %vm1097_vm4, %v9155_v10 }
 0x6c3   : > { %v2707_v11 = vpop.xlane.xlu0 %2706  ;;  %10846 = vst [vmem:[#allocation89_spill] sm:$0xff] %v9172_v41 }
 0x6c4   : > { %v9168_v8 = vmax.f32 %v9161_v27, %v2707_v11  ;;  %v9199_v11 = vld [vmem:[#allocation2 + $0x138] sm:$0xff] }
 0x6c5   : > { %2813 = vperm.xlu1 %6540, %v9123_v63   ;;  %6717 = vrot.lane.b32.xlu0 %v6716_v50, %s7312_s24  ;;  %10852 = vst [vmem:[#allocation95_spill] sm:$0xff] %v9199_v11 }
 0x6c6   : > { %10845 = vst [vmem:[#allocation88_spill] sm:$0xff] %v9168_v8  ;;  %3357 = vst.msk [vmem:[#allocation2 + $0x140] sm:$0xff] %vm1097_vm4, %v9168_v8 }
 0x6c7   : > { %v2711_v48 = vpop.xlane.xlu0 %2710 }
 0x6c8   : > { %v9179_v49 = vmax.f32 %v9172_v41, %v2711_v48  ;;  %v9194_v48 = vld [vmem:[#allocation2 + $0x118] sm:$0xff] }
 0x6c9   : > { %10850 = vst [vmem:[#allocation93_spill] sm:$0xff] %v9194_v48 }
 0x6ca   : > { %10847 = vst [vmem:[#allocation90_spill] sm:$0xff] %v9179_v49  ;;  %3359 = vst.msk [vmem:[#allocation2 + $0x150] sm:$0xff] %vm1097_vm4, %v9179_v49 }
 0x6cb   : > { %v2715_v50 = vpop.xlane.xlu0 %2714 }
 0x6cc   : > { %v9188_v30 = vmax.f32 %v9181_v9, %v2715_v50  ;;  %v9209_v9 = vld [vmem:[#allocation2 + $0x148] sm:$0xff] }
 0x6cd   : > { %10854 = vst [vmem:[#allocation97_spill] sm:$0xff] %v9209_v9 }
 0x6ce   : > { %10849 = vst [vmem:[#allocation92_spill] sm:$0xff] %v9188_v30  ;;  %3361 = vst.msk [vmem:[#allocation2 + $0x160] sm:$0xff] %vm1097_vm4, %v9188_v30 }
 0x6e7   : > { %v2697_v27 = vpop.xlane.xlu1 %2696 }
 0x6e8   : > { %v9197_v63 = vmax.f32 %v9194_v48, %v2697_v27  ;;  %v7093_v48 = vld [vmem:[%s7395_s10 + $0x40] sm:$0xff] }
 0x6ea   : > { %10851 = vst [vmem:[#allocation94_spill] sm:$0xff] %v9197_v63  ;;  %3352 = vst.msk [vmem:[#allocation2 + $0x118] sm:$0xff] %vm1097_vm4, %v9197_v63  ;;  %2803 = vperm.xlu0 %6539, %v9197_v63  }
 0x6eb   : > { %v2705_v50 = vpop.xlane.xlu1 %2704 }
 0x6ec   : > { %v9207_v7 = vmax.f32 %v9199_v11, %v2705_v50  ;;  %v9220_v50 = vld [vmem:[#allocation2 + $0x158] sm:$0xff] }
 0x6ed   : > { %10856 = vst [vmem:[#allocation99_spill] sm:$0xff] %v9220_v50 }
 0x6ee   : > { %10853 = vst [vmem:[#allocation96_spill] sm:$0xff] %v9207_v7  ;;  %3356 = vst.msk [vmem:[#allocation2 + $0x138] sm:$0xff] %vm1097_vm4, %v9207_v7  ;;  %2808 = vperm.xlu0 %6539, %v9141_v45   ;;  %2823 = vperm.xlu1 %6540, %v9207_v7   ;;  %v9231_v7 = vld [vmem:[#allocation2 + $0x168] sm:$0xff] }
 0x6ef   : > { %v2709_v41 = vpop.xlane.xlu1 %2708  ;;  %10858 = vst [vmem:[#allocation101_spill] sm:$0xff] %v9231_v7 }
 0x6f0   : > { %v9218_v63 = vmax.f32 %v9209_v9, %v2709_v41 }
 0x6f2   : > { %10855 = vst [vmem:[#allocation98_spill] sm:$0xff] %v9218_v63  ;;  %3358 = vst.msk [vmem:[#allocation2 + $0x148] sm:$0xff] %vm1097_vm4, %v9218_v63  ;;  %2818 = vperm.xlu0 %6539, %v9155_v10   ;;  %2828 = vperm.xlu1 %6540, %v9168_v8   ;;  %v7094_v10 = vld [vmem:[%s7395_s10 + $0x48] sm:$0xff] }
 0x6f3   : > { %v2713_v27 = vpop.xlane.xlu1 %2712  ;;  %v6721_v9 = vpack.i.bf16 %v7094_v10, %v7093_v48  ;;  %v7095_v48 = vld [vmem:[%s7395_s10 + $0x60] sm:$0xff] }
 0x6f4   : > { %v9229_v45 = vmax.f32 %v9220_v50, %v2713_v27  ;;  %v9244_v27 = vld [vmem:[#allocation2 + $0x178] sm:$0xff] }
 0x6f5   : > { %10860 = vst [vmem:[#allocation103_spill] sm:$0xff] %v9244_v27 }
 0x6f6   : > { %10857 = vst [vmem:[#allocation100_spill] sm:$0xff] %v9229_v45  ;;  %3360 = vst.msk [vmem:[#allocation2 + $0x158] sm:$0xff] %vm1097_vm4, %v9229_v45  ;;  %2833 = vperm.xlu0 %6539, %v9218_v63   ;;  %2838 = vperm.xlu1 %6540, %v9179_v49   ;;  %v7097_v49 = vld [vmem:[%s7395_s10 + $0x50] sm:$0xff] }
 0x6f7   : > { %v2717_v8 = vpop.xlane.xlu1 %2716 }
 0x6f8   : > { %v9242_v11 = vmax.f32 %v9231_v7, %v2717_v8  ;;  %v9255_v8 = vld [vmem:[#allocation2 + $0x170] sm:$0xff] }
 0x6f9   : > { %10862 = vst [vmem:[#allocation105_spill] sm:$0xff] %v9255_v8 }
 0x6fa   : > { %10859 = vst [vmem:[#allocation102_spill] sm:$0xff] %v9242_v11  ;;  %3362 = vst.msk [vmem:[#allocation2 + $0x168] sm:$0xff] %vm1097_vm4, %v9242_v11  ;;  %2843 = vperm.xlu0 %6539, %v9229_v45   ;;  %6722 = vrot.lane.b32.xlu1 %v6721_v9, %s7312_s24 }
 0x6fb   : > { %v2721_v41 = vpop.xlane.xlu1 %2720 }
 0x6fc   : > { %v9253_v10 = vmax.f32 %v9244_v27, %v2721_v41  ;;  %v7096_v27 = vld [vmem:[%s7395_s10 + $0x68] sm:$0xff]  ;;  %v7099_v41 = vld [vmem:[%s7395_s10 + $0x70] sm:$0xff] }
 0x6fe   : > { %10861 = vst [vmem:[#allocation104_spill] sm:$0xff] %v9253_v10  ;;  %3364 = vst.msk [vmem:[#allocation2 + $0x178] sm:$0xff] %vm1097_vm4, %v9253_v10  ;;  %2848 = vperm.xlu0 %6539, %v9188_v30   ;;  %2853 = vperm.xlu1 %6540, %v9242_v11   ;;  %v6731_v30 = vpack.i.bf16 %v7096_v27, %v7095_v48  ;;  %v7102_v27 = vld [vmem:[%s7385_s29 + $0x10] sm:$0xff]  ;;  %v7109_v48 = vld [vmem:[%s7385_s29 + $0x38] sm:$0xff] }
 0x6ff   : > { %v2719_v9 = vpop.xlane.xlu1 %2718 }
 0x700   : > { %v9264_v60 = vmax.f32 %v9255_v8, %v2719_v9  ;;  %v7098_v9 = vld [vmem:[%s7395_s10 + $0x58] sm:$0xff] }
 0x701   : > { %v6726_v11 = vpack.i.bf16 %v7098_v9, %v7097_v49  ;;  %v7103_v49 = vld [vmem:[%s7385_s29 + $0x8] sm:$0xff] }
 0x702   : > { %10863 = vst [vmem:[#allocation106_spill] sm:$0xff] %v9264_v60  ;;  %3363 = vst.msk [vmem:[#allocation2 + $0x170] sm:$0xff] %vm1097_vm4, %v9264_v60  ;;  %2863 = vperm.xlu1 %6540, %v9253_v10   ;;  %2858 = vperm.xlu0 %6539, %v9264_v60   ;;  %v7100_v10 = vld [vmem:[%s7395_s10 + $0x78] sm:$0xff]  ;;  %v7101_v60 = vld [vmem:[%s7385_s29] sm:$0xff] }
 0x703   : > { %v6736_v8 = vpack.i.bf16 %v7100_v10, %v7099_v41  ;;  %v7107_v10 = vld [vmem:[%s7385_s29 + $0x28] sm:$0xff]  ;;  %v7110_v41 = vld [vmem:[%s7385_s29 + $0x50] sm:$0xff] }
 0x704   : > { %v7111_v9 = vld [vmem:[%s7385_s29 + $0x48] sm:$0xff] }
 0x706   : > { %6732 = vrot.lane.b32.xlu1 %v6731_v30, %s7312_s24  ;;  %6727 = vrot.lane.b32.xlu0 %v6726_v11, %s7312_s24  ;;  %v7104_v30 = vld [vmem:[%s7385_s29 + $0x20] sm:$0xff]  ;;  %v7105_v11 = vld [vmem:[%s7385_s29 + $0x18] sm:$0xff] }
 0x70a   : > { %3365 = vrot.lane.b32.xlu1 %v7101_v60, %s7312_s24  ;;  %6737 = vrot.lane.b32.xlu0 %v6736_v8, %s7312_s24  ;;  %v7106_v60 = vld [vmem:[%s7385_s29 + $0x30] sm:$0xff]  ;;  %v7108_v8 = vld [vmem:[%s7385_s29 + $0x40] sm:$0xff] }
 0x70e   : > { %3369 = vrot.lane.b32.xlu1 %v7102_v27, %s7312_s24  ;;  %3367 = vrot.lane.b32.xlu0 %v7103_v49, %s7312_s24  ;;  %v7112_v27 = vld [vmem:[%s7385_s29 + $0x60] sm:$0xff]  ;;  %v7113_v49 = vld [vmem:[%s7385_s29 + $0x58] sm:$0xff] }
 0x712   : > { %3373 = vrot.lane.b32.xlu1 %v7104_v30, %s7312_s24  ;;  %3371 = vrot.lane.b32.xlu0 %v7105_v11, %s7312_s24  ;;  %v7114_v30 = vld [vmem:[%s7385_s29 + $0x70] sm:$0xff]  ;;  %v7115_v11 = vld [vmem:[%s7385_s29 + $0x68] sm:$0xff] }
 0x716   : > { %3377 = vrot.lane.b32.xlu1 %v7106_v60, %s7312_s24  ;;  %3375 = vrot.lane.b32.xlu0 %v7107_v10, %s7312_s24  ;;  %v7116_v60 = vld [vmem:[%s7385_s29 + $0x78] sm:$0xff] }
 0x71a   : > { %3381 = vrot.lane.b32.xlu1 %v7108_v8, %s7312_s24  ;;  %3379 = vrot.lane.b32.xlu0 %v7109_v48, %s7312_s24 }
 0x71e   : > { %3385 = vrot.lane.b32.xlu1 %v7110_v41, %s7312_s24  ;;  %3383 = vrot.lane.b32.xlu0 %v7111_v9, %s7312_s24 }
 0x722   : > { %3389 = vrot.lane.b32.xlu1 %v7112_v27, %s7312_s24  ;;  %3387 = vrot.lane.b32.xlu0 %v7113_v49, %s7312_s24 }
 0x726   : > { %3393 = vrot.lane.b32.xlu1 %v7114_v30, %s7312_s24  ;;  %3391 = vrot.lane.b32.xlu0 %v7115_v11, %s7312_s24 }
 0x72a   : > { %3395 = vrot.lane.b32.xlu0 %v7116_v60, %s7312_s24 }
 0x730   : > { %v2794_v10 = vpop.permute.xlu1 %2793 }
 0x731   : > { %v2867_v9 = vsub.f32 %v9025_v17, %v2794_v10 }
 0x733   : > { %v2884_v19 = vmul.f32 1.442695, %v2867_v9 }
 0x734   : > { %v2789_v8 = vpop.permute.xlu0 %2788  ;;  %v6693_v48 = vpop.permute.xlu1 %6692 }
 0x735   : > { %v2866_v41 = vsub.f32 %v9028_v3, %v2789_v8  ;;  %v6695_v7 = vunpack.i.h.bf16 %v6693_v48  ;;  %v6694_v45 = vunpack.i.l.bf16 %v6693_v48 }
 0x737   : > { %v2882_v27 = vmul.f32 1.442695, %v2866_v41  ;;  %v6385_v18 = vpack.c.bf16 %v6695_v7, %v6694_v45 }
 0x738   : > { %v6688_v49 = vpop.permute.xlu0 %6687  ;;  %v6703_v50 = vpop.permute.xlu1 %6702 }
 0x739   : > { %6877 = vpow2.f32 %v2882_v27  ;;  %v6690_v30 = vunpack.i.h.bf16 %v6688_v49  ;;  %v6689_v63 = vunpack.i.l.bf16 %v6688_v49  ;;  %v6705_v3 = vunpack.i.h.bf16 %v6703_v50 }
 0x73a   : > { %6879 = vpow2.f32 %v2884_v19  ;;  %v6704_v17 = vunpack.i.l.bf16 %v6703_v50 }
 0x73b   : > { %v6381_v11 = vpack.c.bf16 %v6690_v30, %v6689_v63 }
 0x73c   : > { %v6713_v1 = vpop.permute.xlu1 %6712  ;;  %v6698_v60 = vpop.permute.xlu0 %6697  ;;  %v6393_v9 = vpack.c.bf16 %v6705_v3, %v6704_v17 }
 0x73d   : > { %6382 = vmatprep.subr.bf16.mxu1 %v6381_v11  ;;  %v6700_v51 = vunpack.i.h.bf16 %v6698_v60  ;;  %v6699_v34 = vunpack.i.l.bf16 %v6698_v60  ;;  %v6715_v7 = vunpack.i.h.bf16 %v6713_v1  ;;  %v6714_v50 = vunpack.i.l.bf16 %v6713_v1 }
 0x73e   : > { %6384 = vmatpush3.bf16.msra.mxu1 %v6381_v11 }
 0x73f   : > { %6386 = vmatprep.subr.bf16.mxu1 %v6385_v18  ;;  %v6389_v10 = vpack.c.bf16 %v6700_v51, %v6699_v34 }
 0x740   : > { %v2799_v8 = vpop.permute.xlu1 %2798  ;;  %v6708_v45 = vpop.permute.xlu0 %6707 }
 0x741   : > { %v2868_v48 = vsub.f32 %v9033_v29, %v2799_v8  ;;  %v6710_v34 = vunpack.i.h.bf16 %v6708_v45  ;;  %v6709_v51 = vunpack.i.l.bf16 %v6708_v45 }
 0x742   : > { %6388 = vmatpush3.bf16.msra.mxu1 %v6385_v18 }
 0x743   : > { %v9316_v41 = vpop.eup %6877  ;;  %v2886_v63 = vmul.f32 1.442695, %v2868_v48  ;;  %6390 = vmatprep.subr.bf16.mxu1 %v6389_v10  ;;  %v6399_v18 = vpack.c.bf16 %v6710_v34, %v6709_v51 }
 0x744   : > { %6017 = vmatprep.mubr.f32.mxu1 %v9316_v41  ;;  %v9321_v19 = vpop.eup %6879 }
 0x745   : > { %6881 = vpow2.f32 %v2886_v63 }
 0x746   : > { %6392 = vmatpush3.bf16.msra.mxu1 %v6389_v10 }
 0x747   : > { %6395 = vmatprep.subr.msk.bf16.mxu1 %vm7800_vm3, %v6393_v9 }
 0x749   : > { %1968 = vadd.xlane.f32.xlu0 %v8736_v22  ;;  %6018 = vmatmul.mubr.f32.vlgmr.msra.gmra.mrb[32].mxu1 %v9321_v19  ;;  %v6718_v22 = vpop.permute.xlu0 %6717 }
 0x74a   : > { %1966 = vadd.xlane.f32.xlu1 %v8731_v58  ;;  %v6405_v58 = vpack.c.bf16 %v6715_v7, %v6714_v50 }
 0x74d   : > { %1970 = vadd.xlane.f32.xlu0 %v8783_v28  ;;  %v6720_v28 = vunpack.i.h.bf16 %v6718_v22 }
 0x74e   : > { %1972 = vadd.xlane.f32.xlu1 %v8785_v46  ;;  %v6719_v46 = vunpack.i.l.bf16 %v6718_v22 }
 0x74f   : > { %v9328_v29 = vpop.eup %6881  ;;  %6398 = vmatpush3.bf16.xpose.msk.msra.mxu1 %vm7800_vm3, %v6393_v9 }
 0x750   : > { %6020 = vmatprep.mubr.f32.mxu1 %v9328_v29  ;;  %6401 = vmatprep.subr.msk.bf16.mxu1 %vm7800_vm3, %v6399_v18 }
 0x751   : > { %1974 = vadd.xlane.f32.xlu0 %v8794_v33  ;;  %v6411_v33 = vpack.c.bf16 %v6720_v28, %v6719_v46  ;;  %v10864_v28 = vld [vmem:[#allocation11_spill] sm:$0xff]  ;;  %v10865_v46 = vld [vmem:[#allocation9_spill] sm:$0xff] }
 0x752   : > { %1976 = vadd.xlane.f32.xlu1 %v8796_v31  ;;  %v2814_v31 = vpop.permute.xlu1 %2813 }
 0x755   : > { %1978 = vadd.xlane.f32.xlu0 %v8804_v59 }
 0x756   : > { %1980 = vadd.xlane.f32.xlu1 %v8806_v35 }
 0x757   : > { %6404 = vmatpush3.bf16.xpose.msk.msra.mxu1 %vm7800_vm3, %v6399_v18 }
 0x758   : > { %6407 = vmatprep.subr.msk.bf16.mxu1 %vm7800_vm3, %v6405_v58 }
 0x759   : > { %1982 = vadd.xlane.f32.xlu0 %v8817_v55 }
 0x75a   : > { %1984 = vadd.xlane.f32.xlu1 %v8815_v56  ;;  %v2871_v56 = vsub.f32 %v9036_v32, %v2814_v31 }
 0x75d   : > { %1986 = vadd.xlane.f32.xlu0 %v8825_v37 }
 0x75e   : > { %1988 = vadd.xlane.f32.xlu1 %v8823_v23 }
 0x75f   : > { %6410 = vmatpush3.bf16.xpose.msk.msra.mxu1 %vm7800_vm3, %v6405_v58 }
 0x760   : > { %6413 = vmatprep.subr.msk.bf16.mxu1 %vm7800_vm3, %v6411_v33 }
 0x761   : > { %1990 = vadd.xlane.f32.xlu0 %v8829_v5 }
 0x762   : > { %1992 = vadd.xlane.f32.xlu1 %v8836_v25  ;;  %v2892_v25 = vmul.f32 1.442695, %v2871_v56 }
 0x765   : > { %1994 = vadd.xlane.f32.xlu0 %v8841_v52 }
 0x766   : > { %1996 = vadd.xlane.f32.xlu1 %v8843_v16 }
 0x767   : > { %6416 = vmatpush3.bf16.xpose.msk.msra.mxu1 %vm7800_vm3, %v6411_v33  ;;  %v10866_v33 = vsub.f32 %v10864_v28, %v10865_v46  ;;  %v7119_v28 = vld [vmem:[%s7400_s14 + $0x10] sm:$0xff]  ;;  %v7120_v46 = vld [vmem:[%s7400_s14 + $0x18] sm:$0xff] }
 0x769   : > { %v2804_v59 = vpop.permute.xlu0 %2803  ;;  %v1775_v31 = vmul.f32 1.442695, %v10866_v33  ;;  %v6746_v33 = vpack.i.bf16 %v7120_v46, %v7119_v28  ;;  %v1936_v28 = vld [vmem:[#allocation3 + $0x90] sm:$0xff] }
 0x76a   : > { %v2869_v35 = vsub.f32 %v9030_v47, %v2804_v59 }
 0x76c   : > { %v2888_v55 = vmul.f32 1.442695, %v2869_v35 }
 0x76d   : > { %v2809_v23 = vpop.permute.xlu0 %2808  ;;  %v2824_v37 = vpop.permute.xlu1 %2823 }
 0x76e   : > { %6883 = vpow2.f32 %v2888_v55  ;;  %v2870_v5 = vsub.f32 %v9038_v40, %v2809_v23  ;;  %v2873_v52 = vsub.f32 %v9041_v42, %v2824_v37  ;;  %v10868_v37 = vld [vmem:[#allocation10_spill] sm:$0xff] }
 0x770   : > { %v2890_v1 = vmul.f32 1.442695, %v2870_v5  ;;  %v2896_v47 = vmul.f32 1.442695, %v2873_v52 }
 0x771   : > { %v2819_v16 = vpop.permute.xlu0 %2818  ;;  %v2829_v27 = vpop.permute.xlu1 %2828 }
 0x772   : > { %6885 = vpow2.f32 %v2890_v1  ;;  %v2872_v49 = vsub.f32 %v9043_v12, %v2819_v16  ;;  %v2874_v30 = vsub.f32 %v9048_v57, %v2829_v27  ;;  %v10870_v16 = vld [vmem:[#allocation21_spill] sm:$0xff] }
 0x773   : > { %6887 = vpow2.f32 %v2892_v25  ;;  %v10871_v27 = vld [vmem:[#allocation17_spill] sm:$0xff] }
 0x774   : > { %v2894_v32 = vmul.f32 1.442695, %v2872_v49  ;;  %v2898_v11 = vmul.f32 1.442695, %v2874_v30  ;;  %v10872_v49 = vsub.f32 %v10870_v16, %v10871_v27  ;;  %v10884_v16 = vld [vmem:[#allocation16_spill] sm:$0xff]  ;;  %v10885_v27 = vld [vmem:[#allocation23_spill] sm:$0xff] }
 0x775   : > { %v2834_v60 = vpop.permute.xlu0 %2833  ;;  %v2839_v3 = vpop.permute.xlu1 %2838 }
 0x776   : > { %6889 = vpow2.f32 %v2894_v32  ;;  %v2875_v40 = vsub.f32 %v9046_v53, %v2834_v60  ;;  %v2876_v17 = vsub.f32 %v9057_v62, %v2839_v3  ;;  %v1777_v30 = vmul.f32 1.442695, %v10872_v49  ;;  %v10874_v60 = vld [vmem:[#allocation50_spill] sm:$0xff] }
 0x777   : > { %6891 = vpow2.f32 %v2896_v47  ;;  %1142 = vperm.xlu1 %6540, %v8900_v20   ;;  %v10886_v49 = vsub.f32 %v10884_v16, %v10885_v27  ;;  %v1939_v27 = vld [vmem:[#allocation3 + $0xa8] sm:$0xff] }
 0x778   : > { %v9366_v42 = vpop.eup %6883  ;;  %v2900_v10 = vmul.f32 1.442695, %v2875_v40  ;;  %6893 = vpow2.f32 %v2898_v11  ;;  %v2902_v12 = vmul.f32 1.442695, %v2876_v17  ;;  %v10873_v11 = vld [vmem:[#allocation48_spill] sm:$0xff] }
 0x779   : > { %v2844_v57 = vpop.permute.xlu0 %2843  ;;  %v6723_v8 = vpop.permute.xlu1 %6722  ;;  %6021 = vmatmul.mubr.f32.gmra.mrb[34].mxu1 %v9366_v42  ;;  %v10875_v3 = vsub.f32 %v10873_v11, %v10874_v60  ;;  %v10890_v60 = vld [vmem:[#allocation52_spill] sm:$0xff] }
 0x77a   : > { %6895 = vpow2.f32 %v2900_v10  ;;  %v2877_v48 = vsub.f32 %v9055_v24, %v2844_v57  ;;  %v6725_v9 = vunpack.i.h.bf16 %v6723_v8  ;;  %v6724_v63 = vunpack.i.l.bf16 %v6723_v8 }
 0x77b   : > { %1152 = vperm.xlu1 %6540, %v8913_v21   ;;  %1147 = vperm.xlu0 %6539, %v8903_v43   ;;  %6897 = vpow2.f32 %v2902_v12  ;;  %v1781_v40 = vmul.f32 1.442695, %v10875_v3  ;;  %v10891_v3 = vld [vmem:[#allocation54_spill] sm:$0xff] }
 0x77c   : > { %v9372_v53 = vpop.eup %6885  ;;  %v2904_v20 = vmul.f32 1.442695, %v2877_v48  ;;  %v6417_v62 = vpack.c.bf16 %v6725_v9, %v6724_v63 }
 0x77d   : > { %v9374_v45 = vpop.eup %6887  ;;  %v2849_v34 = vpop.permute.xlu0 %2848  ;;  %6023 = vmatprep.mubr.f32.mxu1 %v9372_v53 }
 0x77e   : > { %v2854_v51 = vpop.permute.xlu1 %2853  ;;  %6899 = vpow2.f32 %v2904_v20  ;;  %v2878_v24 = vsub.f32 %v9064_v38, %v2849_v34  ;;  %6024 = vmatmul.mubr.f32.gmra.mrb[36].mxu1 %v9374_v45  ;;  %6419 = vmatprep.subr.msk.bf16.mxu1 %vm7800_vm3, %v6417_v62 }
 0x77f   : > { %v2879_v18 = vsub.f32 %v9062_v54, %v2854_v51  ;;  %1162 = vperm.xlu1 %6540, %v8927_v13   ;;  %1157 = vperm.xlu0 %6539, %v8917_v4  }
 0x780   : > { %v9384_v43 = vpop.eup %6889  ;;  %v2906_v21 = vmul.f32 1.442695, %v2878_v24  ;;  %6422 = vmatpush3.bf16.xpose.msk.msra.mxu1 %vm7800_vm3, %v6417_v62 }
 0x781   : > { %v2908_v7 = vmul.f32 1.442695, %v2879_v18  ;;  %v9388_v50 = vpop.eup %6891  ;;  %v2859_v38 = vpop.permute.xlu0 %2858  ;;  %6026 = vmatprep.mubr.f32.mxu1 %v9384_v43  ;;  %v10878_v18 = vld [vmem:[#allocation18_spill] sm:$0xff] }
 0x782   : > { %v2864_v54 = vpop.permute.xlu1 %2863  ;;  %6901 = vpow2.f32 %v2906_v21  ;;  %v2880_v58 = vsub.f32 %v9069_v26, %v2859_v38  ;;  %6027 = vmatmul.mubr.f32.gmra.mrb[38].mxu1 %v9388_v50  ;;  %v9394_v4 = vpop.eup %6893  ;;  %v7117_v21 = vld [vmem:[%s7400_s14] sm:$0xff] }
 0x783   : > { %v2881_v13 = vsub.f32 %v9067_v14, %v2864_v54  ;;  %6903 = vpow2.f32 %v2908_v7  ;;  %1172 = vperm.xlu1 %6540, %v8945_v0   ;;  %1167 = vperm.xlu0 %6539, %v8931_v2   ;;  %v10867_v2 = vld [vmem:[#allocation12_spill] sm:$0xff]  ;;  %v7118_v7 = vld [vmem:[%s7400_s14 + $0x8] sm:$0xff] }
 0x784   : > { %v9398_v22 = vpop.eup %6895  ;;  %v2910_v59 = vmul.f32 1.442695, %v2880_v58  ;;  %6029 = vmatprep.mubr.f32.mxu1 %v9394_v4  ;;  %v10869_v5 = vsub.f32 %v10867_v2, %v10868_v37  ;;  %v6741_v38 = vpack.i.bf16 %v7118_v7, %v7117_v21  ;;  %v10900_v21 = vld [vmem:[#allocation59_spill] sm:$0xff] }
 0x785   : > { %v2912_v35 = vmul.f32 1.442695, %v2881_v13  ;;  %v6728_v14 = vpop.permute.xlu0 %6727  ;;  %v9405_v23 = vpop.eup %6897  ;;  %v10879_v13 = vld [vmem:[#allocation6_spill] sm:$0xff] }
 0x786   : > { %v6733_v26 = vpop.permute.xlu1 %6732  ;;  %6905 = vpow2.f32 %v2910_v59  ;;  %v6730_v56 = vunpack.i.h.bf16 %v6728_v14  ;;  %v6729_v55 = vunpack.i.l.bf16 %v6728_v14  ;;  %6030 = vmatmul.mubr.f32.gmra.mrb[40].mxu1 %v9398_v22  ;;  %v1773_v25 = vmul.f32 1.442695, %v10869_v5  ;;  %v10880_v59 = vld [vmem:[#allocation75_spill] sm:$0xff] }
 0x787   : > { %v6735_v0 = vunpack.i.h.bf16 %v6733_v26  ;;  %6907 = vpow2.f32 %v2912_v35  ;;  %1182 = vperm.xlu1 %6540, %v8955_v61   ;;  %1177 = vperm.xlu0 %6539, %v8949_v39   ;;  %v6734_v52 = vunpack.i.l.bf16 %v6733_v26  ;;  %v10881_v35 = vld [vmem:[#allocation19_spill] sm:$0xff] }
 0x788   : > { %v9412_v1 = vpop.eup %6899  ;;  %6909 = vpow2.f32 %v1775_v31  ;;  %v6423_v47 = vpack.c.bf16 %v6730_v56, %v6729_v55  ;;  %6032 = vmatprep.mubr.f32.mxu1 %v9405_v23  ;;  %v10882_v56 = vld [vmem:[#allocation80_spill] sm:$0xff] }
 0x789   : > { %v6429_v32 = vpack.c.bf16 %v6735_v0, %v6734_v52  ;;  %v6738_v61 = vpop.permute.xlu0 %6737  ;;  %6911 = vpow2.f32 %v1773_v25  ;;  %v10883_v0 = vld [vmem:[#allocation82_spill] sm:$0xff] }
 0x78a   : > { %6033 = vmatmul.mubr.f32.gmra.mrb[42].mxu1 %v9412_v1  ;;  %6425 = vmatprep.subr.msk.bf16.mxu1 %vm7800_vm3, %v6423_v47  ;;  %6913 = vpow2.f32 %v1777_v30  ;;  %v6739_v10 = vunpack.i.l.bf16 %v6738_v61  ;;  %v3366_v12 = vpop.permute.xlu1 %3365  ;;  %v1779_v30 = vmul.f32 1.442695, %v10886_v49  ;;  %v10908_v49 = vld [vmem:[#allocation64_spill] sm:$0xff] }
 0x78b   : > { %1192 = vperm.xlu1 %6540, %v8969_v15   ;;  %1187 = vperm.xlu0 %6539, %v8963_v44   ;;  %v6740_v15 = vunpack.i.h.bf16 %v6738_v61  ;;  %v10876_v44 = vld [vmem:[#allocation13_spill] sm:$0xff]  ;;  %6915 = vpow2.f32 %v1781_v40  ;;  %v10892_v40 = vsub.f32 %v10890_v60, %v10891_v3 }
 0x78c   : > { %v9423_v39 = vpop.eup %6901  ;;  %6428 = vmatpush3.bf16.xpose.msk.msra.mxu1 %vm7800_vm3, %v6423_v47  ;;  %6917 = vpow2.f32 %v1779_v30  ;;  %v10887_v47 = vld [vmem:[#allocation49_spill] sm:$0xff]  ;;  %v10909_v30 = vld [vmem:[#allocation66_spill] sm:$0xff] }
 0x78d   : > { %v9430_v17 = vpop.eup %6903  ;;  %6035 = vmatprep.mubr.f32.mxu1 %v9423_v39  ;;  %6431 = vmatprep.subr.msk.bf16.mxu1 %vm7800_vm3, %v6429_v32  ;;  %v6435_v48 = vpack.c.bf16 %v6740_v15, %v6739_v10  ;;  %v3368_v63 = vpop.permute.xlu0 %3367  ;;  %v1785_v15 = vmul.f32 1.442695, %v10892_v40  ;;  %v10893_v10 = vld [vmem:[#allocation53_spill] sm:$0xff] }
 0x78e   : > { %6036 = vmatmul.mubr.f32.gmra.mrb[44].mxu1 %v9430_v17  ;;  %v3370_v62 = vpop.permute.xlu1 %3369 }
 0x78f   : > { %1202 = vperm.xlu1 %6540, %v8977_v36   ;;  %1197 = vperm.xlu0 %6539, %v10876_v44   ;;  %v10877_v36 = vld [vmem:[#allocation14_spill] sm:$0xff]  ;;  %v10894_v44 = vld [vmem:[#allocation55_spill] sm:$0xff] }
 0x790   : > { %v9438_v57 = vpop.eup %6905 }
 0x791   : > { %v9440_v8 = vpop.eup %6907  ;;  %6038 = vmatprep.mubr.f32.mxu1 %v9438_v57  ;;  %v3372_v51 = vpop.permute.xlu0 %3371 }
 0x792   : > { %v9443_v9 = vpop.eup %6909  ;;  %6039 = vmatmul.mubr.f32.gmra.mrb[46].mxu1 %v9440_v8  ;;  %v3374_v54 = vpop.permute.xlu1 %3373 }
 0x793   : > { %2054 = vperm.xlu1 %6540, %v9443_v9   ;;  %1207 = vperm.xlu0 %6539, %v10877_v36   ;;  %v9451_v20 = vpop.eup %6911  ;;  %v10897_v36 = vld [vmem:[#allocation58_spill] sm:$0xff] }
 0x794   : > { %6434 = vmatpush3.bf16.xpose.msk.msra.mxu1 %vm7800_vm3, %v6429_v32  ;;  %6073 = vmatprep.mubr.msk.f32.mxu1 %vm535_vm2, %v3366_v12  ;;  %v9455_v34 = vpop.eup %6913  ;;  %v10888_v32 = vld [vmem:[#allocation51_spill] sm:$0xff]  ;;  %v10895_v12 = vsub.f32 %v10893_v10, %v10894_v44 }
 0x795   : > { %6437 = vmatprep.subr.msk.bf16.mxu1 %vm7800_vm3, %v6435_v48  ;;  %v9459_v24 = vpop.eup %6915  ;;  %v3376_v58 = vpop.permute.xlu0 %3375  ;;  %v10889_v61 = vsub.f32 %v10887_v47, %v10888_v32  ;;  %v10910_v47 = vsub.f32 %v10908_v49, %v10909_v30 }
 0x796   : > { %v3378_v31 = vpop.permute.xlu1 %3377  ;;  %v9520_v46 = vpop.eup %6917 }
 0x797   : > { %2059 = vperm.xlu1 %6540, %v9455_v34   ;;  %2049 = vperm.xlu0 %6539, %v9451_v20   ;;  %v1783_v11 = vmul.f32 1.442695, %v10889_v61  ;;  %v1797_v32 = vmul.f32 1.442695, %v10910_v47  ;;  %v1946_v47 = vld [vmem:[#allocation3 + $0xe0] sm:$0xff] }
 0x799   : > { %v3380_v6 = vpop.permute.xlu0 %3379  ;;  %6919 = vpow2.f32 %v1783_v11  ;;  %v10911_v11 = vld [vmem:[#allocation65_spill] sm:$0xff] }
 0x79a   : > { %v3382_v14 = vpop.permute.xlu1 %3381  ;;  %6921 = vpow2.f32 %v1785_v15 }
 0x79b   : > { %2069 = vperm.xlu1 %6540, %v9459_v24   ;;  %6752 = vrot.lane.b32.xlu0 %v10878_v18, %s7312_s24  ;;  %v10899_v18 = vld [vmem:[#allocation57_spill] sm:$0xff] }
 0x79c   : > { %6440 = vmatpush3.bf16.xpose.msk.msra.mxu1 %vm7800_vm3, %v6435_v48  ;;  %v1935_v48 = vld [vmem:[#allocation3 + $0x88] sm:$0xff]  ;;  %v10901_v7 = vsub.f32 %v10899_v18, %v10900_v21 }
 0x79d   : > { %v3384_v26 = vpop.permute.xlu0 %3383 }
 0x79e   : > { %v3386_v55 = vpop.permute.xlu1 %3385 }
 0x79f   : > { %6742 = vrot.lane.b32.xlu1 %v6741_v38, %s7312_s24  ;;  %6762 = vrot.lane.b32.xlu0 %v10879_v13, %s7312_s24  ;;  %v1791_v38 = vmul.f32 1.442695, %v10901_v7  ;;  %v10918_v7 = vld [vmem:[#allocation69_spill] sm:$0xff] }
 0x7a1   : > { %v3388_v2 = vpop.permute.xlu0 %3387 }
 0x7a2   : > { %v3390_v37 = vpop.permute.xlu1 %3389 }
 0x7a3   : > { %6074 = vmatmul.mubr.msk.f32.vlgmr.msra.gmra.mrb[48].mxu1 %vm535_vm2, %v3368_v63  ;;  %6747 = vrot.lane.b32.xlu1 %v6746_v33, %s7312_s24  ;;  %v10896_v63 = vld [vmem:[#allocation56_spill] sm:$0xff] }
 0x7a4   : > { %6772 = vrot.lane.b32.xlu0 %v10880_v59, %s7312_s24  ;;  %6076 = vmatprep.mubr.msk.f32.mxu1 %vm535_vm2, %v3370_v62  ;;  %v10898_v62 = vsub.f32 %v10896_v63, %v10897_v36  ;;  %v10902_v59 = vld [vmem:[#allocation60_spill] sm:$0xff]  ;;  %v10914_v36 = vld [vmem:[#allocation70_spill] sm:$0xff] }
 0x7a5   : > { %v3392_v5 = vpop.permute.xlu0 %3391  ;;  %v1941_v63 = vld [vmem:[#allocation3 + $0xb8] sm:$0xff] }
 0x7a6   : > { %v3394_v25 = vpop.permute.xlu1 %3393 }
 0x7a7   : > { %6077 = vmatmul.mubr.msk.f32.gmra.mrb[50].mxu1 %vm535_vm2, %v3372_v51  ;;  %6757 = vrot.lane.b32.xlu1 %v10881_v35, %s7312_s24  ;;  %v1789_v51 = vmul.f32 1.442695, %v10898_v62  ;;  %v10915_v62 = vld [vmem:[#allocation71_spill] sm:$0xff] }
 0x7a8   : > { %6079 = vmatprep.mubr.msk.f32.mxu1 %vm535_vm2, %v3374_v54  ;;  %v1951_v54 = vmul.f32 %v9443_v9, %v1935_v48 }
 0x7a9   : > { %v3396_v52 = vpop.permute.xlu0 %3395 }
 0x7ab   : > { %6080 = vmatmul.mubr.msk.f32.gmra.mrb[52].mxu1 %vm535_vm2, %v3376_v58  ;;  %6767 = vrot.lane.b32.xlu1 %v10882_v56, %s7312_s24  ;;  %v10905_v56 = vld [vmem:[#allocation61_spill] sm:$0xff] }
 0x7ac   : > { %6082 = vmatprep.mubr.msk.f32.mxu1 %vm535_vm2, %v3378_v31  ;;  %v1937_v31 = vld [vmem:[#allocation3 + $0x98] sm:$0xff] }
 0x7af   : > { %6083 = vmatmul.mubr.msk.f32.gmra.mrb[54].mxu1 %vm535_vm2, %v3380_v6  ;;  %6777 = vrot.lane.b32.xlu1 %v10883_v0, %s7312_s24  ;;  %v10903_v6 = vld [vmem:[#allocation62_spill] sm:$0xff] }
 0x7b0   : > { %6085 = vmatprep.mubr.msk.f32.mxu1 %vm535_vm2, %v3382_v14  ;;  %v10904_v35 = vsub.f32 %v10902_v59, %v10903_v6 }
 0x7b2   : > { %v1793_v14 = vmul.f32 1.442695, %v10904_v35  ;;  %v1943_v35 = vld [vmem:[#allocation3 + $0xc8] sm:$0xff] }
 0x7b3   : > { %6086 = vmatmul.mubr.msk.f32.gmra.mrb[56].mxu1 %vm535_vm2, %v3384_v26 }
 0x7b4   : > { %6088 = vmatprep.mubr.msk.f32.mxu1 %vm535_vm2, %v3386_v55  ;;  %v10906_v55 = vld [vmem:[#allocation63_spill] sm:$0xff] }
 0x7b5   : > { %v10907_v0 = vsub.f32 %v10905_v56, %v10906_v55 }
 0x7b7   : > { %6089 = vmatmul.mubr.msk.f32.gmra.mrb[58].mxu1 %vm535_vm2, %v3388_v2  ;;  %v1795_v9 = vmul.f32 1.442695, %v10907_v0 }
 0x7b8   : > { %6091 = vmatprep.mubr.msk.f32.mxu1 %vm535_vm2, %v3390_v37  ;;  %v1953_v37 = vmul.f32 %v9520_v46, %v1937_v31 }
 0x7bb   : > { %6092 = vmatmul.mubr.msk.f32.gmra.mrb[60].mxu1 %vm535_vm2, %v3392_v5  ;;  %v1938_v5 = vld [vmem:[#allocation3 + $0xa0] sm:$0xff] }
 0x7bc   : > { %6094 = vmatprep.mubr.msk.f32.mxu1 %vm535_vm2, %v3394_v25  ;;  %v9532_v25 = vpop.eup %6919  ;;  %v1954_v40 = vmul.f32 %v9459_v24, %v1938_v5  ;;  %v10917_v24 = vld [vmem:[#allocation68_spill] sm:$0xff] }
 0x7bd   : > { %v9542_v15 = vpop.eup %6921  ;;  %v1955_v44 = vmul.f32 %v9532_v25, %v1939_v27  ;;  %v1945_v5 = vld [vmem:[#allocation3 + $0xd8] sm:$0xff] }
 0x7bf   : > { %6095 = vmatmul.mubr.msk.f32.gmra.mrb[62].mxu1 %vm535_vm2, %v3396_v52 }
 0x7c3   : > { %2949 = vadd.xlane.f32.xlu0 %v9321_v19  ;;  %v1787_v19 = vmul.f32 1.442695, %v10895_v12  ;;  %v1940_v12 = vld [vmem:[#allocation3 + $0xb0] sm:$0xff] }
 0x7c5   : > { %6923 = vpow2.f32 %v1787_v19 }
 0x7c6   : > { %6925 = vpow2.f32 %v1789_v51  ;;  %v10916_v51 = vsub.f32 %v10914_v36, %v10915_v62  ;;  %v1949_v36 = vld [vmem:[#allocation3 + $0xf8] sm:$0xff] }
 0x7c7   : > { %2951 = vadd.xlane.f32.xlu0 %v9328_v29  ;;  %v1934_v29 = vld [vmem:[#allocation3 + $0x80] sm:$0xff]  ;;  %6927 = vpow2.f32 %v1791_v38  ;;  %v10919_v38 = vsub.f32 %v10917_v24, %v10918_v7 }
 0x7c8   : > { %v1950_v13 = vmul.f32 %v9451_v20, %v1934_v29  ;;  %v1952_v20 = vmul.f32 %v9455_v34, %v1936_v28  ;;  %6929 = vpow2.f32 %v1793_v14  ;;  %v10912_v34 = vld [vmem:[#allocation67_spill] sm:$0xff]  ;;  %v1801_v18 = vmul.f32 1.442695, %v10916_v51 }
 0x7c9   : > { %6931 = vpow2.f32 %v1795_v9  ;;  %v10913_v60 = vsub.f32 %v10911_v11, %v10912_v34  ;;  %v1944_v9 = vld [vmem:[#allocation3 + $0xd0] sm:$0xff]  ;;  %v1947_v34 = vld [vmem:[#allocation3 + $0xe8] sm:$0xff] }
 0x7ca   : > { %6933 = vpow2.f32 %v1797_v32 }
 0x7cb   : > { %v1799_v3 = vmul.f32 1.442695, %v10913_v60 }
 0x7cd   : > { %6935 = vpow2.f32 %v1799_v3 }
 0x7ce   : > { %6937 = vpow2.f32 %v1801_v18 }
 0x7cf   : > { %v9546_v19 = vpop.eup %6923 }
 0x7d3   : > { %2947 = vadd.xlane.f32.xlu1 %v9316_v41 }
 0x7d6   : > { %v1969_v58 = vpop.xlane.xlu0 %1968 }
 0x7d7   : > { %v1999_v41 = vadd.f32 %v1969_v58, %v1951_v54  ;;  %v1967_v33 = vpop.xlane.xlu1 %1966  ;;  %v1803_v54 = vmul.f32 1.442695, %v10919_v38  ;;  %v1956_v58 = vmul.f32 %v9542_v15, %v1940_v12  ;;  %v1948_v12 = vld [vmem:[#allocation3 + $0xf0] sm:$0xff] }
 0x7d8   : > { %v1998_v26 = vadd.f32 %v1967_v33, %v1950_v13  ;;  %v9556_v13 = vpop.eup %6925  ;;  %v1942_v33 = vld [vmem:[#allocation3 + $0xc0] sm:$0xff] }
 0x7d9   : > { %2015 = vst.msk [vmem:[#allocation3 + $0x88] sm:$0xff] %vm1097_vm4, %v1999_v41  ;;  %v1957_v41 = vmul.f32 %v9546_v19, %v1941_v63  ;;  %v9560_v31 = vpop.eup %6927  ;;  %6939 = vpow2.f32 %v1803_v54  ;;  %v1116_v54 = vld [vmem:[#allocation4 + $0x10] sm:$0xff] }
 0x7da   : > { %2014 = vst.msk [vmem:[#allocation3 + $0x80] sm:$0xff] %vm1097_vm4, %v1998_v26  ;;  %v1971_v2 = vpop.xlane.xlu0 %1970  ;;  %v1958_v26 = vmul.f32 %v9556_v13, %v1942_v33  ;;  %v9564_v56 = vpop.eup %6929  ;;  %v1959_v0 = vmul.f32 %v9560_v31, %v1943_v35  ;;  %v1118_v33 = vld [vmem:[#allocation4 + $0x20] sm:$0xff] }
 0x7db   : > { %v2000_v52 = vadd.f32 %v1971_v2, %v1952_v20  ;;  %v1973_v16 = vpop.xlane.xlu1 %1972  ;;  %v9568_v20 = vpop.eup %6931 }
 0x7dc   : > { %v2001_v61 = vadd.f32 %v1973_v16, %v1953_v37  ;;  %v1960_v16 = vmul.f32 %v9564_v56, %v1944_v9  ;;  %v9572_v27 = vpop.eup %6933  ;;  %v1961_v30 = vmul.f32 %v9568_v20, %v1945_v5  ;;  %v10921_v9 = vld [vmem:[#allocation7_spill] sm:$0xff]  ;;  %v10922_v5 = vld [vmem:[#allocation37_spill] sm:$0xff] }
 0x7dd   : > { %2016 = vst.msk [vmem:[#allocation3 + $0x90] sm:$0xff] %vm1097_vm4, %v2000_v52  ;;  %v9576_v32 = vpop.eup %6935  ;;  %v1962_v3 = vmul.f32 %v9572_v27, %v1946_v47 }
 0x7de   : > { %2017 = vst.msk [vmem:[#allocation3 + $0x98] sm:$0xff] %vm1097_vm4, %v2001_v61  ;;  %v1975_v10 = vpop.xlane.xlu0 %1974 }
 0x7df   : > { %v2002_v48 = vadd.f32 %v1975_v10, %v1954_v40  ;;  %v1977_v29 = vpop.xlane.xlu1 %1976  ;;  %v9580_v40 = vpop.eup %6937 }
 0x7e0   : > { %v2003_v21 = vadd.f32 %v1977_v29, %v1955_v44  ;;  %v1963_v44 = vmul.f32 %v9576_v32, %v1947_v34  ;;  %v1964_v51 = vmul.f32 %v9580_v40, %v1948_v12 }
 0x7e1   : > { %2018 = vst.msk [vmem:[#allocation3 + $0xa0] sm:$0xff] %vm1097_vm4, %v2002_v48 }
 0x7e2   : > { %2019 = vst.msk [vmem:[#allocation3 + $0xa8] sm:$0xff] %vm1097_vm4, %v2003_v21  ;;  %v1979_v28 = vpop.xlane.xlu0 %1978 }
 0x7e3   : > { %v2004_v59 = vadd.f32 %v1979_v28, %v1956_v58  ;;  %v1981_v6 = vpop.xlane.xlu1 %1980  ;;  %v9584_v48 = vpop.eup %6939 }
 0x7e4   : > { %v2005_v14 = vadd.f32 %v1981_v6, %v1957_v41  ;;  %v1965_v21 = vmul.f32 %v9584_v48, %v1949_v36  ;;  %v1117_v41 = vld [vmem:[#allocation4 + $0x18] sm:$0xff]  ;;  %v1123_v36 = vld [vmem:[#allocation4 + $0x48] sm:$0xff] }
 0x7e5   : > { %2020 = vst.msk [vmem:[#allocation3 + $0xb0] sm:$0xff] %vm1097_vm4, %v2004_v59  ;;  %v10920_v59 = vld [vmem:[#allocation8_spill] sm:$0xff] }
 0x7e6   : > { %2021 = vst.msk [vmem:[#allocation3 + $0xb8] sm:$0xff] %vm1097_vm4, %v2005_v14  ;;  %v1983_v55 = vpop.xlane.xlu0 %1982 }
 0x7e7   : > { %v2006_v2 = vadd.f32 %v1983_v55, %v1958_v26  ;;  %v1985_v37 = vpop.xlane.xlu1 %1984 }
 0x7e8   : > { %v2007_v52 = vadd.f32 %v1985_v37, %v1959_v0  ;;  %v1119_v0 = vld [vmem:[#allocation4 + $0x28] sm:$0xff]  ;;  %v1120_v37 = vld [vmem:[#allocation4 + $0x30] sm:$0xff] }
 0x7e9   : > { %2022 = vst.msk [vmem:[#allocation3 + $0xc0] sm:$0xff] %vm1097_vm4, %v2006_v2 }
 0x7ea   : > { %2023 = vst.msk [vmem:[#allocation3 + $0xc8] sm:$0xff] %vm1097_vm4, %v2007_v52  ;;  %v1987_v49 = vpop.xlane.xlu0 %1986 }
 0x7eb   : > { %v2008_v61 = vadd.f32 %v1987_v49, %v1960_v16  ;;  %v1989_v11 = vpop.xlane.xlu1 %1988 }
 0x7ec   : > { %v2009_v60 = vadd.f32 %v1989_v11, %v1961_v30  ;;  %v10923_v11 = vld [vmem:[#allocation36_spill] sm:$0xff] }
 0x7ed   : > { %2024 = vst.msk [vmem:[#allocation3 + $0xd0] sm:$0xff] %vm1097_vm4, %v2008_v61  ;;  %v1121_v61 = vld [vmem:[#allocation4 + $0x38] sm:$0xff] }
 0x7ee   : > { %2025 = vst.msk [vmem:[#allocation3 + $0xd8] sm:$0xff] %vm1097_vm4, %v2009_v60  ;;  %v1991_v10 = vpop.xlane.xlu0 %1990  ;;  %v1122_v60 = vld [vmem:[#allocation4 + $0x40] sm:$0xff] }
 0x7ef   : > { %v2010_v29 = vadd.f32 %v1991_v10, %v1962_v3  ;;  %v1993_v63 = vpop.xlane.xlu1 %1992  ;;  %v10924_v3 = vld [vmem:[#allocation39_spill] sm:$0xff] }
 0x7f0   : > { %v2011_v62 = vadd.f32 %v1993_v63, %v1963_v44 }
 0x7f1   : > { %2026 = vst.msk [vmem:[#allocation3 + $0xe0] sm:$0xff] %vm1097_vm4, %v2010_v29 }
 0x7f2   : > { %2027 = vst.msk [vmem:[#allocation3 + $0xe8] sm:$0xff] %vm1097_vm4, %v2011_v62  ;;  %v1995_v18 = vpop.xlane.xlu0 %1994  ;;  %v10925_v62 = vld [vmem:[#allocation38_spill] sm:$0xff] }
 0x7f3   : > { %v2012_v24 = vadd.f32 %v1995_v18, %v1964_v51  ;;  %v1997_v7 = vpop.xlane.xlu1 %1996  ;;  %v1124_v18 = vld [vmem:[#allocation4 + $0x50] sm:$0xff] }
 0x7f4   : > { %v2013_v38 = vadd.f32 %v1997_v7, %v1965_v21  ;;  %v10926_v21 = vld [vmem:[#allocation41_spill] sm:$0xff] }
 0x7f5   : > { %2028 = vst.msk [vmem:[#allocation3 + $0xf0] sm:$0xff] %vm1097_vm4, %v2012_v24 }
 0x7f6   : > { %2029 = vst.msk [vmem:[#allocation3 + $0xf8] sm:$0xff] %vm1097_vm4, %v2013_v38 }
 0x7f7   : > { %v1143_v58 = vpop.permute.xlu1 %1142 }
 0x7f8   : > { %v1212_v28 = vmul.f32 %v1143_v58, %v1116_v54 }
 0x7fa   : > { %v1373_v6 = vadd.f32 %v10920_v59, %v1212_v28  ;;  %v1148_v35 = vpop.permute.xlu0 %1147  ;;  %v1125_v28 = vld [vmem:[#allocation4 + $0x58] sm:$0xff]  ;;  %v1126_v59 = vld [vmem:[#allocation4 + $0x60] sm:$0xff] }
 0x7fb   : > { %v1213_v14 = vmul.f32 %v1148_v35, %v1117_v41  ;;  %v1153_v26 = vpop.permute.xlu1 %1152  ;;  %v10927_v41 = vld [vmem:[#allocation40_spill] sm:$0xff] }
 0x7fc   : > { %1389 = vst.msk [vmem:[#allocation4 + $0x10] sm:$0xff] %vm535_vm2, %v1373_v6  ;;  %v1214_v55 = vmul.f32 %v1153_v26, %v1118_v33  ;;  %v10928_v6 = vld [vmem:[#allocation43_spill] sm:$0xff] }
 0x7fd   : > { %v1374_v2 = vadd.f32 %v10921_v9, %v1213_v14  ;;  %v1127_v9 = vld [vmem:[#allocation4 + $0x68] sm:$0xff] }
 0x7fe   : > { %v1375_v52 = vadd.f32 %v10922_v5, %v1214_v55  ;;  %v1158_v16 = vpop.permute.xlu0 %1157  ;;  %v1128_v5 = vld [vmem:[#allocation4 + $0x70] sm:$0xff] }
 0x7ff   : > { %1390 = vst.msk [vmem:[#allocation4 + $0x18] sm:$0xff] %vm535_vm2, %v1374_v2  ;;  %v1215_v49 = vmul.f32 %v1158_v16, %v1119_v0  ;;  %v1163_v30 = vpop.permute.xlu1 %1162  ;;  %v10929_v2 = vld [vmem:[#allocation42_spill] sm:$0xff] }
 0x800   : > { %1391 = vst.msk [vmem:[#allocation4 + $0x20] sm:$0xff] %vm535_vm2, %v1375_v52  ;;  %v1216_v47 = vmul.f32 %v1163_v30, %v1120_v37  ;;  %v10930_v52 = vld [vmem:[#allocation45_spill] sm:$0xff] }
 0x801   : > { %v1376_v34 = vadd.f32 %v10923_v11, %v1215_v49  ;;  %v1129_v11 = vld [vmem:[#allocation4 + $0x78] sm:$0xff] }
 0x802   : > { %v1377_v10 = vadd.f32 %v10924_v3, %v1216_v47  ;;  %v1168_v44 = vpop.permute.xlu0 %1167  ;;  %v2032_v3 = vld [vmem:[#allocation4 + $0x88] sm:$0xff] }
 0x803   : > { %1392 = vst.msk [vmem:[#allocation4 + $0x28] sm:$0xff] %vm535_vm2, %v1376_v34  ;;  %v1217_v12 = vmul.f32 %v1168_v44, %v1121_v61  ;;  %v1173_v29 = vpop.permute.xlu1 %1172  ;;  %v10931_v34 = vld [vmem:[#allocation44_spill] sm:$0xff] }
 0x804   : > { %1393 = vst.msk [vmem:[#allocation4 + $0x30] sm:$0xff] %vm535_vm2, %v1377_v10  ;;  %v1218_v63 = vmul.f32 %v1173_v29, %v1122_v60  ;;  %v10932_v10 = vld [vmem:[#allocation47_spill] sm:$0xff] }
 0x805   : > { %v1378_v51 = vadd.f32 %v10925_v62, %v1217_v12  ;;  %v2031_v62 = vld [vmem:[#allocation4 + $0x80] sm:$0xff] }
 0x806   : > { %v1379_v24 = vadd.f32 %v10926_v21, %v1218_v63  ;;  %v1178_v7 = vpop.permute.xlu0 %1177  ;;  %v2033_v21 = vld [vmem:[#allocation4 + $0x90] sm:$0xff] }
 0x807   : > { %1394 = vst.msk [vmem:[#allocation4 + $0x38] sm:$0xff] %vm535_vm2, %v1378_v51  ;;  %v1219_v38 = vmul.f32 %v1178_v7, %v1123_v36  ;;  %v1183_v54 = vpop.permute.xlu1 %1182  ;;  %v10933_v51 = vld [vmem:[#allocation46_spill] sm:$0xff] }
 0x808   : > { %1395 = vst.msk [vmem:[#allocation4 + $0x40] sm:$0xff] %vm535_vm2, %v1379_v24  ;;  %v1220_v58 = vmul.f32 %v1183_v54, %v1124_v18  ;;  %v10934_v24 = vld [vmem:[#allocation20_spill] sm:$0xff] }
 0x809   : > { %v1380_v33 = vadd.f32 %v10927_v41, %v1219_v38  ;;  %v10935_v41 = vld [vmem:[#allocation15_spill] sm:$0xff] }
 0x80a   : > { %v1381_v35 = vadd.f32 %v10928_v6, %v1220_v58  ;;  %v1188_v14 = vpop.permute.xlu0 %1187  ;;  %v10936_v6 = vld [vmem:[#allocation24_spill] sm:$0xff] }
 0x80b   : > { %1396 = vst.msk [vmem:[#allocation4 + $0x48] sm:$0xff] %vm535_vm2, %v1380_v33  ;;  %v1221_v26 = vmul.f32 %v1188_v14, %v1125_v28  ;;  %v1193_v55 = vpop.permute.xlu1 %1192 }
 0x80c   : > { %1397 = vst.msk [vmem:[#allocation4 + $0x50] sm:$0xff] %vm535_vm2, %v1381_v35  ;;  %v1222_v0 = vmul.f32 %v1193_v55, %v1126_v59  ;;  %v2035_v59 = vld [vmem:[#allocation4 + $0xa0] sm:$0xff] }
 0x80d   : > { %v1382_v37 = vadd.f32 %v10929_v2, %v1221_v26 }
 0x80e   : > { %v1383_v16 = vadd.f32 %v10930_v52, %v1222_v0  ;;  %v1198_v49 = vpop.permute.xlu0 %1197 }
 0x80f   : > { %1398 = vst.msk [vmem:[#allocation4 + $0x58] sm:$0xff] %vm535_vm2, %v1382_v37  ;;  %v1223_v30 = vmul.f32 %v1198_v49, %v1127_v9  ;;  %v1203_v47 = vpop.permute.xlu1 %1202  ;;  %v10939_v9 = vld [vmem:[#allocation26_spill] sm:$0xff] }
 0x810   : > { %1399 = vst.msk [vmem:[#allocation4 + $0x60] sm:$0xff] %vm535_vm2, %v1383_v16  ;;  %v1224_v61 = vmul.f32 %v1203_v47, %v1128_v5 }
 0x811   : > { %v1384_v60 = vadd.f32 %v10931_v34, %v1223_v30 }
 0x812   : > { %v1385_v44 = vadd.f32 %v10932_v10, %v1224_v61  ;;  %v1208_v12 = vpop.permute.xlu0 %1207 }
 0x813   : > { %1400 = vst.msk [vmem:[#allocation4 + $0x68] sm:$0xff] %vm535_vm2, %v1384_v60  ;;  %v1225_v29 = vmul.f32 %v1208_v12, %v1129_v11  ;;  %v2055_v63 = vpop.permute.xlu1 %2054 }
 0x814   : > { %1401 = vst.msk [vmem:[#allocation4 + $0x70] sm:$0xff] %vm535_vm2, %v1385_v44  ;;  %v2128_v36 = vmul.f32 %v2055_v63, %v2032_v3 }
 0x815   : > { %v1386_v18 = vadd.f32 %v10933_v51, %v1225_v29 }
 0x816   : > { %v2353_v7 = vadd.f32 %v10934_v24, %v2128_v36  ;;  %v2050_v38 = vpop.permute.xlu0 %2049 }
 0x817   : > { %1402 = vst.msk [vmem:[#allocation4 + $0x78] sm:$0xff] %vm535_vm2, %v1386_v18  ;;  %v2127_v54 = vmul.f32 %v2050_v38, %v2031_v62  ;;  %v2060_v58 = vpop.permute.xlu1 %2059 }
 0x818   : > { %2369 = vst.msk [vmem:[#allocation4 + $0x88] sm:$0xff] %vm535_vm2, %v2353_v7  ;;  %v2129_v28 = vmul.f32 %v2060_v58, %v2033_v21 }
 0x819   : > { %v2352_v33 = vadd.f32 %v10935_v41, %v2127_v54 }
 0x81a   : > { %v2354_v35 = vadd.f32 %v10936_v6, %v2129_v28  ;;  %v6753_v30 = vpop.permute.xlu0 %6752  ;;  %v10940_v6 = vld [vmem:[#allocation72_spill] sm:$0xff] }
 0x81b   : > { %2368 = vst.msk [vmem:[#allocation4 + $0x80] sm:$0xff] %vm535_vm2, %v2352_v33  ;;  %v2070_v14 = vpop.permute.xlu1 %2069  ;;  %v6755_v11 = vunpack.i.h.bf16 %v6753_v30  ;;  %v6754_v34 = vunpack.i.l.bf16 %v6753_v30  ;;  %v2916_v30 = vld [vmem:[#allocation3 + $0x108] sm:$0xff] }
 0x81c   : > { %2370 = vst.msk [vmem:[#allocation4 + $0x90] sm:$0xff] %vm535_vm2, %v2354_v35  ;;  %v2131_v26 = vmul.f32 %v2070_v14, %v2035_v59  ;;  %v9626_v55 = vpop.f32.mrb[32].mxu1  ;;  %v10941_v35 = vld [vmem:[#allocation73_spill] sm:$0xff] }
 0x81d   : > { %10937 = vst [vmem:[#allocation11_spill] sm:$0xff] %v9626_v55  ;;  %v9628_v0 = vpop.f32.mrb[33].mxu1  ;;  %v6449_v36 = vpack.c.bf16 %v6755_v11, %v6754_v34  ;;  %v10942_v14 = vsub.f32 %v10940_v6, %v10941_v35  ;;  %v10950_v11 = vld [vmem:[#allocation77_spill] sm:$0xff]  ;;  %v9782_v55 = vld [vmem:[#allocation2 + $0x1b8] sm:$0xff] }
 0x81e   : > { %10938 = vst [vmem:[#allocation9_spill] sm:$0xff] %v9628_v0  ;;  %v2356_v2 = vadd.f32 %v10939_v9, %v2131_v26  ;;  %v6763_v10 = vpop.permute.xlu0 %6762 }
 0x81f   : > { %v6743_v37 = vpop.permute.xlu1 %6742  ;;  %v6765_v44 = vunpack.i.h.bf16 %v6763_v10  ;;  %v6764_v12 = vunpack.i.l.bf16 %v6763_v10  ;;  %v2756_v26 = vmul.f32 1.442695, %v10942_v14 }
 0x820   : > { %2372 = vst.msk [vmem:[#allocation4 + $0xa0] sm:$0xff] %vm535_vm2, %v2356_v2  ;;  %v6745_v5 = vunpack.i.h.bf16 %v6743_v37  ;;  %v6744_v52 = vunpack.i.l.bf16 %v6743_v37  ;;  %v10943_v2 = vld [vmem:[#allocation76_spill] sm:$0xff]  ;;  %v10944_v37 = vld [vmem:[#allocation78_spill] sm:$0xff] }
 0x821   : > { %v6457_v24 = vpack.c.bf16 %v6765_v44, %v6764_v12  ;;  %6941 = vpow2.f32 %v2756_v26  ;;  %v2917_v12 = vld [vmem:[#allocation3 + $0x110] sm:$0xff] }
 0x822   : > { %v6441_v16 = vpack.c.bf16 %v6745_v5, %v6744_v52  ;;  %v6773_v7 = vpop.permute.xlu0 %6772  ;;  %v10945_v5 = vsub.f32 %v10943_v2, %v10944_v37 }
 0x823   : > { %v6748_v49 = vpop.permute.xlu1 %6747  ;;  %v6775_v38 = vunpack.i.h.bf16 %v6773_v7  ;;  %v6774_v54 = vunpack.i.l.bf16 %v6773_v7 }
 0x824   : > { %6442 = vmatprep.subr.bf16.mxu0 %v6441_v16  ;;  %v6750_v47 = vunpack.i.h.bf16 %v6748_v49  ;;  %v6749_v61 = vunpack.i.l.bf16 %v6748_v49  ;;  %v2758_v52 = vmul.f32 1.442695, %v10945_v5 }
 0x825   : > { %6444 = vmatpush3.bf16.msra.mxu0 %v6441_v16  ;;  %v6465_v59 = vpack.c.bf16 %v6775_v38, %v6774_v54 }
 0x826   : > { %v6445_v60 = vpack.c.bf16 %v6750_v47, %v6749_v61  ;;  %6943 = vpow2.f32 %v2758_v52  ;;  %v10949_v61 = vld [vmem:[#allocation74_spill] sm:$0xff] }
 0x827   : > { %v6758_v3 = vpop.permute.xlu1 %6757  ;;  %v10951_v34 = vsub.f32 %v10949_v61, %v10950_v11 }
 0x828   : > { %6446 = vmatprep.subr.bf16.mxu0 %v6445_v60  ;;  %v6760_v29 = vunpack.i.h.bf16 %v6758_v3  ;;  %v6759_v63 = vunpack.i.l.bf16 %v6758_v3 }
 0x829   : > { %6448 = vmatpush3.bf16.msra.mxu0 %v6445_v60  ;;  %v2754_v60 = vmul.f32 1.442695, %v10951_v34 }
 0x82a   : > { %6450 = vmatprep.subr.bf16.mxu0 %v6449_v36  ;;  %v6453_v21 = vpack.c.bf16 %v6760_v29, %v6759_v63 }
 0x82b   : > { %v6768_v62 = vpop.permute.xlu1 %6767  ;;  %v9638_v16 = vpop.eup %6941  ;;  %6945 = vpow2.f32 %v2754_v60 }
 0x82c   : > { %v6770_v51 = vunpack.i.h.bf16 %v6768_v62  ;;  %v6769_v18 = vunpack.i.l.bf16 %v6768_v62  ;;  %10946 = vst [vmem:[#allocation12_spill] sm:$0xff] %v9638_v16  ;;  %v2932_v3 = vmul.f32 %v9638_v16, %v2916_v30 }
 0x82d   : > { %6452 = vmatpush3.bf16.msra.mxu0 %v6449_v36 }
 0x82e   : > { %6454 = vmatprep.subr.bf16.mxu0 %v6453_v21  ;;  %v6461_v58 = vpack.c.bf16 %v6770_v51, %v6769_v18 }
 0x82f   : > { %v6778_v28 = vpop.permute.xlu1 %6777 }
 0x830   : > { %v6780_v41 = vunpack.i.h.bf16 %v6778_v28  ;;  %v6779_v33 = vunpack.i.l.bf16 %v6778_v28  ;;  %v9648_v10 = vpop.eup %6943 }
 0x831   : > { %6456 = vmatpush3.bf16.msra.mxu0 %v6453_v21  ;;  %10952 = vst [vmem:[#allocation17_spill] sm:$0xff] %v9648_v10  ;;  %v2933_v62 = vmul.f32 %v9648_v10, %v2917_v12 }
 0x832   : > { %6458 = vmatprep.subr.bf16.mxu0 %v6457_v24  ;;  %v6469_v9 = vpack.c.bf16 %v6780_v41, %v6779_v33 }
 0x835   : > { %6460 = vmatpush3.bf16.msra.mxu0 %v6457_v24  ;;  %v9665_v54 = vpop.eup %6945 }
 0x836   : > { %6462 = vmatprep.subr.bf16.mxu0 %v6461_v58 }
 0x839   : > { %6464 = vmatpush3.bf16.msra.mxu0 %v6461_v58  ;;  %v2915_v58 = vld [vmem:[#allocation3 + $0x100] sm:$0xff] }
 0x83a   : > { %6466 = vmatprep.subr.bf16.mxu0 %v6465_v59  ;;  %v2931_v33 = vmul.f32 %v9665_v54, %v2915_v58  ;;  %v9732_v58 = vld [vmem:[#allocation2 + $0x188] sm:$0xff] }
 0x83b   : > { %10970 = vst [vmem:[#allocation55_spill] sm:$0xff] %v9732_v58 }
 0x83d   : > { %6468 = vmatpush3.bf16.msra.mxu0 %v6465_v59 }
 0x83e   : > { %6470 = vmatprep.subr.bf16.mxu0 %v6469_v9 }
 0x841   : > { %6472 = vmatpush3.bf16.msra.mxu0 %v6469_v9 }
 0x84c   : > { %v9640_v49 = vpop.f32.mrb[34].mxu1 }
 0x84d   : > { %10947 = vst [vmem:[#allocation10_spill] sm:$0xff] %v9640_v49  ;;  %v9642_v47 = vpop.f32.mrb[35].mxu1 }
 0x84e   : > { %10948 = vst [vmem:[#allocation21_spill] sm:$0xff] %v9642_v47 }
 0x850   : > { %v2950_v44 = vpop.xlane.xlu0 %2949 }
 0x851   : > { %v2980_v29 = vadd.f32 %v2950_v44, %v2932_v3  ;;  %v9650_v63 = vpop.f32.mrb[36].mxu1 }
 0x852   : > { %10953 = vst [vmem:[#allocation48_spill] sm:$0xff] %v9650_v63  ;;  %v9652_v36 = vpop.f32.mrb[37].mxu1  ;;  %v9804_v63 = vld [vmem:[#allocation2 + $0x1c0] sm:$0xff] }
 0x853   : > { %10954 = vst [vmem:[#allocation50_spill] sm:$0xff] %v9652_v36  ;;  %2996 = vst.msk [vmem:[#allocation3 + $0x108] sm:$0xff] %vm1097_vm4, %v2980_v29 }
 0x854   : > { %v2952_v51 = vpop.xlane.xlu0 %2951  ;;  %10978 = vst [vmem:[#allocation63_spill] sm:$0xff] %v9804_v63 }
 0x855   : > { %v2981_v18 = vadd.f32 %v2952_v51, %v2933_v62  ;;  %v9656_v21 = vpop.f32.mrb[38].mxu1 }
 0x856   : > { %10955 = vst [vmem:[#allocation13_spill] sm:$0xff] %v9656_v21  ;;  %v9658_v24 = vpop.f32.mrb[39].mxu1  ;;  %v9802_v21 = vld [vmem:[#allocation2 + $0x1c8] sm:$0xff] }
 0x857   : > { %10956 = vst [vmem:[#allocation14_spill] sm:$0xff] %v9658_v24  ;;  %2997 = vst.msk [vmem:[#allocation3 + $0x110] sm:$0xff] %vm1097_vm4, %v2981_v18  ;;  %v9764_v24 = vld [vmem:[#allocation2 + $0x1a0] sm:$0xff] }
 0x858   : > { %10974 = vst [vmem:[#allocation59_spill] sm:$0xff] %v9764_v24 }
 0x859   : > { %v9661_v7 = vpop.f32.mrb[40].mxu1 }
 0x85a   : > { %10957 = vst [vmem:[#allocation18_spill] sm:$0xff] %v9661_v7  ;;  %v9663_v38 = vpop.f32.mrb[41].mxu1 }
 0x85b   : > { %10958 = vst [vmem:[#allocation6_spill] sm:$0xff] %v9663_v38  ;;  %v9762_v38 = vld [vmem:[#allocation2 + $0x1a8] sm:$0xff] }
 0x85d   : > { %v9667_v28 = vpop.f32.mrb[42].mxu1 }
 0x85e   : > { %10959 = vst [vmem:[#allocation75_spill] sm:$0xff] %v9667_v28  ;;  %v9669_v41 = vpop.f32.mrb[43].mxu1 }
 0x85f   : > { %10960 = vst [vmem:[#allocation19_spill] sm:$0xff] %v9669_v41 }
 0x860   : > { %v2948_v59 = vpop.xlane.xlu1 %2947 }
 0x861   : > { %v2979_v6 = vadd.f32 %v2948_v59, %v2931_v33  ;;  %v9672_v35 = vpop.f32.mrb[44].mxu1  ;;  %v9734_v33 = vld [vmem:[#allocation2 + $0x180] sm:$0xff] }
 0x862   : > { %10961 = vst [vmem:[#allocation80_spill] sm:$0xff] %v9672_v35  ;;  %v9674_v14 = vpop.f32.mrb[45].mxu1  ;;  %v9784_v35 = vld [vmem:[#allocation2 + $0x1b0] sm:$0xff] }
 0x863   : > { %10962 = vst [vmem:[#allocation82_spill] sm:$0xff] %v9674_v14  ;;  %2995 = vst.msk [vmem:[#allocation3 + $0x100] sm:$0xff] %vm1097_vm4, %v2979_v6 }
 0x864   : > { %10976 = vst [vmem:[#allocation62_spill] sm:$0xff] %v9784_v35 }
 0x865   : > { %v9677_v26 = vpop.f32.mrb[46].mxu1 }
 0x866   : > { %10963 = vst [vmem:[#allocation16_spill] sm:$0xff] %v9677_v26  ;;  %v9679_v9 = vpop.f32.mrb[47].mxu1 }
 0x867   : > { %10964 = vst [vmem:[#allocation23_spill] sm:$0xff] %v9679_v9 }
 0x876   : > { %v9681_v2 = vpop.f32.mrb[48].mxu1 }
 0x877   : > { %3657 = vmax.xlane.f32.xlu0 %v9681_v2  ;;  %v9684_v37 = vpop.f32.mrb[49].mxu1 }
 0x878   : > { %3655 = vmax.xlane.f32.xlu1 %v9684_v37 }
 0x87a   : > { %v9687_v5 = vpop.f32.mrb[50].mxu1 }
 0x87b   : > { %v9689_v52 = vpop.f32.mrb[51].mxu1 }
 0x87c   : > { %3661 = vmax.xlane.f32.xlu1 %v9687_v5  ;;  %3659 = vmax.xlane.f32.xlu0 %v9689_v52 }
 0x87e   : > { %v9693_v30 = vpop.f32.mrb[52].mxu1 }
 0x87f   : > { %v9695_v61 = vpop.f32.mrb[53].mxu1 }
 0x880   : > { %3665 = vmax.xlane.f32.xlu1 %v9693_v30  ;;  %3663 = vmax.xlane.f32.xlu0 %v9695_v61 }
 0x882   : > { %v9699_v11 = vpop.f32.mrb[54].mxu1 }
 0x883   : > { %v9701_v34 = vpop.f32.mrb[55].mxu1 }
 0x884   : > { %3669 = vmax.xlane.f32.xlu1 %v9699_v11  ;;  %3667 = vmax.xlane.f32.xlu0 %v9701_v34 }
 0x886   : > { %v9705_v60 = vpop.f32.mrb[56].mxu1 }
 0x887   : > { %v9707_v3 = vpop.f32.mrb[57].mxu1 }
 0x888   : > { %3673 = vmax.xlane.f32.xlu1 %v9705_v60  ;;  %3671 = vmax.xlane.f32.xlu0 %v9707_v3 }
 0x88a   : > { %v9711_v44 = vpop.f32.mrb[58].mxu1 }
 0x88b   : > { %10965 = vst [vmem:[#allocation49_spill] sm:$0xff] %v9711_v44  ;;  %v9713_v12 = vpop.f32.mrb[59].mxu1 }
 0x88c   : > { %3675 = vmax.xlane.f32.xlu0 %v9713_v12  ;;  %3677 = vmax.xlane.f32.xlu1 %v9711_v44 }
 0x88e   : > { %v9717_v29 = vpop.f32.mrb[60].mxu1 }
 0x88f   : > { %10966 = vst [vmem:[#allocation51_spill] sm:$0xff] %v9717_v29  ;;  %v9719_v62 = vpop.f32.mrb[61].mxu1 }
 0x890   : > { %10967 = vst [vmem:[#allocation52_spill] sm:$0xff] %v9719_v62  ;;  %3679 = vmax.xlane.f32.xlu0 %v9719_v62  ;;  %3681 = vmax.xlane.f32.xlu1 %v9717_v29  ;;  %v9824_v29 = vld [vmem:[#allocation2 + $0x1d8] sm:$0xff] }
 0x892   : > { %v9723_v51 = vpop.f32.mrb[62].mxu1 }
 0x893   : > { %10968 = vst [vmem:[#allocation54_spill] sm:$0xff] %v9723_v51  ;;  %v9725_v18 = vpop.f32.mrb[63].mxu1 }
 0x894   : > { %10969 = vst [vmem:[#allocation53_spill] sm:$0xff] %v9725_v18  ;;  %3683 = vmax.xlane.f32.xlu0 %v9725_v18  ;;  %3685 = vmax.xlane.f32.xlu1 %v9723_v51  ;;  %v9822_v51 = vld [vmem:[#allocation2 + $0x1d0] sm:$0xff] }
 0x895   : > { %10980 = vst [vmem:[#allocation66_spill] sm:$0xff] %v9822_v51  ;;  %v9861_v18 = vld [vmem:[#allocation2 + $0x1f0] sm:$0xff] }
 0x896   : > { %10984 = vst [vmem:[#allocation71_spill] sm:$0xff] %v9861_v18 }
 0x8aa   : > { %2064 = vperm.xlu0 %6539, %v9520_v46   ;;  %v9747_v46 = vld [vmem:[#allocation2 + $0x198] sm:$0xff] }
 0x8ae   : > { %2074 = vperm.xlu0 %6539, %v9532_v25   ;;  %v9749_v25 = vld [vmem:[#allocation2 + $0x190] sm:$0xff] }
 0x8af   : > { %10972 = vst [vmem:[#allocation58_spill] sm:$0xff] %v9749_v25 }
 0x8b2   : > { %2079 = vperm.xlu0 %6539, %v9542_v15  }
 0x904   : > { %v3658_v59 = vpop.xlane.xlu0 %3657 }
 0x905   : > { %v9737_v6 = vmax.f32 %v9732_v58, %v3658_v59  ;;  %v3656_v26 = vpop.xlane.xlu1 %3655  ;;  %v10988_v58 = vld [vmem:[#allocation25_spill] sm:$0xff] }
 0x906   : > { %v9740_v9 = vmax.f32 %v9734_v33, %v3656_v26 }
 0x907   : > { %10971 = vst [vmem:[#allocation56_spill] sm:$0xff] %v9737_v6  ;;  %4315 = vst.msk [vmem:[#allocation2 + $0x188] sm:$0xff] %vm1097_vm4, %v9737_v6  ;;  %3758 = vperm.xlu0 %6539, %v9737_v6  }
 0x908   : > { %4314 = vst.msk [vmem:[#allocation2 + $0x180] sm:$0xff] %vm1097_vm4, %v9740_v9  ;;  %3753 = vperm.xlu1 %6540, %v9740_v9  }
 0x909   : > { %v3662_v26 = vpop.xlane.xlu1 %3661  ;;  %v3660_v59 = vpop.xlane.xlu0 %3659 }
 0x90a   : > { %v9757_v14 = vmax.f32 %v9747_v46, %v3662_v26  ;;  %v9760_v41 = vmax.f32 %v9749_v25, %v3660_v59 }
 0x90c   : > { %10973 = vst [vmem:[#allocation57_spill] sm:$0xff] %v9760_v41  ;;  %4317 = vst.msk [vmem:[#allocation2 + $0x198] sm:$0xff] %vm1097_vm4, %v9757_v14  ;;  %3768 = vperm.xlu1 %6540, %v9757_v14   ;;  %3763 = vperm.xlu0 %6539, %v9760_v41  }
 0x90d   : > { %4316 = vst.msk [vmem:[#allocation2 + $0x190] sm:$0xff] %vm1097_vm4, %v9760_v41  ;;  %v3666_v26 = vpop.xlane.xlu1 %3665  ;;  %v3664_v59 = vpop.xlane.xlu0 %3663  ;;  %v2036_v41 = vld [vmem:[#allocation4 + $0xa8] sm:$0xff] }
 0x90e   : > { %v9777_v47 = vmax.f32 %v9762_v38, %v3666_v26  ;;  %v9780_v15 = vmax.f32 %v9764_v24, %v3664_v59 }
 0x910   : > { %10975 = vst [vmem:[#allocation60_spill] sm:$0xff] %v9780_v15  ;;  %4319 = vst.msk [vmem:[#allocation2 + $0x1a8] sm:$0xff] %vm1097_vm4, %v9777_v47  ;;  %3773 = vperm.xlu1 %6540, %v9780_v15   ;;  %3778 = vperm.xlu0 %6539, %v9777_v47  }
 0x911   : > { %4318 = vst.msk [vmem:[#allocation2 + $0x1a0] sm:$0xff] %vm1097_vm4, %v9780_v15  ;;  %v3670_v26 = vpop.xlane.xlu1 %3669  ;;  %v3668_v59 = vpop.xlane.xlu0 %3667 }
 0x912   : > { %v9797_v7 = vmax.f32 %v9782_v55, %v3670_v26  ;;  %v9800_v36 = vmax.f32 %v9784_v35, %v3668_v59  ;;  %v9844_v35 = vld [vmem:[#allocation2 + $0x1e8] sm:$0xff] }
 0x914   : > { %10977 = vst [vmem:[#allocation61_spill] sm:$0xff] %v9800_v36  ;;  %4321 = vst.msk [vmem:[#allocation2 + $0x1b8] sm:$0xff] %vm1097_vm4, %v9797_v7  ;;  %3788 = vperm.xlu1 %6540, %v9797_v7   ;;  %3783 = vperm.xlu0 %6539, %v9800_v36  }
 0x915   : > { %4320 = vst.msk [vmem:[#allocation2 + $0x1b0] sm:$0xff] %vm1097_vm4, %v9800_v36  ;;  %v3674_v26 = vpop.xlane.xlu1 %3673  ;;  %v3672_v59 = vpop.xlane.xlu0 %3671  ;;  %v9842_v36 = vld [vmem:[#allocation2 + $0x1e0] sm:$0xff] }
 0x916   : > { %v9817_v0 = vmax.f32 %v9802_v21, %v3674_v26  ;;  %v9820_v28 = vmax.f32 %v9804_v63, %v3672_v59  ;;  %10982 = vst [vmem:[#allocation67_spill] sm:$0xff] %v9842_v36 }
 0x918   : > { %10979 = vst [vmem:[#allocation64_spill] sm:$0xff] %v9820_v28  ;;  %4323 = vst.msk [vmem:[#allocation2 + $0x1c8] sm:$0xff] %vm1097_vm4, %v9817_v0  ;;  %3793 = vperm.xlu1 %6540, %v9820_v28   ;;  %3798 = vperm.xlu0 %6539, %v9817_v0  }
 0x919   : > { %4322 = vst.msk [vmem:[#allocation2 + $0x1c0] sm:$0xff] %vm1097_vm4, %v9820_v28  ;;  %v3676_v26 = vpop.xlane.xlu0 %3675  ;;  %v3678_v59 = vpop.xlane.xlu1 %3677 }
 0x91a   : > { %v9837_v44 = vmax.f32 %v9822_v51, %v3676_v26  ;;  %v9840_v49 = vmax.f32 %v9824_v29, %v3678_v59  ;;  %v9863_v51 = vld [vmem:[#allocation2 + $0x1f8] sm:$0xff] }
 0x91b   : > { %10985 = vst [vmem:[#allocation68_spill] sm:$0xff] %v9863_v51 }
 0x91c   : > { %10981 = vst [vmem:[#allocation65_spill] sm:$0xff] %v9837_v44  ;;  %4324 = vst.msk [vmem:[#allocation2 + $0x1d0] sm:$0xff] %vm1097_vm4, %v9837_v44  ;;  %3803 = vperm.xlu0 %6539, %v9837_v44  }
 0x91d   : > { %4325 = vst.msk [vmem:[#allocation2 + $0x1d8] sm:$0xff] %vm1097_vm4, %v9840_v49  ;;  %v3680_v26 = vpop.xlane.xlu0 %3679  ;;  %v3682_v59 = vpop.xlane.xlu1 %3681 }
 0x91e   : > { %v9856_v63 = vmax.f32 %v9842_v36, %v3680_v26  ;;  %v9859_v62 = vmax.f32 %v9844_v35, %v3682_v59 }
 0x920   : > { %10983 = vst [vmem:[#allocation70_spill] sm:$0xff] %v9856_v63  ;;  %4326 = vst.msk [vmem:[#allocation2 + $0x1e0] sm:$0xff] %vm1097_vm4, %v9856_v63  ;;  %3813 = vperm.xlu0 %6539, %v9856_v63   ;;  %v2034_v63 = vld [vmem:[#allocation4 + $0x98] sm:$0xff] }
 0x921   : > { %4327 = vst.msk [vmem:[#allocation2 + $0x1e8] sm:$0xff] %vm1097_vm4, %v9859_v62  ;;  %v3684_v26 = vpop.xlane.xlu0 %3683  ;;  %v3686_v59 = vpop.xlane.xlu1 %3685 }
 0x922   : > { %v9875_v15 = vmax.f32 %v9861_v18, %v3684_v26  ;;  %v9878_v24 = vmax.f32 %v9863_v51, %v3686_v59  ;;  %v10987_v59 = vld [vmem:[#allocation22_spill] sm:$0xff]  ;;  %v2037_v18 = vld [vmem:[#allocation4 + $0xb0] sm:$0xff]  ;;  %v10989_v51 = vld [vmem:[#allocation28_spill] sm:$0xff] }
 0x924   : > { %10986 = vst [vmem:[#allocation69_spill] sm:$0xff] %v9875_v15  ;;  %4328 = vst.msk [vmem:[#allocation2 + $0x1f0] sm:$0xff] %vm1097_vm4, %v9875_v15  ;;  %3823 = vperm.xlu0 %6539, %v9875_v15  }
 0x925   : > { %4329 = vst.msk [vmem:[#allocation2 + $0x1f8] sm:$0xff] %vm1097_vm4, %v9878_v24 }
 0x929   : > { %v2065_v26 = vpop.permute.xlu0 %2064 }
 0x92a   : > { %v2130_v36 = vmul.f32 %v2065_v26, %v2034_v63 }
 0x92c   : > { %v2355_v25 = vadd.f32 %v10987_v59, %v2130_v36 }
 0x92d   : > { %v2075_v6 = vpop.permute.xlu0 %2074 }
 0x92e   : > { %2371 = vst.msk [vmem:[#allocation4 + $0x98] sm:$0xff] %vm535_vm2, %v2355_v25  ;;  %v2132_v44 = vmul.f32 %v2075_v6, %v2036_v41  ;;  %v11006_v25 = vld [vmem:[#allocation102_spill] sm:$0xff] }
 0x930   : > { %v2357_v10 = vadd.f32 %v10988_v58, %v2132_v44 }
 0x931   : > { %v2080_v15 = vpop.permute.xlu0 %2079 }
 0x932   : > { %2373 = vst.msk [vmem:[#allocation4 + $0xa8] sm:$0xff] %vm535_vm2, %v2357_v10  ;;  %v2133_v28 = vmul.f32 %v2080_v15, %v2037_v18 }
 0x934   : > { %v2358_v16 = vadd.f32 %v10989_v51, %v2133_v28 }
 0x936   : > { %2374 = vst.msk [vmem:[#allocation4 + $0xb0] sm:$0xff] %vm535_vm2, %v2358_v16 }
 0x93c   : > { %2953 = vadd.xlane.f32.xlu1 %v9366_v42  ;;  %v10990_v42 = vld [vmem:[#allocation93_spill] sm:$0xff] }
 0x943   : > { %2955 = vadd.xlane.f32.xlu0 %v9372_v53  ;;  %v10991_v53 = vld [vmem:[#allocation94_spill] sm:$0xff] }
 0x947   : > { %2959 = vadd.xlane.f32.xlu0 %v9384_v43  ;;  %v10992_v43 = vsub.f32 %v10990_v42, %v10991_v53 }
 0x94b   : > { %2963 = vadd.xlane.f32.xlu0 %v9394_v4  ;;  %v2760_v4 = vmul.f32 1.442695, %v10992_v43 }
 0x94d   : > { %3808 = vperm.xlu1 %6540, %v9840_v49   ;;  %6947 = vpow2.f32 %v2760_v4 }
 0x94f   : > { %2967 = vadd.xlane.f32.xlu0 %v9405_v23  ;;  %v10993_v23 = vld [vmem:[#allocation79_spill] sm:$0xff] }
 0x951   : > { %3818 = vperm.xlu1 %6540, %v9859_v62  }
 0x953   : > { %2971 = vadd.xlane.f32.xlu0 %v9423_v39  ;;  %v10994_v39 = vld [vmem:[#allocation81_spill] sm:$0xff] }
 0x954   : > { %v10995_v16 = vsub.f32 %v10993_v23, %v10994_v39 }
 0x955   : > { %3828 = vperm.xlu1 %6540, %v9878_v24  }
 0x956   : > { %v2764_v10 = vmul.f32 1.442695, %v10995_v16 }
 0x957   : > { %2975 = vadd.xlane.f32.xlu0 %v9438_v57  ;;  %v10996_v57 = vld [vmem:[#allocation95_spill] sm:$0xff]  ;;  %v9926_v28 = vpop.eup %6947 }
 0x958   : > { %6949 = vpow2.f32 %v2764_v10 }
 0x962   : > { %v9934_v18 = vpop.eup %6949 }
 0x96d   : > { %2084 = vperm.xlu0 %6539, %v9546_v19   ;;  %v10997_v19 = vld [vmem:[#allocation96_spill] sm:$0xff] }
 0x971   : > { %2094 = vperm.xlu0 %6539, %v9560_v31   ;;  %v10998_v31 = vsub.f32 %v10996_v57, %v10997_v19 }
 0x975   : > { %2104 = vperm.xlu0 %6539, %v9568_v20   ;;  %v2768_v20 = vmul.f32 1.442695, %v10998_v31 }
 0x977   : > { %6951 = vpow2.f32 %v2768_v20 }
 0x979   : > { %2957 = vadd.xlane.f32.xlu1 %v9374_v45  ;;  %2114 = vperm.xlu0 %6539, %v9576_v32   ;;  %v10999_v45 = vld [vmem:[#allocation97_spill] sm:$0xff]  ;;  %v11000_v32 = vld [vmem:[#allocation98_spill] sm:$0xff] }
 0x97a   : > { %v11001_v63 = vsub.f32 %v10999_v45, %v11000_v32 }
 0x97c   : > { %v2772_v36 = vmul.f32 1.442695, %v11001_v63 }
 0x97d   : > { %2961 = vadd.xlane.f32.xlu1 %v9388_v50  ;;  %2124 = vperm.xlu0 %6539, %v9584_v48   ;;  %v11002_v50 = vld [vmem:[#allocation99_spill] sm:$0xff]  ;;  %v11003_v48 = vld [vmem:[#allocation100_spill] sm:$0xff] }
 0x97e   : > { %6953 = vpow2.f32 %v2772_v36  ;;  %v11004_v41 = vsub.f32 %v11002_v50, %v11003_v48 }
 0x980   : > { %v2776_v44 = vmul.f32 1.442695, %v11004_v41 }
 0x981   : > { %2965 = vadd.xlane.f32.xlu1 %v9398_v22  ;;  %3030 = vperm.xlu0 %6539, %v9665_v54   ;;  %v9942_v43 = vpop.eup %6951 }
 0x982   : > { %6955 = vpow2.f32 %v2776_v44 }
 0x985   : > { %2969 = vadd.xlane.f32.xlu1 %v9412_v1  ;;  %3045 = vperm.xlu0 %6539, %v9926_v28   ;;  %v11005_v1 = vld [vmem:[#allocation101_spill] sm:$0xff] }
 0x986   : > { %v3759_v51 = vpop.permute.xlu0 %3758  ;;  %v11007_v15 = vsub.f32 %v11005_v1, %v11006_v25 }
 0x987   : > { %v3832_v22 = vsub.f32 %v9681_v2, %v3759_v51  ;;  %v3754_v54 = vpop.permute.xlu1 %3753 }
 0x988   : > { %v3831_v58 = vsub.f32 %v9684_v37, %v3754_v54  ;;  %v2780_v26 = vmul.f32 1.442695, %v11007_v15  ;;  %v9951_v57 = vpop.eup %6953 }
 0x989   : > { %v3849_v6 = vmul.f32 1.442695, %v3832_v22  ;;  %2973 = vadd.xlane.f32.xlu1 %v9430_v17  ;;  %3055 = vperm.xlu0 %6539, %v9934_v18   ;;  %v11008_v17 = vsub.f32 %v9734_v33, %v9740_v9 }
 0x98a   : > { %v3847_v59 = vmul.f32 1.442695, %v3831_v58 }
 0x98b   : > { %v3769_v42 = vpop.permute.xlu1 %3768  ;;  %v3764_v53 = vpop.permute.xlu0 %3763  ;;  %v3719_v4 = vmul.f32 1.442695, %v11008_v17 }
 0x98c   : > { %6957 = vpow2.f32 %v3847_v59  ;;  %v3834_v2 = vsub.f32 %v9687_v5, %v3769_v42  ;;  %v3833_v37 = vsub.f32 %v9689_v52, %v3764_v53  ;;  %v9959_v45 = vpop.eup %6955  ;;  %v11014_v53 = vsub.f32 %v9844_v35, %v9859_v62  ;;  %v11019_v35 = vld [vmem:[#allocation86_spill] sm:$0xff] }
 0x98d   : > { %6959 = vpow2.f32 %v3849_v6  ;;  %2977 = vadd.xlane.f32.xlu1 %v9440_v8  ;;  %3065 = vperm.xlu0 %6539, %v9942_v43   ;;  %v11009_v8 = vsub.f32 %v9747_v46, %v9757_v14  ;;  %v11010_v14 = vsub.f32 %v9762_v38, %v9777_v47  ;;  %v11011_v38 = vsub.f32 %v9782_v55, %v9797_v7 }
 0x98e   : > { %6961 = vpow2.f32 %v2780_v26  ;;  %v3853_v23 = vmul.f32 1.442695, %v3834_v2  ;;  %v3851_v39 = vmul.f32 1.442695, %v3833_v37  ;;  %v11012_v55 = vsub.f32 %v9802_v21, %v9817_v0  ;;  %v11016_v2 = vld [vmem:[#allocation84_spill] sm:$0xff] }
 0x98f   : > { %v3774_v16 = vpop.permute.xlu1 %3773  ;;  %v3779_v10 = vpop.permute.xlu0 %3778  ;;  %v3725_v9 = vmul.f32 1.442695, %v11009_v8  ;;  %v3729_v46 = vmul.f32 1.442695, %v11010_v14  ;;  %v3733_v51 = vmul.f32 1.442695, %v11011_v38  ;;  %v11013_v0 = vsub.f32 %v9824_v29, %v9840_v49 }
 0x990   : > { %6963 = vpow2.f32 %v3853_v23  ;;  %v3835_v5 = vsub.f32 %v9695_v61, %v3774_v16  ;;  %v3836_v52 = vsub.f32 %v9693_v30, %v3779_v10  ;;  %v3737_v7 = vmul.f32 1.442695, %v11012_v55  ;;  %v11015_v29 = vld [vmem:[#allocation83_spill] sm:$0xff]  ;;  %v11021_v10 = vld [vmem:[#allocation12_spill] sm:$0xff] }
 0x991   : > { %6965 = vpow2.f32 %v3851_v39  ;;  %3075 = vperm.xlu0 %6539, %v9951_v57   ;;  %v3741_v21 = vmul.f32 1.442695, %v11013_v0  ;;  %v3745_v49 = vmul.f32 1.442695, %v11014_v53  ;;  %v11017_v37 = vsub.f32 %v11015_v29, %v11016_v2  ;;  %v11039_v0 = vld [vmem:[#allocation56_spill] sm:$0xff] }
 0x992   : > { %6967 = vpow2.f32 %v3719_v4  ;;  %v3855_v33 = vmul.f32 1.442695, %v3835_v5  ;;  %v3857_v19 = vmul.f32 1.442695, %v3836_v52  ;;  %v11022_v5 = vld [vmem:[#allocation87_spill] sm:$0xff]  ;;  %v11023_v52 = vld [vmem:[#allocation88_spill] sm:$0xff] }
 0x993   : > { %v3789_v31 = vpop.permute.xlu1 %3788  ;;  %v3784_v20 = vpop.permute.xlu0 %3783  ;;  %v2762_v17 = vmul.f32 1.442695, %v11017_v37  ;;  %v11024_v8 = vsub.f32 %v11022_v5, %v11023_v52  ;;  %v2918_v29 = vld [vmem:[#allocation3 + $0x118] sm:$0xff]  ;;  %v11041_v37 = vld [vmem:[#allocation58_spill] sm:$0xff]  ;;  %v11044_v52 = vld [vmem:[#allocation59_spill] sm:$0xff] }
 0x994   : > { %6969 = vpow2.f32 %v3855_v33  ;;  %v3838_v32 = vsub.f32 %v9699_v11, %v3789_v31  ;;  %v3837_v61 = vsub.f32 %v9701_v34, %v3784_v20  ;;  %v11027_v31 = vld [vmem:[#allocation90_spill] sm:$0xff] }
 0x995   : > { %6971 = vpow2.f32 %v3857_v19  ;;  %3085 = vperm.xlu0 %6539, %v9959_v45   ;;  %v11026_v19 = vld [vmem:[#allocation89_spill] sm:$0xff] }
 0x996   : > { %v9964_v30 = vpop.eup %6957  ;;  %6973 = vpow2.f32 %v3725_v9  ;;  %v3861_v63 = vmul.f32 1.442695, %v3838_v32  ;;  %v3859_v36 = vmul.f32 1.442695, %v3837_v61  ;;  %v2770_v9 = vmul.f32 1.442695, %v11024_v8 }
 0x997   : > { %v9969_v50 = vpop.eup %6959  ;;  %6129 = vmatprep.mubr.f32.mxu0 %v9964_v30  ;;  %v3794_v48 = vpop.permute.xlu1 %3793  ;;  %v11028_v20 = vsub.f32 %v11026_v19, %v11027_v31  ;;  %v11045_v8 = vld [vmem:[#allocation60_spill] sm:$0xff] }
 0x998   : > { %v3799_v11 = vpop.permute.xlu0 %3798  ;;  %v9972_v41 = vpop.eup %6961  ;;  %6975 = vpow2.f32 %v3861_v63  ;;  %v3839_v34 = vsub.f32 %v9707_v3, %v3794_v48  ;;  %6130 = vmatmul.mubr.f32.vlgmr.msra.gmra.mrb[48].mxu0 %v9969_v50  ;;  %v11030_v63 = vld [vmem:[#allocation92_spill] sm:$0xff] }
 0x999   : > { %v3840_v44 = vsub.f32 %v9705_v60, %v3799_v11  ;;  %6977 = vpow2.f32 %v3859_v36  ;;  %3095 = vperm.xlu0 %6539, %v9972_v41   ;;  %v2774_v32 = vmul.f32 1.442695, %v11028_v20  ;;  %v11047_v19 = vld [vmem:[#allocation52_spill] sm:$0xff] }
 0x99a   : > { %v9978_v47 = vpop.eup %6963  ;;  %6979 = vpow2.f32 %v3729_v46  ;;  %v3863_v22 = vmul.f32 1.442695, %v3839_v34  ;;  %v11029_v46 = vld [vmem:[#allocation91_spill] sm:$0xff]  ;;  %v11032_v34 = vld [vmem:[#allocation105_spill] sm:$0xff] }
 0x99b   : > { %v3865_v54 = vmul.f32 1.442695, %v3840_v44  ;;  %v9983_v58 = vpop.eup %6965  ;;  %v11031_v36 = vsub.f32 %v11029_v46, %v11030_v63  ;;  %v11033_v44 = vld [vmem:[#allocation106_spill] sm:$0xff]  ;;  %v11049_v63 = vld [vmem:[#allocation61_spill] sm:$0xff] }
 0x99c   : > { %v3804_v6 = vpop.permute.xlu0 %3803  ;;  %v9985_v3 = vpop.eup %6967  ;;  %6981 = vpow2.f32 %v3863_v22  ;;  %6132 = vmatprep.mubr.f32.mxu0 %v9983_v58  ;;  %v11034_v38 = vsub.f32 %v11032_v34, %v11033_v44  ;;  %v11051_v44 = vld [vmem:[#allocation49_spill] sm:$0xff] }
 0x99d   : > { %v3841_v60 = vsub.f32 %v9713_v12, %v3804_v6  ;;  %6983 = vpow2.f32 %v3865_v54  ;;  %6133 = vmatmul.mubr.f32.gmra.mrb[50].mxu0 %v9978_v47  ;;  %3995 = vperm.xlu0 %6539, %v9985_v3   ;;  %v2778_v48 = vmul.f32 1.442695, %v11031_v36  ;;  %v11035_v54 = vld [vmem:[#allocation103_spill] sm:$0xff]  ;;  %v11036_v6 = vld [vmem:[#allocation104_spill] sm:$0xff] }
 0x99e   : > { %v9991_v1 = vpop.eup %6969  ;;  %6985 = vpow2.f32 %v3733_v51  ;;  %2089 = vperm.xlu1 %6540, %v9556_v13   ;;  %v2782_v51 = vmul.f32 1.442695, %v11034_v38 }
 0x99f   : > { %v3867_v25 = vmul.f32 1.442695, %v3841_v60  ;;  %v9997_v15 = vpop.eup %6971  ;;  %6135 = vmatprep.mubr.f32.mxu0 %v9991_v1  ;;  %v11037_v60 = vsub.f32 %v11035_v54, %v11036_v6  ;;  %v11052_v54 = vld [vmem:[#allocation53_spill] sm:$0xff] }
 0x9a0   : > { %v10000_v12 = vpop.eup %6973  ;;  %v3814_v2 = vpop.permute.xlu0 %3813 }
 0x9a1   : > { %6987 = vpow2.f32 %v3867_v25  ;;  %6136 = vmatmul.mubr.f32.gmra.mrb[52].mxu0 %v9997_v15  ;;  %4010 = vperm.xlu0 %6539, %v10000_v12   ;;  %v2784_v55 = vmul.f32 1.442695, %v11037_v60  ;;  %v11038_v25 = vld [vmem:[#allocation55_spill] sm:$0xff]  ;;  %v3843_v31 = vsub.f32 %v11047_v19, %v3814_v2 }
 0x9a2   : > { %v10004_v26 = vpop.eup %6975  ;;  %6989 = vpow2.f32 %v3737_v7  ;;  %2099 = vperm.xlu1 %6540, %v9564_v56  }
 0x9a3   : > { %v10010_v13 = vpop.eup %6977  ;;  %6991 = vpow2.f32 %v3741_v21  ;;  %v11040_v21 = vsub.f32 %v11038_v25, %v11039_v0  ;;  %v2921_v0 = vld [vmem:[#allocation3 + $0x130] sm:$0xff] }
 0x9a4   : > { %v10012_v59 = vpop.eup %6979  ;;  %6138 = vmatprep.mubr.f32.mxu0 %v10010_v13  ;;  %6993 = vpow2.f32 %v3745_v49  ;;  %v3824_v20 = vpop.permute.xlu0 %3823 }
 0x9a5   : > { %6139 = vmatmul.mubr.f32.gmra.mrb[54].mxu0 %v10004_v26  ;;  %4020 = vperm.xlu0 %6539, %v10012_v59   ;;  %6995 = vpow2.f32 %v2762_v17  ;;  %v3721_v53 = vmul.f32 1.442695, %v11040_v21  ;;  %v11042_v17 = vld [vmem:[#allocation57_spill] sm:$0xff]  ;;  %v3845_v6 = vsub.f32 %v11052_v54, %v3824_v20  ;;  %v11061_v54 = vld [vmem:[#allocation67_spill] sm:$0xff] }
 0x9a6   : > { %v10017_v42 = vpop.eup %6981  ;;  %2109 = vperm.xlu1 %6540, %v9572_v27   ;;  %v11018_v27 = vld [vmem:[#allocation85_spill] sm:$0xff] }
 0x9a7   : > { %v10023_v56 = vpop.eup %6983  ;;  %6141 = vmatprep.mubr.f32.mxu0 %v10017_v42  ;;  %v11020_v62 = vsub.f32 %v11018_v27, %v11019_v35  ;;  %v11043_v27 = vsub.f32 %v11041_v37, %v11042_v17 }
 0x9a8   : > { %v10029_v4 = vpop.eup %6985 }
 0x9a9   : > { %6142 = vmatmul.mubr.f32.gmra.mrb[56].mxu0 %v10023_v56  ;;  %4030 = vperm.xlu0 %6539, %v10029_v4   ;;  %v2766_v39 = vmul.f32 1.442695, %v11020_v62  ;;  %v3723_v35 = vmul.f32 1.442695, %v11043_v27  ;;  %v2934_v62 = vmul.f32 %v9926_v28, %v2918_v29  ;;  %v11048_v28 = vld [vmem:[#allocation62_spill] sm:$0xff]  ;;  %v11054_v29 = vld [vmem:[#allocation64_spill] sm:$0xff] }
 0x9aa   : > { %2119 = vperm.xlu1 %6540, %v9580_v40   ;;  %v11025_v40 = vld [vmem:[#allocation17_spill] sm:$0xff]  ;;  %v11050_v36 = vsub.f32 %v11048_v28, %v11049_v63 }
 0x9ab   : > { %v10033_v23 = vpop.eup %6987  ;;  %6997 = vpow2.f32 %v2766_v39  ;;  %v11059_v28 = vld [vmem:[#allocation65_spill] sm:$0xff] }
 0x9ac   : > { %6144 = vmatprep.mubr.f32.mxu0 %v10033_v23  ;;  %v10040_v16 = vpop.eup %6989  ;;  %6999 = vpow2.f32 %v2770_v9  ;;  %v11046_v9 = vsub.f32 %v11044_v52, %v11045_v8  ;;  %v2923_v8 = vld [vmem:[#allocation3 + $0x140] sm:$0xff] }
 0x9ad   : > { %4040 = vperm.xlu0 %6539, %v10040_v16   ;;  %v10047_v33 = vpop.eup %6991  ;;  %7001 = vpow2.f32 %v2774_v32  ;;  %v2919_v32 = vld [vmem:[#allocation3 + $0x120] sm:$0xff] }
 0x9ae   : > { %3035 = vperm.xlu1 %6540, %v11021_v10   ;;  %v10054_v61 = vpop.eup %6993  ;;  %7003 = vpow2.f32 %v2778_v48  ;;  %v3731_v48 = vmul.f32 1.442695, %v11050_v36 }
 0x9af   : > { %v6996_v14 = vpop.eup %6995  ;;  %7005 = vpow2.f32 %v2782_v51  ;;  %v3871_v51 = vmul.f32 1.442695, %v3843_v31  ;;  %v11057_v31 = vld [vmem:[#allocation54_spill] sm:$0xff] }
 0x9b0   : > { %7007 = vpow2.f32 %v2784_v55  ;;  %v2935_v60 = vmul.f32 %v6996_v14, %v2919_v32  ;;  %v11058_v32 = vld [vmem:[#allocation66_spill] sm:$0xff] }
 0x9b1   : > { %4050 = vperm.xlu0 %6539, %v10047_v33   ;;  %7009 = vpow2.f32 %v3721_v53  ;;  %v11053_v53 = vld [vmem:[#allocation63_spill] sm:$0xff]  ;;  %v11060_v63 = vsub.f32 %v11058_v32, %v11059_v28  ;;  %v2042_v32 = vld [vmem:[#allocation4 + $0xd8] sm:$0xff]  ;;  %v11065_v28 = vld [vmem:[#allocation30_spill] sm:$0xff] }
 0x9b2   : > { %3040 = vperm.xlu1 %6540, %v11025_v40   ;;  %7011 = vpow2.f32 %v3723_v35  ;;  %v3727_v40 = vmul.f32 1.442695, %v11046_v9  ;;  %v11055_v2 = vsub.f32 %v11053_v53, %v11054_v29  ;;  %v11056_v35 = vld [vmem:[#allocation51_spill] sm:$0xff] }
 0x9b3   : > { %v3739_v36 = vmul.f32 1.442695, %v11060_v63 }
 0x9b4   : > { %7013 = vpow2.f32 %v3727_v40  ;;  %v3735_v37 = vmul.f32 1.442695, %v11055_v2 }
 0x9b5   : > { %4060 = vperm.xlu0 %6539, %v10054_v61   ;;  %v6998_v11 = vpop.eup %6997  ;;  %7015 = vpow2.f32 %v3731_v48 }
 0x9b6   : > { %3050 = vperm.xlu1 %6540, %v6996_v14   ;;  %v10063_v22 = vpop.eup %6999  ;;  %v2937_v14 = vmul.f32 %v6998_v11, %v2921_v0  ;;  %v2927_v0 = vld [vmem:[#allocation3 + $0x160] sm:$0xff] }
 0x9b7   : > { %v10069_v7 = vpop.eup %7001 }
 0x9b8   : > { %v10075_v49 = vpop.eup %7003 }
 0x9b9   : > { %v10082_v39 = vpop.eup %7005 }
 0x9ba   : > { %3060 = vperm.xlu1 %6540, %v6998_v11   ;;  %v10090_v46 = vpop.eup %7007 }
 0x9bb   : > { %v10098_v21 = vpop.eup %7009 }
 0x9bc   : > { %v10107_v9 = vpop.eup %7011 }
 0x9be   : > { %3070 = vperm.xlu1 %6540, %v10063_v22  }
 0x9c2   : > { %3080 = vperm.xlu1 %6540, %v10069_v7  }
 0x9c6   : > { %3090 = vperm.xlu1 %6540, %v10075_v49  }
 0x9c9   : > { %v2954_v10 = vpop.xlane.xlu1 %2953 }
 0x9ca   : > { %v2982_v5 = vadd.f32 %v2954_v10, %v2934_v62  ;;  %3100 = vperm.xlu1 %6540, %v10082_v39   ;;  %v3875_v10 = vmul.f32 1.442695, %v3845_v6  ;;  %v11062_v6 = vld [vmem:[#allocation70_spill] sm:$0xff] }
 0x9cc   : > { %2998 = vst.msk [vmem:[#allocation3 + $0x118] sm:$0xff] %vm1097_vm4, %v2982_v5 }
 0x9cd   : > { %v3809_v34 = vpop.permute.xlu1 %3808 }
 0x9ce   : > { %v3842_v38 = vsub.f32 %v11051_v44, %v3809_v34  ;;  %3105 = vperm.xlu1 %6540, %v10090_v46   ;;  %v2925_v34 = vld [vmem:[#allocation3 + $0x150] sm:$0xff]  ;;  %v10117_v44 = vpop.eup %7013 }
 0x9d0   : > { %v3869_v55 = vmul.f32 1.442695, %v3842_v38  ;;  %v2956_v25 = vpop.xlane.xlu0 %2955 }
 0x9d1   : > { %v2983_v17 = vadd.f32 %v2956_v25, %v2935_v60  ;;  %v3819_v27 = vpop.permute.xlu1 %3818  ;;  %v11063_v60 = vsub.f32 %v11061_v54, %v11062_v6  ;;  %v2046_v54 = vld [vmem:[#allocation4 + $0xf8] sm:$0xff] }
 0x9d2   : > { %7017 = vpow2.f32 %v3869_v55  ;;  %v3844_v62 = vsub.f32 %v11056_v35, %v3819_v27  ;;  %4000 = vperm.xlu1 %6540, %v10098_v21   ;;  %v11067_v6 = vld [vmem:[#allocation68_spill] sm:$0xff] }
 0x9d3   : > { %7019 = vpow2.f32 %v3871_v51  ;;  %2999 = vst.msk [vmem:[#allocation3 + $0x120] sm:$0xff] %vm1097_vm4, %v2983_v17  ;;  %v10120_v51 = vpop.eup %7015  ;;  %v3743_v55 = vmul.f32 1.442695, %v11063_v60  ;;  %v2929_v17 = vld [vmem:[#allocation3 + $0x170] sm:$0xff]  ;;  %v11068_v60 = vsub.f32 %v11067_v6, %v9878_v24 }
 0x9d4   : > { %v3873_v5 = vmul.f32 1.442695, %v3844_v62  ;;  %3912 = vadd.xlane.f32.xlu0 %v9964_v30  ;;  %v2960_v52 = vpop.xlane.xlu0 %2959  ;;  %7021 = vpow2.f32 %v3735_v37  ;;  %v2939_v30 = vmul.f32 %v10063_v22, %v2923_v8  ;;  %v2941_v22 = vmul.f32 %v10069_v7, %v2925_v34 }
 0x9d5   : > { %v2985_v40 = vadd.f32 %v2960_v52, %v2937_v14  ;;  %v3829_v19 = vpop.permute.xlu1 %3828  ;;  %v2943_v7 = vmul.f32 %v10075_v49, %v2927_v0  ;;  %v2945_v62 = vmul.f32 %v10082_v39, %v2929_v17  ;;  %v2038_v52 = vld [vmem:[#allocation4 + $0xb8] sm:$0xff] }
 0x9d6   : > { %7023 = vpow2.f32 %v3873_v5  ;;  %v3846_v20 = vsub.f32 %v11057_v31, %v3829_v19  ;;  %4005 = vperm.xlu1 %6540, %v10107_v9  }
 0x9d7   : > { %7025 = vpow2.f32 %v3875_v10  ;;  %3001 = vst.msk [vmem:[#allocation3 + $0x130] sm:$0xff] %vm1097_vm4, %v2985_v40  ;;  %v11064_v40 = vld [vmem:[#allocation27_spill] sm:$0xff] }
 0x9d8   : > { %v3877_v11 = vmul.f32 1.442695, %v3846_v20  ;;  %3918 = vadd.xlane.f32.xlu0 %v9978_v47  ;;  %v2964_v48 = vpop.xlane.xlu0 %2963 }
 0x9d9   : > { %v2987_v38 = vadd.f32 %v2964_v48, %v2939_v30  ;;  %v2044_v30 = vld [vmem:[#allocation4 + $0xe8] sm:$0xff] }
 0x9da   : > { %7027 = vpow2.f32 %v3877_v11  ;;  %4015 = vperm.xlu1 %6540, %v10117_v44   ;;  %v11066_v11 = vld [vmem:[#allocation31_spill] sm:$0xff] }
 0x9db   : > { %7029 = vpow2.f32 %v3739_v36  ;;  %3003 = vst.msk [vmem:[#allocation3 + $0x140] sm:$0xff] %vm1097_vm4, %v2987_v38 }
 0x9dc   : > { %v7018_v47 = vpop.eup %7017  ;;  %3916 = vadd.xlane.f32.xlu0 %v9983_v58  ;;  %v2968_v25 = vpop.xlane.xlu0 %2967  ;;  %7031 = vpow2.f32 %v3743_v55  ;;  %v3749_v55 = vmul.f32 1.442695, %v11068_v60  ;;  %v2926_v60 = vld [vmem:[#allocation3 + $0x158] sm:$0xff] }
 0x9dd   : > { %v10128_v53 = vpop.eup %7019  ;;  %v2989_v29 = vadd.f32 %v2968_v25, %v2941_v22  ;;  %6145 = vmatmul.mubr.f32.gmra.mrb[58].mxu0 %v7018_v47  ;;  %v11069_v22 = vld [vmem:[#allocation33_spill] sm:$0xff] }
 0x9de   : > { %4025 = vperm.xlu1 %6540, %v10120_v51   ;;  %6147 = vmatprep.mubr.f32.mxu0 %v10128_v53  ;;  %v10132_v2 = vpop.eup %7021  ;;  %7033 = vpow2.f32 %v3749_v55  ;;  %v11074_v55 = vld [vmem:[#allocation13_spill] sm:$0xff] }
 0x9df   : > { %3005 = vst.msk [vmem:[#allocation3 + $0x150] sm:$0xff] %vm1097_vm4, %v2989_v29  ;;  %v3012_v29 = vld [vmem:[#allocation4 + $0x100] sm:$0xff] }
 0x9e0   : > { %v7024_v37 = vpop.eup %7023  ;;  %3922 = vadd.xlane.f32.xlu0 %v9997_v15  ;;  %v2972_v58 = vpop.xlane.xlu0 %2971 }
 0x9e1   : > { %v10137_v27 = vpop.eup %7025  ;;  %v2991_v35 = vadd.f32 %v2972_v58, %v2943_v7  ;;  %6148 = vmatmul.mubr.f32.gmra.mrb[60].mxu0 %v7024_v37  ;;  %v11070_v7 = vld [vmem:[#allocation35_spill] sm:$0xff] }
 0x9e2   : > { %4035 = vperm.xlu1 %6540, %v10132_v2   ;;  %6150 = vmatprep.mubr.f32.mxu0 %v10137_v27 }
 0x9e3   : > { %3007 = vst.msk [vmem:[#allocation3 + $0x160] sm:$0xff] %vm1097_vm4, %v2991_v35  ;;  %v3015_v35 = vld [vmem:[#allocation4 + $0x118] sm:$0xff] }
 0x9e4   : > { %v7028_v10 = vpop.eup %7027  ;;  %3926 = vadd.xlane.f32.xlu0 %v10004_v26  ;;  %v2976_v49 = vpop.xlane.xlu0 %2975  ;;  %v2040_v26 = vld [vmem:[#allocation4 + $0xc8] sm:$0xff] }
 0x9e5   : > { %v10144_v14 = vpop.eup %7029  ;;  %v2993_v15 = vadd.f32 %v2976_v49, %v2945_v62  ;;  %6151 = vmatmul.mubr.f32.gmra.mrb[62].mxu0 %v7028_v10  ;;  %v2920_v62 = vld [vmem:[#allocation3 + $0x128] sm:$0xff] }
 0x9e6   : > { %4045 = vperm.xlu1 %6540, %v10144_v14   ;;  %v10149_v5 = vpop.eup %7031 }
 0x9e7   : > { %3009 = vst.msk [vmem:[#allocation3 + $0x170] sm:$0xff] %vm1097_vm4, %v2993_v15 }
 0x9e8   : > { %3930 = vadd.xlane.f32.xlu0 %v10023_v56 }
 0x9ea   : > { %4055 = vperm.xlu1 %6540, %v10149_v5  }
 0x9ec   : > { %3934 = vadd.xlane.f32.xlu0 %v7018_v47  ;;  %v2085_v39 = vpop.permute.xlu0 %2084 }
 0x9ed   : > { %v2134_v8 = vmul.f32 %v2085_v39, %v2038_v52  ;;  %v2936_v52 = vmul.f32 %v9934_v18, %v2920_v62  ;;  %v3019_v18 = vld [vmem:[#allocation4 + $0x138] sm:$0xff] }
 0x9ef   : > { %v2359_v19 = vadd.f32 %v11064_v40, %v2134_v8  ;;  %v3017_v8 = vld [vmem:[#allocation4 + $0x128] sm:$0xff] }
 0x9f0   : > { %3938 = vadd.xlane.f32.xlu0 %v7024_v37  ;;  %v2095_v31 = vpop.permute.xlu0 %2094  ;;  %v11072_v40 = vld [vmem:[#allocation10_spill] sm:$0xff] }
 0x9f1   : > { %2375 = vst.msk [vmem:[#allocation4 + $0xb8] sm:$0xff] %vm535_vm2, %v2359_v19  ;;  %v2136_v20 = vmul.f32 %v2095_v31, %v2040_v26  ;;  %v2922_v26 = vld [vmem:[#allocation3 + $0x138] sm:$0xff] }
 0x9f3   : > { %v2361_v63 = vadd.f32 %v11065_v28, %v2136_v20 }
 0x9f4   : > { %3942 = vadd.xlane.f32.xlu0 %v7028_v10  ;;  %v2105_v56 = vpop.permute.xlu0 %2104  ;;  %v11071_v10 = vld [vmem:[#allocation9_spill] sm:$0xff] }
 0x9f5   : > { %2377 = vst.msk [vmem:[#allocation4 + $0xc8] sm:$0xff] %vm535_vm2, %v2361_v63  ;;  %v2138_v36 = vmul.f32 %v2105_v56, %v2042_v32  ;;  %v10169_v32 = vpop.eup %7033  ;;  %v2938_v63 = vmul.f32 %v9942_v43, %v2922_v26  ;;  %v3021_v43 = vld [vmem:[#allocation4 + $0x148] sm:$0xff] }
 0x9f7   : > { %v2363_v48 = vadd.f32 %v11066_v11, %v2138_v36  ;;  %v2924_v36 = vld [vmem:[#allocation3 + $0x148] sm:$0xff] }
 0x9f8   : > { %v2115_v34 = vpop.permute.xlu0 %2114 }
 0x9f9   : > { %2379 = vst.msk [vmem:[#allocation4 + $0xd8] sm:$0xff] %vm535_vm2, %v2363_v48  ;;  %v2140_v38 = vmul.f32 %v2115_v34, %v2044_v30  ;;  %v11073_v30 = vld [vmem:[#allocation48_spill] sm:$0xff] }
 0x9fb   : > { %v2365_v47 = vadd.f32 %v11069_v22, %v2140_v38 }
 0x9fc   : > { %v2125_v25 = vpop.permute.xlu0 %2124 }
 0x9fd   : > { %2381 = vst.msk [vmem:[#allocation4 + $0xe8] sm:$0xff] %vm535_vm2, %v2365_v47  ;;  %v2142_v0 = vmul.f32 %v2125_v25, %v2046_v54  ;;  %v2940_v54 = vmul.f32 %v9951_v57, %v2924_v36  ;;  %v3023_v57 = vld [vmem:[#allocation4 + $0x158] sm:$0xff] }
 0x9ff   : > { %v2367_v37 = vadd.f32 %v11070_v7, %v2142_v0 }
 0xa00   : > { %v3031_v58 = vpop.permute.xlu0 %3030 }
 0xa01   : > { %2383 = vst.msk [vmem:[#allocation4 + $0xf8] sm:$0xff] %vm535_vm2, %v2367_v37  ;;  %v3108_v17 = vmul.f32 %v3031_v58, %v3012_v29  ;;  %v2942_v29 = vmul.f32 %v9959_v45, %v2926_v60  ;;  %v2928_v37 = vld [vmem:[#allocation3 + $0x168] sm:$0xff] }
 0xa02   : > { %v11075_v58 = vld [vmem:[#allocation18_spill] sm:$0xff] }
 0xa03   : > { %v3317_v49 = vadd.f32 %v11071_v10, %v3108_v17  ;;  %v2944_v10 = vmul.f32 %v9972_v41, %v2928_v37  ;;  %v3025_v45 = vld [vmem:[#allocation4 + $0x168] sm:$0xff]  ;;  %v11077_v41 = vld [vmem:[#allocation80_spill] sm:$0xff] }
 0xa04   : > { %v3046_v24 = vpop.permute.xlu0 %3045  ;;  %v11083_v60 = vld [vmem:[#allocation34_spill] sm:$0xff] }
 0xa05   : > { %3333 = vst.msk [vmem:[#allocation4 + $0x100] sm:$0xff] %vm535_vm2, %v3317_v49  ;;  %v3111_v15 = vmul.f32 %v3046_v24, %v3015_v35  ;;  %v2930_v24 = vld [vmem:[#allocation3 + $0x178] sm:$0xff] }
 0xa06   : > { %v2958_v39 = vpop.xlane.xlu1 %2957  ;;  %v2946_v26 = vmul.f32 %v10090_v46, %v2930_v24  ;;  %v2043_v46 = vld [vmem:[#allocation4 + $0xe0] sm:$0xff]  ;;  %v3018_v24 = vld [vmem:[#allocation4 + $0x130] sm:$0xff] }
 0xa07   : > { %v3320_v19 = vadd.f32 %v11072_v40, %v3111_v15  ;;  %v2984_v31 = vadd.f32 %v2958_v39, %v2936_v52  ;;  %v11076_v15 = vld [vmem:[#allocation75_spill] sm:$0xff] }
 0xa08   : > { %v3056_v20 = vpop.permute.xlu0 %3055 }
 0xa09   : > { %3336 = vst.msk [vmem:[#allocation4 + $0x118] sm:$0xff] %vm535_vm2, %v3320_v19  ;;  %v3113_v28 = vmul.f32 %v3056_v20, %v3017_v8 }
 0xa0a   : > { %3000 = vst.msk [vmem:[#allocation3 + $0x128] sm:$0xff] %vm1097_vm4, %v2984_v31  ;;  %v2962_v56 = vpop.xlane.xlu1 %2961  ;;  %4070 = vperm.xlu0 %6539, %v10169_v32  }
 0xa0b   : > { %v3322_v11 = vadd.f32 %v11073_v30, %v3113_v28  ;;  %v2986_v48 = vadd.f32 %v2962_v56, %v2938_v63  ;;  %v2041_v63 = vld [vmem:[#allocation4 + $0xd0] sm:$0xff]  ;;  %v11078_v56 = vld [vmem:[#allocation29_spill] sm:$0xff]  ;;  %v11079_v30 = vld [vmem:[#allocation32_spill] sm:$0xff] }
 0xa0c   : > { %v3066_v34 = vpop.permute.xlu0 %3065 }
 0xa0d   : > { %3338 = vst.msk [vmem:[#allocation4 + $0x128] sm:$0xff] %vm535_vm2, %v3322_v11  ;;  %v3115_v38 = vmul.f32 %v3066_v34, %v3019_v18 }
 0xa0e   : > { %3002 = vst.msk [vmem:[#allocation3 + $0x138] sm:$0xff] %vm1097_vm4, %v2986_v48  ;;  %v2966_v6 = vpop.xlane.xlu1 %2965  ;;  %3914 = vadd.xlane.f32.xlu1 %v9969_v50 }
 0xa0f   : > { %v3324_v22 = vadd.f32 %v11074_v55, %v3115_v38  ;;  %v2988_v47 = vadd.f32 %v2966_v6, %v2940_v54  ;;  %v11081_v38 = vld [vmem:[#allocation69_spill] sm:$0xff] }
 0xa10   : > { %v3076_v25 = vpop.permute.xlu0 %3075 }
 0xa11   : > { %3340 = vst.msk [vmem:[#allocation4 + $0x138] sm:$0xff] %vm535_vm2, %v3324_v22  ;;  %v3117_v0 = vmul.f32 %v3076_v25, %v3021_v43  ;;  %v2045_v43 = vld [vmem:[#allocation4 + $0xf0] sm:$0xff]  ;;  %v11084_v25 = vld [vmem:[#allocation5_spill] sm:$0xff] }
 0xa12   : > { %3004 = vst.msk [vmem:[#allocation3 + $0x148] sm:$0xff] %vm1097_vm4, %v2988_v47  ;;  %v2970_v7 = vpop.xlane.xlu1 %2969  ;;  %3920 = vadd.xlane.f32.xlu1 %v9991_v1  ;;  %v3013_v47 = vld [vmem:[#allocation4 + $0x108] sm:$0xff] }
 0xa13   : > { %v3326_v50 = vadd.f32 %v11075_v58, %v3117_v0  ;;  %v2990_v17 = vadd.f32 %v2970_v7, %v2942_v29  ;;  %v3014_v7 = vld [vmem:[#allocation4 + $0x110] sm:$0xff] }
 0xa14   : > { %v3086_v35 = vpop.permute.xlu0 %3085 }
 0xa15   : > { %3342 = vst.msk [vmem:[#allocation4 + $0x148] sm:$0xff] %vm535_vm2, %v3326_v50  ;;  %v3119_v62 = vmul.f32 %v3086_v35, %v3023_v57  ;;  %v11085_v57 = vld [vmem:[#allocation11_spill] sm:$0xff]  ;;  %v11086_v35 = vld [vmem:[#allocation21_spill] sm:$0xff] }
 0xa16   : > { %3006 = vst.msk [vmem:[#allocation3 + $0x158] sm:$0xff] %vm1097_vm4, %v2990_v17  ;;  %v2974_v49 = vpop.xlane.xlu1 %2973  ;;  %3924 = vadd.xlane.f32.xlu1 %v10010_v13  ;;  %v2039_v13 = vld [vmem:[#allocation4 + $0xc0] sm:$0xff] }
 0xa17   : > { %v3328_v1 = vadd.f32 %v11076_v15, %v3119_v62  ;;  %v2992_v52 = vadd.f32 %v2974_v49, %v2944_v10  ;;  %v3016_v17 = vld [vmem:[#allocation4 + $0x120] sm:$0xff] }
 0xa18   : > { %v3096_v39 = vpop.permute.xlu0 %3095 }
 0xa19   : > { %3344 = vst.msk [vmem:[#allocation4 + $0x158] sm:$0xff] %vm535_vm2, %v3328_v1  ;;  %v3121_v8 = vmul.f32 %v3096_v39, %v3025_v45  ;;  %v11087_v1 = vld [vmem:[#allocation50_spill] sm:$0xff] }
 0xa1a   : > { %3008 = vst.msk [vmem:[#allocation3 + $0x168] sm:$0xff] %vm1097_vm4, %v2992_v52  ;;  %v2978_v40 = vpop.xlane.xlu1 %2977  ;;  %3928 = vadd.xlane.f32.xlu1 %v10017_v42 }
 0xa1b   : > { %v3330_v19 = vadd.f32 %v11077_v41, %v3121_v8  ;;  %v2994_v31 = vadd.f32 %v2978_v40, %v2946_v26  ;;  %v3020_v26 = vld [vmem:[#allocation4 + $0x140] sm:$0xff]  ;;  %v11088_v40 = vld [vmem:[#allocation14_spill] sm:$0xff] }
 0xa1c   : > { %v3996_v15 = vpop.permute.xlu0 %3995 }
 0xa1d   : > { %3346 = vst.msk [vmem:[#allocation4 + $0x168] sm:$0xff] %vm535_vm2, %v3330_v19 }
 0xa1e   : > { %3010 = vst.msk [vmem:[#allocation3 + $0x178] sm:$0xff] %vm1097_vm4, %v2994_v31  ;;  %v2090_v20 = vpop.permute.xlu1 %2089  ;;  %3932 = vadd.xlane.f32.xlu1 %v10033_v23  ;;  %v11080_v23 = vld [vmem:[#allocation71_spill] sm:$0xff] }
 0xa1f   : > { %v2135_v28 = vmul.f32 %v2090_v20, %v2039_v13  ;;  %v11082_v54 = vsub.f32 %v11080_v23, %v11081_v38  ;;  %v3022_v20 = vld [vmem:[#allocation4 + $0x150] sm:$0xff]  ;;  %v11091_v23 = vld [vmem:[#allocation82_spill] sm:$0xff] }
 0xa20   : > { %v10222_v31 = vpop.permute.xlu0 %4010 }
 0xa21   : > { %v2360_v18 = vadd.f32 %v11078_v56, %v2135_v28  ;;  %v3747_v6 = vmul.f32 1.442695, %v11082_v54  ;;  %v11089_v28 = vld [vmem:[#allocation6_spill] sm:$0xff] }
 0xa22   : > { %v2100_v36 = vpop.permute.xlu1 %2099  ;;  %3936 = vadd.xlane.f32.xlu1 %v10128_v53 }
 0xa23   : > { %2376 = vst.msk [vmem:[#allocation4 + $0xc0] sm:$0xff] %vm535_vm2, %v2360_v18  ;;  %v2137_v42 = vmul.f32 %v2100_v36, %v2041_v63  ;;  %7035 = vpow2.f32 %v3747_v6  ;;  %v3024_v36 = vld [vmem:[#allocation4 + $0x160] sm:$0xff] }
 0xa25   : > { %v2362_v11 = vadd.f32 %v11079_v30, %v2137_v42  ;;  %v10227_v42 = vpop.permute.xlu0 %4020 }
 0xa26   : > { %v2110_v48 = vpop.permute.xlu1 %2109  ;;  %3940 = vadd.xlane.f32.xlu1 %v10137_v27 }
 0xa27   : > { %2378 = vst.msk [vmem:[#allocation4 + $0xd0] sm:$0xff] %vm535_vm2, %v2362_v11  ;;  %v2139_v34 = vmul.f32 %v2110_v48, %v2043_v46  ;;  %v11090_v46 = vld [vmem:[#allocation19_spill] sm:$0xff] }
 0xa29   : > { %v2364_v55 = vadd.f32 %v11083_v60, %v2139_v34  ;;  %v3026_v34 = vld [vmem:[#allocation4 + $0x170] sm:$0xff]  ;;  %v10232_v6 = vpop.permute.xlu0 %4030  ;;  %v3027_v60 = vld [vmem:[#allocation4 + $0x178] sm:$0xff] }
 0xa2a   : > { %v2120_v53 = vpop.permute.xlu1 %2119 }
 0xa2b   : > { %2380 = vst.msk [vmem:[#allocation4 + $0xe0] sm:$0xff] %vm535_vm2, %v2364_v55  ;;  %v2141_v22 = vmul.f32 %v2120_v53, %v2045_v43  ;;  %v11092_v55 = vld [vmem:[#allocation23_spill] sm:$0xff] }
 0xa2d   : > { %v2366_v0 = vadd.f32 %v11084_v25, %v2141_v22  ;;  %v10215_v10 = vpop.eup %7035  ;;  %v10237_v25 = vpop.permute.xlu0 %4040 }
 0xa2e   : > { %v3036_v29 = vpop.permute.xlu1 %3035 }
 0xa2f   : > { %2382 = vst.msk [vmem:[#allocation4 + $0xf0] sm:$0xff] %vm535_vm2, %v2366_v0  ;;  %v3109_v27 = vmul.f32 %v3036_v29, %v3013_v47  ;;  %v11093_v0 = vld [vmem:[#allocation16_spill] sm:$0xff] }
 0xa31   : > { %v3318_v37 = vadd.f32 %v11085_v57, %v3109_v27  ;;  %v10241_v27 = vpop.permute.xlu0 %4050  ;;  %v3880_v57 = vld [vmem:[#allocation3 + $0x180] sm:$0xff] }
 0xa32   : > { %v3041_v58 = vpop.permute.xlu1 %3040 }
 0xa33   : > { %3334 = vst.msk [vmem:[#allocation4 + $0x108] sm:$0xff] %vm535_vm2, %v3318_v37  ;;  %v3110_v50 = vmul.f32 %v3041_v58, %v3014_v7  ;;  %v3896_v58 = vmul.f32 %v9985_v3, %v3880_v57  ;;  %v3983_v57 = vld [vmem:[#allocation4 + $0x1b0] sm:$0xff] }
 0xa35   : > { %v3319_v62 = vadd.f32 %v11086_v35, %v3110_v50  ;;  %v10243_v7 = vpop.permute.xlu0 %4060 }
 0xa36   : > { %v3051_v49 = vpop.permute.xlu1 %3050 }
 0xa37   : > { %3335 = vst.msk [vmem:[#allocation4 + $0x110] sm:$0xff] %vm535_vm2, %v3319_v62  ;;  %v3112_v45 = vmul.f32 %v3051_v49, %v3016_v17  ;;  %4065 = vperm.xlu1 %6540, %v10215_v10   ;;  %v3883_v17 = vld [vmem:[#allocation3 + $0x198] sm:$0xff] }
 0xa38   : > { %v3899_v62 = vmul.f32 %v10000_v12, %v3883_v17  ;;  %v3891_v17 = vld [vmem:[#allocation3 + $0x1d8] sm:$0xff] }
 0xa39   : > { %v3321_v52 = vadd.f32 %v11087_v1, %v3112_v45  ;;  %v3882_v45 = vld [vmem:[#allocation3 + $0x190] sm:$0xff] }
 0xa3a   : > { %v3061_v39 = vpop.permute.xlu1 %3060 }
 0xa3b   : > { %3337 = vst.msk [vmem:[#allocation4 + $0x120] sm:$0xff] %vm535_vm2, %v3321_v52  ;;  %v3114_v8 = vmul.f32 %v3061_v39, %v3018_v24  ;;  %v3978_v52 = vld [vmem:[#allocation4 + $0x188] sm:$0xff]  ;;  %v3977_v39 = vld [vmem:[#allocation4 + $0x180] sm:$0xff] }
 0xa3d   : > { %v3323_v41 = vadd.f32 %v11088_v40, %v3114_v8  ;;  %v3898_v8 = vmul.f32 %v10107_v9, %v3882_v45  ;;  %v3885_v40 = vld [vmem:[#allocation3 + $0x1a8] sm:$0xff] }
 0xa3e   : > { %v3071_v19 = vpop.permute.xlu1 %3070 }
 0xa3f   : > { %3339 = vst.msk [vmem:[#allocation4 + $0x130] sm:$0xff] %vm535_vm2, %v3323_v41  ;;  %v3116_v13 = vmul.f32 %v3071_v19, %v3020_v26  ;;  %v4073_v19 = vmul.f32 %v3996_v15, %v3977_v39  ;;  %v3982_v15 = vld [vmem:[#allocation4 + $0x1a8] sm:$0xff] }
 0xa41   : > { %v3325_v63 = vadd.f32 %v11089_v28, %v3116_v13 }
 0xa42   : > { %v3081_v56 = vpop.permute.xlu1 %3080 }
 0xa43   : > { %3341 = vst.msk [vmem:[#allocation4 + $0x140] sm:$0xff] %vm535_vm2, %v3325_v63  ;;  %v3118_v18 = vmul.f32 %v3081_v56, %v3022_v20  ;;  %v3980_v20 = vld [vmem:[#allocation4 + $0x198] sm:$0xff]  ;;  %v3901_v56 = vmul.f32 %v10012_v59, %v3885_v40  ;;  %v3893_v40 = vld [vmem:[#allocation3 + $0x1e8] sm:$0xff] }
 0xa45   : > { %v3327_v30 = vadd.f32 %v11090_v46, %v3118_v18  ;;  %v3979_v18 = vld [vmem:[#allocation4 + $0x190] sm:$0xff] }
 0xa46   : > { %v3091_v11 = vpop.permute.xlu1 %3090 }
 0xa47   : > { %3343 = vst.msk [vmem:[#allocation4 + $0x150] sm:$0xff] %vm535_vm2, %v3327_v30  ;;  %v3120_v48 = vmul.f32 %v3091_v11, %v3024_v36  ;;  %v3887_v30 = vld [vmem:[#allocation3 + $0x1b8] sm:$0xff]  ;;  %v4076_v11 = vmul.f32 %v10222_v31, %v3980_v20  ;;  %v3909_v20 = vmul.f32 %v10054_v61, %v3893_v40 }
 0xa48   : > { %v3984_v31 = vld [vmem:[#allocation4 + $0x1b8] sm:$0xff] }
 0xa49   : > { %v3329_v38 = vadd.f32 %v11091_v23, %v3120_v48  ;;  %v3903_v23 = vmul.f32 %v10029_v4, %v3887_v30 }
 0xa4a   : > { %v3101_v54 = vpop.permute.xlu1 %3100 }
 0xa4b   : > { %3345 = vst.msk [vmem:[#allocation4 + $0x160] sm:$0xff] %vm535_vm2, %v3329_v38  ;;  %v3122_v43 = vmul.f32 %v3101_v54, %v3026_v34  ;;  %v3981_v38 = vld [vmem:[#allocation4 + $0x1a0] sm:$0xff] }
 0xa4d   : > { %v3331_v53 = vadd.f32 %v11092_v55, %v3122_v43 }
 0xa4e   : > { %v3106_v22 = vpop.permute.xlu1 %3105 }
 0xa4f   : > { %3347 = vst.msk [vmem:[#allocation4 + $0x170] sm:$0xff] %vm535_vm2, %v3331_v53  ;;  %v3123_v47 = vmul.f32 %v3106_v22, %v3027_v60  ;;  %v3889_v60 = vld [vmem:[#allocation3 + $0x1c8] sm:$0xff] }
 0xa50   : > { %v3905_v4 = vmul.f32 %v10040_v16, %v3889_v60  ;;  %v3907_v16 = vmul.f32 %v10047_v33, %v3891_v17  ;;  %v3888_v60 = vld [vmem:[#allocation3 + $0x1c0] sm:$0xff] }
 0xa51   : > { %v3332_v29 = vadd.f32 %v11093_v0, %v3123_v47  ;;  %v4078_v47 = vmul.f32 %v10227_v42, %v3982_v15  ;;  %v4080_v42 = vmul.f32 %v10232_v6, %v3984_v31 }
 0xa52   : > { %v4001_v37 = vpop.permute.xlu1 %4000 }
 0xa53   : > { %3348 = vst.msk [vmem:[#allocation4 + $0x178] sm:$0xff] %vm535_vm2, %v3332_v29  ;;  %v4074_v3 = vmul.f32 %v4001_v37, %v3978_v52  ;;  %v3985_v52 = vld [vmem:[#allocation4 + $0x1c0] sm:$0xff] }
 0xa56   : > { %v4006_v24 = vpop.permute.xlu1 %4005 }
 0xa57   : > { %v4075_v48 = vmul.f32 %v4006_v24, %v3979_v18 }
 0xa5a   : > { %v4016_v28 = vpop.permute.xlu1 %4015 }
 0xa5b   : > { %v4077_v0 = vmul.f32 %v4016_v28, %v3981_v38 }
 0xa5e   : > { %v4026_v55 = vpop.permute.xlu1 %4025 }
 0xa5f   : > { %v4079_v45 = vmul.f32 %v4026_v55, %v3983_v57  ;;  %v3987_v57 = vld [vmem:[#allocation4 + $0x1d0] sm:$0xff] }
 0xa61   : > { %v3913_v50 = vpop.xlane.xlu0 %3912 }
 0xa62   : > { %v3944_v35 = vadd.f32 %v3913_v50, %v3896_v58  ;;  %v4036_v24 = vpop.permute.xlu1 %4035 }
 0xa64   : > { %3960 = vst.msk [vmem:[#allocation3 + $0x180] sm:$0xff] %vm1097_vm4, %v3944_v35 }
 0xa65   : > { %v3919_v49 = vpop.xlane.xlu0 %3918 }
 0xa66   : > { %v3947_v1 = vadd.f32 %v3919_v49, %v3899_v62  ;;  %v3986_v49 = vld [vmem:[#allocation4 + $0x1c8] sm:$0xff]  ;;  %v4046_v30 = vpop.permute.xlu1 %4045 }
 0xa67   : > { %v4082_v6 = vmul.f32 %v10237_v25, %v3986_v49  ;;  %v4083_v17 = vmul.f32 %v4046_v30, %v3987_v57  ;;  %v4340_v30 = vld [vmem:[#allocation3 + $0x30] sm:$0xff] (!%p5446_p10) }
 0xa68   : > { %3963 = vst.msk [vmem:[#allocation3 + $0x198] sm:$0xff] %vm1097_vm4, %v3947_v1 }
 0xa69   : > { %v3917_v26 = vpop.xlane.xlu0 %3916 }
 0xa6a   : > { %v3946_v41 = vadd.f32 %v3917_v26, %v3898_v8  ;;  %v4056_v61 = vpop.permute.xlu1 %4055 }
 0xa6b   : > { %v6131_v13 = vpop.f32.mrb[48].mxu0 }
 0xa6c   : > { %3962 = vst.msk [vmem:[#allocation3 + $0x190] sm:$0xff] %vm1097_vm4, %v3946_v41  ;;  %v4283_v12 = vadd.f32 %v6131_v13, %v4074_v3  ;;  %v4203_v63 = vpop.f32.mrb[49].mxu0 }
 0xa6d   : > { %v4282_v36 = vadd.f32 %v4203_v63, %v4073_v19  ;;  %v3923_v46 = vpop.xlane.xlu0 %3922  ;;  %v4081_v19 = vmul.f32 %v4036_v24, %v3985_v52  ;;  %v3895_v63 = vld [vmem:[#allocation3 + $0x1f8] sm:$0xff] }
 0xa6e   : > { %4299 = vst.msk [vmem:[#allocation4 + $0x188] sm:$0xff] %vm535_vm2, %v4283_v12  ;;  %v3949_v9 = vadd.f32 %v3923_v46, %v3901_v56  ;;  %v3911_v25 = vmul.f32 %v10169_v32, %v3895_v63  ;;  %v4337_v63 = vld [vmem:[#allocation3 + $0x18] sm:$0xff] (!%p5446_p10) }
 0xa6f   : > { %4298 = vst.msk [vmem:[#allocation4 + $0x180] sm:$0xff] %vm535_vm2, %v4282_v36 }
 0xa70   : > { %3965 = vst.msk [vmem:[#allocation3 + $0x1a8] sm:$0xff] %vm1097_vm4, %v3949_v9  ;;  %v6134_v34 = vpop.f32.mrb[50].mxu0  ;;  %v3881_v9 = vld [vmem:[#allocation3 + $0x188] sm:$0xff] }
 0xa71   : > { %v4285_v59 = vadd.f32 %v6134_v34, %v4076_v11  ;;  %v4213_v54 = vpop.f32.mrb[51].mxu0  ;;  %v3927_v43 = vpop.xlane.xlu0 %3926  ;;  %v3897_v11 = vmul.f32 %v10098_v21, %v3881_v9  ;;  %v3904_v21 = vmul.f32 %v10132_v2, %v3888_v60  ;;  %v3894_v2 = vld [vmem:[#allocation3 + $0x1f0] sm:$0xff]  ;;  %v4346_v60 = vld [vmem:[#allocation3 + $0x60] sm:$0xff] (!%p5446_p10) }
 0xa72   : > { %v4284_v53 = vadd.f32 %v4213_v54, %v4075_v48  ;;  %v3951_v22 = vadd.f32 %v3927_v43, %v3903_v23  ;;  %v3884_v48 = vld [vmem:[#allocation3 + $0x1a0] sm:$0xff]  ;;  %v3910_v24 = vmul.f32 %v10215_v10, %v3894_v2 }
 0xa73   : > { %4301 = vst.msk [vmem:[#allocation4 + $0x198] sm:$0xff] %vm535_vm2, %v4285_v59  ;;  %v3900_v23 = vmul.f32 %v10117_v44, %v3884_v48  ;;  %v3886_v59 = vld [vmem:[#allocation3 + $0x1b0] sm:$0xff]  ;;  %v4342_v48 = vld [vmem:[#allocation3 + $0x40] sm:$0xff] (!%p5446_p10) }
 0xa74   : > { %4300 = vst.msk [vmem:[#allocation4 + $0x190] sm:$0xff] %vm535_vm2, %v4284_v53  ;;  %v6137_v29 = vpop.f32.mrb[52].mxu0  ;;  %v3902_v32 = vmul.f32 %v10120_v51, %v3886_v59  ;;  %v4344_v59 = vld [vmem:[#allocation3 + $0x50] sm:$0xff] (!%p5446_p10) }
 0xa75   : > { %3967 = vst.msk [vmem:[#allocation3 + $0x1b8] sm:$0xff] %vm1097_vm4, %v3951_v22  ;;  %v4287_v37 = vadd.f32 %v6137_v29, %v4078_v47  ;;  %v4223_v58 = vpop.f32.mrb[53].mxu0  ;;  %v3931_v50 = vpop.xlane.xlu0 %3930  ;;  %v3890_v22 = vld [vmem:[#allocation3 + $0x1d0] sm:$0xff]  ;;  %v3988_v29 = vld [vmem:[#allocation4 + $0x1d8] sm:$0xff] }
 0xa76   : > { %v4286_v35 = vadd.f32 %v4223_v58, %v4077_v0  ;;  %v3953_v62 = vadd.f32 %v3931_v50, %v3905_v4  ;;  %v3906_v44 = vmul.f32 %v10144_v14, %v3890_v22  ;;  %v3892_v0 = vld [vmem:[#allocation3 + $0x1e0] sm:$0xff]  ;;  %v3990_v50 = vld [vmem:[#allocation4 + $0x1e8] sm:$0xff]  ;;  %v4348_v22 = vld [vmem:[#allocation3 + $0x70] sm:$0xff] (!%p5446_p10) }
 0xa77   : > { %4303 = vst.msk [vmem:[#allocation4 + $0x1a8] sm:$0xff] %vm535_vm2, %v4287_v37  ;;  %v3908_v51 = vmul.f32 %v10149_v5, %v3892_v0  ;;  %v4084_v37 = vmul.f32 %v10241_v27, %v3988_v29  ;;  %v4350_v0 = vld [vmem:[#allocation3 + $0x80] sm:$0xff] (!%p5446_p10) }
 0xa78   : > { %4302 = vst.msk [vmem:[#allocation4 + $0x1a0] sm:$0xff] %vm535_vm2, %v4286_v35  ;;  %v6140_v1 = vpop.f32.mrb[54].mxu0 }
 0xa79   : > { %3969 = vst.msk [vmem:[#allocation3 + $0x1c8] sm:$0xff] %vm1097_vm4, %v3953_v62  ;;  %v4289_v39 = vadd.f32 %v6140_v1, %v4080_v42  ;;  %v4233_v8 = vpop.f32.mrb[55].mxu0  ;;  %v3935_v26 = vpop.xlane.xlu0 %3934  ;;  %v3989_v42 = vld [vmem:[#allocation4 + $0x1e0] sm:$0xff]  ;;  %v4086_v1 = vmul.f32 %v10243_v7, %v3990_v50 }
 0xa7a   : > { %v4288_v3 = vadd.f32 %v4233_v8, %v4079_v45  ;;  %v3955_v41 = vadd.f32 %v3935_v26, %v3907_v16  ;;  %v4085_v27 = vmul.f32 %v4056_v61, %v3989_v42  ;;  %v3992_v16 = vld [vmem:[#allocation4 + $0x1f8] sm:$0xff]  ;;  %v4354_v50 = vld [vmem:[#allocation3 + $0xa0] sm:$0xff] (!%p5446_p10)  ;;  %v4356_v42 = vld [vmem:[#allocation3 + $0xb0] sm:$0xff] (!%p5446_p10) }
 0xa7b   : > { %4305 = vst.msk [vmem:[#allocation4 + $0x1b8] sm:$0xff] %vm535_vm2, %v4289_v39 }
 0xa7c   : > { %4304 = vst.msk [vmem:[#allocation4 + $0x1b0] sm:$0xff] %vm535_vm2, %v4288_v3  ;;  %v6143_v13 = vpop.f32.mrb[56].mxu0  ;;  %v3991_v3 = vld [vmem:[#allocation4 + $0x1f0] sm:$0xff] }
 0xa7d   : > { %3971 = vst.msk [vmem:[#allocation3 + $0x1d8] sm:$0xff] %vm1097_vm4, %v3955_v41  ;;  %v4291_v33 = vadd.f32 %v6143_v13, %v4082_v6  ;;  %v4243_v28 = vpop.f32.mrb[57].mxu0  ;;  %v3939_v12 = vpop.xlane.xlu0 %3938 }
 0xa7e   : > { %v4290_v56 = vadd.f32 %v4243_v28, %v4081_v19  ;;  %v3957_v18 = vadd.f32 %v3939_v12, %v3909_v20  ;;  %v4336_v28 = vld [vmem:[#allocation3 + $0x10] sm:$0xff] (!%p5446_p10)  ;;  %v4334_v12 = vld [vmem:[#allocation3] sm:$0xff] (!%p5446_p10) }
 0xa7f   : > { %4307 = vst.msk [vmem:[#allocation4 + $0x1c8] sm:$0xff] %vm535_vm2, %v4291_v33  ;;  %7123 = vrcp.f32 (!%p5446_p10), %v4336_v28 }
 0xa80   : > { %4306 = vst.msk [vmem:[#allocation4 + $0x1c0] sm:$0xff] %vm535_vm2, %v4290_v56  ;;  %v7313_v56 = vmov (!%p5446_p10), 0   ;;  %7125 = vrcp.f32 (!%p5446_p10), %v4334_v12  ;;  %v4368_v12 = vld [vmem:[#allocation3 + $0x110] sm:$0xff] (!%p5446_p10) }
 0xa81   : > { %3973 = vst.msk [vmem:[#allocation3 + $0x1e8] sm:$0xff] %vm1097_vm4, %v3957_v18  ;;  %v3943_v36 = vpop.xlane.xlu0 %3942  ;;  %7122 = vset.pattern.permute.xlu1 (!%p5446_p10), %v7313_v56  ;;  %7121 = vset.pattern.permute.xlu0 (!%p5446_p10), %v7313_v56  ;;  %v4335_v18 = vld [vmem:[#allocation3 + $0x8] sm:$0xff] (!%p5446_p10)  ;;  %7127 = vrcp.f32 (!%p5446_p10), %v4337_v63 }
 0xa82   : > { %v3959_v46 = vadd.f32 %v3943_v36, %v3911_v25  ;;  %7129 = vrcp.f32 (!%p5446_p10), %v4335_v18  ;;  %v4339_v25 = vld [vmem:[#allocation3 + $0x28] sm:$0xff] (!%p5446_p10)  ;;  %v4338_v36 = vld [vmem:[#allocation3 + $0x20] sm:$0xff] (!%p5446_p10) }
 0xa83   : > { %7131 = vrcp.f32 (!%p5446_p10), %v4339_v25  ;;  %v4371_v56 = vld [vmem:[#allocation3 + $0x128] sm:$0xff] (!%p5446_p10)  ;;  %v4370_v25 = vld [vmem:[#allocation3 + $0x120] sm:$0xff] (!%p5446_p10) }
 0xa84   : > { %3975 = vst.msk [vmem:[#allocation3 + $0x1f8] sm:$0xff] %vm1097_vm4, %v3959_v46  ;;  %7133 = vrcp.f32 (!%p5446_p10), %v4338_v36  ;;  %v4341_v46 = vld [vmem:[#allocation3 + $0x38] sm:$0xff] (!%p5446_p10) }
 0xa85   : > { %7135 = vrcp.f32 (!%p5446_p10), %v4341_v46  ;;  %v4373_v46 = vld [vmem:[#allocation3 + $0x138] sm:$0xff] (!%p5446_p10) }
 0xa86   : > { %7137 = vrcp.f32 (!%p5446_p10), %v4340_v30 }
 0xa89   : > { %v4071_v52 = vpop.permute.xlu0 %4070  ;;  %v7124_v61 = vpop.eup (!%p5446_p10), %7123 }
 0xa8a   : > { %v4088_v6 = vmul.f32 %v4071_v52, %v3992_v16  ;;  %v7126_v9 = vpop.eup (!%p5446_p10), %7125  ;;  %4538 = vperm.xlu1 (!%p5446_p10), %7122, %v7124_v61   ;;  %v4360_v16 = vld [vmem:[#allocation3 + $0xd0] sm:$0xff] (!%p5446_p10) }
 0xa8b   : > { %4528 = vperm.xlu0 (!%p5446_p10), %7121, %v7126_v9   ;;  %v4372_v61 = vld [vmem:[#allocation3 + $0x130] sm:$0xff] (!%p5446_p10) }
 0xa9b   : > { %v3915_v15 = vpop.xlane.xlu1 %3914 }
 0xa9c   : > { %v3945_v34 = vadd.f32 %v3915_v15, %v3897_v11  ;;  %v4343_v11 = vld [vmem:[#allocation3 + $0x48] sm:$0xff] (!%p5446_p10)  ;;  %v7128_v15 = vpop.eup (!%p5446_p10), %7127 }
 0xa9d   : > { %7139 = vrcp.f32 (!%p5446_p10), %v4343_v11  ;;  %4543 = vperm.xlu1 (!%p5446_p10), %7122, %v7128_v15   ;;  %v4375_v11 = vld [vmem:[#allocation3 + $0x148] sm:$0xff] (!%p5446_p10) }
 0xa9e   : > { %3961 = vst.msk [vmem:[#allocation3 + $0x188] sm:$0xff] %vm1097_vm4, %v3945_v34  ;;  %v7130_v34 = vpop.eup (!%p5446_p10), %7129  ;;  %7141 = vrcp.f32 (!%p5446_p10), %v4342_v48  ;;  %v4374_v48 = vld [vmem:[#allocation3 + $0x140] sm:$0xff] (!%p5446_p10) }
 0xa9f   : > { %v3921_v38 = vpop.xlane.xlu1 %3920  ;;  %4533 = vperm.xlu0 (!%p5446_p10), %7121, %v7130_v34  }
 0xaa0   : > { %v3948_v54 = vadd.f32 %v3921_v38, %v3900_v23  ;;  %v4345_v23 = vld [vmem:[#allocation3 + $0x58] sm:$0xff] (!%p5446_p10)  ;;  %v7132_v38 = vpop.eup (!%p5446_p10), %7131 }
 0xaa1   : > { %7143 = vrcp.f32 (!%p5446_p10), %v4345_v23  ;;  %4553 = vperm.xlu1 (!%p5446_p10), %7122, %v7132_v38   ;;  %v4377_v23 = vld [vmem:[#allocation3 + $0x158] sm:$0xff] (!%p5446_p10) }
 0xaa2   : > { %3964 = vst.msk [vmem:[#allocation3 + $0x1a0] sm:$0xff] %vm1097_vm4, %v3948_v54  ;;  %v7134_v54 = vpop.eup (!%p5446_p10), %7133  ;;  %7145 = vrcp.f32 (!%p5446_p10), %v4344_v59  ;;  %v4376_v59 = vld [vmem:[#allocation3 + $0x150] sm:$0xff] (!%p5446_p10) }
 0xaa3   : > { %v3925_v43 = vpop.xlane.xlu1 %3924  ;;  %4548 = vperm.xlu0 (!%p5446_p10), %7121, %v7134_v54  }
 0xaa4   : > { %v3950_v55 = vadd.f32 %v3925_v43, %v3902_v32  ;;  %v4347_v32 = vld [vmem:[#allocation3 + $0x68] sm:$0xff] (!%p5446_p10)  ;;  %v7136_v43 = vpop.eup (!%p5446_p10), %7135 }
 0xaa5   : > { %7147 = vrcp.f32 (!%p5446_p10), %v4347_v32  ;;  %4563 = vperm.xlu1 (!%p5446_p10), %7122, %v7136_v43   ;;  %v4379_v32 = vld [vmem:[#allocation3 + $0x168] sm:$0xff] (!%p5446_p10) }
 0xaa6   : > { %3966 = vst.msk [vmem:[#allocation3 + $0x1b0] sm:$0xff] %vm1097_vm4, %v3950_v55  ;;  %v7138_v55 = vpop.eup (!%p5446_p10), %7137  ;;  %7149 = vrcp.f32 (!%p5446_p10), %v4346_v60  ;;  %v4378_v60 = vld [vmem:[#allocation3 + $0x160] sm:$0xff] (!%p5446_p10) }
 0xaa7   : > { %v3929_v53 = vpop.xlane.xlu1 %3928  ;;  %4558 = vperm.xlu0 (!%p5446_p10), %7121, %v7138_v55  }
 0xaa8   : > { %v3952_v47 = vadd.f32 %v3929_v53, %v3904_v21  ;;  %v4349_v21 = vld [vmem:[#allocation3 + $0x78] sm:$0xff] (!%p5446_p10)  ;;  %v7140_v53 = vpop.eup (!%p5446_p10), %7139 }
 0xaa9   : > { %7151 = vrcp.f32 (!%p5446_p10), %v4349_v21  ;;  %4573 = vperm.xlu1 (!%p5446_p10), %7122, %v7140_v53   ;;  %v4381_v21 = vld [vmem:[#allocation3 + $0x178] sm:$0xff] (!%p5446_p10) }
 0xaaa   : > { %3968 = vst.msk [vmem:[#allocation3 + $0x1c0] sm:$0xff] %vm1097_vm4, %v3952_v47  ;;  %v7142_v47 = vpop.eup (!%p5446_p10), %7141  ;;  %7153 = vrcp.f32 (!%p5446_p10), %v4348_v22  ;;  %v4380_v22 = vld [vmem:[#allocation3 + $0x170] sm:$0xff] (!%p5446_p10) }
 0xaab   : > { %v3933_v31 = vpop.xlane.xlu1 %3932  ;;  %4568 = vperm.xlu0 (!%p5446_p10), %7121, %v7142_v47  }
 0xaac   : > { %v3954_v4 = vadd.f32 %v3933_v31, %v3906_v44  ;;  %v4351_v44 = vld [vmem:[#allocation3 + $0x88] sm:$0xff] (!%p5446_p10)  ;;  %v7144_v31 = vpop.eup (!%p5446_p10), %7143 }
 0xaad   : > { %v7146_v29 = vpop.eup (!%p5446_p10), %7145  ;;  %7155 = vrcp.f32 (!%p5446_p10), %v4351_v44  ;;  %4583 = vperm.xlu1 (!%p5446_p10), %7122, %v7144_v31   ;;  %v4383_v44 = vld [vmem:[#allocation3 + $0x188] sm:$0xff] (!%p5446_p10) }
 0xaae   : > { %3970 = vst.msk [vmem:[#allocation3 + $0x1d0] sm:$0xff] %vm1097_vm4, %v3954_v4  ;;  %7157 = vrcp.f32 (!%p5446_p10), %v4350_v0  ;;  %v4353_v4 = vld [vmem:[#allocation3 + $0x98] sm:$0xff] (!%p5446_p10)  ;;  %v4382_v0 = vld [vmem:[#allocation3 + $0x180] sm:$0xff] (!%p5446_p10) }
 0xaaf   : > { %v3937_v58 = vpop.xlane.xlu1 %3936  ;;  %v7148_v57 = vpop.eup (!%p5446_p10), %7147  ;;  %4578 = vperm.xlu0 (!%p5446_p10), %7121, %v7146_v29   ;;  %7159 = vrcp.f32 (!%p5446_p10), %v4353_v4  ;;  %v4385_v4 = vld [vmem:[#allocation3 + $0x198] sm:$0xff] (!%p5446_p10) }
 0xab0   : > { %v3956_v35 = vadd.f32 %v3937_v58, %v3908_v51  ;;  %v6146_v62 = vpop.f32.mrb[58].mxu0  ;;  %v4352_v51 = vld [vmem:[#allocation3 + $0x90] sm:$0xff] (!%p5446_p10)  ;;  %v4355_v58 = vld [vmem:[#allocation3 + $0xa8] sm:$0xff] (!%p5446_p10) }
 0xab1   : > { %v4293_v49 = vadd.f32 %v6146_v62, %v4084_v37  ;;  %v4253_v14 = vpop.f32.mrb[59].mxu0  ;;  %v7150_v37 = vpop.eup (!%p5446_p10), %7149  ;;  %4593 = vperm.xlu1 (!%p5446_p10), %7122, %v7148_v57   ;;  %7161 = vrcp.f32 (!%p5446_p10), %v4352_v51  ;;  %v4384_v51 = vld [vmem:[#allocation3 + $0x190] sm:$0xff] (!%p5446_p10) }
 0xab2   : > { %3972 = vst.msk [vmem:[#allocation3 + $0x1e0] sm:$0xff] %vm1097_vm4, %v3956_v35  ;;  %v4292_v45 = vadd.f32 %v4253_v14, %v4083_v17  ;;  %7163 = vrcp.f32 (!%p5446_p10), %v4355_v58  ;;  %v4357_v35 = vld [vmem:[#allocation3 + $0xb8] sm:$0xff] (!%p5446_p10)  ;;  %v4359_v14 = vld [vmem:[#allocation3 + $0xc8] sm:$0xff] (!%p5446_p10) }
 0xab3   : > { %4309 = vst.msk [vmem:[#allocation4 + $0x1d8] sm:$0xff] %vm535_vm2, %v4293_v49  ;;  %v3941_v5 = vpop.xlane.xlu1 %3940  ;;  %v7152_v2 = vpop.eup (!%p5446_p10), %7151  ;;  %4588 = vperm.xlu0 (!%p5446_p10), %7121, %v7150_v37   ;;  %7165 = vrcp.f32 (!%p5446_p10), %v4354_v50  ;;  %v4387_v58 = vld [vmem:[#allocation3 + $0x1a8] sm:$0xff] (!%p5446_p10)  ;;  %v4386_v50 = vld [vmem:[#allocation3 + $0x1a0] sm:$0xff] (!%p5446_p10) }
 0xab4   : > { %4308 = vst.msk [vmem:[#allocation4 + $0x1d0] sm:$0xff] %vm535_vm2, %v4292_v45  ;;  %v3958_v39 = vadd.f32 %v3941_v5, %v3910_v24  ;;  %v6149_v8 = vpop.f32.mrb[60].mxu0  ;;  %v7154_v17 = vpop.eup (!%p5446_p10), %7153  ;;  %7167 = vrcp.f32 (!%p5446_p10), %v4357_v35  ;;  %v4358_v24 = vld [vmem:[#allocation3 + $0xc0] sm:$0xff] (!%p5446_p10)  ;;  %v4361_v5 = vld [vmem:[#allocation3 + $0xd8] sm:$0xff] (!%p5446_p10) }
 0xab5   : > { %v4295_v26 = vadd.f32 %v6149_v8, %v4086_v1  ;;  %v4263_v40 = vpop.f32.mrb[61].mxu0  ;;  %4603 = vperm.xlu1 (!%p5446_p10), %7122, %v7152_v2   ;;  %7169 = vrcp.f32 (!%p5446_p10), %v4356_v42  ;;  %v4389_v35 = vld [vmem:[#allocation3 + $0x1b8] sm:$0xff] (!%p5446_p10)  ;;  %v4388_v42 = vld [vmem:[#allocation3 + $0x1b0] sm:$0xff] (!%p5446_p10) }
 0xab6   : > { %3974 = vst.msk [vmem:[#allocation3 + $0x1f0] sm:$0xff] %vm1097_vm4, %v3958_v39  ;;  %v4294_v41 = vadd.f32 %v4263_v40, %v4085_v27  ;;  %4333 = sbr.rel (%p5446_p10) target bundleno = 3086 (0xc0e), region = 40  ;;  %7171 = vrcp.f32 (!%p5446_p10), %v4359_v14  ;;  %v4363_v39 = vld [vmem:[#allocation3 + $0xe8] sm:$0xff] (!%p5446_p10) }
 0xab7   : > { %4311 = vst.msk [vmem:[#allocation4 + $0x1e8] sm:$0xff] %vm535_vm2, %v4295_v26  ;;  %v4066_v10 = vpop.permute.xlu1 %4065  ;;  %v7156_v62 = vpop.eup (!%p5446_p10), %7155  ;;  %4598 = vperm.xlu0 (!%p5446_p10), %7121, %v7154_v17   ;;  %7173 = vrcp.f32 (!%p5446_p10), %v4358_v24  ;;  %v4362_v26 = vld [vmem:[#allocation3 + $0xe0] sm:$0xff] (!%p5446_p10)  ;;  %v4391_v14 = vld [vmem:[#allocation3 + $0x1c8] sm:$0xff] (!%p5446_p10) }
 0xab8   : > { %4310 = vst.msk [vmem:[#allocation4 + $0x1e0] sm:$0xff] %vm535_vm2, %v4294_v41  ;;  %v4087_v7 = vmul.f32 %v4066_v10, %v3991_v3  ;;  %v6152_v19 = vpop.f32.mrb[62].mxu0  ;;  %v7158_v49 = vpop.eup (!%p5446_p10), %7157  ;;  %7175 = vrcp.f32 (!%p5446_p10), %v4361_v5  ;;  %v4365_v3 = vld [vmem:[#allocation3 + $0xf8] sm:$0xff] (!%p5446_p10)  ;;  %v4390_v24 = vld [vmem:[#allocation3 + $0x1c0] sm:$0xff] (!%p5446_p10) }
 0xab9   : > { %v4297_v13 = vadd.f32 %v6152_v19, %v4088_v6  ;;  %v4273_v20 = vpop.f32.mrb[63].mxu0  ;;  %4613 = vperm.xlu1 (!%p5446_p10), %7122, %v7156_v62   ;;  %v7160_v45 = vpop.eup (!%p5446_p10), %7159  ;;  %7177 = vrcp.f32 (!%p5446_p10), %v4360_v16  ;;  %v4364_v6 = vld [vmem:[#allocation3 + $0xf0] sm:$0xff] (!%p5446_p10)  ;;  %v4393_v5 = vld [vmem:[#allocation3 + $0x1d8] sm:$0xff] (!%p5446_p10) }
 0xaba   : > { %v4296_v33 = vadd.f32 %v4273_v20, %v4087_v7  ;;  %7179 = vrcp.f32 (!%p5446_p10), %v4363_v39  ;;  %v4367_v7 = vld [vmem:[#allocation3 + $0x108] sm:$0xff] (!%p5446_p10)  ;;  %v4392_v16 = vld [vmem:[#allocation3 + $0x1d0] sm:$0xff] (!%p5446_p10) }
 0xabb   : > { %4313 = vst.msk [vmem:[#allocation4 + $0x1f8] sm:$0xff] %vm535_vm2, %v4297_v13  ;;  %4608 = vperm.xlu0 (!%p5446_p10), %7121, %v7158_v49   ;;  %v7162_v1 = vpop.eup (!%p5446_p10), %7161  ;;  %7181 = vrcp.f32 (!%p5446_p10), %v4362_v26  ;;  %v4366_v13 = vld [vmem:[#allocation3 + $0x100] sm:$0xff] (!%p5446_p10)  ;;  %v4395_v39 = vld [vmem:[#allocation3 + $0x1e8] sm:$0xff] (!%p5446_p10) }
 0xabc   : > { %4312 = vst.msk [vmem:[#allocation4 + $0x1f0] sm:$0xff] %vm535_vm2, %v4296_v33  ;;  %v7164_v27 = vpop.eup (!%p5446_p10), %7163  ;;  %7183 = vrcp.f32 (!%p5446_p10), %v4365_v3  ;;  %v4369_v33 = vld [vmem:[#allocation3 + $0x118] sm:$0xff] (!%p5446_p10)  ;;  %v4394_v26 = vld [vmem:[#allocation3 + $0x1e0] sm:$0xff] (!%p5446_p10) }
 0xabd   : > { %4623 = vperm.xlu1 %7122, %v7160_v45   ;;  %v7166_v52 = vpop.eup %7165  ;;  %7185 = vrcp.f32 %v4364_v6  ;;  %v4397_v3 = vld [vmem:[#allocation3 + $0x1f8] sm:$0xff]  ;;  %v4396_v6 = vld [vmem:[#allocation3 + $0x1f0] sm:$0xff] }
 0xabe   : > { %v7168_v8 = vpop.eup %7167  ;;  %7187 = vrcp.f32 %v4367_v7 }
 0xabf   : > { %4618 = vperm.xlu0 %7121, %v7162_v1   ;;  %v7170_v40 = vpop.eup %7169  ;;  %7189 = vrcp.f32 %v4366_v13 }
 0xac0   : > { %v7172_v41 = vpop.eup %7171  ;;  %7191 = vrcp.f32 %v4369_v33 }
 0xac1   : > { %4633 = vperm.xlu1 %7122, %v7164_v27   ;;  %v7174_v10 = vpop.eup %7173  ;;  %7193 = vrcp.f32 %v4368_v12 }
 0xac2   : > { %v7176_v19 = vpop.eup %7175  ;;  %7195 = vrcp.f32 %v4371_v56 }
 0xac3   : > { %4628 = vperm.xlu0 %7121, %v7166_v52   ;;  %v7178_v20 = vpop.eup %7177  ;;  %7197 = vrcp.f32 %v4370_v25 }
 0xac4   : > { %v7180_v28 = vpop.eup %7179  ;;  %7199 = vrcp.f32 %v4373_v46 }
 0xac5   : > { %4643 = vperm.xlu1 %7122, %v7168_v8   ;;  %v7182_v63 = vpop.eup %7181  ;;  %7201 = vrcp.f32 %v4372_v61 }
 0xac6   : > { %v7184_v18 = vpop.eup %7183  ;;  %7203 = vrcp.f32 %v4375_v11 }
 0xac7   : > { %4638 = vperm.xlu0 %7121, %v7170_v40   ;;  %v7186_v36 = vpop.eup %7185  ;;  %7205 = vrcp.f32 %v4374_v48 }
 0xac8   : > { %v7188_v30 = vpop.eup %7187  ;;  %7207 = vrcp.f32 %v4377_v23 }
 0xac9   : > { %4653 = vperm.xlu1 %7122, %v7172_v41   ;;  %v7190_v9 = vpop.eup %7189  ;;  %7209 = vrcp.f32 %v4376_v59  ;;  %v4479_v59 = vld [vmem:[#allocation4 + $0x88] sm:$0xff] }
 0xaca   : > { %v7192_v15 = vpop.eup %7191  ;;  %7211 = vrcp.f32 %v4379_v32 }
 0xacb   : > { %4648 = vperm.xlu0 %7121, %v7174_v10   ;;  %v7194_v34 = vpop.eup %7193  ;;  %7213 = vrcp.f32 %v4378_v60 }
 0xacc   : > { %v7196_v38 = vpop.eup %7195  ;;  %7215 = vrcp.f32 %v4381_v21  ;;  %v4481_v21 = vld [vmem:[#allocation4 + $0x98] sm:$0xff] }
 0xacd   : > { %4663 = vperm.xlu1 %7122, %v7176_v19   ;;  %v7198_v54 = vpop.eup %7197  ;;  %7217 = vrcp.f32 %v4380_v22 }
 0xace   : > { %v7200_v43 = vpop.eup %7199  ;;  %7219 = vrcp.f32 %v4383_v44 }
 0xacf   : > { %4658 = vperm.xlu0 %7121, %v7178_v20   ;;  %v7202_v55 = vpop.eup %7201  ;;  %7221 = vrcp.f32 %v4382_v0  ;;  %v4483_v0 = vld [vmem:[#allocation4 + $0xa8] sm:$0xff] }
 0xad0   : > { %v7204_v53 = vpop.eup %7203  ;;  %7223 = vrcp.f32 %v4385_v4 }
 0xad1   : > { %4673 = vperm.xlu1 %7122, %v7180_v28   ;;  %v7206_v47 = vpop.eup %7205  ;;  %7225 = vrcp.f32 %v4384_v51 }
 0xad2   : > { %v7208_v31 = vpop.eup %7207  ;;  %7227 = vrcp.f32 %v4387_v58  ;;  %v4485_v58 = vld [vmem:[#allocation4 + $0xb8] sm:$0xff] }
 0xad3   : > { %4668 = vperm.xlu0 %7121, %v7182_v63   ;;  %v7210_v29 = vpop.eup %7209  ;;  %7229 = vrcp.f32 %v4386_v50 }
 0xad4   : > { %v7212_v57 = vpop.eup %7211  ;;  %7231 = vrcp.f32 %v4389_v35 }
 0xad5   : > { %4683 = vperm.xlu1 %7122, %v7184_v18   ;;  %v7214_v37 = vpop.eup %7213  ;;  %7233 = vrcp.f32 %v4388_v42  ;;  %v4487_v42 = vld [vmem:[#allocation4 + $0xc8] sm:$0xff] }
 0xad6   : > { %v7216_v2 = vpop.eup %7215  ;;  %7235 = vrcp.f32 %v4391_v14 }
 0xad7   : > { %4678 = vperm.xlu0 %7121, %v7186_v36   ;;  %v7218_v17 = vpop.eup %7217  ;;  %7237 = vrcp.f32 %v4390_v24 }
 0xad8   : > { %v7220_v62 = vpop.eup %7219  ;;  %7239 = vrcp.f32 %v4393_v5  ;;  %v4489_v5 = vld [vmem:[#allocation4 + $0xd8] sm:$0xff] }
 0xad9   : > { %4693 = vperm.xlu1 %7122, %v7188_v30   ;;  %v7222_v49 = vpop.eup %7221  ;;  %7241 = vrcp.f32 %v4392_v16 }
 0xada   : > { %v7224_v45 = vpop.eup %7223  ;;  %7243 = vrcp.f32 %v4395_v39 }
 0xadb   : > { %4688 = vperm.xlu0 %7121, %v7190_v9   ;;  %v7226_v1 = vpop.eup %7225  ;;  %7245 = vrcp.f32 %v4394_v26  ;;  %v4491_v26 = vld [vmem:[#allocation4 + $0xe8] sm:$0xff] }
 0xadc   : > { %v7228_v27 = vpop.eup %7227  ;;  %7247 = vrcp.f32 %v4397_v3 }
 0xadd   : > { %4703 = vperm.xlu1 %7122, %v7192_v15   ;;  %v7230_v52 = vpop.eup %7229  ;;  %7249 = vrcp.f32 %v4396_v6 }
 0xade   : > { %v7232_v8 = vpop.eup %7231 }
 0xadf   : > { %4698 = vperm.xlu0 %7121, %v7194_v34   ;;  %v7234_v40 = vpop.eup %7233 }
 0xae0   : > { %v7236_v41 = vpop.eup %7235 }
 0xae1   : > { %4713 = vperm.xlu1 %7122, %v7196_v38   ;;  %v7238_v10 = vpop.eup %7237 }
 0xae2   : > { %v7240_v7 = vpop.eup %7239 }
 0xae3   : > { %4708 = vperm.xlu0 %7121, %v7198_v54   ;;  %v7242_v19 = vpop.eup %7241  ;;  %v4478_v54 = vld [vmem:[#allocation4 + $0x80] sm:$0xff] }
 0xae4   : > { %v7244_v13 = vpop.eup %7243 }
 0xae5   : > { %4723 = vperm.xlu1 %7122, %v7200_v43   ;;  %v7246_v20 = vpop.eup %7245 }
 0xae6   : > { %v7248_v33 = vpop.eup %7247 }
 0xae7   : > { %4718 = vperm.xlu0 %7121, %v7202_v55   ;;  %v7250_v28 = vpop.eup %7249 }
 0xae9   : > { %4733 = vperm.xlu1 %7122, %v7204_v53   ;;  %v4480_v53 = vld [vmem:[#allocation4 + $0x90] sm:$0xff] }
 0xaeb   : > { %4728 = vperm.xlu0 %7121, %v7206_v47  }
 0xaed   : > { %4743 = vperm.xlu1 %7122, %v7208_v31  }
 0xaef   : > { %4738 = vperm.xlu0 %7121, %v7210_v29   ;;  %v4482_v29 = vld [vmem:[#allocation4 + $0xa0] sm:$0xff] }
 0xaf1   : > { %4753 = vperm.xlu1 %7122, %v7212_v57  }
 0xaf3   : > { %4748 = vperm.xlu0 %7121, %v7214_v37  }
 0xaf5   : > { %4763 = vperm.xlu1 %7122, %v7216_v2   ;;  %v4484_v2 = vld [vmem:[#allocation4 + $0xb0] sm:$0xff] }
 0xaf7   : > { %4758 = vperm.xlu0 %7121, %v7218_v17  }
 0xaf9   : > { %4773 = vperm.xlu1 %7122, %v7220_v62  }
 0xafb   : > { %4768 = vperm.xlu0 %7121, %v7222_v49   ;;  %v4486_v49 = vld [vmem:[#allocation4 + $0xc0] sm:$0xff] }
 0xafd   : > { %4783 = vperm.xlu1 %7122, %v7224_v45  }
 0xaff   : > { %4778 = vperm.xlu0 %7121, %v7226_v1  }
 0xb01   : > { %4793 = vperm.xlu1 %7122, %v7228_v27   ;;  %v4488_v27 = vld [vmem:[#allocation4 + $0xd0] sm:$0xff] }
 0xb03   : > { %4788 = vperm.xlu0 %7121, %v7230_v52  }
 0xb05   : > { %4803 = vperm.xlu1 %7122, %v7232_v8  }
 0xb07   : > { %4798 = vperm.xlu0 %7121, %v7234_v40   ;;  %v4490_v40 = vld [vmem:[#allocation4 + $0xe0] sm:$0xff] }
 0xb09   : > { %4813 = vperm.xlu1 %7122, %v7236_v41   ;;  %v10300_v12 = vpop.permute.xlu1 %4538 }
 0xb0a   : > { %v10302_v63 = vpop.permute.xlu0 %4528 }
 0xb0b   : > { %4808 = vperm.xlu0 %7121, %v7238_v10  }
 0xb0d   : > { %4823 = vperm.xlu1 %7122, %v7240_v7   ;;  %v4493_v7 = vld [vmem:[#allocation4 + $0xf8] sm:$0xff] }
 0xb0f   : > { %4818 = vperm.xlu0 %7121, %v7242_v19   ;;  %v4492_v19 = vld [vmem:[#allocation4 + $0xf0] sm:$0xff] }
 0xb11   : > { %4833 = vperm.xlu1 %7122, %v7244_v13  }
 0xb13   : > { %4828 = vperm.xlu0 %7121, %v7246_v20  }
 0xb15   : > { %4843 = vperm.xlu1 %7122, %v7248_v33  }
 0xb17   : > { %4838 = vperm.xlu0 %7121, %v7250_v28  }
 0xb1c   : > { %v10304_v56 = vpop.permute.xlu1 %4543 }
 0xb1e   : > { %v10306_v18 = vpop.permute.xlu0 %4533 }
 0xb20   : > { %v10308_v25 = vpop.permute.xlu1 %4553 }
 0xb22   : > { %v10310_v36 = vpop.permute.xlu0 %4548 }
 0xb24   : > { %v10312_v46 = vpop.permute.xlu1 %4563 }
 0xb26   : > { %v10314_v30 = vpop.permute.xlu0 %4558 }
 0xb28   : > { %v10316_v61 = vpop.permute.xlu1 %4573 }
 0xb2a   : > { %v10318_v9 = vpop.permute.xlu0 %4568 }
 0xb2c   : > { %v10320_v11 = vpop.permute.xlu1 %4583 }
 0xb2e   : > { %v10322_v15 = vpop.permute.xlu0 %4578 }
 0xb30   : > { %v10324_v48 = vpop.permute.xlu1 %4593 }
 0xb32   : > { %v10326_v34 = vpop.permute.xlu0 %4588 }
 0xb34   : > { %v10328_v23 = vpop.permute.xlu1 %4603 }
 0xb36   : > { %v10330_v38 = vpop.permute.xlu0 %4598 }
 0xb38   : > { %v4614_v32 = vpop.permute.xlu1 %4613 }
 0xb39   : > { %v4863_v43 = vmul.f32 %v4614_v32, %v4479_v59  ;;  %v4495_v59 = vld [vmem:[#allocation4 + $0x108] sm:$0xff] }
 0xb3a   : > { %v4609_v60 = vpop.permute.xlu0 %4608 }
 0xb3b   : > { %v4862_v55 = vmul.f32 %v4609_v60, %v4478_v54  ;;  %4928 = vrot.lane.b32.xlu1 %v4863_v43, %s7314_s12  ;;  %v4494_v54 = vld [vmem:[#allocation4 + $0x100] sm:$0xff] }
 0xb3c   : > { %v4624_v22 = vpop.permute.xlu1 %4623 }
 0xb3d   : > { %4926 = vrot.lane.b32.xlu0 %v4862_v55, %s7314_s12  ;;  %v4865_v47 = vmul.f32 %v4624_v22, %v4481_v21  ;;  %v4497_v21 = vld [vmem:[#allocation4 + $0x118] sm:$0xff] }
 0xb3e   : > { %v4619_v44 = vpop.permute.xlu0 %4618 }
 0xb3f   : > { %v4864_v31 = vmul.f32 %v4619_v44, %v4480_v53  ;;  %4932 = vrot.lane.b32.xlu1 %v4865_v47, %s7314_s12  ;;  %v4496_v53 = vld [vmem:[#allocation4 + $0x110] sm:$0xff] }
 0xb40   : > { %v4634_v4 = vpop.permute.xlu1 %4633 }
 0xb41   : > { %4930 = vrot.lane.b32.xlu0 %v4864_v31, %s7314_s12  ;;  %v4867_v57 = vmul.f32 %v4634_v4, %v4483_v0  ;;  %v4499_v0 = vld [vmem:[#allocation4 + $0x128] sm:$0xff] }
 0xb42   : > { %v4629_v51 = vpop.permute.xlu0 %4628 }
 0xb43   : > { %v4866_v37 = vmul.f32 %v4629_v51, %v4482_v29  ;;  %4936 = vrot.lane.b32.xlu1 %v4867_v57, %s7314_s12  ;;  %v4498_v29 = vld [vmem:[#allocation4 + $0x120] sm:$0xff] }
 0xb44   : > { %v4644_v50 = vpop.permute.xlu1 %4643 }
 0xb45   : > { %4934 = vrot.lane.b32.xlu0 %v4866_v37, %s7314_s12  ;;  %v4869_v17 = vmul.f32 %v4644_v50, %v4485_v58  ;;  %v4501_v58 = vld [vmem:[#allocation4 + $0x138] sm:$0xff] }
 0xb46   : > { %v4639_v35 = vpop.permute.xlu0 %4638 }
 0xb47   : > { %v4868_v62 = vmul.f32 %v4639_v35, %v4484_v2  ;;  %4940 = vrot.lane.b32.xlu1 %v4869_v17, %s7314_s12  ;;  %v4500_v2 = vld [vmem:[#allocation4 + $0x130] sm:$0xff] }
 0xb48   : > { %v4654_v14 = vpop.permute.xlu1 %4653 }
 0xb49   : > { %4938 = vrot.lane.b32.xlu0 %v4868_v62, %s7314_s12  ;;  %v4871_v45 = vmul.f32 %v4654_v14, %v4487_v42  ;;  %v4503_v42 = vld [vmem:[#allocation4 + $0x148] sm:$0xff] }
 0xb4a   : > { %v4649_v24 = vpop.permute.xlu0 %4648 }
 0xb4b   : > { %v4870_v1 = vmul.f32 %v4649_v24, %v4486_v49  ;;  %4944 = vrot.lane.b32.xlu1 %v4871_v45, %s7314_s12  ;;  %v4502_v49 = vld [vmem:[#allocation4 + $0x140] sm:$0xff] }
 0xb4c   : > { %v4664_v16 = vpop.permute.xlu1 %4663 }
 0xb4d   : > { %4942 = vrot.lane.b32.xlu0 %v4870_v1, %s7314_s12  ;;  %v4873_v52 = vmul.f32 %v4664_v16, %v4489_v5  ;;  %v4505_v5 = vld [vmem:[#allocation4 + $0x158] sm:$0xff] }
 0xb4e   : > { %v4659_v39 = vpop.permute.xlu0 %4658 }
 0xb4f   : > { %v4872_v8 = vmul.f32 %v4659_v39, %v4488_v27  ;;  %4948 = vrot.lane.b32.xlu1 %v4873_v52, %s7314_s12  ;;  %v4504_v27 = vld [vmem:[#allocation4 + $0x150] sm:$0xff] }
 0xb50   : > { %v4674_v3 = vpop.permute.xlu1 %4673 }
 0xb51   : > { %4946 = vrot.lane.b32.xlu0 %v4872_v8, %s7314_s12  ;;  %v4875_v41 = vmul.f32 %v4674_v3, %v4491_v26  ;;  %v4507_v26 = vld [vmem:[#allocation4 + $0x168] sm:$0xff] }
 0xb52   : > { %v4669_v6 = vpop.permute.xlu0 %4668 }
 0xb53   : > { %v4874_v10 = vmul.f32 %v4669_v6, %v4490_v40  ;;  %4952 = vrot.lane.b32.xlu1 %v4875_v41, %s7314_s12  ;;  %v4506_v40 = vld [vmem:[#allocation4 + $0x160] sm:$0xff] }
 0xb54   : > { %v4684_v13 = vpop.permute.xlu1 %4683 }
 0xb55   : > { %4950 = vrot.lane.b32.xlu0 %v4874_v10, %s7314_s12  ;;  %v4877_v20 = vmul.f32 %v4684_v13, %v4493_v7  ;;  %v4509_v7 = vld [vmem:[#allocation4 + $0x178] sm:$0xff] }
 0xb56   : > { %v4679_v33 = vpop.permute.xlu0 %4678 }
 0xb57   : > { %v4876_v28 = vmul.f32 %v4679_v33, %v4492_v19  ;;  %4956 = vrot.lane.b32.xlu1 %v4877_v20, %s7314_s12  ;;  %v4508_v19 = vld [vmem:[#allocation4 + $0x170] sm:$0xff] }
 0xb58   : > { %v4694_v32 = vpop.permute.xlu1 %4693 }
 0xb59   : > { %4954 = vrot.lane.b32.xlu0 %v4876_v28, %s7314_s12  ;;  %v4879_v43 = vmul.f32 %v4694_v32, %v4495_v59  ;;  %v4511_v59 = vld [vmem:[#allocation4 + $0x188] sm:$0xff] }
 0xb5a   : > { %v4689_v60 = vpop.permute.xlu0 %4688 }
 0xb5b   : > { %v4878_v55 = vmul.f32 %v4689_v60, %v4494_v54  ;;  %4992 = vrot.lane.b32.xlu1 %v4879_v43, %s7315_s25  ;;  %v4510_v54 = vld [vmem:[#allocation4 + $0x180] sm:$0xff] }
 0xb5c   : > { %v4704_v22 = vpop.permute.xlu1 %4703 }
 0xb5d   : > { %4990 = vrot.lane.b32.xlu0 %v4878_v55, %s7315_s25  ;;  %v4881_v47 = vmul.f32 %v4704_v22, %v4497_v21  ;;  %v4513_v21 = vld [vmem:[#allocation4 + $0x198] sm:$0xff] }
 0xb5e   : > { %v4699_v44 = vpop.permute.xlu0 %4698 }
 0xb5f   : > { %v4880_v31 = vmul.f32 %v4699_v44, %v4496_v53  ;;  %4996 = vrot.lane.b32.xlu1 %v4881_v47, %s7315_s25  ;;  %v4512_v53 = vld [vmem:[#allocation4 + $0x190] sm:$0xff] }
 0xb60   : > { %v4714_v4 = vpop.permute.xlu1 %4713 }
 0xb61   : > { %4994 = vrot.lane.b32.xlu0 %v4880_v31, %s7315_s25  ;;  %v4883_v57 = vmul.f32 %v4714_v4, %v4499_v0  ;;  %v4515_v0 = vld [vmem:[#allocation4 + $0x1a8] sm:$0xff] }
 0xb62   : > { %v4709_v51 = vpop.permute.xlu0 %4708 }
 0xb63   : > { %v4882_v37 = vmul.f32 %v4709_v51, %v4498_v29  ;;  %5000 = vrot.lane.b32.xlu1 %v4883_v57, %s7315_s25  ;;  %v4514_v29 = vld [vmem:[#allocation4 + $0x1a0] sm:$0xff] }
 0xb64   : > { %v4724_v50 = vpop.permute.xlu1 %4723 }
 0xb65   : > { %4998 = vrot.lane.b32.xlu0 %v4882_v37, %s7315_s25  ;;  %v4885_v17 = vmul.f32 %v4724_v50, %v4501_v58  ;;  %v4517_v58 = vld [vmem:[#allocation4 + $0x1b8] sm:$0xff] }
 0xb66   : > { %v4719_v35 = vpop.permute.xlu0 %4718 }
 0xb67   : > { %v4884_v62 = vmul.f32 %v4719_v35, %v4500_v2  ;;  %5004 = vrot.lane.b32.xlu1 %v4885_v17, %s7315_s25  ;;  %v4516_v2 = vld [vmem:[#allocation4 + $0x1b0] sm:$0xff] }
 0xb68   : > { %v4734_v14 = vpop.permute.xlu1 %4733 }
 0xb69   : > { %5002 = vrot.lane.b32.xlu0 %v4884_v62, %s7315_s25  ;;  %v4887_v45 = vmul.f32 %v4734_v14, %v4503_v42  ;;  %v4519_v42 = vld [vmem:[#allocation4 + $0x1c8] sm:$0xff] }
 0xb6a   : > { %v4729_v24 = vpop.permute.xlu0 %4728 }
 0xb6b   : > { %v4886_v1 = vmul.f32 %v4729_v24, %v4502_v49  ;;  %5008 = vrot.lane.b32.xlu1 %v4887_v45, %s7315_s25  ;;  %v4518_v49 = vld [vmem:[#allocation4 + $0x1c0] sm:$0xff] }
 0xb6c   : > { %v4744_v16 = vpop.permute.xlu1 %4743 }
 0xb6d   : > { %5006 = vrot.lane.b32.xlu0 %v4886_v1, %s7315_s25  ;;  %v4889_v52 = vmul.f32 %v4744_v16, %v4505_v5  ;;  %v4521_v5 = vld [vmem:[#allocation4 + $0x1d8] sm:$0xff] }
 0xb6e   : > { %v4739_v39 = vpop.permute.xlu0 %4738 }
 0xb6f   : > { %v4888_v8 = vmul.f32 %v4739_v39, %v4504_v27  ;;  %5012 = vrot.lane.b32.xlu1 %v4889_v52, %s7315_s25  ;;  %v4520_v27 = vld [vmem:[#allocation4 + $0x1d0] sm:$0xff] }
 0xb70   : > { %v4754_v3 = vpop.permute.xlu1 %4753 }
 0xb71   : > { %5010 = vrot.lane.b32.xlu0 %v4888_v8, %s7315_s25  ;;  %v4891_v41 = vmul.f32 %v4754_v3, %v4507_v26  ;;  %v4523_v26 = vld [vmem:[#allocation4 + $0x1e8] sm:$0xff] }
 0xb72   : > { %v4749_v6 = vpop.permute.xlu0 %4748 }
 0xb73   : > { %v4890_v10 = vmul.f32 %v4749_v6, %v4506_v40  ;;  %5016 = vrot.lane.b32.xlu1 %v4891_v41, %s7315_s25  ;;  %v4522_v40 = vld [vmem:[#allocation4 + $0x1e0] sm:$0xff] }
 0xb74   : > { %v4764_v13 = vpop.permute.xlu1 %4763 }
 0xb75   : > { %5014 = vrot.lane.b32.xlu0 %v4890_v10, %s7315_s25  ;;  %v4893_v20 = vmul.f32 %v4764_v13, %v4509_v7  ;;  %v4525_v7 = vld [vmem:[#allocation4 + $0x1f8] sm:$0xff] }
 0xb76   : > { %v4759_v33 = vpop.permute.xlu0 %4758 }
 0xb77   : > { %v4892_v28 = vmul.f32 %v4759_v33, %v4508_v19  ;;  %5020 = vrot.lane.b32.xlu1 %v4893_v20, %s7315_s25  ;;  %v4524_v19 = vld [vmem:[#allocation4 + $0x1f0] sm:$0xff] }
 0xb78   : > { %v4774_v32 = vpop.permute.xlu1 %4773 }
 0xb79   : > { %5018 = vrot.lane.b32.xlu0 %v4892_v28, %s7315_s25  ;;  %v4895_v43 = vmul.f32 %v4774_v32, %v4511_v59 }
 0xb7a   : > { %v4769_v60 = vpop.permute.xlu0 %4768 }
 0xb7b   : > { %v4894_v55 = vmul.f32 %v4769_v60, %v4510_v54  ;;  %5056 = vrot.lane.b32.xlu1 %v4895_v43, %s7316_s26 }
 0xb7c   : > { %v4784_v22 = vpop.permute.xlu1 %4783 }
 0xb7d   : > { %5054 = vrot.lane.b32.xlu0 %v4894_v55, %s7316_s26  ;;  %v4897_v47 = vmul.f32 %v4784_v22, %v4513_v21 }
 0xb7e   : > { %v4779_v44 = vpop.permute.xlu0 %4778 }
 0xb7f   : > { %v4896_v31 = vmul.f32 %v4779_v44, %v4512_v53  ;;  %5060 = vrot.lane.b32.xlu1 %v4897_v47, %s7316_s26 }
 0xb80   : > { %v4794_v4 = vpop.permute.xlu1 %4793 }
 0xb81   : > { %5058 = vrot.lane.b32.xlu0 %v4896_v31, %s7316_s26  ;;  %v4899_v57 = vmul.f32 %v4794_v4, %v4515_v0 }
 0xb82   : > { %v4789_v51 = vpop.permute.xlu0 %4788 }
 0xb83   : > { %v4898_v37 = vmul.f32 %v4789_v51, %v4514_v29  ;;  %5064 = vrot.lane.b32.xlu1 %v4899_v57, %s7316_s26 }
 0xb84   : > { %v4804_v50 = vpop.permute.xlu1 %4803 }
 0xb85   : > { %5062 = vrot.lane.b32.xlu0 %v4898_v37, %s7316_s26  ;;  %v4901_v17 = vmul.f32 %v4804_v50, %v4517_v58 }
 0xb86   : > { %v4799_v35 = vpop.permute.xlu0 %4798 }
 0xb87   : > { %v4900_v62 = vmul.f32 %v4799_v35, %v4516_v2  ;;  %5068 = vrot.lane.b32.xlu1 %v4901_v17, %s7316_s26 }
 0xb88   : > { %v4814_v14 = vpop.permute.xlu1 %4813 }
 0xb89   : > { %5066 = vrot.lane.b32.xlu0 %v4900_v62, %s7316_s26  ;;  %v4903_v45 = vmul.f32 %v4814_v14, %v4519_v42 }
 0xb8a   : > { %v4809_v24 = vpop.permute.xlu0 %4808 }
 0xb8b   : > { %v4902_v1 = vmul.f32 %v4809_v24, %v4518_v49  ;;  %5072 = vrot.lane.b32.xlu1 %v4903_v45, %s7316_s26 }
 0xb8c   : > { %v4824_v16 = vpop.permute.xlu1 %4823 }
 0xb8d   : > { %5070 = vrot.lane.b32.xlu0 %v4902_v1, %s7316_s26  ;;  %v4905_v52 = vmul.f32 %v4824_v16, %v4521_v5  ;;  %v4463_v5 = vld [vmem:[#allocation4 + $0x8] sm:$0xff] }
 0xb8e   : > { %v4819_v39 = vpop.permute.xlu0 %4818 }
 0xb8f   : > { %v4904_v8 = vmul.f32 %v4819_v39, %v4520_v27  ;;  %5076 = vrot.lane.b32.xlu1 %v4905_v52, %s7316_s26  ;;  %v4462_v27 = vld [vmem:[#allocation4] sm:$0xff]  ;;  %v4847_v52 = vmul.f32 %v10306_v18, %v4463_v5 }
 0xb90   : > { %v4834_v3 = vpop.permute.xlu1 %4833 }
 0xb91   : > { %5074 = vrot.lane.b32.xlu0 %v4904_v8, %s7316_s26  ;;  %v4907_v41 = vmul.f32 %v4834_v3, %v4523_v26  ;;  %v4846_v8 = vmul.f32 %v10302_v63, %v4462_v27  ;;  %v4465_v26 = vld [vmem:[#allocation4 + $0x18] sm:$0xff] }
 0xb92   : > { %v4829_v6 = vpop.permute.xlu0 %4828 }
 0xb93   : > { %v4906_v10 = vmul.f32 %v4829_v6, %v4522_v40  ;;  %5080 = vrot.lane.b32.xlu1 %v4907_v41, %s7316_s26  ;;  %v4464_v40 = vld [vmem:[#allocation4 + $0x10] sm:$0xff] }
 0xb94   : > { %v4844_v13 = vpop.permute.xlu1 %4843  ;;  %v4848_v63 = vmul.f32 %v10300_v12, %v4464_v40 }
 0xb95   : > { %5078 = vrot.lane.b32.xlu0 %v4906_v10, %s7316_s26  ;;  %v4909_v20 = vmul.f32 %v4844_v13, %v4525_v7  ;;  %v4849_v7 = vmul.f32 %v10304_v56, %v4465_v26  ;;  %v4468_v26 = vld [vmem:[#allocation4 + $0x30] sm:$0xff] }
 0xb96   : > { %v4839_v33 = vpop.permute.xlu0 %4838 }
 0xb97   : > { %v4908_v28 = vmul.f32 %v4839_v33, %v4524_v19  ;;  %5084 = vrot.lane.b32.xlu1 %v4909_v20, %s7316_s26  ;;  %v4467_v20 = vld [vmem:[#allocation4 + $0x28] sm:$0xff] }
 0xb99   : > { %5082 = vrot.lane.b32.xlu0 %v4908_v28, %s7316_s26  ;;  %v4466_v28 = vld [vmem:[#allocation4 + $0x20] sm:$0xff] }
 0xbad   : > { %v4929_v59 = vpop.permute.xlu1 %4928 }
 0xbae   : > { %v5103_v3 = vsel %vm535_vm2, %v4847_v52, %v4929_v59  ;;  %v4850_v52 = vmul.f32 %v10310_v36, %v4466_v28 }
 0xbaf   : > { %v4927_v54 = vpop.permute.xlu0 %4926 }
 0xbb0   : > { %v5102_v41 = vsel %vm535_vm2, %v4846_v8, %v4927_v54  ;;  %v4469_v8 = vld [vmem:[#allocation4 + $0x38] sm:$0xff] }
 0xbb1   : > { %v4933_v32 = vpop.permute.xlu1 %4932  ;;  %v4853_v40 = vmul.f32 %v10312_v46, %v4469_v8  ;;  %v4476_v8 = vld [vmem:[#allocation4 + $0x70] sm:$0xff] }
 0xbb2   : > { %v5105_v59 = vsel %vm535_vm2, %v4849_v7, %v4933_v32  ;;  %v4470_v7 = vld [vmem:[#allocation4 + $0x40] sm:$0xff] }
 0xbb3   : > { %v4931_v43 = vpop.permute.xlu0 %4930 }
 0xbb4   : > { %v5104_v54 = vsel %vm535_vm2, %v4848_v63, %v4931_v43  ;;  %v4854_v63 = vmul.f32 %v10318_v9, %v4470_v7 }
 0xbb5   : > { %v10380_v60 = vpop.permute.xlu1 %4936 }
 0xbb7   : > { %v10382_v55 = vpop.permute.xlu0 %4934 }
 0xbb9   : > { %v10384_v21 = vpop.permute.xlu1 %4940 }
 0xbbb   : > { %v10386_v53 = vpop.permute.xlu0 %4938 }
 0xbbd   : > { %v10388_v22 = vpop.permute.xlu1 %4944 }
 0xbbf   : > { %v10390_v47 = vpop.permute.xlu0 %4942 }
 0xbc1   : > { %v10392_v44 = vpop.permute.xlu1 %4948 }
 0xbc3   : > { %v10394_v31 = vpop.permute.xlu0 %4946 }
 0xbc5   : > { %v10396_v0 = vpop.permute.xlu1 %4952 }
 0xbc7   : > { %v10398_v29 = vpop.permute.xlu0 %4950 }
 0xbc9   : > { %v10400_v4 = vpop.permute.xlu1 %4956 }
 0xbcb   : > { %v10402_v57 = vpop.permute.xlu0 %4954 }
 0xbcd   : > { %v4993_v51 = vpop.permute.xlu1 %4992 }
 0xbce   : > { %v5120_v6 = vsel %vm5118_vm5, %v5103_v3, %v4993_v51 }
 0xbcf   : > { %v4991_v37 = vpop.permute.xlu0 %4990 }
 0xbd0   : > { %v5119_v18 = vsel %vm5118_vm5, %v5102_v41, %v4991_v37  ;;  %v4851_v37 = vmul.f32 %v10308_v25, %v4467_v20  ;;  %v5106_v25 = vsel %vm535_vm2, %v4850_v52, %v10382_v55  ;;  %v5109_v55 = vsel %vm535_vm2, %v4853_v40, %v10384_v21  ;;  %v4473_v21 = vld [vmem:[#allocation4 + $0x58] sm:$0xff] }
 0xbd1   : > { %v4997_v58 = vpop.permute.xlu1 %4996  ;;  %v4857_v9 = vmul.f32 %v10320_v11, %v4473_v21 }
 0xbd2   : > { %v5122_v56 = vsel %vm5118_vm5, %v5105_v59, %v4997_v58  ;;  %v5107_v43 = vsel %vm535_vm2, %v4851_v37, %v10380_v60 }
 0xbd3   : > { %v4995_v2 = vpop.permute.xlu0 %4994 }
 0xbd4   : > { %v5121_v5 = vsel %vm5118_vm5, %v5104_v54, %v4995_v2 }
 0xbd5   : > { %v5001_v50 = vpop.permute.xlu1 %5000 }
 0xbd6   : > { %v5124_v58 = vsel %vm5118_vm5, %v5107_v43, %v5001_v50 }
 0xbd7   : > { %v4999_v17 = vpop.permute.xlu0 %4998 }
 0xbd8   : > { %v5123_v36 = vsel %vm5118_vm5, %v5106_v25, %v4999_v17 }
 0xbd9   : > { %v10404_v35 = vpop.permute.xlu1 %5004 }
 0xbda   : > { %v5126_v50 = vsel %vm5118_vm5, %v5109_v55, %v10404_v35 }
 0xbdb   : > { %v10406_v62 = vpop.permute.xlu0 %5002 }
 0xbdd   : > { %v10408_v42 = vpop.permute.xlu1 %5008 }
 0xbdf   : > { %v10410_v49 = vpop.permute.xlu0 %5006 }
 0xbe1   : > { %v10412_v14 = vpop.permute.xlu1 %5012 }
 0xbe3   : > { %v10414_v45 = vpop.permute.xlu0 %5010 }
 0xbe5   : > { %v10416_v24 = vpop.permute.xlu1 %5016 }
 0xbe7   : > { %v10418_v1 = vpop.permute.xlu0 %5014 }
 0xbe9   : > { %v10420_v16 = vpop.permute.xlu1 %5020 }
 0xbeb   : > { %v10423_v39 = vpop.permute.xlu0 %5018 }
 0xbed   : > { %v5057_v10 = vpop.permute.xlu1 %5056 }
 0xbee   : > { %v5137_v19 = vsel %vm5135_vm6, %v5120_v6, %v5057_v10  ;;  %v4852_v6 = vmul.f32 %v10314_v30, %v4468_v26  ;;  %v4471_v10 = vld [vmem:[#allocation4 + $0x48] sm:$0xff] }
 0xbef   : > { %v5055_v13 = vpop.permute.xlu0 %5054  ;;  %5153 = vst [vmem:[%s7390_s5 + $0x8] sm:$0xff] %v5137_v19  ;;  %v4855_v30 = vmul.f32 %v10316_v61, %v4471_v10  ;;  %v5110_v61 = vsel %vm535_vm2, %v4854_v63, %v10390_v47  ;;  %v4474_v47 = vld [vmem:[#allocation4 + $0x60] sm:$0xff] }
 0xbf0   : > { %v5136_v33 = vsel %vm5135_vm6, %v5119_v18, %v5055_v13  ;;  %v5108_v46 = vsel %vm535_vm2, %v4852_v6, %v10386_v53  ;;  %v4472_v53 = vld [vmem:[#allocation4 + $0x50] sm:$0xff]  ;;  %v5127_v28 = vsel %vm5118_vm5, %v5110_v61, %v10410_v49  ;;  %v4858_v52 = vmul.f32 %v10326_v34, %v4474_v47 }
 0xbf1   : > { %5152 = vst [vmem:[%s7390_s5] sm:$0xff] %v5136_v33  ;;  %v5061_v51 = vpop.permute.xlu1 %5060  ;;  %v5125_v18 = vsel %vm5118_vm5, %v5108_v46, %v10406_v62  ;;  %v5111_v35 = vsel %vm535_vm2, %v4855_v30, %v10388_v22  ;;  %v4475_v22 = vld [vmem:[#allocation4 + $0x68] sm:$0xff] }
 0xbf2   : > { %v5139_v12 = vsel %vm5135_vm6, %v5122_v56, %v5061_v51  ;;  %v5128_v62 = vsel %vm5118_vm5, %v5111_v35, %v10408_v42  ;;  %v4856_v56 = vmul.f32 %v10322_v15, %v4472_v53  ;;  %v5113_v42 = vsel %vm535_vm2, %v4857_v9, %v10392_v44  ;;  %v4477_v44 = vld [vmem:[#allocation4 + $0x78] sm:$0xff] }
 0xbf3   : > { %v5059_v27 = vpop.permute.xlu0 %5058  ;;  %5155 = vst [vmem:[%s7390_s5 + $0x18] sm:$0xff] %v5139_v12  ;;  %v5130_v49 = vsel %vm5118_vm5, %v5113_v42, %v10412_v14  ;;  %v4859_v15 = vmul.f32 %v10324_v48, %v4475_v22  ;;  %v5114_v48 = vsel %vm535_vm2, %v4858_v52, %v10398_v29  ;;  %v4861_v34 = vmul.f32 %v10328_v23, %v4477_v44 }
 0xbf4   : > { %v5138_v32 = vsel %vm5135_vm6, %v5121_v5, %v5059_v27  ;;  %v5112_v11 = vsel %vm535_vm2, %v4856_v56, %v10394_v31  ;;  %v5131_v26 = vsel %vm5118_vm5, %v5114_v48, %v10418_v1 }
 0xbf5   : > { %5154 = vst [vmem:[%s7390_s5 + $0x10] sm:$0xff] %v5138_v32  ;;  %v5065_v2 = vpop.permute.xlu1 %5064  ;;  %v5129_v5 = vsel %vm5118_vm5, %v5112_v11, %v10414_v45  ;;  %v5115_v14 = vsel %vm535_vm2, %v4859_v15, %v10396_v0  ;;  %v4860_v0 = vmul.f32 %v10330_v38, %v4476_v8  ;;  %v5117_v29 = vsel %vm535_vm2, %v4861_v34, %v10400_v4 }
 0xbf6   : > { %v5141_v3 = vsel %vm5135_vm6, %v5124_v58, %v5065_v2  ;;  %v5132_v45 = vsel %vm5118_vm5, %v5115_v14, %v10416_v24  ;;  %v5134_v23 = vsel %vm5118_vm5, %v5117_v29, %v10420_v16 }
 0xbf7   : > { %v5063_v41 = vpop.permute.xlu0 %5062  ;;  %5157 = vst [vmem:[%s7390_s5 + $0x28] sm:$0xff] %v5141_v3  ;;  %v5116_v24 = vsel %vm535_vm2, %v4860_v0, %v10402_v57 }
 0xbf8   : > { %v5140_v60 = vsel %vm5135_vm6, %v5123_v36, %v5063_v41  ;;  %v5133_v2 = vsel %vm5118_vm5, %v5116_v24, %v10423_v39 }
 0xbf9   : > { %5156 = vst [vmem:[%s7390_s5 + $0x20] sm:$0xff] %v5140_v60  ;;  %v5069_v17 = vpop.permute.xlu1 %5068 }
 0xbfa   : > { %v5143_v19 = vsel %vm5135_vm6, %v5126_v50, %v5069_v17 }
 0xbfb   : > { %v5067_v13 = vpop.permute.xlu0 %5066  ;;  %5159 = vst [vmem:[%s7390_s5 + $0x38] sm:$0xff] %v5143_v19 }
 0xbfc   : > { %v5142_v20 = vsel %vm5135_vm6, %v5125_v18, %v5067_v13 }
 0xbfd   : > { %5158 = vst [vmem:[%s7390_s5 + $0x30] sm:$0xff] %v5142_v20  ;;  %v5073_v33 = vpop.permute.xlu1 %5072 }
 0xbfe   : > { %v5145_v59 = vsel %vm5135_vm6, %v5128_v62, %v5073_v33 }
 0xbff   : > { %v5071_v54 = vpop.permute.xlu0 %5070  ;;  %5161 = vst [vmem:[%s7390_s5 + $0x48] sm:$0xff] %v5145_v59 }
 0xc00   : > { %v5144_v51 = vsel %vm5135_vm6, %v5127_v28, %v5071_v54 }
 0xc01   : > { %5160 = vst [vmem:[%s7390_s5 + $0x40] sm:$0xff] %v5144_v51  ;;  %v5077_v37 = vpop.permute.xlu1 %5076 }
 0xc02   : > { %v5147_v12 = vsel %vm5135_vm6, %v5130_v49, %v5077_v37 }
 0xc03   : > { %v5075_v27 = vpop.permute.xlu0 %5074  ;;  %5163 = vst [vmem:[%s7390_s5 + $0x58] sm:$0xff] %v5147_v12 }
 0xc04   : > { %v5146_v31 = vsel %vm5135_vm6, %v5129_v5, %v5075_v27 }
 0xc05   : > { %5162 = vst [vmem:[%s7390_s5 + $0x50] sm:$0xff] %v5146_v31  ;;  %v5081_v32 = vpop.permute.xlu1 %5080 }
 0xc06   : > { %v5149_v43 = vsel %vm5135_vm6, %v5132_v45, %v5081_v32 }
 0xc07   : > { %v5079_v25 = vpop.permute.xlu0 %5078  ;;  %5165 = vst [vmem:[%s7390_s5 + $0x68] sm:$0xff] %v5149_v43 }
 0xc08   : > { %v5148_v58 = vsel %vm5135_vm6, %v5131_v26, %v5079_v25 }
 0xc09   : > { %5164 = vst [vmem:[%s7390_s5 + $0x60] sm:$0xff] %v5148_v58  ;;  %v5085_v1 = vpop.permute.xlu1 %5084 }
 0xc0a   : > { %v5151_v40 = vsel %vm5135_vm6, %v5134_v23, %v5085_v1 }
 0xc0b   : > { %v5083_v38 = vpop.permute.xlu0 %5082  ;;  %5167 = vst [vmem:[%s7390_s5 + $0x78] sm:$0xff] %v5151_v40 }
 0xc0c   : > { %v5150_v36 = vsel %vm5135_vm6, %v5133_v2, %v5083_v38 }
 0xc0d   : > { %5166 = vst [vmem:[%s7390_s5 + $0x70] sm:$0xff] %v5150_v36 }
 0xc0e PF: > { %s13_s18 = sadd.s32 1, %s7305_s18   ;;  %s11094_s12 = smov %s7293_s15 }
 0xc0f   : > { %p10_p11 = scmp.ge.s32.totalorder %s13_s18, 10   ;;  %s11095_s13 = smov %s7297_s16 }
 0xc10   : > { %s11096_s14 = smov %s7301_s17  ;;  %s11097_s15 = smov %s11101_s19 }
 0xc11   : > { %s11098_s16 = smov %s11105_s20  ;;  %s11099_s17 = smov %s11109_s21 }
 0xc12   :  { %12 = sbr.rel (!%p10_p11) target bundleno = 4 (0x4), region = 85 }

</bundles_post_ra>
